<compile_context>
chip_gen: v7x
topology: tpu7x:2x2x1
jax: 0.10.0
libtpu: 0.0.40
codegen_flags: <defaults>
</compile_context>

<pallas_src>
import jax
import jax.numpy as jnp
from jax import lax
from jax.experimental import pallas as pl
from jax.experimental.pallas import tpu as pltpu


def _round_up(x, m):
    return ((x + m - 1) // m) * m


# ------------------------------ fused Pallas kernel ------------------------------ #

def make_vgg_block_kernel(num_convs, H, W, Cp, P, n_bufs):
    """Fused kernel for a fixed layer count / spatial size / padded channel count.

    Activation layout inside the kernel: a flattened zero-halo slab of shape (P, Cp)
    with P = (H+2)*(W+2) + 2 guard rows; flat row r = py*(W+2) + px.  The conv for
    tap (dy, dx) is then acc[i] += slab[dy*(W+2)+dx + i] @ W_tap, i.e. a contiguous
    slice of the slab — rows i with (i mod (W+2)) < W are exactly the valid outputs.
    """
    Wp = W + 2
    M = H * Wp                      # rows of the conv-output slab (incl. 2 wrap cols)
    top = W + 3                     # rows [0, top): top halo + left halo of first row
    bot = (H + 1) * Wp + 1          # rows [bot, P): bottom halo + OOB guard rows
    taps = [(dy, dx) for dy in range(3) for dx in range(3)]

    def kernel(*refs):
        x_ref = refs[0]                                   # (P, Cp) bf16, pre-padded
        w_refs = refs[1:1 + num_convs]                    # (9*Cp, Cp) bf16 each
        s_refs = refs[1 + num_convs:1 + 2 * num_convs]    # (1, Cp)   f32 each
        o_ref = refs[1 + 2 * num_convs]                   # (H//2, W//2, Cp) f32
        bufs = refs[2 + 2 * num_convs:2 + 2 * num_convs + n_bufs]

        # Zero only the halo strips of each intermediate slab.  The interior rows
        # [top, top+M) are fully (re)written by the masked store below before any
        # read, and that store also refreshes the left/right halo columns, so this
        # is correct per grid step (megacore-safe: no cross-iteration state).
        for b in bufs:
            b[0:top, :] = jnp.zeros((top, Cp), jnp.bfloat16)
            b[bot:P, :] = jnp.zeros((P - bot, Cp), jnp.bfloat16)

        # Validity mask over the flattened (H, W+2) slab: the last two columns of
        # each row are wrap-around garbage (they double as the halo refresh -> 0).
        col = lax.broadcasted_iota(jnp.int32, (M, 1), 0) % Wp
        interior = col < W                                 # (M, 1) bool

        def conv_bn_relu(read, layer):
            acc = None
            for t, (dy, dx) in enumerate(taps):
                off = dy * Wp + dx
                lhs = read(off)                            # (M, Cp) bf16, contiguous
                rhs = w_refs[layer][t * Cp:(t + 1) * Cp, :]  # (Cp, Cp) bf16
                d = jnp.dot(lhs, rhs, preferred_element_type=jnp.float32)
                acc = d if acc is None else acc + d
            # BN scale folded into the weights offline; epilogue is shift + ReLU.
            return jnp.maximum(acc + s_refs[layer][...], 0.0)   # (M, Cp) f32

        read = lambda off: x_ref[off:off + M, :]
        y = None
        for layer in range(num_convs):
            y = conv_bn_relu(read, layer)
            if layer + 1 < num_convs:
                dst = bufs[layer % n_bufs]
                dst[top:top + M, :] = jnp.where(interior, y, 0.0).astype(jnp.bfloat16)
                read = (lambda off, src=dst: src[off:off + M, :])

        # MaxPool2d(kernel=2, stride=2): elementwise max of the four window corners.
        yv = y.reshape(H, Wp, Cp)[:, :W, :]
        t5 = yv.reshape(H // 2, 2, W // 2, 2, Cp)
        pooled = jnp.maximum(jnp.maximum(t5[:, 0, :, 0, :], t5[:, 0, :, 1, :]),
                             jnp.maximum(t5[:, 1, :, 0, :], t5[:, 1, :, 1, :]))
        o_ref[...] = pooled.astype(o_ref.dtype)

    return kernel


def vgg_basic_block(x_nchw, params):
    """Forward pass of VGGBasicBlock. Input/output are NCHW like PyTorch."""
    layers = params["layers"]
    cp = params["cp"]
    cout = params["output_channels"]
    num_convs = len(layers)

    x = jnp.transpose(x_nchw, (0, 2, 3, 1))                  # NCHW -> NHWC
    N, H, W, cin = x.shape
    assert H % 2 == 0 and W % 2 == 0, "MaxPool2d(2,2) expects even spatial dims here"
    Hp, Wp = H + 2, W + 2
    P = Hp * Wp + 2                # +2 guard rows so every tap slice stays in bounds

    # One-time layout plumbing at the block boundary: 1-px zero halo, lane-pad the
    # channels to Cp, cast to bf16 and flatten the padded spatial dims to one axis.
    x = jnp.pad(x, ((0, 0), (1, 1), (1, 1), (0, cp - cin))).astype(jnp.bfloat16)
    x = x.reshape(N, Hp * Wp, cp)
    x = jnp.pad(x, ((0, 0), (0, P - Hp * Wp), (0, 0)))       # guard rows (zeros)

    w_list = [l["w2d"] for l in layers]
    s_list = [l["shift2d"] for l in layers]
    n_bufs = min(num_convs - 1, 2)                           # ping-pong only if needed

    in_specs = [pl.BlockSpec((None, P, cp), lambda n: (n, 0, 0))]
    # Constant index_map -> weight / shift blocks stay resident in VMEM across the grid.
    in_specs += [pl.BlockSpec((9 * cp, cp), lambda n: (0, 0)) for _ in range(num_convs)]
    in_specs += [pl.BlockSpec((1, cp), lambda n: (0, 0)) for _ in range(num_convs)]

    out = pl.pallas_call(
        make_vgg_block_kernel(num_convs, H, W, cp, P, n_bufs),
        out_shape=jax.ShapeDtypeStruct((N, H // 2, W // 2, cp), jnp.float32),
        grid=(N,),
        in_specs=in_specs,
        out_specs=pl.BlockSpec((None, H // 2, W // 2, cp), lambda n: (n, 0, 0, 0)),
        scratch_shapes=[pltpu.VMEM((P, cp), jnp.bfloat16) for _ in range(n_bufs)],
        compiler_params=pltpu.CompilerParams(dimension_semantics=("parallel",)),
    )(x, *w_list, *s_list)

    out = out[..., :cout].astype(x_nchw.dtype)               # drop lane padding
    return jnp.transpose(out, (0, 3, 1, 2))                  # NHWC -> NCHW


# -------------------------- parameter construction --------------------------- #

def init_conv_bn_params(key, cin, cout, cp, eps=1e-5):
    """Deterministic synthetic Conv2d + BatchNorm2d params, pre-folded for the kernel."""
    kw, kg, kb, km, kv = jax.random.split(key, 5)
    w = 0.1 * jax.random.normal(kw, (cout, cin, 3, 3), jnp.float32)   # PyTorch OIHW
    gamma = 1.0 + 0.1 * jax.random.normal(kg, (cout,), jnp.float32)
    beta = 0.1 * jax.random.normal(kb, (cout,), jnp.float32)
    running_mean = 0.05 * jax.random.normal(km, (cout,), jnp.float32)
    running_var = 1.0 + 0.1 * jax.random.uniform(kv, (cout,), jnp.float32)

    scale = gamma / jnp.sqrt(running_var + eps)              # (Cout,)
    shift = beta - running_mean * scale                      # (Cout,)

    # Fold BN scale into the conv weights and lay them out as a single (9*Cp, Cp)
    # matrix: row index = (dy*3+dx)*Cp + ci, column = co. Padded rows/cols are 0.
    w_t = jnp.transpose(w, (2, 3, 1, 0)) * scale             # (3,3,Cin,Cout) * scale
    w_p = jnp.zeros((3, 3, cp, cp), jnp.float32).at[:, :, :cin, :cout].set(w_t)
    w2d = w_p.reshape(9 * cp, cp).astype(jnp.bfloat16)
    shift2d = jnp.zeros((1, cp), jnp.float32).at[0, :cout].set(shift)
    return {"w2d": w2d, "shift2d": shift2d,                  # kernel-ready (folded)
            "w": w, "scale": scale, "shift": shift}          # raw copies for the ref


def make_vgg_basic_block_params(key, num_convs, input_channels, output_channels):
    cp = _round_up(max(input_channels, output_channels), 128)   # lane-dense channels
    layers = []
    cin = input_channels
    for _ in range(num_convs):
        key, sub = jax.random.split(key)
        layers.append(init_conv_bn_params(sub, cin, output_channels, cp))
        cin = output_channels
    return {"layers": layers, "cp": cp, "output_channels": output_channels}


# ----------------------------- pure-JAX reference ----------------------------- #

def vgg_basic_block_reference(x_nchw, params):
    """f32 reference: lax.conv + folded BN + ReLU per layer, then 2x2 maxpool."""
    x = x_nchw
    for l in params["layers"]:
        y = lax.conv_general_dilated(x, l["w"], window_strides=(1, 1),
                                     padding=((1, 1), (1, 1)),
                                     dimension_numbers=("NCHW", "OIHW", "NCHW"))
        y = y * l["scale"][None, :, None, None] + l["shift"][None, :, None, None]
        x = jnp.maximum(y, 0.0)
    return lax.reduce_window(x, -jnp.inf, lax.max,
                             (1, 1, 2, 2), (1, 1, 2, 2), "VALID")


# ------------------------------------ main ------------------------------------ #

if __name__ == "__main__":
    num_convs = 2
    input_channels = 4
    output_channels = 8

    key = jax.random.PRNGKey(0)
    key, xkey = jax.random.split(key)
    x = jax.random.normal(xkey, (2, input_channels, 16, 16), jnp.float32)   # NCHW

    params = make_vgg_basic_block_params(key, num_convs, input_channels, output_channels)

    out = jax.jit(lambda inp: vgg_basic_block(inp, params))(x)
    out = jax.block_until_ready(out)

    expected_shape = (2, output_channels, 8, 8)        # H, W halved by MaxPool2d(2,2)
    assert out.shape == expected_shape, (out.shape, expected_shape)
    assert bool(jnp.all(out >= 0.0)), "ReLU precedes the pool -> output must be >= 0"

    # Numerical check vs. f32 reference (loose tolerance: bf16 matmul operands).
    ref = vgg_basic_block_reference(x, params)
    assert bool(jnp.allclose(out, ref, rtol=1e-1, atol=1e-1)), (
        float(jnp.max(jnp.abs(out - ref))))

    print("KERNEL_OK")
</pallas_src>

<mosaic_0001>
module attributes {stable_mosaic.version = 11 : i64} {
  func.func @kernel(%arg0: i32, %arg1: memref<1x326x128xbf16, #tpu.memory_space<vmem>>, %arg2: memref<1152x128xbf16, #tpu.memory_space<vmem>>, %arg3: memref<1152x128xbf16, #tpu.memory_space<vmem>>, %arg4: memref<1x128xf32, #tpu.memory_space<vmem>>, %arg5: memref<1x128xf32, #tpu.memory_space<vmem>>, %arg6: memref<1x8x8x128xf32, #tpu.memory_space<vmem>>, %arg7: memref<326x128xbf16, #tpu.memory_space<vmem>>) attributes {dimension_semantics = [#tpu.dimension_semantics<parallel>], iteration_bounds = array<i64: 2>, scalar_prefetch = 0 : i64, scratch_operands = 1 : i64, tpu.core_type = #tpu.core_type<tc>, window_params = [{transform_indices = @transform_0, window_bounds = array<i64: 1, 326, 128>}, {pipeline_mode = #tpu.pipeline_mode<synchronous>, transform_indices = @transform_1, window_bounds = array<i64: 1152, 128>}, {pipeline_mode = #tpu.pipeline_mode<synchronous>, transform_indices = @transform_2, window_bounds = array<i64: 1152, 128>}, {pipeline_mode = #tpu.pipeline_mode<synchronous>, transform_indices = @transform_3, window_bounds = array<i64: 1, 128>}, {pipeline_mode = #tpu.pipeline_mode<synchronous>, transform_indices = @transform_4, window_bounds = array<i64: 1, 128>}, {transform_indices = @transform_5, window_bounds = array<i64: 1, 8, 8, 128>}]} {
    %cst = arith.constant 0.000000e+00 : bf16
    %0 = vector.broadcast %cst : bf16 to vector<19x128xbf16>
    %c0 = arith.constant 0 : index
    %c0_0 = arith.constant 0 : index
    %1 = vector.load %arg7[%c0, %c0_0] : memref<326x128xbf16, #tpu.memory_space<vmem>>, vector<19x128xbf16>
    tpu.vector_store %arg7[%c0, %c0_0], %0 {strides = array<i32>} : memref<326x128xbf16, #tpu.memory_space<vmem>>, vector<19x128xbf16>,
    %cst_1 = arith.constant 0.000000e+00 : bf16
    %2 = vector.broadcast %cst_1 : bf16 to vector<19x128xbf16>
    %c307 = arith.constant 307 : index
    %c0_2 = arith.constant 0 : index
    %3 = vector.load %arg7[%c307, %c0_2] : memref<326x128xbf16, #tpu.memory_space<vmem>>, vector<19x128xbf16>
    tpu.vector_store %arg7[%c307, %c0_2], %2 {strides = array<i32>} : memref<326x128xbf16, #tpu.memory_space<vmem>>, vector<19x128xbf16>,
    %4 = tpu.iota {dimensions = array<i32: 0>} : vector<288x1xi32>
    %c18_i32 = arith.constant 18 : i32
    %c0_i32 = arith.constant 0 : i32
    %5 = arith.cmpi eq, %c18_i32, %c0_i32 : i32
    %c1_i32 = arith.constant 1 : i32
    %6 = arith.select %5, %c1_i32, %c18_i32 : i32
    %7 = vector.broadcast %6 : i32 to vector<288x1xi32>
    %8 = arith.remsi %4, %7 : vector<288x1xi32>
    %c0_i32_3 = arith.constant 0 : i32
    %9 = vector.broadcast %c0_i32_3 : i32 to vector<288x1xi32>
    %10 = arith.cmpi ne, %8, %9 : vector<288x1xi32>
    %c0_i32_4 = arith.constant 0 : i32
    %11 = vector.broadcast %c0_i32_4 : i32 to vector<288x1xi32>
    %12 = arith.cmpi slt, %8, %11 : vector<288x1xi32>
    %c0_i32_5 = arith.constant 0 : i32
    %13 = arith.cmpi slt, %6, %c0_i32_5 : i32
    %14 = vector.broadcast %13 : i1 to vector<288x1xi1>
    %15 = vector.broadcast %14 : vector<288x1xi1> to vector<288x1xi1>
    %16 = arith.xori %12, %15 : vector<288x1xi1>
    %17 = arith.andi %16, %10 : vector<288x1xi1>
    %18 = vector.broadcast %6 : i32 to vector<288x1xi32>
    %19 = arith.addi %8, %18 : vector<288x1xi32>
    %20 = arith.select %17, %19, %8 : vector<288x1xi1>, vector<288x1xi32>
    %c16_i32 = arith.constant 16 : i32
    %21 = vector.broadcast %c16_i32 : i32 to vector<288x1xi32>
    %22 = arith.cmpi slt, %20, %21 : vector<288x1xi32>
    %c0_6 = arith.constant 0 : index
    %c0_7 = arith.constant 0 : index
    %c0_8 = arith.constant 0 : index
    %23 = vector.load %arg1[%c0_6, %c0_7, %c0_8] : memref<1x326x128xbf16, #tpu.memory_space<vmem>>, vector<1x288x128xbf16>
    %24 = vector.shape_cast %23 : vector<1x288x128xbf16> to vector<288x128xbf16>
    %c0_9 = arith.constant 0 : index
    %c0_10 = arith.constant 0 : index
    %25 = vector.load %arg2[%c0_9, %c0_10] : memref<1152x128xbf16, #tpu.memory_space<vmem>>, vector<128x128xbf16>
    %cst_11 = arith.constant dense<0.000000e+00> : vector<288x128xf32>
    %26 = tpu.matmul %24, %25, %cst_11 {dimension_numbers = #tpu.dot_dimension_numbers<[1], [0], [0], [1], [0, 0, 1, 1], [], []>} : vector<288x128xbf16>, vector<128x128xbf16>, vector<288x128xf32> -> vector<288x128xf32>
    %c0_12 = arith.constant 0 : index
    %c1 = arith.constant 1 : index
    %c0_13 = arith.constant 0 : index
    %27 = vector.load %arg1[%c0_12, %c1, %c0_13] : memref<1x326x128xbf16, #tpu.memory_space<vmem>>, vector<1x288x128xbf16>
    %28 = vector.shape_cast %27 : vector<1x288x128xbf16> to vector<288x128xbf16>
    %c128 = arith.constant 128 : index
    %c0_14 = arith.constant 0 : index
    %29 = vector.load %arg2[%c128, %c0_14] : memref<1152x128xbf16, #tpu.memory_space<vmem>>, vector<128x128xbf16>
    %cst_15 = arith.constant dense<0.000000e+00> : vector<288x128xf32>
    %30 = tpu.matmul %28, %29, %cst_15 {dimension_numbers = #tpu.dot_dimension_numbers<[1], [0], [0], [1], [0, 0, 1, 1], [], []>} : vector<288x128xbf16>, vector<128x128xbf16>, vector<288x128xf32> -> vector<288x128xf32>
    %31 = arith.addf %26, %30 : vector<288x128xf32>
    %c0_16 = arith.constant 0 : index
    %c2 = arith.constant 2 : index
    %c0_17 = arith.constant 0 : index
    %32 = vector.load %arg1[%c0_16, %c2, %c0_17] : memref<1x326x128xbf16, #tpu.memory_space<vmem>>, vector<1x288x128xbf16>
    %33 = vector.shape_cast %32 : vector<1x288x128xbf16> to vector<288x128xbf16>
    %c256 = arith.constant 256 : index
    %c0_18 = arith.constant 0 : index
    %34 = vector.load %arg2[%c256, %c0_18] : memref<1152x128xbf16, #tpu.memory_space<vmem>>, vector<128x128xbf16>
    %cst_19 = arith.constant dense<0.000000e+00> : vector<288x128xf32>
    %35 = tpu.matmul %33, %34, %cst_19 {dimension_numbers = #tpu.dot_dimension_numbers<[1], [0], [0], [1], [0, 0, 1, 1], [], []>} : vector<288x128xbf16>, vector<128x128xbf16>, vector<288x128xf32> -> vector<288x128xf32>
    %36 = arith.addf %31, %35 : vector<288x128xf32>
    %c0_20 = arith.constant 0 : index
    %c18 = arith.constant 18 : index
    %c0_21 = arith.constant 0 : index
    %37 = vector.load %arg1[%c0_20, %c18, %c0_21] : memref<1x326x128xbf16, #tpu.memory_space<vmem>>, vector<1x288x128xbf16>
    %38 = vector.shape_cast %37 : vector<1x288x128xbf16> to vector<288x128xbf16>
    %c384 = arith.constant 384 : index
    %c0_22 = arith.constant 0 : index
    %39 = vector.load %arg2[%c384, %c0_22] : memref<1152x128xbf16, #tpu.memory_space<vmem>>, vector<128x128xbf16>
    %cst_23 = arith.constant dense<0.000000e+00> : vector<288x128xf32>
    %40 = tpu.matmul %38, %39, %cst_23 {dimension_numbers = #tpu.dot_dimension_numbers<[1], [0], [0], [1], [0, 0, 1, 1], [], []>} : vector<288x128xbf16>, vector<128x128xbf16>, vector<288x128xf32> -> vector<288x128xf32>
    %41 = arith.addf %36, %40 : vector<288x128xf32>
    %c0_24 = arith.constant 0 : index
    %c19 = arith.constant 19 : index
    %c0_25 = arith.constant 0 : index
    %42 = vector.load %arg1[%c0_24, %c19, %c0_25] : memref<1x326x128xbf16, #tpu.memory_space<vmem>>, vector<1x288x128xbf16>
    %43 = vector.shape_cast %42 : vector<1x288x128xbf16> to vector<288x128xbf16>
    %c512 = arith.constant 512 : index
    %c0_26 = arith.constant 0 : index
    %44 = vector.load %arg2[%c512, %c0_26] : memref<1152x128xbf16, #tpu.memory_space<vmem>>, vector<128x128xbf16>
    %cst_27 = arith.constant dense<0.000000e+00> : vector<288x128xf32>
    %45 = tpu.matmul %43, %44, %cst_27 {dimension_numbers = #tpu.dot_dimension_numbers<[1], [0], [0], [1], [0, 0, 1, 1], [], []>} : vector<288x128xbf16>, vector<128x128xbf16>, vector<288x128xf32> -> vector<288x128xf32>
    %46 = arith.addf %41, %45 : vector<288x128xf32>
    %c0_28 = arith.constant 0 : index
    %c20 = arith.constant 20 : index
    %c0_29 = arith.constant 0 : index
    %47 = vector.load %arg1[%c0_28, %c20, %c0_29] : memref<1x326x128xbf16, #tpu.memory_space<vmem>>, vector<1x288x128xbf16>
    %48 = vector.shape_cast %47 : vector<1x288x128xbf16> to vector<288x128xbf16>
    %c640 = arith.constant 640 : index
    %c0_30 = arith.constant 0 : index
    %49 = vector.load %arg2[%c640, %c0_30] : memref<1152x128xbf16, #tpu.memory_space<vmem>>, vector<128x128xbf16>
    %cst_31 = arith.constant dense<0.000000e+00> : vector<288x128xf32>
    %50 = tpu.matmul %48, %49, %cst_31 {dimension_numbers = #tpu.dot_dimension_numbers<[1], [0], [0], [1], [0, 0, 1, 1], [], []>} : vector<288x128xbf16>, vector<128x128xbf16>, vector<288x128xf32> -> vector<288x128xf32>
    %51 = arith.addf %46, %50 : vector<288x128xf32>
    %c0_32 = arith.constant 0 : index
    %c36 = arith.constant 36 : index
    %c0_33 = arith.constant 0 : index
    %52 = vector.load %arg1[%c0_32, %c36, %c0_33] : memref<1x326x128xbf16, #tpu.memory_space<vmem>>, vector<1x288x128xbf16>
    %53 = vector.shape_cast %52 : vector<1x288x128xbf16> to vector<288x128xbf16>
    %c768 = arith.constant 768 : index
    %c0_34 = arith.constant 0 : index
    %54 = vector.load %arg2[%c768, %c0_34] : memref<1152x128xbf16, #tpu.memory_space<vmem>>, vector<128x128xbf16>
    %cst_35 = arith.constant dense<0.000000e+00> : vector<288x128xf32>
    %55 = tpu.matmul %53, %54, %cst_35 {dimension_numbers = #tpu.dot_dimension_numbers<[1], [0], [0], [1], [0, 0, 1, 1], [], []>} : vector<288x128xbf16>, vector<128x128xbf16>, vector<288x128xf32> -> vector<288x128xf32>
    %56 = arith.addf %51, %55 : vector<288x128xf32>
    %c0_36 = arith.constant 0 : index
    %c37 = arith.constant 37 : index
    %c0_37 = arith.constant 0 : index
    %57 = vector.load %arg1[%c0_36, %c37, %c0_37] : memref<1x326x128xbf16, #tpu.memory_space<vmem>>, vector<1x288x128xbf16>
    %58 = vector.shape_cast %57 : vector<1x288x128xbf16> to vector<288x128xbf16>
    %c896 = arith.constant 896 : index
    %c0_38 = arith.constant 0 : index
    %59 = vector.load %arg2[%c896, %c0_38] : memref<1152x128xbf16, #tpu.memory_space<vmem>>, vector<128x128xbf16>
    %cst_39 = arith.constant dense<0.000000e+00> : vector<288x128xf32>
    %60 = tpu.matmul %58, %59, %cst_39 {dimension_numbers = #tpu.dot_dimension_numbers<[1], [0], [0], [1], [0, 0, 1, 1], [], []>} : vector<288x128xbf16>, vector<128x128xbf16>, vector<288x128xf32> -> vector<288x128xf32>
    %61 = arith.addf %56, %60 : vector<288x128xf32>
    %c0_40 = arith.constant 0 : index
    %c38 = arith.constant 38 : index
    %c0_41 = arith.constant 0 : index
    %62 = vector.load %arg1[%c0_40, %c38, %c0_41] : memref<1x326x128xbf16, #tpu.memory_space<vmem>>, vector<1x288x128xbf16>
    %63 = vector.shape_cast %62 : vector<1x288x128xbf16> to vector<288x128xbf16>
    %c1024 = arith.constant 1024 : index
    %c0_42 = arith.constant 0 : index
    %64 = vector.load %arg2[%c1024, %c0_42] : memref<1152x128xbf16, #tpu.memory_space<vmem>>, vector<128x128xbf16>
    %cst_43 = arith.constant dense<0.000000e+00> : vector<288x128xf32>
    %65 = tpu.matmul %63, %64, %cst_43 {dimension_numbers = #tpu.dot_dimension_numbers<[1], [0], [0], [1], [0, 0, 1, 1], [], []>} : vector<288x128xbf16>, vector<128x128xbf16>, vector<288x128xf32> -> vector<288x128xf32>
    %66 = arith.addf %61, %65 : vector<288x128xf32>
    %c0_44 = arith.constant 0 : index
    %c0_45 = arith.constant 0 : index
    %67 = vector.load %arg4[%c0_44, %c0_45] : memref<1x128xf32, #tpu.memory_space<vmem>>, vector<1x128xf32>
    %68 = vector.broadcast %67 : vector<1x128xf32> to vector<288x128xf32>
    %69 = arith.addf %66, %68 : vector<288x128xf32>
    %cst_46 = arith.constant 0.000000e+00 : f32
    %70 = vector.broadcast %cst_46 : f32 to vector<288x128xf32>
    %71 = arith.maximumf %69, %70 : vector<288x128xf32>
    %cst_47 = arith.constant 0.000000e+00 : f32
    %72 = vector.shape_cast %22 : vector<288x1xi1> to vector<288x1xi1>
    %73 = vector.broadcast %72 : vector<288x1xi1> to vector<288x128xi1>
    %74 = vector.broadcast %cst_47 : f32 to vector<288x128xf32>
    %75 = arith.select %73, %71, %74 : vector<288x128xi1>, vector<288x128xf32>
    %76 = arith.truncf %75 : vector<288x128xf32> to vector<288x128xbf16>
    %c19_48 = arith.constant 19 : index
    %c0_49 = arith.constant 0 : index
    %77 = vector.load %arg7[%c19_48, %c0_49] : memref<326x128xbf16, #tpu.memory_space<vmem>>, vector<288x128xbf16>
    tpu.vector_store %arg7[%c19_48, %c0_49], %76 {strides = array<i32>} : memref<326x128xbf16, #tpu.memory_space<vmem>>, vector<288x128xbf16>,
    %c0_50 = arith.constant 0 : index
    %c0_51 = arith.constant 0 : index
    %78 = vector.load %arg7[%c0_50, %c0_51] : memref<326x128xbf16, #tpu.memory_space<vmem>>, vector<288x128xbf16>
    %c0_52 = arith.constant 0 : index
    %c0_53 = arith.constant 0 : index
    %79 = vector.load %arg3[%c0_52, %c0_53] : memref<1152x128xbf16, #tpu.memory_space<vmem>>, vector<128x128xbf16>
    %cst_54 = arith.constant dense<0.000000e+00> : vector<288x128xf32>
    %80 = tpu.matmul %78, %79, %cst_54 {dimension_numbers = #tpu.dot_dimension_numbers<[1], [0], [0], [1], [0, 0, 1, 1], [], []>} : vector<288x128xbf16>, vector<128x128xbf16>, vector<288x128xf32> -> vector<288x128xf32>
    %c1_55 = arith.constant 1 : index
    %c0_56 = arith.constant 0 : index
    %81 = vector.load %arg7[%c1_55, %c0_56] : memref<326x128xbf16, #tpu.memory_space<vmem>>, vector<288x128xbf16>
    %c128_57 = arith.constant 128 : index
    %c0_58 = arith.constant 0 : index
    %82 = vector.load %arg3[%c128_57, %c0_58] : memref<1152x128xbf16, #tpu.memory_space<vmem>>, vector<128x128xbf16>
    %cst_59 = arith.constant dense<0.000000e+00> : vector<288x128xf32>
    %83 = tpu.matmul %81, %82, %cst_59 {dimension_numbers = #tpu.dot_dimension_numbers<[1], [0], [0], [1], [0, 0, 1, 1], [], []>} : vector<288x128xbf16>, vector<128x128xbf16>, vector<288x128xf32> -> vector<288x128xf32>
    %84 = arith.addf %80, %83 : vector<288x128xf32>
    %c2_60 = arith.constant 2 : index
    %c0_61 = arith.constant 0 : index
    %85 = vector.load %arg7[%c2_60, %c0_61] : memref<326x128xbf16, #tpu.memory_space<vmem>>, vector<288x128xbf16>
    %c256_62 = arith.constant 256 : index
    %c0_63 = arith.constant 0 : index
    %86 = vector.load %arg3[%c256_62, %c0_63] : memref<1152x128xbf16, #tpu.memory_space<vmem>>, vector<128x128xbf16>
    %cst_64 = arith.constant dense<0.000000e+00> : vector<288x128xf32>
    %87 = tpu.matmul %85, %86, %cst_64 {dimension_numbers = #tpu.dot_dimension_numbers<[1], [0], [0], [1], [0, 0, 1, 1], [], []>} : vector<288x128xbf16>, vector<128x128xbf16>, vector<288x128xf32> -> vector<288x128xf32>
    %88 = arith.addf %84, %87 : vector<288x128xf32>
    %c18_65 = arith.constant 18 : index
    %c0_66 = arith.constant 0 : index
    %89 = vector.load %arg7[%c18_65, %c0_66] : memref<326x128xbf16, #tpu.memory_space<vmem>>, vector<288x128xbf16>
    %c384_67 = arith.constant 384 : index
    %c0_68 = arith.constant 0 : index
    %90 = vector.load %arg3[%c384_67, %c0_68] : memref<1152x128xbf16, #tpu.memory_space<vmem>>, vector<128x128xbf16>
    %cst_69 = arith.constant dense<0.000000e+00> : vector<288x128xf32>
    %91 = tpu.matmul %89, %90, %cst_69 {dimension_numbers = #tpu.dot_dimension_numbers<[1], [0], [0], [1], [0, 0, 1, 1], [], []>} : vector<288x128xbf16>, vector<128x128xbf16>, vector<288x128xf32> -> vector<288x128xf32>
    %92 = arith.addf %88, %91 : vector<288x128xf32>
    %c19_70 = arith.constant 19 : index
    %c0_71 = arith.constant 0 : index
    %93 = vector.load %arg7[%c19_70, %c0_71] : memref<326x128xbf16, #tpu.memory_space<vmem>>, vector<288x128xbf16>
    %c512_72 = arith.constant 512 : index
    %c0_73 = arith.constant 0 : index
    %94 = vector.load %arg3[%c512_72, %c0_73] : memref<1152x128xbf16, #tpu.memory_space<vmem>>, vector<128x128xbf16>
    %cst_74 = arith.constant dense<0.000000e+00> : vector<288x128xf32>
    %95 = tpu.matmul %93, %94, %cst_74 {dimension_numbers = #tpu.dot_dimension_numbers<[1], [0], [0], [1], [0, 0, 1, 1], [], []>} : vector<288x128xbf16>, vector<128x128xbf16>, vector<288x128xf32> -> vector<288x128xf32>
    %96 = arith.addf %92, %95 : vector<288x128xf32>
    %c20_75 = arith.constant 20 : index
    %c0_76 = arith.constant 0 : index
    %97 = vector.load %arg7[%c20_75, %c0_76] : memref<326x128xbf16, #tpu.memory_space<vmem>>, vector<288x128xbf16>
    %c640_77 = arith.constant 640 : index
    %c0_78 = arith.constant 0 : index
    %98 = vector.load %arg3[%c640_77, %c0_78] : memref<1152x128xbf16, #tpu.memory_space<vmem>>, vector<128x128xbf16>
    %cst_79 = arith.constant dense<0.000000e+00> : vector<288x128xf32>
    %99 = tpu.matmul %97, %98, %cst_79 {dimension_numbers = #tpu.dot_dimension_numbers<[1], [0], [0], [1], [0, 0, 1, 1], [], []>} : vector<288x128xbf16>, vector<128x128xbf16>, vector<288x128xf32> -> vector<288x128xf32>
    %100 = arith.addf %96, %99 : vector<288x128xf32>
    %c36_80 = arith.constant 36 : index
    %c0_81 = arith.constant 0 : index
    %101 = vector.load %arg7[%c36_80, %c0_81] : memref<326x128xbf16, #tpu.memory_space<vmem>>, vector<288x128xbf16>
    %c768_82 = arith.constant 768 : index
    %c0_83 = arith.constant 0 : index
    %102 = vector.load %arg3[%c768_82, %c0_83] : memref<1152x128xbf16, #tpu.memory_space<vmem>>, vector<128x128xbf16>
    %cst_84 = arith.constant dense<0.000000e+00> : vector<288x128xf32>
    %103 = tpu.matmul %101, %102, %cst_84 {dimension_numbers = #tpu.dot_dimension_numbers<[1], [0], [0], [1], [0, 0, 1, 1], [], []>} : vector<288x128xbf16>, vector<128x128xbf16>, vector<288x128xf32> -> vector<288x128xf32>
    %104 = arith.addf %100, %103 : vector<288x128xf32>
    %c37_85 = arith.constant 37 : index
    %c0_86 = arith.constant 0 : index
    %105 = vector.load %arg7[%c37_85, %c0_86] : memref<326x128xbf16, #tpu.memory_space<vmem>>, vector<288x128xbf16>
    %c896_87 = arith.constant 896 : index
    %c0_88 = arith.constant 0 : index
    %106 = vector.load %arg3[%c896_87, %c0_88] : memref<1152x128xbf16, #tpu.memory_space<vmem>>, vector<128x128xbf16>
    %cst_89 = arith.constant dense<0.000000e+00> : vector<288x128xf32>
    %107 = tpu.matmul %105, %106, %cst_89 {dimension_numbers = #tpu.dot_dimension_numbers<[1], [0], [0], [1], [0, 0, 1, 1], [], []>} : vector<288x128xbf16>, vector<128x128xbf16>, vector<288x128xf32> -> vector<288x128xf32>
    %108 = arith.addf %104, %107 : vector<288x128xf32>
    %c38_90 = arith.constant 38 : index
    %c0_91 = arith.constant 0 : index
    %109 = vector.load %arg7[%c38_90, %c0_91] : memref<326x128xbf16, #tpu.memory_space<vmem>>, vector<288x128xbf16>
    %c1024_92 = arith.constant 1024 : index
    %c0_93 = arith.constant 0 : index
    %110 = vector.load %arg3[%c1024_92, %c0_93] : memref<1152x128xbf16, #tpu.memory_space<vmem>>, vector<128x128xbf16>
    %cst_94 = arith.constant dense<0.000000e+00> : vector<288x128xf32>
    %111 = tpu.matmul %109, %110, %cst_94 {dimension_numbers = #tpu.dot_dimension_numbers<[1], [0], [0], [1], [0, 0, 1, 1], [], []>} : vector<288x128xbf16>, vector<128x128xbf16>, vector<288x128xf32> -> vector<288x128xf32>
    %112 = arith.addf %108, %111 : vector<288x128xf32>
    %c0_95 = arith.constant 0 : index
    %c0_96 = arith.constant 0 : index
    %113 = vector.load %arg5[%c0_95, %c0_96] : memref<1x128xf32, #tpu.memory_space<vmem>>, vector<1x128xf32>
    %114 = vector.broadcast %113 : vector<1x128xf32> to vector<288x128xf32>
    %115 = arith.addf %112, %114 : vector<288x128xf32>
    %cst_97 = arith.constant 0.000000e+00 : f32
    %116 = vector.broadcast %cst_97 : f32 to vector<288x128xf32>
    %117 = arith.maximumf %115, %116 : vector<288x128xf32>
    %118 = vector.shape_cast %117 : vector<288x128xf32> to vector<16x18x128xf32>
    %119 = vector.extract_strided_slice %118 {offsets = [0, 0, 0], sizes = [16, 16, 128], strides = [1, 1, 1]} : vector<16x18x128xf32> to vector<16x16x128xf32>
    %120 = vector.shape_cast %119 : vector<16x16x128xf32> to vector<8x2x8x2x128xf32>
    %121 = vector.extract_strided_slice %120 {offsets = [0, 0, 0, 0, 0], sizes = [8, 1, 8, 1, 128], strides = [1, 1, 1, 1, 1]} : vector<8x2x8x2x128xf32> to vector<8x1x8x1x128xf32>
    %122 = vector.shape_cast %121 : vector<8x1x8x1x128xf32> to vector<8x8x128xf32>
    %123 = vector.extract_strided_slice %120 {offsets = [0, 0, 0, 1, 0], sizes = [8, 1, 8, 1, 128], strides = [1, 1, 1, 1, 1]} : vector<8x2x8x2x128xf32> to vector<8x1x8x1x128xf32>
    %124 = vector.shape_cast %123 : vector<8x1x8x1x128xf32> to vector<8x8x128xf32>
    %125 = arith.maximumf %122, %124 : vector<8x8x128xf32>
    %126 = vector.extract_strided_slice %120 {offsets = [0, 1, 0, 0, 0], sizes = [8, 1, 8, 1, 128], strides = [1, 1, 1, 1, 1]} : vector<8x2x8x2x128xf32> to vector<8x1x8x1x128xf32>
    %127 = vector.shape_cast %126 : vector<8x1x8x1x128xf32> to vector<8x8x128xf32>
    %128 = vector.extract_strided_slice %120 {offsets = [0, 1, 0, 1, 0], sizes = [8, 1, 8, 1, 128], strides = [1, 1, 1, 1, 1]} : vector<8x2x8x2x128xf32> to vector<8x1x8x1x128xf32>
    %129 = vector.shape_cast %128 : vector<8x1x8x1x128xf32> to vector<8x8x128xf32>
    %130 = arith.maximumf %127, %129 : vector<8x8x128xf32>
    %131 = arith.maximumf %125, %130 : vector<8x8x128xf32>
    %c0_98 = arith.constant 0 : index
    %c0_99 = arith.constant 0 : index
    %c0_100 = arith.constant 0 : index
    %c0_101 = arith.constant 0 : index
    %132 = vector.load %arg6[%c0_98, %c0_99, %c0_100, %c0_101] : memref<1x8x8x128xf32, #tpu.memory_space<vmem>>, vector<1x8x8x128xf32>
    %133 = vector.shape_cast %132 : vector<1x8x8x128xf32> to vector<8x8x128xf32>
    %134 = vector.shape_cast %131 : vector<8x8x128xf32> to vector<1x8x8x128xf32>
    tpu.vector_store %arg6[%c0_98, %c0_99, %c0_100, %c0_101], %134 {strides = array<i32>} : memref<1x8x8x128xf32, #tpu.memory_space<vmem>>, vector<1x8x8x128xf32>,
    return
  }
  func.func @transform_0(%arg0: i32) -> (i32, i32, i32) {
    %c0_i32 = arith.constant 0 : i32
    %c0_i32_0 = arith.constant 0 : i32
    %c0_i32_1 = arith.constant 0 : i32
    return %arg0, %c0_i32, %c0_i32_0 : i32, i32, i32
  }
  func.func @transform_1(%arg0: i32) -> (i32, i32) {
    %c0_i32 = arith.constant 0 : i32
    %c0_i32_0 = arith.constant 0 : i32
    %c0_i32_1 = arith.constant 0 : i32
    return %c0_i32, %c0_i32_0 : i32, i32
  }
  func.func @transform_2(%arg0: i32) -> (i32, i32) {
    %c0_i32 = arith.constant 0 : i32
    %c0_i32_0 = arith.constant 0 : i32
    %c0_i32_1 = arith.constant 0 : i32
    return %c0_i32, %c0_i32_0 : i32, i32
  }
  func.func @transform_3(%arg0: i32) -> (i32, i32) {
    %c0_i32 = arith.constant 0 : i32
    %c0_i32_0 = arith.constant 0 : i32
    %c0_i32_1 = arith.constant 0 : i32
    return %c0_i32, %c0_i32_0 : i32, i32
  }
  func.func @transform_4(%arg0: i32) -> (i32, i32) {
    %c0_i32 = arith.constant 0 : i32
    %c0_i32_0 = arith.constant 0 : i32
    %c0_i32_1 = arith.constant 0 : i32
    return %c0_i32, %c0_i32_0 : i32, i32
  }
  func.func @transform_5(%arg0: i32) -> (i32, i32, i32, i32) {
    %c0_i32 = arith.constant 0 : i32
    %c0_i32_0 = arith.constant 0 : i32
    %c0_i32_1 = arith.constant 0 : i32
    %c0_i32_2 = arith.constant 0 : i32
    return %arg0, %c0_i32, %c0_i32_0, %c0_i32_1 : i32, i32, i32, i32
  }
}

</mosaic_0001>

<bundles_post_ra>
// kernel: _lambda_.1
= control target key start
LH: loop header
LB: loop body
LE: loop exit
PB: predicated region body
PF: predicated region fallthrough
CT: control target
= control target key end

     0   :  { %s13723_s18 = smov 0   ;;  %s17603_s0 = inlined_call_operand.vmem [shape: bf16[2,326,128], index: 0, kind: input, shape index: {}]   ;;  %s17604_s1 = inlined_call_operand.vmem [shape: bf16[1152,128], index: 1, kind: input, shape index: {}]   ;;  %s17605_s2 = inlined_call_operand.vmem [shape: bf16[1152,128], index: 2, kind: input, shape index: {}]   ;;  %s17606_s3 = inlined_call_operand.vmem [shape: f32[1,128], index: 3, kind: input, shape index: {}]   ;;  %s17607_s4 = inlined_call_operand.vmem [shape: f32[1,128], index: 4, kind: input, shape index: {}]   ;;  %s17608_s5 = inlined_call_operand.vmem [shape: f32[2,8,8,128], index: 5, kind: output, shape index: {}]  }
   0x1 LB: > { %s10840_s19 = sadd.s32 4294967295, %s13689_s18   ;;  %p10844_p0 = scmp.ge.s32.totalorder %s13689_s18, 1  ;;  %s13689_s18 = sphi %s13723_s18, %s15_s18  }
   0x2   : > { %p187_p1 = scmp.lt.s32.totalorder %s13689_s18, 3 }
   0x4   : > { %p188_p2 = pnand %p10844_p0, %p187_p1 }
   0x6   : > { %191 = sbr.rel (%p188_p2) target bundleno = 1911 (0x777), region = 40 }
   0xd   : > { %v13384_v0 = vld [vmem:[%s17604_s1 + $0x40] sm:$0xff]   ;;  %p215_p3 = scmp.lt.s32.totalorder %s10840_s19, 1  ;;  %v13385_v1 = vld [vmem:[%s17604_s1 + $0x48] sm:$0xff]   ;;  %v13386_v2 = vld [vmem:[%s17604_s1 + $0x50] sm:$0xff]   ;;  %vm17614_vm0 = vsmask.f32 7424 }
   0xe   : > { %11789 = vmatprep.subr.bf16.mxu0 %v13384_v0  ;;  %v13387_v3 = vld [vmem:[%s17604_s1 + $0x58] sm:$0xff]   ;;  %v13388_v11 = vld [vmem:[%s17604_s1 + $0x60] sm:$0xff]   ;;  %v13389_v15 = vld [vmem:[%s17604_s1 + $0x68] sm:$0xff]   ;;  %vm17610_vm1 = vcmask 1046528   ;;  %vm17613_vm2 = vsmask.f32 6400 }
   0xf   : > { %s18387_s19 = smov (!%p215_p3, %s10840_s19), 1  ;;  %11790 = vmatpush3.bf16.msra.mxu0 %v13384_v0  ;;  %v13390_v18 = vld [vmem:[%s17604_s1 + $0x70] sm:$0xff]   ;;  %v13391_v21 = vld [vmem:[%s17604_s1 + $0x78] sm:$0xff]   ;;  %v13395_v28 = vld [vmem:[%s17604_s1] sm:$0xff]   ;;  %vm17612_vm3 = vcmask 1045504   ;;  %vm17609_vm5 = vcmask 1044480  }
  0x10   : > { %11791 = vmatprep.subr.bf16.mxu0 %v13385_v1  ;;  %s13301_s26 = smul.u32 164, %s18387_s19  ;;  %v13398_v38 = vld [vmem:[%s17604_s1 + $0x8] sm:$0xff]   ;;  %v13401_v49 = vld [vmem:[%s17604_s1 + $0x10] sm:$0xff]   ;;  %v13404_v58 = vld [vmem:[%s17604_s1 + $0x18] sm:$0xff]   ;;  %vm17611_vm4 = vsmask.f32 5376 }
  0x11   : > { %vm228_vm6 = vcmask 1041408   ;;  %vm17615_vm7 = vsmask.f32 1280  ;;  %vm234_vm9 = vcmask 1043457   ;;  %vm235_vm10 = vsmask.f32 7942 }
  0x12   : > { %s13746_s29 = scalar_lea.vmem %s17603_s0, %s13301_s26  ;;  %vm14527_vm8 = vmand %vm228_vm6, %vm17615_vm7  ;;  %s11284_s26 = sshll.u32 %s18387_s19, 6 }
  0x13   : > { %11792 = vmatpush3.bf16.msra.mxu0 %v13385_v1  ;;  %v891_v4 = vld [vmem:[%s13746_s29] sm:$0xf]  ;;  %v892_v5 = vld [vmem:[%s13746_s29 + $0x4] sm:$0xf]  ;;  %v13756_v7 = vld [vmem:[%s13746_s29 + $0x8] sm:$0xff]   ;;  %s17131_s19 = scalar_lea.vmem %s17608_s5, %s11284_s26 }
  0x14   : > { %11793 = vmatprep.subr.bf16.mxu0 %v13386_v2  ;;  %v13753_v6 = vcombine.low %v891_v4, %v892_v5  ;;  %v1062_v10 = vshll.u32 %v13756_v7, 16  ;;  %v13769_v17 = vld [vmem:[%s13746_s29 + $0x10] sm:$0xff]   ;;  %v13775_v19 = vld [vmem:[%s13746_s29 + $0x18] sm:$0xff]   ;;  %v1066_v22 = vshrl.u32 %v13756_v7, 16  ;;  %v13785_v26 = vld [vmem:[%s13746_s29 + $0x20] sm:$0xff]  }
  0x15   : > { %v1070_v20 = vshll.u32 %v13769_v17, 16  ;;  %v1074_v23 = vshrl.u32 %v13769_v17, 16  ;;  %v1078_v24 = vshll.u32 %v13775_v19, 16  ;;  %v13791_v31 = vld [vmem:[%s13746_s29 + $0x28] sm:$0xff]   ;;  %v1082_v32 = vshrl.u32 %v13775_v19, 16  ;;  %v13796_v34 = vld [vmem:[%s13746_s29 + $0x30] sm:$0xff]   ;;  %vm14533_vm11 = vmand %vm234_vm9, %vm235_vm10 }
  0x16   : > { %v1055_v8 = vshrl.u32 %v13753_v6, 16  ;;  %v1057_v9 = vshll.u32 %v13753_v6, 16  ;;  %v1064_v13 = vrot.slane %v1062_v10, 1  ;;  %v1086_v33 = vshll.u32 %v13785_v26, 16  ;;  %v13800_v36 = vld [vmem:[%s13746_s29 + $0x38] sm:$0xff]   ;;  %v13809_v41 = vld [vmem:[%s13746_s29 + $0x40] sm:$0xff]  }
  0x17   : > { %11794 = vmatpush3.bf16.msra.mxu0 %v13386_v2  ;;  %v1072_v25 = vrot.slane %v1070_v20, 1  ;;  %v1080_v30 = vrot.slane %v1078_v24, 1  ;;  %v1090_v39 = vshrl.u32 %v13785_v26, 16  ;;  %v1094_v40 = vshll.u32 %v13791_v31, 16  ;;  %v13814_v46 = vld [vmem:[%s13746_s29 + $0x48] sm:$0xff]   ;;  %v13822_v52 = vld [vmem:[%s13746_s29 + $0x50] sm:$0xff]  }
  0x18   : > { %11795 = vmatprep.subr.bf16.mxu0 %v13387_v3  ;;  %v1059_v12 = vrot.slane %v1057_v9, 1  ;;  %v1068_v27 = vor.u32 %v1066_v22, %v1064_v13  ;;  %v1088_v43 = vrot.slane %v1086_v33, 1  ;;  %v1102_v44 = vshll.u32 %v13796_v34, 16  ;;  %v13833_v61 = vld [vmem:[%s13746_s29 + $0x58] sm:$0xff]  }
  0x19   : > { %v1076_v29 = vor.u32 %v1074_v23, %v1072_v25  ;;  %v1084_v42 = vor.u32 %v1082_v32, %v1080_v30  ;;  %v1110_v45 = vshll.u32 %v13800_v36, 16  ;;  %v1096_v48 = vrot.slane %v1094_v40, 1 }
  0x1a   : > { %v1060_v14 = vor.u32 %v1059_v12, %v1055_v8  ;;  %v1073_v35 = vsel %vm17614_vm0, %v1068_v27, %v1072_v25  ;;  %v1092_v47 = vor.u32 %v1090_v39, %v1088_v43  ;;  %v1098_v50 = vshrl.u32 %v13791_v31, 16  ;;  %v13407_v8 = vld [vmem:[%s17604_s1 + $0x20] sm:$0xff]   ;;  %v13848_v12 = vld [vmem:[%s13746_s29 + $0x68] sm:$0xff]   ;;  %v13413_v25 = vld [vmem:[%s17604_s1 + $0x30] sm:$0xff]  }
  0x1b   : > { %11796 = vmatpush3.bf16.msra.mxu0 %v13387_v3  ;;  %v1081_v37 = vsel %vm17614_vm0, %v1076_v29, %v1080_v30  ;;  %v1118_v51 = vshll.u32 %v13809_v41, 16  ;;  %v1089_v53 = vsel %vm17614_vm0, %v1084_v42, %v1088_v43  ;;  %v1106_v54 = vshrl.u32 %v13796_v34, 16  ;;  %v13839_v3 = vld [vmem:[%s13746_s29 + $0x60] sm:$0xff]   ;;  %v13417_v29 = vld [vmem:[%s17604_s1 + $0x38] sm:$0xff]  }
  0x1c   : > { %11797 = vmatprep.subr.bf16.mxu0 %v13388_v11  ;;  %v1065_v16 = vsel %vm17614_vm0, %v1060_v14, %v1064_v13  ;;  %v1114_v55 = vshrl.u32 %v13800_v36, 16  ;;  %v1104_v56 = vrot.slane %v1102_v44, 1  ;;  %v1112_v57 = vrot.slane %v1110_v45, 1  ;;  %v13419_v39 = vld [vmem:[%s17604_s1 + $0x80] sm:$0xff]   ;;  %v13875_v42 = vld [vmem:[%s13746_s29 + $0x78] sm:$0xff]  }
  0x1d   : > { %11805 = vmatprep.mubr.bf16.mxu0 %v1065_v16  ;;  %v1122_v59 = vshrl.u32 %v13809_v41, 16  ;;  %v1126_v60 = vshll.u32 %v13814_v46, 16  ;;  %v1097_v62 = vsel %vm17614_vm0, %v1092_v47, %v1096_v48  ;;  %v1120_v63 = vrot.slane %v1118_v51, 1 }
  0x1e   : > { %v1134_v0 = vshll.u32 %v13822_v52, 16  ;;  %v1100_v1 = vor.u32 %v1098_v50, %v1096_v48  ;;  %v1142_v2 = vshll.u32 %v13833_v61, 16  ;;  %v1108_v4 = vor.u32 %v1106_v54, %v1104_v56  ;;  %v13886_v54 = vld [vmem:[%s13746_s29 + $0x88] sm:$0xff]  }
  0x1f   : > { %11798 = vmatpush3.bf16.msra.mxu0 %v13388_v11  ;;  %v1130_v5 = vshrl.u32 %v13814_v46, 16  ;;  %v1128_v9 = vrot.slane %v1126_v60, 1  ;;  %v1138_v10 = vshrl.u32 %v13822_v52, 16  ;;  %v1146_v11 = vshrl.u32 %v13833_v61, 16 }
  0x20   : > { %11799 = vmatprep.subr.bf16.mxu0 %v13389_v15  ;;  %v1105_v13 = vsel %vm17614_vm0, %v1100_v1, %v1104_v56  ;;  %v1136_v14 = vrot.slane %v1134_v0, 1  ;;  %v1150_v16 = vshll.u32 %v13839_v3, 16  ;;  %v1113_v20 = vsel %vm17614_vm0, %v1108_v4, %v1112_v57  ;;  %v13894_v0 = vld [vmem:[%s13746_s29 + $0x90] ss:$0 sps:$4 sm:$0x11]  }
  0x21   : > { %v1158_v22 = vshll.u32 %v13848_v12, 16  ;;  %v1116_v23 = vor.u32 %v1114_v55, %v1112_v57  ;;  %v1124_v27 = vor.u32 %v1122_v59, %v1120_v63  ;;  %v1174_v47 = vshll.u32 %v13875_v42, 16 }
  0x22   : > { %v1152_v24 = vrot.slane %v1150_v16, 1  ;;  %v1140_v40 = vor.u32 %v1138_v10, %v1136_v14  ;;  %v1178_v50 = vshrl.u32 %v13875_v42, 16  ;;  %v1198_v10 = vshll.u32 %v13894_v0, 16 }
  0x23   : > { %11800 = vmatpush3.bf16.msra.mxu0 %v13389_v15  ;;  %v1144_v15 = vrot.slane %v1142_v2, 1  ;;  %v1121_v30 = vsel %vm17614_vm0, %v1116_v23, %v1120_v63  ;;  %v1129_v32 = vsel %vm17614_vm0, %v1124_v27, %v1128_v9  ;;  %v1160_v33 = vrot.slane %v1158_v22, 1  ;;  %v13422_v22 = vld [vmem:[%s17604_s1 + $0x98] sm:$0xff]   ;;  %v13654_v23 = vld [vmem:[%s13746_s29 + $0x10] sm:$0xff]  }
  0x24   : > { %11801 = vmatprep.subr.bf16.mxu0 %v13390_v18  ;;  %v1176_v57 = vrot.slane %v1174_v47, 1  ;;  %v1200_v16 = vrot.slane %v1198_v10, 1  ;;  %v13439_v10 = vld [vmem:[%s17604_s1 + $0x100] sm:$0xff]  }
  0x25   : > { %v1145_v44 = vsel %vm17614_vm0, %v1140_v40, %v1144_v15  ;;  %v1148_v48 = vor.u32 %v1146_v11, %v1144_v15 }
  0x27   : > { %11802 = vmatpush3.bf16.msra.mxu0 %v13390_v18  ;;  %v13410_v18 = vld [vmem:[%s17604_s1 + $0x28] sm:$0xff]   ;;  %v1153_v55 = vsel %vm17614_vm0, %v1148_v48, %v1152_v24  ;;  %v13659_v48 = vld [vmem:[%s13746_s29 + $0x38] sm:$0xff]  }
  0x28   : > { %11803 = vmatprep.subr.bf16.mxu0 %v13391_v21 }
  0x2b   : > { %11804 = vmatpush3.bf16.msra.mxu0 %v13391_v21  ;;  %v1154_v21 = vshrl.u32 %v13839_v3, 16 }
  0x2c   : > { %11841 = vmatprep.subr.bf16.mxu0 %v13395_v28 }
  0x2d   : > { %v1156_v51 = vor.u32 %v1154_v21, %v1152_v24  ;;  %v13421_v21 = vld [vmem:[%s17604_s1 + $0x90] sm:$0xff]   ;;  %v1712_v24 = vrot.slane %v13654_v23, 1  ;;  %v14030_v23 = vld [vmem:[%s13746_s29 + $0x28] sm:$0xff]  }
  0x2e   : > { %11806 = vmatmul.mubr.bf16.vlgmr.msra.gmra.mrb[0].mxu0 %v1073_v35  ;;  %v1162_v35 = vshrl.u32 %v13848_v12, 16 }
  0x2f   : > { %11842 = vmatpush3.bf16.msra.mxu0 %v13395_v28  ;;  %11809 = vmatprep.mubr.bf16.mxu0 %v1081_v37  ;;  %v13862_v28 = vld [vmem:[%s13746_s29 + $0x70] sm:$0xff]   ;;  %v1132_v37 = vor.u32 %v1130_v5, %v1128_v9  ;;  %v1161_v56 = vsel %vm17614_vm0, %v1156_v51, %v1160_v33  ;;  %v1194_v5 = vshrl.u32 %v13886_v54, 16 }
  0x30   : > { %11843 = vmatprep.subr.bf16.mxu0 %v13398_v38  ;;  %v1170_v45 = vshrl.u32 %v13862_v28, 16  ;;  %v1164_v59 = vor.u32 %v1162_v35, %v1160_v33  ;;  %v13656_v33 = vld [vmem:[%s13746_s29 + $0x20] sm:$0xff]  }
  0x31   : > { %v1137_v43 = vsel %vm17614_vm0, %v1132_v37, %v1136_v14  ;;  %v1716_v35 = vrot.slane %v13656_v33, 1  ;;  %v13657_v37 = vld [vmem:[%s13746_s29 + $0x28] sm:$0xff]  }
  0x33   : > { %11844 = vmatpush3.bf16.msra.mxu0 %v13398_v38  ;;  %v1166_v38 = vshll.u32 %v13862_v28, 16 }
  0x34   : > { %11845 = vmatprep.subr.bf16.mxu0 %v13401_v49 }
  0x36   : > { %11810 = vmatmul.mubr.bf16.gmra.mrb[4].mxu0 %v1089_v53  ;;  %v13883_v53 = vld [vmem:[%s13746_s29 + $0x80] sm:$0xff]  }
  0x37   : > { %11813 = vmatprep.mubr.bf16.mxu0 %v1097_v62  ;;  %11846 = vmatpush3.bf16.msra.mxu0 %v13401_v49  ;;  %v1168_v49 = vrot.slane %v1166_v38, 1  ;;  %v1186_v60 = vshrl.u32 %v13883_v53, 16  ;;  %v1190_v62 = vshll.u32 %v13886_v54, 16  ;;  %v1718_v38 = vrot.slane %v13657_v37, 1 }
  0x38   : > { %11847 = vmatprep.subr.bf16.mxu0 %v13404_v58 }
  0x39   : > { %v1172_v63 = vor.u32 %v1170_v45, %v1168_v49  ;;  %v1169_v1 = vsel %vm17614_vm0, %v1164_v59, %v1168_v49  ;;  %v1192_v9 = vrot.slane %v1190_v62, 1  ;;  %v13658_v45 = vld [vmem:[%s13746_s29 + $0x30] sm:$0xff]   ;;  %v1722_v49 = vrot.slane %v13659_v48, 1  ;;  %v13661_v59 = vld [vmem:[%s13746_s29 + $0x48] sm:$0xff]  }
  0x3a   : > { %v1720_v47 = vrot.slane %v13658_v45, 1  ;;  %v13434_v62 = vld [vmem:[%s17604_s1 + $0xf0] sm:$0xff]  }
  0x3b   : > { %11848 = vmatpush3.bf16.msra.mxu0 %v13404_v58  ;;  %v1182_v58 = vshll.u32 %v13883_v53, 16  ;;  %v1177_v2 = vsel %vm17614_vm0, %v1172_v63, %v1176_v57  ;;  %v1196_v15 = vor.u32 %v1194_v5, %v1192_v9 }
  0x3c   : > { %11849 = vmatprep.subr.bf16.mxu0 %v13407_v8  ;;  %v1721_v51 = vsel %vm17610_vm1, %v1718_v38, %v1720_v47 }
  0x3d   : > { %v1184_v4 = vrot.slane %v1182_v58, 1 }
  0x3e   : > { %11814 = vmatmul.mubr.bf16.gmra.mrb[8].mxu0 %v1105_v13 }
  0x3f   : > { %11817 = vmatprep.mubr.bf16.mxu0 %v1113_v20  ;;  %11850 = vmatpush3.bf16.msra.mxu0 %v13407_v8  ;;  %v1180_v8 = vor.u32 %v1178_v50, %v1176_v57  ;;  %v1188_v11 = vor.u32 %v1186_v60, %v1184_v4  ;;  %v13420_v20 = vld [vmem:[%s17604_s1 + $0x88] sm:$0xff]   ;;  %v13432_v50 = vld [vmem:[%s17604_s1 + $0xe0] sm:$0xff]   ;;  %v1726_v60 = vrot.slane %v13661_v59, 1 }
  0x40   : > { %11851 = vmatprep.subr.bf16.mxu0 %v13410_v18  ;;  %v13660_v57 = vld [vmem:[%s13746_s29 + $0x40] sm:$0xff]  }
  0x41   : > { %v1185_v13 = vsel %vm17614_vm0, %v1180_v8, %v1184_v4  ;;  %v1193_v14 = vsel %vm17614_vm0, %v1188_v11, %v1192_v9  ;;  %v1724_v58 = vrot.slane %v13660_v57, 1  ;;  %v13662_v4 = vld [vmem:[%s13746_s29 + $0x50] sm:$0xff]   ;;  %v13663_v8 = vld [vmem:[%s13746_s29 + $0x58] sm:$0xff]  }
  0x42   : > { %v1728_v5 = vrot.slane %v13662_v4, 1  ;;  %v1730_v9 = vrot.slane %v13663_v8, 1 }
  0x43   : > { %11852 = vmatpush3.bf16.msra.mxu0 %v13410_v18  ;;  %v1201_v18 = vsel %vm17614_vm0, %v1196_v15, %v1200_v16  ;;  %v1725_v63 = vsel %vm17610_vm1, %v1722_v49, %v1724_v58  ;;  %v1734_v15 = vrot.slane %v13848_v12, 1 }
  0x44   : > { %11853 = vmatprep.subr.bf16.mxu0 %v13413_v25  ;;  %v1729_v11 = vsel %vm17610_vm1, %v1726_v60, %v1728_v5 }
  0x46   : > { %11818 = vmatmul.mubr.bf16.gmra.mrb[12].mxu0 %v1121_v30 }
  0x47   : > { %11821 = vmatprep.mubr.bf16.mxu0 %v1129_v32  ;;  %11854 = vmatpush3.bf16.msra.mxu0 %v13413_v25  ;;  %v13655_v25 = vld [vmem:[%s13746_s29 + $0x18] sm:$0xff]   ;;  %v13429_v32 = vld [vmem:[%s17604_s1 + $0xc8] sm:$0xff]  }
  0x48   : > { %11855 = vmatprep.subr.bf16.mxu0 %v13417_v29  ;;  %v1714_v27 = vrot.slane %v13655_v25, 1  ;;  %v13442_v25 = vld [vmem:[%s17604_s1 + $0x108] sm:$0xff]  }
  0x4a   : > { %v1715_v30 = vsel %vm17610_vm1, %v1712_v24, %v1714_v27  ;;  %v1717_v40 = vsel %vm17610_vm1, %v1714_v27, %v1716_v35  ;;  %v14037_v27 = vld [vmem:[%s13746_s29 + $0x30] sm:$0xff]  }
  0x4b   : > { %11856 = vmatpush3.bf16.msra.mxu0 %v13417_v29 }
  0x4c   : > { %11893 = vmatprep.subr.bf16.mxu0 %v13419_v39 }
  0x4e   : > { %11822 = vmatmul.mubr.bf16.gmra.mrb[16].mxu0 %v1137_v43  ;;  %v1719_v43 = vsel %vm17610_vm1, %v1716_v35, %v1718_v38  ;;  %v14046_v35 = vld [vmem:[%s13746_s29 + $0x38] sm:$0xff]   ;;  %v14050_v38 = vld [vmem:[%s13746_s29 + $0x40] sm:$0xff]  }
  0x4f   : > { %11825 = vmatprep.mubr.bf16.mxu0 %v1145_v44  ;;  %v13431_v44 = vld [vmem:[%s17604_s1 + $0xd8] sm:$0xff]  }
  0x56   : > { %11826 = vmatmul.mubr.bf16.gmra.mrb[20].mxu0 %v1153_v55  ;;  %v1723_v55 = vsel %vm17610_vm1, %v1720_v47, %v1722_v49  ;;  %v14062_v47 = vld [vmem:[%s13746_s29 + $0x48] sm:$0xff]   ;;  %v14066_v49 = vld [vmem:[%s13746_s29 + $0x50] sm:$0xff]  }
  0x57   : > { %11829 = vmatprep.mubr.bf16.mxu0 %v1161_v56  ;;  %v13433_v56 = vld [vmem:[%s17604_s1 + $0xe8] sm:$0xff]  }
  0x5e   : > { %11830 = vmatmul.mubr.bf16.gmra.mrb[24].mxu0 %v1169_v1  ;;  %v1727_v1 = vsel %vm17610_vm1, %v1724_v58, %v1726_v60  ;;  %v14078_v58 = vld [vmem:[%s13746_s29 + $0x58] sm:$0xff]   ;;  %v14082_v60 = vld [vmem:[%s13746_s29 + $0x60] sm:$0xff]  }
  0x5f   : > { %11833 = vmatprep.mubr.bf16.mxu0 %v1177_v2  ;;  %v13435_v2 = vld [vmem:[%s17604_s1 + $0xf8] sm:$0xff]  }
  0x66   : > { %11834 = vmatmul.mubr.bf16.gmra.mrb[28].mxu0 %v1185_v13  ;;  %v1731_v13 = vsel %vm17610_vm1, %v1728_v5, %v1730_v9  ;;  %v14096_v5 = vld [vmem:[%s13746_s29 + $0x68] sm:$0xff]  }
  0x67   : > { %11837 = vmatprep.mubr.bf16.mxu0 %v1193_v14  ;;  %v1732_v14 = vrot.slane %v13839_v3, 1 }
  0x69   : > { %v1733_v16 = vsel %vm17610_vm1, %v1730_v9, %v1732_v14  ;;  %v14100_v9 = vld [vmem:[%s13746_s29 + $0x70] sm:$0xff]  }
  0x6e   : > { %11838 = vmatmul.mubr.bf16.gmra.mrb[32].mxu0 %v1201_v18  ;;  %v1735_v18 = vsel %vm17610_vm1, %v1732_v14, %v1734_v15  ;;  %v14107_v14 = vld [vmem:[%s13746_s29 + $0x78] sm:$0xff]  }
  0x6f   : > { %11857 = vmatprep.mubr.bf16.mxu0 %v13753_v6  ;;  %v13423_v6 = vld [vmem:[%s17604_s1 + $0xa0] sm:$0xff]  }
  0x76   : > { %11858 = vmatmul.mubr.bf16.vlgmr.msra.gmra.mrb[0].mxu0 %v13756_v7  ;;  %v13424_v7 = vld [vmem:[%s17604_s1 + $0xa8] sm:$0xff]  }
  0x77   : > { %11894 = vmatpush3.bf16.msra.mxu0 %v13419_v39  ;;  %11861 = vmatprep.mubr.bf16.mxu0 %v13769_v17  ;;  %v13425_v17 = vld [vmem:[%s17604_s1 + $0xb0] sm:$0xff]  }
  0x78   : > { %11895 = vmatprep.subr.bf16.mxu0 %v13420_v20  ;;  %v13430_v39 = vld [vmem:[%s17604_s1 + $0xd0] sm:$0xff]  }
  0x7b   : > { %11896 = vmatpush3.bf16.msra.mxu0 %v13420_v20  ;;  %v1736_v20 = vrot.slane %v13862_v28, 1 }
  0x7c   : > { %11897 = vmatprep.subr.bf16.mxu0 %v13421_v21 }
  0x7e   : > { %11862 = vmatmul.mubr.bf16.gmra.mrb[4].mxu0 %v13775_v19  ;;  %v13426_v19 = vld [vmem:[%s17604_s1 + $0xb8] sm:$0xff]  }
  0x7f   : > { %11865 = vmatprep.mubr.bf16.mxu0 %v13785_v26  ;;  %11898 = vmatpush3.bf16.msra.mxu0 %v13421_v21  ;;  %v13428_v26 = vld [vmem:[%s17604_s1 + $0xc0] sm:$0xff]   ;;  %v1738_v21 = vrot.slane %v13875_v42, 1 }
  0x80   : > { %11899 = vmatprep.subr.bf16.mxu0 %v13422_v22 }
  0x83   : > { %11900 = vmatpush3.bf16.msra.mxu0 %v13422_v22  ;;  %v1737_v22 = vsel %vm17610_vm1, %v1734_v15, %v1736_v20 }
  0x84   : > { %11901 = vmatprep.subr.bf16.mxu0 %v13423_v6 }
  0x86   : > { %11866 = vmatmul.mubr.bf16.gmra.mrb[8].mxu0 %v13791_v31  ;;  %v1688_v31 = vld [vmem:[%s13746_s29] sm:$0xe] }
  0x87   : > { %11869 = vmatprep.mubr.bf16.mxu0 %v13796_v34  ;;  %11902 = vmatpush3.bf16.msra.mxu0 %v13423_v6  ;;  %v13652_v34 = vld [vmem:[%s13746_s29 + $0x4] sm:$0xf]  ;;  %v1739_v6 = vsel %vm17610_vm1, %v1736_v20, %v1738_v21 }
  0x88   : > { %11903 = vmatprep.subr.bf16.mxu0 %v13424_v7 }
  0x8b   : > { %11904 = vmatpush3.bf16.msra.mxu0 %v13424_v7  ;;  %v2025_v7 = vld [vmem:[%s13746_s29 + $0x8] sm:$0xe] }
  0x8c   : > { %11905 = vmatprep.subr.bf16.mxu0 %v13425_v17 }
  0x8e   : > { %11870 = vmatmul.mubr.bf16.gmra.mrb[12].mxu0 %v13800_v36  ;;  %v10883_v36 = vcombine.low %v1688_v31, %v13652_v34 }
  0x8f   : > { %11873 = vmatprep.mubr.bf16.mxu0 %v13809_v41  ;;  %11906 = vmatpush3.bf16.msra.mxu0 %v13425_v17  ;;  %v14005_v17 = vld [vmem:[%s13746_s29 + $0xc] sm:$0xf] }
  0x90   : > { %11907 = vmatprep.subr.bf16.mxu0 %v13426_v19  ;;  %v1709_v41 = vrot.slane %v10883_v36, 1  ;;  %v14020_v36 = vld [vmem:[%s13746_s29 + $0x18] sm:$0xff]  }
  0x93   : > { %11908 = vmatpush3.bf16.msra.mxu0 %v13426_v19 }
  0x94   : > { %11945 = vmatprep.subr.bf16.mxu0 %v13428_v26 }
  0x96   : > { %11874 = vmatmul.mubr.bf16.gmra.mrb[16].mxu0 %v13814_v46  ;;  %v13653_v46 = vld [vmem:[%s13746_s29 + $0x8] sm:$0xff]  }
  0x97   : > { %11877 = vmatprep.mubr.bf16.mxu0 %v13822_v52  ;;  %v1710_v52 = vrot.slane %v13653_v46, 1  ;;  %v14024_v46 = vld [vmem:[%s13746_s29 + $0x20] sm:$0xff]  }
  0x99   : > { %v1713_v29 = vsel %vm17610_vm1, %v1710_v52, %v1712_v24 }
  0x9e   : > { %11878 = vmatmul.mubr.bf16.gmra.mrb[20].mxu0 %v13833_v61  ;;  %v1711_v61 = vsel %vm17610_vm1, %v1709_v41, %v1710_v52  ;;  %v2174_v52 = vrot.slane %v14020_v36, 1 }
  0x9f   : > { %11881 = vmatprep.mubr.bf16.mxu0 %v13839_v3  ;;  %v1740_v3 = vrot.slane %v13883_v53, 1 }
  0xa1   : > { %v1741_v19 = vsel %vm17610_vm1, %v1738_v21, %v1740_v3 }
  0xa6   : > { %11882 = vmatmul.mubr.bf16.gmra.mrb[24].mxu0 %v13848_v12  ;;  %v1742_v12 = vrot.slane %v13886_v54, 1 }
  0xa7   : > { %11885 = vmatprep.mubr.bf16.mxu0 %v13862_v28 }
  0xa8   : > { %v1743_v28 = vsel %vm17610_vm1, %v1740_v3, %v1742_v12 }
  0xae   : > { %11886 = vmatmul.mubr.bf16.gmra.mrb[28].mxu0 %v13875_v42  ;;  %v14010_v42 = vcombine.low %v2025_v7, %v14005_v17 }
  0xaf   : > { %11889 = vmatprep.mubr.bf16.mxu0 %v13883_v53  ;;  %v1744_v53 = vrot.slane %v13894_v0, 1 }
  0xb1   : > { %v1745_v34 = vsel %vm17610_vm1, %v1742_v12, %v1744_v53 }
  0xb6   : > { %11890 = vmatmul.mubr.bf16.gmra.mrb[32].mxu0 %v13886_v54  ;;  %v2171_v54 = vrot.slane %v14010_v42, 1 }
  0xb7   : > { %11909 = vmatprep.mubr.bf16.mxu0 %v1711_v61  ;;  %v2176_v61 = vrot.slane %v14024_v46, 1 }
  0xb9   : > { %v2177_v24 = vsel %vm17610_vm1, %v2174_v52, %v2176_v61 }
  0xbe   : > { %11910 = vmatmul.mubr.bf16.vlgmr.msra.gmra.mrb[0].mxu0 %v1713_v29  ;;  %v2178_v29 = vrot.slane %v14030_v23, 1 }
  0xbf   : > { %11946 = vmatpush3.bf16.msra.mxu0 %v13428_v26  ;;  %11913 = vmatprep.mubr.bf16.mxu0 %v1715_v30  ;;  %v14013_v26 = vld [vmem:[%s13746_s29 + $0x10] sm:$0xff]   ;;  %v2180_v30 = vrot.slane %v14037_v27, 1 }
  0xc0   : > { %11947 = vmatprep.subr.bf16.mxu0 %v13429_v32  ;;  %v2172_v31 = vrot.slane %v14013_v26, 1  ;;  %v2179_v33 = vsel %vm17610_vm1, %v2176_v61, %v2178_v29  ;;  %v2517_v53 = vshrl.u32 %v14013_v26, 16 }
  0xc1   : > { %v2181_v37 = vsel %vm17610_vm1, %v2178_v29, %v2180_v30  ;;  %v2526_v29 = vshrl.u32 %v14020_v36, 16 }
  0xc2   : > { %v2173_v41 = vsel %vm17610_vm1, %v2171_v54, %v2172_v31  ;;  %v2175_v0 = vsel %vm17610_vm1, %v2172_v31, %v2174_v52  ;;  %v2520_v54 = vshll.u32 %v14013_v26, 16 }
  0xc3   : > { %11948 = vmatpush3.bf16.msra.mxu0 %v13429_v32  ;;  %v13445_v32 = vld [vmem:[%s17604_s1 + $0x110] sm:$0xff]  }
  0xc4   : > { %11949 = vmatprep.subr.bf16.mxu0 %v13430_v39 }
  0xc6   : > { %11914 = vmatmul.mubr.bf16.gmra.mrb[4].mxu0 %v1717_v40  ;;  %v2182_v40 = vrot.slane %v14046_v35, 1 }
  0xc7   : > { %11917 = vmatprep.mubr.bf16.mxu0 %v1719_v43  ;;  %11950 = vmatpush3.bf16.msra.mxu0 %v13430_v39  ;;  %v13448_v39 = vld [vmem:[%s17604_s1 + $0x118] sm:$0xff]   ;;  %v2184_v43 = vrot.slane %v14050_v38, 1 }
  0xc8   : > { %11951 = vmatprep.subr.bf16.mxu0 %v13431_v44  ;;  %v2183_v45 = vsel %vm17610_vm1, %v2180_v30, %v2182_v40 }
  0xc9   : > { %v2185_v48 = vsel %vm17610_vm1, %v2182_v40, %v2184_v43  ;;  %v2528_v40 = vrot.slane %v2526_v29, 1 }
  0xcb   : > { %11952 = vmatpush3.bf16.msra.mxu0 %v13431_v44  ;;  %v13451_v44 = vld [vmem:[%s17604_s1 + $0x120] sm:$0xff]  }
  0xcc   : > { %11953 = vmatprep.subr.bf16.mxu0 %v13432_v50 }
  0xce   : > { %11918 = vmatmul.mubr.bf16.gmra.mrb[8].mxu0 %v1721_v51  ;;  %v2186_v51 = vrot.slane %v14062_v47, 1 }
  0xcf   : > { %11921 = vmatprep.mubr.bf16.mxu0 %v1723_v55  ;;  %11954 = vmatpush3.bf16.msra.mxu0 %v13432_v50  ;;  %v13454_v50 = vld [vmem:[%s17604_s1 + $0x128] sm:$0xff]   ;;  %v2188_v55 = vrot.slane %v14066_v49, 1 }
  0xd0   : > { %11955 = vmatprep.subr.bf16.mxu0 %v13433_v56  ;;  %v2187_v57 = vsel %vm17610_vm1, %v2184_v43, %v2186_v51 }
  0xd1   : > { %v2189_v59 = vsel %vm17610_vm1, %v2186_v51, %v2188_v55  ;;  %v2544_v51 = vshrl.u32 %v14030_v23, 16 }
  0xd3   : > { %11956 = vmatpush3.bf16.msra.mxu0 %v13433_v56  ;;  %v13457_v56 = vld [vmem:[%s17604_s1 + $0x130] sm:$0xff]  }
  0xd4   : > { %11957 = vmatprep.subr.bf16.mxu0 %v13434_v62 }
  0xd6   : > { %11922 = vmatmul.mubr.bf16.gmra.mrb[12].mxu0 %v1725_v63  ;;  %v2190_v63 = vrot.slane %v14078_v58, 1 }
  0xd7   : > { %11925 = vmatprep.mubr.bf16.mxu0 %v1727_v1  ;;  %11958 = vmatpush3.bf16.msra.mxu0 %v13434_v62  ;;  %v13461_v62 = vld [vmem:[%s17604_s1 + $0x138] sm:$0xff]   ;;  %v2192_v1 = vrot.slane %v14082_v60, 1 }
  0xd8   : > { %11959 = vmatprep.subr.bf16.mxu0 %v13435_v2  ;;  %v2191_v4 = vsel %vm17610_vm1, %v2188_v55, %v2190_v63  ;;  %v2547_v55 = vshll.u32 %v14030_v23, 16 }
  0xd9   : > { %v2193_v8 = vsel %vm17610_vm1, %v2190_v63, %v2192_v1  ;;  %v2546_v63 = vrot.slane %v2544_v51, 1  ;;  %v13469_v51 = vld [vmem:[%s17604_s1 + $0x170] sm:$0xff]  }
  0xdb   : > { %11960 = vmatpush3.bf16.msra.mxu0 %v13435_v2  ;;  %v14092_v2 = vld [vmem:[%s17604_s1 + $0x140] sm:$0xff]  }
  0xdc   : > { %11997 = vmatprep.subr.bf16.mxu0 %v13439_v10 }
  0xde   : > { %11926 = vmatmul.mubr.bf16.gmra.mrb[16].mxu0 %v1729_v11  ;;  %v2196_v11 = vrot.slane %v14100_v9, 1 }
  0xdf   : > { %11929 = vmatprep.mubr.bf16.mxu0 %v1731_v13 }
  0xe6   : > { %11930 = vmatmul.mubr.bf16.gmra.mrb[20].mxu0 %v1733_v16  ;;  %v14111_v16 = vld [vmem:[%s13746_s29 + $0x80] sm:$0xff]  }
  0xe7   : > { %11933 = vmatprep.mubr.bf16.mxu0 %v1735_v18  ;;  %v2198_v18 = vrot.slane %v14107_v14, 1  ;;  %v2200_v20 = vrot.slane %v14111_v16, 1 }
  0xe9   : > { %v2199_v21 = vsel %vm17610_vm1, %v2196_v11, %v2198_v18  ;;  %v2201_v3 = vsel %vm17610_vm1, %v2198_v18, %v2200_v20  ;;  %v2565_v18 = vshll.u32 %v14046_v35, 16 }
  0xee   : > { %11934 = vmatmul.mubr.bf16.gmra.mrb[24].mxu0 %v1737_v22  ;;  %v14117_v22 = vld [vmem:[%s13746_s29 + $0x88] sm:$0xff]  }
  0xef   : > { %11937 = vmatprep.mubr.bf16.mxu0 %v1739_v6  ;;  %v14120_v6 = vld [vmem:[%s13746_s29 + $0x90] sm:$0xff]   ;;  %v2202_v12 = vrot.slane %v14117_v22, 1 }
  0xf0   : > { %v2204_v7 = vrot.slane %v14120_v6, 1 }
  0xf1   : > { %v2203_v31 = vsel %vm17610_vm1, %v2200_v20, %v2202_v12 }
  0xf6   : > { %11938 = vmatmul.mubr.bf16.gmra.mrb[28].mxu0 %v1741_v19  ;;  %v2509_v19 = vshrl.u32 %v14010_v42, 16 }
  0xf7   : > { %11941 = vmatprep.mubr.bf16.mxu0 %v1743_v28  ;;  %v2512_v28 = vshll.u32 %v14010_v42, 16  ;;  %v2529_v42 = vshll.u32 %v14020_v36, 16 }
  0xf8   : > { %v2511_v52 = vrot.slane %v2509_v19, 1  ;;  %v2567_v19 = vrot.slane %v2565_v18, 2  ;;  %v14191_v18 = vld [vmem:[%s17604_s1 + $0x180] sm:$0xff]  }
  0xf9   : > { %v2514_v61 = vrot.slane %v2512_v28, 2  ;;  %v2531_v43 = vrot.slane %v2529_v42, 2 }
  0xfb   : > { %v2515_v30 = vor.u32 %v2514_v61, %v2511_v52  ;;  %v2583_v52 = vshll.u32 %v14062_v47, 16 }
  0xfe   : > { %11942 = vmatmul.mubr.bf16.gmra.mrb[32].mxu0 %v1745_v34  ;;  %v2205_v34 = vsel %vm17610_vm1, %v2202_v12, %v2204_v7  ;;  %v2574_v12 = vshll.u32 %v14050_v38, 16 }
  0xff   : > { %11961 = vmatprep.mubr.bf16.mxu0 %v2173_v41  ;;  %v13462_v41 = vld [vmem:[%s13746_s29 + $0x98] ss:$0 sps:$4 sm:$0x11]  }
 0x106   : > { %11962 = vmatmul.mubr.bf16.vlgmr.msra.gmra.mrb[0].mxu0 %v2175_v0  ;;  %v2519_v0 = vrot.slane %v2517_v53, 1 }
 0x107   : > { %11998 = vmatpush3.bf16.msra.mxu0 %v13439_v10  ;;  %11965 = vmatprep.mubr.bf16.mxu0 %v2177_v24  ;;  %v2194_v10 = vrot.slane %v14096_v5, 1  ;;  %v2522_v24 = vrot.slane %v2520_v54, 2  ;;  %v2576_v54 = vrot.slane %v2574_v12, 2 }
 0x108   : > { %11999 = vmatprep.subr.bf16.mxu0 %v13442_v25 }
 0x109   : > { %v2195_v13 = vsel %vm17610_vm1, %v2192_v1, %v2194_v10  ;;  %v2197_v15 = vsel %vm17610_vm1, %v2194_v10, %v2196_v11  ;;  %v2549_v1 = vrot.slane %v2547_v55, 2 }
 0x10b   : > { %12000 = vmatpush3.bf16.msra.mxu0 %v13442_v25  ;;  %v2206_v25 = vrot.slane %v13462_v41, 1  ;;  %v2580_v41 = vshrl.u32 %v14062_v47, 16 }
 0x10c   : > { %12001 = vmatprep.subr.bf16.mxu0 %v13445_v32 }
 0x10d   : > { %v2582_v42 = vrot.slane %v2580_v41, 1 }
 0x10e   : > { %11966 = vmatmul.mubr.bf16.gmra.mrb[4].mxu0 %v2179_v33  ;;  %v2535_v33 = vshrl.u32 %v14024_v46, 16 }
 0x10f   : > { %11969 = vmatprep.mubr.bf16.mxu0 %v2181_v37  ;;  %12002 = vmatpush3.bf16.msra.mxu0 %v13445_v32  ;;  %v2523_v32 = vor.u32 %v2522_v24, %v2519_v0  ;;  %v2538_v37 = vshll.u32 %v14024_v46, 16  ;;  %v2589_v0 = vshrl.u32 %v14066_v49, 16  ;;  %v2592_v24 = vshll.u32 %v14066_v49, 16 }
 0x110   : > { %12003 = vmatprep.subr.bf16.mxu0 %v13448_v39 }
 0x113   : > { %12004 = vmatpush3.bf16.msra.mxu0 %v13448_v39  ;;  %v2207_v39 = vsel %vm17610_vm1, %v2204_v7, %v2206_v25  ;;  %v13467_v25 = vld [vmem:[%s17604_s1 + $0x160] sm:$0xff]  }
 0x114   : > { %12005 = vmatprep.subr.bf16.mxu0 %v13451_v44 }
 0x116   : > { %11970 = vmatmul.mubr.bf16.gmra.mrb[8].mxu0 %v2183_v45  ;;  %v2537_v45 = vrot.slane %v2535_v33, 1  ;;  %v2591_v33 = vrot.slane %v2589_v0, 1 }
 0x117   : > { %11973 = vmatprep.mubr.bf16.mxu0 %v2185_v48  ;;  %12006 = vmatpush3.bf16.msra.mxu0 %v13451_v44  ;;  %v2524_v44 = vsel %vm17613_vm2, %v2515_v30, %v2523_v32  ;;  %v2540_v48 = vrot.slane %v2538_v37, 2  ;;  %v2585_v30 = vrot.slane %v2583_v52, 2  ;;  %v2594_v37 = vrot.slane %v2592_v24, 2 }
 0x118   : > { %12007 = vmatprep.subr.bf16.mxu0 %v13454_v50 }
 0x11b   : > { %12008 = vmatpush3.bf16.msra.mxu0 %v13454_v50  ;;  %v2532_v50 = vor.u32 %v2531_v43, %v2528_v40  ;;  %v2586_v40 = vor.u32 %v2585_v30, %v2582_v42  ;;  %v2598_v43 = vshrl.u32 %v14078_v58, 16  ;;  %v2652_v42 = vshrl.u32 %v14117_v22, 16 }
 0x11c   : > { %12009 = vmatprep.subr.bf16.mxu0 %v13457_v56  ;;  %v2655_v30 = vshll.u32 %v14117_v22, 16 }
 0x11e   : > { %11974 = vmatmul.mubr.bf16.gmra.mrb[12].mxu0 %v2187_v57  ;;  %v2553_v57 = vshrl.u32 %v14037_v27, 16 }
 0x11f   : > { %11977 = vmatprep.mubr.bf16.mxu0 %v2189_v59  ;;  %12010 = vmatpush3.bf16.msra.mxu0 %v13457_v56  ;;  %v2541_v56 = vor.u32 %v2540_v48, %v2537_v45  ;;  %v2556_v59 = vshll.u32 %v14037_v27, 16  ;;  %v2595_v45 = vor.u32 %v2594_v37, %v2591_v33  ;;  %v2607_v48 = vshrl.u32 %v14082_v60, 16 }
 0x120   : > { %12011 = vmatprep.subr.bf16.mxu0 %v13461_v62  ;;  %v2555_v10 = vrot.slane %v2553_v57, 1  ;;  %v2661_v33 = vshrl.u32 %v14120_v6, 16  ;;  %v2664_v37 = vshll.u32 %v14120_v6, 16 }
 0x121   : > { %v2558_v11 = vrot.slane %v2556_v59, 2  ;;  %v2596_v59 = vsel %vm17613_vm2, %v2586_v40, %v2595_v45 }
 0x123   : > { %12012 = vmatpush3.bf16.msra.mxu0 %v13461_v62  ;;  %v2533_v62 = vsel %vm17613_vm2, %v2523_v32, %v2532_v50  ;;  %v2559_v20 = vor.u32 %v2558_v11, %v2555_v10  ;;  %v2619_v10 = vshll.u32 %v14096_v5, 16 }
 0x124   : > { %12049 = vmatprep.subr.bf16.mxu0 %v14092_v2 }
 0x126   : > { %11978 = vmatmul.mubr.bf16.gmra.mrb[16].mxu0 %v2191_v4  ;;  %v2542_v4 = vsel %vm17613_vm2, %v2532_v50, %v2541_v56  ;;  %v2610_v50 = vshll.u32 %v14082_v60, 16 }
 0x127   : > { %11981 = vmatprep.mubr.bf16.mxu0 %v2193_v8  ;;  %v13464_v8 = vld [vmem:[%s17604_s1 + $0x148] sm:$0xff]  }
 0x12e   : > { %11982 = vmatmul.mubr.bf16.gmra.mrb[20].mxu0 %v2195_v13  ;;  %v2550_v13 = vor.u32 %v2549_v1, %v2546_v63  ;;  %v2612_v63 = vrot.slane %v2610_v50, 2  ;;  %v13470_v1 = vld [vmem:[%s17604_s1 + $0x178] sm:$0xff]   ;;  %v2666_v50 = vrot.slane %v2664_v37, 2 }
 0x12f   : > { %11985 = vmatprep.mubr.bf16.mxu0 %v2197_v15  ;;  %v2562_v15 = vshrl.u32 %v14046_v35, 16 }
 0x130   : > { %v2551_v7 = vsel %vm17613_vm2, %v2541_v56, %v2550_v13  ;;  %v2560_v28 = vsel %vm17613_vm2, %v2550_v13, %v2559_v20  ;;  %v2600_v56 = vrot.slane %v2598_v43, 1  ;;  %v2625_v13 = vshrl.u32 %v14100_v9, 16 }
 0x131   : > { %v2657_v43 = vrot.slane %v2655_v30, 2  ;;  %v3005_v30 = vrot.slane %v14107_v14, 2 }
 0x136   : > { %11986 = vmatmul.mubr.bf16.gmra.mrb[24].mxu0 %v2199_v21  ;;  %v13465_v21 = vld [vmem:[%s17604_s1 + $0x150] sm:$0xff]  }
 0x137   : > { %11989 = vmatprep.mubr.bf16.mxu0 %v2201_v3  ;;  %v2571_v3 = vshrl.u32 %v14050_v38, 16 }
 0x139   : > { %v2573_v53 = vrot.slane %v2571_v3, 1  ;;  %v2621_v3 = vrot.slane %v2619_v10, 2 }
 0x13b   : > { %v2577_v61 = vor.u32 %v2576_v54, %v2573_v53  ;;  %v2637_v53 = vshll.u32 %v14107_v14, 16 }
 0x13d   : > { %v2587_v55 = vsel %vm17613_vm2, %v2577_v61, %v2586_v40  ;;  %v2654_v40 = vrot.slane %v2652_v42, 1 }
 0x13e   : > { %11990 = vmatmul.mubr.bf16.gmra.mrb[28].mxu0 %v2203_v31  ;;  %v13466_v31 = vld [vmem:[%s17604_s1 + $0x158] sm:$0xff]  }
 0x13f   : > { %11993 = vmatprep.mubr.bf16.mxu0 %v2205_v34 }
 0x146   : > { %11994 = vmatmul.mubr.bf16.gmra.mrb[32].mxu0 %v2207_v39  ;;  %v13468_v39 = vld [vmem:[%s17604_s1 + $0x168] sm:$0xff]  }
 0x147   : > { %12013 = vmatprep.mubr.bf16.mxu0 %v2524_v44  ;;  %v2601_v44 = vshll.u32 %v14078_v58, 16 }
 0x149   : > { %v2603_v57 = vrot.slane %v2601_v44, 2  ;;  %v14208_v44 = vld [vmem:[%s13746_s29 + $0x98] ss:$0 sps:$4 sm:$0x33]  }
 0x14e   : > { %12014 = vmatmul.mubr.bf16.vlgmr.msra.gmra.mrb[0].mxu0 %v2533_v62  ;;  %v2609_v62 = vrot.slane %v2607_v48, 1  ;;  %v2663_v48 = vrot.slane %v2661_v33, 1 }
 0x14f   : > { %12050 = vmatpush3.bf16.msra.mxu0 %v14092_v2  ;;  %12017 = vmatprep.mubr.bf16.mxu0 %v2542_v4  ;;  %v2564_v2 = vrot.slane %v2562_v15, 1  ;;  %v2604_v4 = vor.u32 %v2603_v57, %v2600_v56  ;;  %v2628_v15 = vshll.u32 %v14100_v9, 16  ;;  %v2673_v56 = vshll.u32 %v14208_v44, 16 }
 0x150   : > { %12051 = vmatprep.subr.bf16.mxu0 %v13464_v8  ;;  %v2613_v11 = vor.u32 %v2612_v63, %v2609_v62  ;;  %v2667_v57 = vor.u32 %v2666_v50, %v2663_v48 }
 0x151   : > { %v2568_v34 = vor.u32 %v2567_v19, %v2564_v2  ;;  %v2630_v2 = vrot.slane %v2628_v15, 2 }
 0x152   : > { %v2614_v12 = vsel %vm17613_vm2, %v2604_v4, %v2613_v11 }
 0x153   : > { %12052 = vmatpush3.bf16.msra.mxu0 %v13464_v8  ;;  %v2569_v29 = vsel %vm17613_vm2, %v2559_v20, %v2568_v34  ;;  %v2578_v32 = vsel %vm17613_vm2, %v2568_v34, %v2577_v61  ;;  %v2616_v8 = vshrl.u32 %v14096_v5, 16  ;;  %v2605_v20 = vsel %vm17613_vm2, %v2595_v45, %v2604_v4 }
 0x154   : > { %12053 = vmatprep.subr.bf16.mxu0 %v13465_v21  ;;  %v2646_v34 = vshll.u32 %v14111_v16, 16  ;;  %v2639_v61 = vrot.slane %v2637_v53, 2 }
 0x156   : > { %12018 = vmatmul.mubr.bf16.gmra.mrb[4].mxu0 %v2551_v7  ;;  %v2627_v7 = vrot.slane %v2625_v13, 1  ;;  %v2979_v13 = vrot.slane %v14013_v26, 2  ;;  %v2985_v26 = vrot.slane %v14030_v23, 2  ;;  %v2989_v23 = vrot.slane %v14046_v35, 2 }
 0x157   : > { %12021 = vmatprep.mubr.bf16.mxu0 %v2560_v28  ;;  %12054 = vmatpush3.bf16.msra.mxu0 %v13465_v21  ;;  %v2618_v21 = vrot.slane %v2616_v8, 1  ;;  %v2634_v28 = vshrl.u32 %v14107_v14, 16  ;;  %v2993_v35 = vrot.slane %v14062_v47, 2  ;;  %v2997_v47 = vrot.slane %v14078_v58, 2 }
 0x158   : > { %12055 = vmatprep.subr.bf16.mxu0 %v13466_v31  ;;  %v2631_v54 = vor.u32 %v2630_v2, %v2627_v7  ;;  %v13474_v7 = vld [vmem:[%s17604_s1 + $0x188] sm:$0xff]   ;;  %v2987_v2 = vrot.slane %v14037_v27, 2  ;;  %v2991_v27 = vrot.slane %v14050_v38, 2  ;;  %v2995_v38 = vrot.slane %v14066_v49, 2 }
 0x159   : > { %v2622_v19 = vor.u32 %v2621_v3, %v2618_v21  ;;  %v2636_v52 = vrot.slane %v2634_v28, 1  ;;  %v2981_v21 = vrot.slane %v14020_v36, 2  ;;  %v2983_v3 = vrot.slane %v14024_v46, 2  ;;  %v13475_v36 = vld [vmem:[%s17604_s1 + $0x190] sm:$0xff]   ;;  %v13477_v28 = vld [vmem:[%s17604_s1 + $0x1a0] sm:$0xff]  }
 0x15a   : > { %v2990_v53 = vsel %vm17612_vm3, %v2987_v2, %v2989_v23  ;;  %v2999_v49 = vrot.slane %v14082_v60, 2  ;;  %v3001_v58 = vrot.slane %v14096_v5, 2  ;;  %v3009_v5 = vrot.slane %v14117_v22, 2 }
 0x15b   : > { %12056 = vmatpush3.bf16.msra.mxu0 %v13466_v31  ;;  %v2643_v31 = vshrl.u32 %v14111_v16, 16  ;;  %v2623_v41 = vsel %vm17613_vm2, %v2613_v11, %v2622_v19  ;;  %v2632_v0 = vsel %vm17613_vm2, %v2622_v19, %v2631_v54  ;;  %v2986_v46 = vsel %vm17612_vm3, %v2983_v3, %v2985_v26 }
 0x15c   : > { %12057 = vmatprep.subr.bf16.mxu0 %v13467_v25  ;;  %v2988_v19 = vsel %vm17612_vm3, %v2985_v26, %v2987_v2  ;;  %v3002_v60 = vsel %vm17612_vm3, %v2999_v49, %v3001_v58  ;;  %v3013_v22 = vrot.slane %v14208_v44, 2  ;;  %v14334_v2 = vld [vmem:[%s13746_s29 + $0x50] sm:$0xff]  }
 0x15d   : > { %v2645_v24 = vrot.slane %v2643_v31, 1  ;;  %v13478_v31 = vld [vmem:[%s17604_s1 + $0x1a8] sm:$0xff]  }
 0x15e   : > { %12022 = vmatmul.mubr.bf16.gmra.mrb[8].mxu0 %v2569_v29  ;;  %v2640_v29 = vor.u32 %v2639_v61, %v2636_v52  ;;  %v2996_v52 = vsel %vm17612_vm3, %v2993_v35, %v2995_v38  ;;  %v13480_v61 = vld [vmem:[%s17604_s1 + $0x1b8] sm:$0xff]  }
 0x15f   : > { %12025 = vmatprep.mubr.bf16.mxu0 %v2578_v32  ;;  %12058 = vmatpush3.bf16.msra.mxu0 %v13467_v25  ;;  %v2648_v25 = vrot.slane %v2646_v34, 2  ;;  %v13479_v34 = vld [vmem:[%s17604_s1 + $0x1b0] sm:$0xff]  }
 0x160   : > { %12059 = vmatprep.subr.bf16.mxu0 %v13468_v39 }
 0x161   : > { %v2649_v32 = vor.u32 %v2648_v25, %v2645_v24  ;;  %v2998_v24 = vsel %vm17612_vm3, %v2995_v38, %v2997_v47  ;;  %v3000_v25 = vsel %vm17612_vm3, %v2997_v47, %v2999_v49  ;;  %v14372_v49 = vld [vmem:[%s13746_s29 + $0x78] sm:$0xff]  }
 0x163   : > { %12060 = vmatpush3.bf16.msra.mxu0 %v13468_v39  ;;  %v2641_v39 = vsel %vm17613_vm2, %v2631_v54, %v2640_v29  ;;  %v2650_v45 = vsel %vm17613_vm2, %v2640_v29, %v2649_v32  ;;  %v2992_v54 = vsel %vm17612_vm3, %v2989_v23, %v2991_v27  ;;  %v3003_v29 = vrot.slane %v14100_v9, 2 }
 0x164   : > { %12061 = vmatprep.subr.bf16.mxu0 %v13469_v51  ;;  %v3011_v9 = vrot.slane %v14120_v6, 2 }
 0x165   : > { %v3004_v42 = vsel %vm17612_vm3, %v3001_v58, %v3003_v29  ;;  %v3006_v33 = vsel %vm17612_vm3, %v3003_v29, %v3005_v30  ;;  %v14379_v58 = vld [vmem:[%s13746_s29 + $0x80] sm:$0xff]  }
 0x166   : > { %12026 = vmatmul.mubr.bf16.gmra.mrb[12].mxu0 %v2587_v55  ;;  %v2670_v55 = vshrl.u32 %v14208_v44, 16  ;;  %v3012_v14 = vsel %vm17612_vm3, %v3009_v5, %v3011_v9  ;;  %v3014_v50 = vsel %vm17612_vm3, %v3011_v9, %v3013_v22 }
 0x167   : > { %12029 = vmatprep.mubr.bf16.mxu0 %v2596_v59  ;;  %12062 = vmatpush3.bf16.msra.mxu0 %v13469_v51  ;;  %v2658_v51 = vor.u32 %v2657_v43, %v2654_v40  ;;  %v2957_v59 = vld [vmem:[%s13746_s29 + $0x8] sm:$0xc]  ;;  %v14277_v40 = vld [vmem:[%s13746_s29 + $0x14] sm:$0xf] }
 0x168   : > { %12063 = vmatprep.subr.bf16.mxu0 %v13470_v1  ;;  %v2672_v63 = vrot.slane %v2670_v55, 1  ;;  %v10928_v8 = vcombine.low %v2957_v59, %v14005_v17  ;;  %v2984_v17 = vsel %vm17612_vm3, %v2981_v21, %v2983_v3  ;;  %v13493_v3 = vld [vmem:[%s17604_s1 + $0x1d8] sm:$0xff]  }
 0x169   : > { %v2659_v62 = vsel %vm17613_vm2, %v2649_v32, %v2658_v51  ;;  %v2668_v4 = vsel %vm17613_vm2, %v2658_v51, %v2667_v57  ;;  %v3007_v32 = vrot.slane %v14111_v16, 2  ;;  %v14292_v51 = vld [vmem:[%s13746_s29 + $0x20] sm:$0xff]  }
 0x16a   : > { %v2978_v11 = vrot.slane %v10928_v8, 2 }
 0x16b   : > { %12064 = vmatpush3.bf16.msra.mxu0 %v13470_v1  ;;  %v2675_v1 = vrot.slane %v2673_v56, 2  ;;  %v3008_v37 = vsel %vm17612_vm3, %v3005_v30, %v3007_v32  ;;  %v3010_v43 = vsel %vm17612_vm3, %v3007_v32, %v3009_v5  ;;  %v14296_v56 = vld [vmem:[%s13746_s29 + $0x28] sm:$0xff]  }
 0x16c   : > { %12101 = vmatprep.subr.bf16.mxu0 %v14191_v18  ;;  %v3445_v59 = vrot.slane %v14296_v56, 2 }
 0x16d   : > { %v2676_v10 = vor.u32 %v2675_v1, %v2672_v63  ;;  %v13487_v1 = vld [vmem:[%s17604_s1 + $0x1c8] sm:$0xff]  }
 0x16e   : > { %12030 = vmatmul.mubr.bf16.gmra.mrb[16].mxu0 %v2605_v20  ;;  %v2980_v20 = vsel %vm17612_vm3, %v2978_v11, %v2979_v13  ;;  %v13490_v11 = vld [vmem:[%s17604_s1 + $0x1d0] sm:$0xff]  }
 0x16f   : > { %12033 = vmatprep.mubr.bf16.mxu0 %v2614_v12  ;;  %v2677_v15 = vsel %vm17613_vm2, %v2667_v57, %v2676_v10  ;;  %v2982_v12 = vsel %vm17612_vm3, %v2979_v13, %v2981_v21  ;;  %v3443_v57 = vrot.slane %v14292_v51, 2  ;;  %v14322_v21 = vld [vmem:[%s13746_s29 + $0x48] sm:$0xff]  }
 0x171   : > { %v3446_v63 = vsel %vm17612_vm3, %v3443_v57, %v3445_v59 }
 0x176   : > { %12034 = vmatmul.mubr.bf16.gmra.mrb[20].mxu0 %v2623_v41  ;;  %v2994_v41 = vsel %vm17612_vm3, %v2991_v27, %v2993_v35  ;;  %v13502_v27 = vld [vmem:[%s17604_s1 + $0x1f0] sm:$0xff]   ;;  %v13506_v35 = vld [vmem:[%s17604_s1 + $0x1f8] sm:$0xff]  }
 0x177   : > { %12037 = vmatprep.mubr.bf16.mxu0 %v2632_v0  ;;  %v13484_v0 = vld [vmem:[%s17604_s1 + $0x1c0] sm:$0xff]  }
 0x17e   : > { %12038 = vmatmul.mubr.bf16.gmra.mrb[24].mxu0 %v2641_v39  ;;  %v3294_v39 = vld [vmem:[%s13746_s29 + $0x10] sm:$0xc] }
 0x17f   : > { %12041 = vmatprep.mubr.bf16.mxu0 %v2650_v45  ;;  %v14282_v16 = vcombine.low %v3294_v39, %v14277_v40  ;;  %v14285_v45 = vld [vmem:[%s13746_s29 + $0x18] sm:$0xff]  }
 0x180   : > { %v3441_v48 = vrot.slane %v14285_v45, 2  ;;  %v3786_v22 = vshrl.u32 %v14285_v45, 16 }
 0x181   : > { %v3440_v6 = vrot.slane %v14282_v16, 2 }
 0x182   : > { %v3444_v44 = vsel %vm17612_vm3, %v3441_v48, %v3443_v57 }
 0x183   : > { %v3442_v55 = vsel %vm17612_vm3, %v3440_v6, %v3441_v48  ;;  %v3789_v6 = vshll.u32 %v14285_v45, 16 }
 0x186   : > { %12042 = vmatmul.mubr.bf16.gmra.mrb[28].mxu0 %v2659_v62  ;;  %v14302_v62 = vld [vmem:[%s13746_s29 + $0x30] sm:$0xff]  }
 0x187   : > { %12045 = vmatprep.mubr.bf16.mxu0 %v2668_v4  ;;  %v14309_v4 = vld [vmem:[%s13746_s29 + $0x38] sm:$0xff]   ;;  %v3447_v8 = vrot.slane %v14302_v62, 2 }
 0x188   : > { %v3449_v10 = vrot.slane %v14309_v4, 2 }
 0x189   : > { %v3448_v13 = vsel %vm17612_vm3, %v3445_v59, %v3447_v8 }
 0x18e   : > { %12046 = vmatmul.mubr.bf16.gmra.mrb[32].mxu0 %v2677_v15  ;;  %v14318_v15 = vld [vmem:[%s13746_s29 + $0x40] sm:$0xff]  }
 0x18f   : > { %12065 = vmatprep.mubr.bf16.mxu0 %v2980_v20  ;;  %v3450_v20 = vsel %vm17612_vm3, %v3447_v8, %v3449_v10  ;;  %v3795_v8 = vshrl.u32 %v14292_v51, 16 }
 0x196   : > { %12066 = vmatmul.mubr.bf16.vlgmr.msra.gmra.mrb[0].mxu0 %v2982_v12  ;;  %v3451_v12 = vrot.slane %v14318_v15, 2 }
 0x197   : > { %12102 = vmatpush3.bf16.msra.mxu0 %v14191_v18  ;;  %12069 = vmatprep.mubr.bf16.mxu0 %v2984_v17  ;;  %v13476_v18 = vld [vmem:[%s17604_s1 + $0x198] sm:$0xff]   ;;  %v3453_v17 = vrot.slane %v14322_v21, 2 }
 0x198   : > { %12103 = vmatprep.subr.bf16.mxu0 %v13474_v7  ;;  %v3452_v26 = vsel %vm17612_vm3, %v3449_v10, %v3451_v12 }
 0x19b   : > { %12104 = vmatpush3.bf16.msra.mxu0 %v13474_v7  ;;  %v13496_v7 = vld [vmem:[%s17604_s1 + $0x1e0] sm:$0xff]  }
 0x19c   : > { %12105 = vmatprep.subr.bf16.mxu0 %v13475_v36 }
 0x19e   : > { %12070 = vmatmul.mubr.bf16.gmra.mrb[4].mxu0 %v2986_v46  ;;  %v14338_v46 = vld [vmem:[%s13746_s29 + $0x58] sm:$0xff]  }
 0x19f   : > { %12073 = vmatprep.mubr.bf16.mxu0 %v2988_v19  ;;  %12106 = vmatpush3.bf16.msra.mxu0 %v13475_v36  ;;  %v3454_v36 = vsel %vm17612_vm3, %v3451_v12, %v3453_v17  ;;  %v13499_v19 = vld [vmem:[%s17604_s1 + $0x1e8] sm:$0xff]   ;;  %v3457_v23 = vrot.slane %v14338_v46, 2  ;;  %v3797_v12 = vrot.slane %v3795_v8, 2 }
 0x1a0   : > { %12107 = vmatprep.subr.bf16.mxu0 %v13476_v18 }
 0x1a3   : > { %12108 = vmatpush3.bf16.msra.mxu0 %v13476_v18  ;;  %v3455_v18 = vrot.slane %v14334_v2, 2 }
 0x1a4   : > { %12109 = vmatprep.subr.bf16.mxu0 %v13477_v28 }
 0x1a6   : > { %12074 = vmatmul.mubr.bf16.gmra.mrb[8].mxu0 %v2990_v53  ;;  %v14350_v53 = vld [vmem:[%s13746_s29 + $0x60] sm:$0xff]  }
 0x1a7   : > { %12077 = vmatprep.mubr.bf16.mxu0 %v2992_v54  ;;  %12110 = vmatpush3.bf16.msra.mxu0 %v13477_v28  ;;  %v3456_v28 = vsel %vm17612_vm3, %v3453_v17, %v3455_v18  ;;  %v3458_v54 = vsel %vm17612_vm3, %v3455_v18, %v3457_v23  ;;  %v3459_v38 = vrot.slane %v14350_v53, 2  ;;  %v3813_v18 = vshrl.u32 %v14302_v62, 16 }
 0x1a8   : > { %12111 = vmatprep.subr.bf16.mxu0 %v13478_v31 }
 0x1ab   : > { %12112 = vmatpush3.bf16.msra.mxu0 %v13478_v31  ;;  %v14354_v31 = vld [vmem:[%s13746_s29 + $0x68] sm:$0xff]  }
 0x1ac   : > { %12113 = vmatprep.subr.bf16.mxu0 %v13479_v34 }
 0x1ae   : > { %12078 = vmatmul.mubr.bf16.gmra.mrb[12].mxu0 %v2994_v41  ;;  %v14364_v41 = vld [vmem:[%s17604_s1 + $0x200] sm:$0xff]  }
 0x1af   : > { %12081 = vmatprep.mubr.bf16.mxu0 %v2996_v52  ;;  %12114 = vmatpush3.bf16.msra.mxu0 %v13479_v34  ;;  %v3461_v34 = vrot.slane %v14354_v31, 2  ;;  %v3460_v52 = vsel %vm17612_vm3, %v3457_v23, %v3459_v38  ;;  %v3816_v23 = vshll.u32 %v14302_v62, 16 }
 0x1b0   : > { %12115 = vmatprep.subr.bf16.mxu0 %v13480_v61 }
 0x1b1   : > { %v3462_v47 = vsel %vm17612_vm3, %v3459_v38, %v3461_v34  ;;  %v3815_v38 = vrot.slane %v3813_v18, 2  ;;  %v13514_v18 = vld [vmem:[%s17604_s1 + $0x230] sm:$0xff]  }
 0x1b3   : > { %12116 = vmatpush3.bf16.msra.mxu0 %v13480_v61  ;;  %v14368_v61 = vld [vmem:[%s13746_s29 + $0x70] sm:$0xff]  }
 0x1b4   : > { %12153 = vmatprep.subr.bf16.mxu0 %v13484_v0 }
 0x1b6   : > { %12082 = vmatmul.mubr.bf16.gmra.mrb[16].mxu0 %v2998_v24  ;;  %v3465_v24 = vrot.slane %v14372_v49, 2 }
 0x1b7   : > { %12085 = vmatprep.mubr.bf16.mxu0 %v3000_v25 }
 0x1be   : > { %12086 = vmatmul.mubr.bf16.gmra.mrb[20].mxu0 %v3002_v60  ;;  %v14383_v60 = vld [vmem:[%s13746_s29 + $0x88] sm:$0xff]  }
 0x1bf   : > { %12089 = vmatprep.mubr.bf16.mxu0 %v3004_v42  ;;  %v3467_v42 = vrot.slane %v14379_v58, 2  ;;  %v3469_v30 = vrot.slane %v14383_v60, 2 }
 0x1c1   : > { %v3468_v32 = vsel %vm17612_vm3, %v3465_v24, %v3467_v42  ;;  %v3470_v5 = vsel %vm17612_vm3, %v3467_v42, %v3469_v30  ;;  %v3834_v42 = vshll.u32 %v14318_v15, 16 }
 0x1c6   : > { %12090 = vmatmul.mubr.bf16.gmra.mrb[24].mxu0 %v3006_v33  ;;  %v14389_v33 = vld [vmem:[%s13746_s29 + $0x90] sm:$0xff]  }
 0x1c7   : > { %12093 = vmatprep.mubr.bf16.mxu0 %v3008_v37  ;;  %v14392_v37 = vld [vmem:[%s13746_s29 + $0x98] sm:$0xff]   ;;  %v3471_v9 = vrot.slane %v14389_v33, 2 }
 0x1c8   : > { %v3473_v39 = vrot.slane %v14392_v37, 2 }
 0x1c9   : > { %v3472_v48 = vsel %vm17612_vm3, %v3469_v30, %v3471_v9 }
 0x1ce   : > { %12094 = vmatmul.mubr.bf16.gmra.mrb[28].mxu0 %v3010_v43  ;;  %v3778_v43 = vshrl.u32 %v14282_v16, 16 }
 0x1cf   : > { %12097 = vmatprep.mubr.bf16.mxu0 %v3012_v14  ;;  %v3781_v14 = vshll.u32 %v14282_v16, 16  ;;  %v3798_v16 = vshll.u32 %v14292_v51, 16 }
 0x1d0   : > { %v3780_v57 = vrot.slane %v3778_v43, 2  ;;  %v3836_v43 = vrot.slane %v3834_v42, 3 }
 0x1d1   : > { %v3783_v59 = vrot.slane %v3781_v14, 3  ;;  %v3800_v17 = vrot.slane %v3798_v16, 3 }
 0x1d3   : > { %v3784_v10 = vor.u32 %v3783_v59, %v3780_v57  ;;  %v3852_v57 = vshll.u32 %v14334_v2, 16 }
 0x1d6   : > { %12098 = vmatmul.mubr.bf16.gmra.mrb[32].mxu0 %v3014_v50  ;;  %v3474_v50 = vsel %vm17612_vm3, %v3471_v9, %v3473_v39  ;;  %v3843_v9 = vshll.u32 %v14322_v21, 16 }
 0x1d7   : > { %12117 = vmatprep.mubr.bf16.mxu0 %v3442_v55  ;;  %v13507_v55 = vld [vmem:[%s13746_s29 + $0xa0] ss:$0 sps:$4 sm:$0x33]  }
 0x1de   : > { %12118 = vmatmul.mubr.bf16.vlgmr.msra.gmra.mrb[0].mxu0 %v3444_v44  ;;  %v3788_v44 = vrot.slane %v3786_v22, 2 }
 0x1df   : > { %12154 = vmatpush3.bf16.msra.mxu0 %v13484_v0  ;;  %12121 = vmatprep.mubr.bf16.mxu0 %v3446_v63  ;;  %v3463_v0 = vrot.slane %v14368_v61, 2  ;;  %v3791_v63 = vrot.slane %v3789_v6, 3  ;;  %v3845_v6 = vrot.slane %v3843_v9, 3 }
 0x1e0   : > { %12155 = vmatprep.subr.bf16.mxu0 %v13487_v1 }
 0x1e1   : > { %v3464_v25 = vsel %vm17612_vm3, %v3461_v34, %v3463_v0  ;;  %v3466_v29 = vsel %vm17612_vm3, %v3463_v0, %v3465_v24  ;;  %v3818_v34 = vrot.slane %v3816_v23, 3 }
 0x1e3   : > { %12156 = vmatpush3.bf16.msra.mxu0 %v13487_v1  ;;  %v3475_v1 = vrot.slane %v13507_v55, 2  ;;  %v3849_v55 = vshrl.u32 %v14334_v2, 16 }
 0x1e4   : > { %12157 = vmatprep.subr.bf16.mxu0 %v13490_v11 }
 0x1e5   : > { %v3851_v16 = vrot.slane %v3849_v55, 2 }
 0x1e6   : > { %12122 = vmatmul.mubr.bf16.gmra.mrb[4].mxu0 %v3448_v13  ;;  %v3804_v13 = vshrl.u32 %v14296_v56, 16 }
 0x1e7   : > { %12125 = vmatprep.mubr.bf16.mxu0 %v3450_v20  ;;  %12158 = vmatpush3.bf16.msra.mxu0 %v13490_v11  ;;  %v3792_v11 = vor.u32 %v3791_v63, %v3788_v44  ;;  %v3807_v20 = vshll.u32 %v14296_v56, 16  ;;  %v3858_v44 = vshrl.u32 %v14338_v46, 16  ;;  %v3861_v63 = vshll.u32 %v14338_v46, 16 }
 0x1e8   : > { %12159 = vmatprep.subr.bf16.mxu0 %v13493_v3 }
 0x1eb   : > { %12160 = vmatpush3.bf16.msra.mxu0 %v13493_v3  ;;  %v3476_v3 = vsel %vm17612_vm3, %v3473_v39, %v3475_v1  ;;  %v13512_v1 = vld [vmem:[%s17604_s1 + $0x220] sm:$0xff]  }
 0x1ec   : > { %12161 = vmatprep.subr.bf16.mxu0 %v13496_v7 }
 0x1ee   : > { %12126 = vmatmul.mubr.bf16.gmra.mrb[8].mxu0 %v3452_v26  ;;  %v3806_v26 = vrot.slane %v3804_v13, 2  ;;  %v3860_v13 = vrot.slane %v3858_v44, 2 }
 0x1ef   : > { %12129 = vmatprep.mubr.bf16.mxu0 %v3454_v36  ;;  %12162 = vmatpush3.bf16.msra.mxu0 %v13496_v7  ;;  %v3793_v7 = vsel %vm17611_vm4, %v3784_v10, %v3792_v11  ;;  %v3809_v36 = vrot.slane %v3807_v20, 3  ;;  %v3854_v10 = vrot.slane %v3852_v57, 3  ;;  %v3863_v20 = vrot.slane %v3861_v63, 3 }
 0x1f0   : > { %12163 = vmatprep.subr.bf16.mxu0 %v13499_v19 }
 0x1f3   : > { %12164 = vmatpush3.bf16.msra.mxu0 %v13499_v19  ;;  %v3801_v19 = vor.u32 %v3800_v17, %v3797_v12  ;;  %v3855_v12 = vor.u32 %v3854_v10, %v3851_v16  ;;  %v3867_v17 = vshrl.u32 %v14350_v53, 16  ;;  %v3924_v16 = vshll.u32 %v14389_v33, 16 }
 0x1f4   : > { %12165 = vmatprep.subr.bf16.mxu0 %v13502_v27 }
 0x1f6   : > { %12130 = vmatmul.mubr.bf16.gmra.mrb[12].mxu0 %v3456_v28  ;;  %v3822_v28 = vshrl.u32 %v14309_v4, 16 }
 0x1f7   : > { %12133 = vmatprep.mubr.bf16.mxu0 %v3458_v54  ;;  %12166 = vmatpush3.bf16.msra.mxu0 %v13502_v27  ;;  %v3810_v27 = vor.u32 %v3809_v36, %v3806_v26  ;;  %v3825_v54 = vshll.u32 %v14309_v4, 16  ;;  %v3864_v26 = vor.u32 %v3863_v20, %v3860_v13  ;;  %v3876_v36 = vshrl.u32 %v14354_v31, 16 }
 0x1f8   : > { %12167 = vmatprep.subr.bf16.mxu0 %v13506_v35  ;;  %v3824_v0 = vrot.slane %v3822_v28, 2  ;;  %v3933_v13 = vshll.u32 %v14392_v37, 16 }
 0x1f9   : > { %v3827_v24 = vrot.slane %v3825_v54, 3  ;;  %v3865_v54 = vsel %vm17611_vm4, %v3855_v12, %v3864_v26 }
 0x1fb   : > { %12168 = vmatpush3.bf16.msra.mxu0 %v13506_v35  ;;  %v3802_v35 = vsel %vm17611_vm4, %v3792_v11, %v3801_v19  ;;  %v3828_v30 = vor.u32 %v3827_v24, %v3824_v0  ;;  %v3888_v0 = vshll.u32 %v14368_v61, 16 }
 0x1fc   : > { %12205 = vmatprep.subr.bf16.mxu0 %v14364_v41 }
 0x1fe   : > { %12134 = vmatmul.mubr.bf16.gmra.mrb[16].mxu0 %v3460_v52  ;;  %v3811_v52 = vsel %vm17611_vm4, %v3801_v19, %v3810_v27  ;;  %v3879_v19 = vshll.u32 %v14354_v31, 16 }
 0x1ff   : > { %12137 = vmatprep.mubr.bf16.mxu0 %v3462_v47  ;;  %v13509_v47 = vld [vmem:[%s17604_s1 + $0x208] sm:$0xff]  }
 0x206   : > { %12138 = vmatmul.mubr.bf16.gmra.mrb[20].mxu0 %v3464_v25  ;;  %v3819_v25 = vor.u32 %v3818_v34, %v3815_v38  ;;  %v3881_v38 = vrot.slane %v3879_v19, 3  ;;  %v13515_v34 = vld [vmem:[%s17604_s1 + $0x238] sm:$0xff]  }
 0x207   : > { %12141 = vmatprep.mubr.bf16.mxu0 %v3466_v29  ;;  %v3831_v29 = vshrl.u32 %v14318_v15, 16 }
 0x208   : > { %v3820_v39 = vsel %vm17611_vm4, %v3810_v27, %v3819_v25  ;;  %v3829_v14 = vsel %vm17611_vm4, %v3819_v25, %v3828_v30  ;;  %v3869_v27 = vrot.slane %v3867_v17, 2  ;;  %v3894_v25 = vshrl.u32 %v14372_v49, 16  ;;  %v14474_v17 = vld [vmem:[%s13746_s29 + $0xa0] ss:$0 sps:$4 sm:$0x77]  }
 0x20a   : > { %v3896_v9 = vrot.slane %v3894_v25, 2 }
 0x20e   : > { %12142 = vmatmul.mubr.bf16.gmra.mrb[24].mxu0 %v3468_v32  ;;  %v13510_v32 = vld [vmem:[%s17604_s1 + $0x210] sm:$0xff]  }
 0x20f   : > { %12145 = vmatprep.mubr.bf16.mxu0 %v3470_v5  ;;  %v3840_v5 = vshrl.u32 %v14322_v21, 16 }
 0x211   : > { %v3842_v22 = vrot.slane %v3840_v5, 2 }
 0x213   : > { %v3846_v59 = vor.u32 %v3845_v6, %v3842_v22  ;;  %v3912_v6 = vshrl.u32 %v14383_v60, 16 }
 0x215   : > { %v3856_v23 = vsel %vm17611_vm4, %v3846_v59, %v3855_v12  ;;  %v3914_v44 = vrot.slane %v3912_v6, 2  ;;  %v3926_v12 = vrot.slane %v3924_v16, 3 }
 0x216   : > { %12146 = vmatmul.mubr.bf16.gmra.mrb[28].mxu0 %v3472_v48  ;;  %v13511_v48 = vld [vmem:[%s17604_s1 + $0x218] sm:$0xff]  }
 0x217   : > { %12149 = vmatprep.mubr.bf16.mxu0 %v3474_v50 }
 0x21e   : > { %12150 = vmatmul.mubr.bf16.gmra.mrb[32].mxu0 %v3476_v3  ;;  %v13513_v3 = vld [vmem:[%s17604_s1 + $0x228] sm:$0xff]  }
 0x21f   : > { %12169 = vmatprep.mubr.bf16.mxu0 %v3793_v7  ;;  %v3870_v7 = vshll.u32 %v14350_v53, 16 }
 0x221   : > { %v3872_v28 = vrot.slane %v3870_v7, 3 }
 0x226   : > { %12170 = vmatmul.mubr.bf16.vlgmr.msra.gmra.mrb[0].mxu0 %v3802_v35  ;;  %v3878_v35 = vrot.slane %v3876_v36, 2  ;;  %v3935_v36 = vrot.slane %v3933_v13, 3 }
 0x227   : > { %12206 = vmatpush3.bf16.msra.mxu0 %v14364_v41  ;;  %12173 = vmatprep.mubr.bf16.mxu0 %v3811_v52  ;;  %v3833_v41 = vrot.slane %v3831_v29, 2  ;;  %v3873_v52 = vor.u32 %v3872_v28, %v3869_v27  ;;  %v3897_v29 = vshll.u32 %v14372_v49, 16  ;;  %v4226_v28 = vld [vmem:[%s13746_s29 + $0x10] sm:$0x8] }
 0x228   : > { %12207 = vmatprep.subr.bf16.mxu0 %v13509_v47  ;;  %v3882_v24 = vor.u32 %v3881_v38, %v3878_v35 }
 0x229   : > { %v3837_v50 = vor.u32 %v3836_v43, %v3833_v41  ;;  %v3874_v42 = vsel %vm17611_vm4, %v3864_v26, %v3873_v52  ;;  %v3903_v43 = vshrl.u32 %v14379_v58, 16 }
 0x22a   : > { %v3883_v5 = vsel %vm17611_vm4, %v3873_v52, %v3882_v24  ;;  %v10973_v52 = vcombine.low %v4226_v28, %v14277_v40 }
 0x22b   : > { %12208 = vmatpush3.bf16.msra.mxu0 %v13509_v47  ;;  %v3838_v8 = vsel %vm17611_vm4, %v3828_v30, %v3837_v50  ;;  %v3847_v11 = vsel %vm17611_vm4, %v3837_v50, %v3846_v59  ;;  %v3885_v47 = vshrl.u32 %v14368_v61, 16  ;;  %v3905_v55 = vrot.slane %v3903_v43, 2 }
 0x22c   : > { %12209 = vmatprep.subr.bf16.mxu0 %v13510_v32 }
 0x22d   : > { %v3887_v30 = vrot.slane %v3885_v47, 2 }
 0x22e   : > { %12174 = vmatmul.mubr.bf16.gmra.mrb[4].mxu0 %v3820_v39  ;;  %v3899_v39 = vrot.slane %v3897_v29, 3 }
 0x22f   : > { %12177 = vmatprep.mubr.bf16.mxu0 %v3829_v14  ;;  %12210 = vmatpush3.bf16.msra.mxu0 %v13510_v32  ;;  %v3890_v32 = vrot.slane %v3888_v0, 3  ;;  %v3906_v14 = vshll.u32 %v14379_v58, 16  ;;  %v4247_v0 = vrot.slane %v10973_v52, 3 }
 0x230   : > { %12211 = vmatprep.subr.bf16.mxu0 %v13511_v48  ;;  %v3900_v22 = vor.u32 %v3899_v39, %v3896_v9 }
 0x231   : > { %v3891_v41 = vor.u32 %v3890_v32, %v3887_v30  ;;  %v3908_v57 = vrot.slane %v3906_v14, 3  ;;  %v4252_v30 = vrot.slane %v14296_v56, 3  ;;  %v4260_v56 = vrot.slane %v14322_v21, 3 }
 0x232   : > { %v4268_v21 = vrot.slane %v14354_v31, 3  ;;  %v4276_v31 = vrot.slane %v14383_v60, 3 }
 0x233   : > { %12212 = vmatpush3.bf16.msra.mxu0 %v13511_v48  ;;  %v3915_v48 = vshll.u32 %v14383_v60, 16  ;;  %v3892_v50 = vsel %vm17611_vm4, %v3882_v24, %v3891_v41  ;;  %v3901_v59 = vsel %vm17611_vm4, %v3891_v41, %v3900_v22  ;;  %v4248_v24 = vrot.slane %v14285_v45, 3 }
 0x234   : > { %12213 = vmatprep.subr.bf16.mxu0 %v13512_v1  ;;  %v4256_v45 = vrot.slane %v14309_v4, 3  ;;  %v4264_v4 = vrot.slane %v14338_v46, 3  ;;  %v4272_v46 = vrot.slane %v14372_v49, 3  ;;  %v4280_v49 = vrot.slane %v14392_v37, 3 }
 0x235   : > { %v3917_v63 = vrot.slane %v3915_v48, 3  ;;  %v4249_v29 = vsel %vm17609_vm5, %v4247_v0, %v4248_v24 }
 0x236   : > { %12178 = vmatmul.mubr.bf16.gmra.mrb[8].mxu0 %v3838_v8  ;;  %v3921_v8 = vshrl.u32 %v14389_v33, 16 }
 0x237   : > { %12181 = vmatprep.mubr.bf16.mxu0 %v3847_v11  ;;  %12214 = vmatpush3.bf16.msra.mxu0 %v13512_v1  ;;  %v3909_v1 = vor.u32 %v3908_v57, %v3905_v55  ;;  %v3918_v10 = vor.u32 %v3917_v63, %v3914_v44  ;;  %v3930_v11 = vshrl.u32 %v14392_v37, 16  ;;  %v17719_v37 = vmov 0 }
 0x238   : > { %12215 = vmatprep.subr.bf16.mxu0 %v13513_v3  ;;  %v17720_v37 = vsel %vm14527_vm8, 4294967295, %v17719_v37 }
 0x239   : > { %v3910_v20 = vsel %vm17611_vm4, %v3900_v22, %v3909_v1  ;;  %v3919_v7 = vsel %vm17611_vm4, %v3909_v1, %v3918_v10  ;;  %v3932_v26 = vrot.slane %v3930_v11, 2  ;;  %v13518_v1 = vld [vmem:[%s17605_s2 + $0x40] sm:$0xff]   ;;  %17721 = vst [vmem:[#allocation3_spill] sm:$0xff] %v17720_v37  ;;  %v237_v11 = vld [vmem:[#allocation2 + $0x98] sm:$0xe] }
 0x23a   : > { %12257 = vmatprep.subr.bf16.mxu1 %v13518_v1  ;;  %v238_v13 = vsel %vm14533_vm11, 0, %v237_v11 }
 0x23b   : > { %12216 = vmatpush3.bf16.msra.mxu0 %v13513_v3  ;;  %v3923_v3 = vrot.slane %v3921_v8, 2  ;;  %v3936_v27 = vor.u32 %v3935_v36, %v3932_v26  ;;  %12258 = vmatpush3.bf16.msra.mxu1 %v13518_v1  ;;  %v231_v8 = vld [vmem:[#allocation2 + $0x8] sm:$0x3]  ;;  %239 = vst [vmem:[#allocation2 + $0x98] sm:$0xe] %v238_v13 }
 0x23c   : > { %12217 = vmatprep.subr.bf16.mxu0 %v13514_v18  ;;  %v232_v16 = vsel %vm14527_vm8, 0, %v231_v8  ;;  %v13523_v36 = vld [vmem:[%s17605_s2 + $0x68] sm:$0xff]  }
 0x23d   : > { %v3927_v19 = vor.u32 %v3926_v12, %v3923_v3  ;;  %233 = vst [vmem:[#allocation2 + $0x8] sm:$0x3] %v232_v16  ;;  %v13521_v3 = vld [vmem:[%s17605_s2 + $0x58] sm:$0xff]   ;;  %v242_v12 = vlaneseq }
 0x23e   : > { %12182 = vmatmul.mubr.bf16.gmra.mrb[12].mxu0 %v3856_v23  ;;  %v3942_v23 = vshll.u32 %v14474_v17, 16 }
 0x23f   : > { %12185 = vmatprep.mubr.bf16.mxu0 %v3865_v54  ;;  %12218 = vmatpush3.bf16.msra.mxu0 %v13514_v18  ;;  %v3939_v18 = vshrl.u32 %v14474_v17, 16  ;;  %v3928_v54 = vsel %vm17611_vm4, %v3918_v10, %v3927_v19  ;;  %v17722_v10 = vmov 0 }
 0x240   : > { %12219 = vmatprep.subr.bf16.mxu0 %v13515_v34  ;;  %v3944_v38 = vrot.slane %v3942_v23, 3  ;;  %v17723_v10 = vsel %vm14533_vm11, 4294967295, %v17722_v10 }
 0x241   : > { %v3941_v35 = vrot.slane %v3939_v18, 2  ;;  %17724 = vst [vmem:[#allocation4_spill] sm:$0xff] %v17723_v10  ;;  %v17795_v10 = vmov 0 }
 0x243   : > { %12220 = vmatpush3.bf16.msra.mxu0 %v13515_v34  ;;  %v3937_v34 = vsel %vm17611_vm4, %v3927_v19, %v3936_v27  ;;  %v3945_v47 = vor.u32 %v3944_v38, %v3941_v35  ;;  %v13524_v35 = vld [vmem:[%s17605_s2 + $0x70] sm:$0xff]   ;;  %v13691_v38 = vmov 0  }
 0x244   : > { %226 = vst [vmem:[#allocation2] sm:$0xf] %v13691_v38  ;;  %227 = vst [vmem:[#allocation2 + $0x4] sm:$0xf] %v13691_v38 }
 0x245   : > { %v3946_v25 = vsel %vm17611_vm4, %v3936_v27, %v3945_v47  ;;  %240 = vst [vmem:[#allocation2 + $0x9c] sm:$0xf] %v13691_v38  ;;  %241 = vst [vmem:[#allocation2 + $0xa0] sm:$0x7] %v13691_v38 }
 0x246   : > { %12186 = vmatmul.mubr.bf16.gmra.mrb[16].mxu0 %v3874_v42  ;;  %v4250_v42 = vrot.slane %v14292_v51, 3  ;;  %v4258_v51 = vrot.slane %v14318_v15, 3  ;;  %v4266_v15 = vrot.slane %v14350_v53, 3  ;;  %v4274_v53 = vrot.slane %v14379_v58, 3 }
 0x247   : > { %12189 = vmatprep.mubr.bf16.mxu0 %v3883_v5  ;;  %v4254_v5 = vrot.slane %v14302_v62, 3  ;;  %v4262_v62 = vrot.slane %v14334_v2, 3  ;;  %v4270_v2 = vrot.slane %v14368_v61, 3  ;;  %v4278_v61 = vrot.slane %v14389_v33, 3  ;;  %v13519_v33 = vld [vmem:[%s17605_s2 + $0x48] sm:$0xff]  }
 0x248   : > { %v4251_v32 = vsel %vm17609_vm5, %v4248_v24, %v4250_v42  ;;  %v4253_v40 = vsel %vm17609_vm5, %v4250_v42, %v4252_v30  ;;  %v4259_v41 = vsel %vm17609_vm5, %v4256_v45, %v4258_v51  ;;  %v4261_v43 = vsel %vm17609_vm5, %v4258_v51, %v4260_v56  ;;  %12259 = vmatprep.subr.bf16.mxu1 %v13519_v33  ;;  %v13525_v42 = vld [vmem:[%s17605_s2 + $0x78] sm:$0xff]  }
 0x249   : > { %v4255_v9 = vsel %vm17609_vm5, %v4252_v30, %v4254_v5  ;;  %v4257_v39 = vsel %vm17609_vm5, %v4254_v5, %v4256_v45  ;;  %v4263_v14 = vsel %vm17609_vm5, %v4260_v56, %v4262_v62  ;;  %v4265_v22 = vsel %vm17609_vm5, %v4262_v62, %v4264_v4  ;;  %12260 = vmatpush3.bf16.msra.mxu1 %v13519_v33 }
 0x24a   : > { %v4267_v6 = vsel %vm17609_vm5, %v4264_v4, %v4266_v15  ;;  %v4269_v48 = vsel %vm17609_vm5, %v4266_v15, %v4268_v21  ;;  %v4273_v55 = vsel %vm17609_vm5, %v4270_v2, %v4272_v46  ;;  %v4275_v57 = vsel %vm17609_vm5, %v4272_v46, %v4274_v53 }
 0x24b   : > { %v4279_v44 = vsel %vm17609_vm5, %v4276_v31, %v4278_v61  ;;  %v4281_v63 = vsel %vm17609_vm5, %v4278_v61, %v4280_v49  ;;  %v4282_v58 = vrot.slane %v14474_v17, 3  ;;  %v14545_v17 = vshrl.u32 %v242_v12, 7 }
 0x24d   : > { %v4283_v60 = vsel %vm17609_vm5, %v4280_v49, %v4282_v58  ;;  %17725 = vst [vmem:[#allocation5_spill] sm:$0xff] %v14545_v17  ;;  %v245_v26 = vadd.s32 16, %v14545_v17  ;;  %v246_v19 = vadd.s32 24, %v14545_v17  ;;  %v249_v47 = vadd.s32 48, %v14545_v17 }
 0x24e   : > { %12190 = vmatmul.mubr.bf16.gmra.mrb[20].mxu0 %v3892_v50  ;;  %v4271_v50 = vsel %vm17609_vm5, %v4268_v21, %v4270_v2  ;;  %v14559_v27 = vmul.u32.u64.low 3817748708, %v14545_v17  ;;  %v14560_v28 = vmul.u32.u64.high 3817748708, %v14545_v17, %v14559_v27  ;;  %v247_v0 = vadd.s32 32, %v14545_v17 }
 0x24f   : > { %12193 = vmatprep.mubr.bf16.mxu0 %v3901_v59  ;;  %v4277_v59 = vsel %vm17609_vm5, %v4274_v53, %v4276_v31  ;;  %v14555_v18 = vmul.u32.u64.low 3817748708, %v245_v26  ;;  %v14556_v23 = vmul.u32.u64.high 3817748708, %v245_v26, %v14555_v18  ;;  %v14592_v62 = vadd.s32 40, %v14545_v17 }
 0x250   : > { %v14582_v5 = vmul.u32.u64.low 3817748708, %v247_v0  ;;  %v14583_v45 = vmul.u32.u64.high 3817748708, %v247_v0, %v14582_v5  ;;  %v14596_v15 = vadd.s32 80, %v14545_v17  ;;  %v14635_v8 = vadd.s32 72, %v14545_v17 }
 0x251   : > { %v14602_v2 = vmul.u32.u64.low 3817748708, %v14592_v62  ;;  %v14603_v46 = vmul.u32.u64.high 3817748708, %v14592_v62, %v14602_v2  ;;  %v14688_v38 = vadd.s32 120, %v14545_v17 }
 0x256   : > { %12194 = vmatmul.mubr.bf16.gmra.mrb[24].mxu0 %v3910_v20  ;;  %v13520_v20 = vld [vmem:[%s17605_s2 + $0x50] sm:$0xff]  }
 0x257   : > { %12197 = vmatprep.mubr.bf16.mxu0 %v3919_v7  ;;  %12261 = vmatprep.subr.bf16.mxu1 %v13520_v20  ;;  %v13522_v7 = vld [vmem:[%s17605_s2 + $0x60] sm:$0xff]  }
 0x258   : > { %12262 = vmatpush3.bf16.msra.mxu1 %v13520_v20 }
 0x259   : > { %12263 = vmatprep.subr.bf16.mxu1 %v13521_v3 }
 0x25c   : > { %12264 = vmatpush3.bf16.msra.mxu1 %v13521_v3 }
 0x25d   : > { %12265 = vmatprep.subr.bf16.mxu1 %v13522_v7 }
 0x25e   : > { %12198 = vmatmul.mubr.bf16.gmra.mrb[28].mxu0 %v3928_v54  ;;  %v244_v54 = vadd.s32 8, %v14545_v17 }
 0x25f   : > { %12201 = vmatprep.mubr.bf16.mxu0 %v3937_v34  ;;  %v14566_v34 = vmul.u32.u64.low 3817748708, %v246_v19  ;;  %v14567_v52 = vmul.u32.u64.high 3817748708, %v246_v19, %v14566_v34 }
 0x260   : > { %12266 = vmatpush3.bf16.msra.mxu1 %v13522_v7 }
 0x261   : > { %12267 = vmatprep.subr.bf16.mxu1 %v13523_v36  ;;  %v318_v56 = vshrl.u32 %v14567_v52, 4 }
 0x264   : > { %12268 = vmatpush3.bf16.msra.mxu1 %v13523_v36 }
 0x265   : > { %12269 = vmatprep.subr.bf16.mxu1 %v13524_v35 }
 0x266   : > { %12202 = vmatmul.mubr.bf16.gmra.mrb[32].mxu0 %v3946_v25  ;;  %v14571_v24 = vmul.u32.u64.low 3817748708, %v244_v54  ;;  %v14572_v25 = vmul.u32.u64.high 3817748708, %v244_v54, %v14571_v24 }
 0x267   : > { %12221 = vmatprep.mubr.bf16.mxu0 %v4249_v29  ;;  %v250_v29 = vadd.s32 56, %v14545_v17  ;;  %v14703_v24 = vadd.s32 104, %v14545_v17 }
 0x268   : > { %12270 = vmatpush3.bf16.msra.mxu1 %v13524_v35 }
 0x269   : > { %12271 = vmatprep.subr.bf16.mxu1 %v13525_v42 }
 0x26c   : > { %12272 = vmatpush3.bf16.msra.mxu1 %v13525_v42 }
 0x26e   : > { %12222 = vmatmul.mubr.bf16.vlgmr.msra.gmra.mrb[0].mxu0 %v4251_v32  ;;  %v14578_v30 = vmul.u32.u64.low 3817748708, %v249_v47  ;;  %v14579_v32 = vmul.u32.u64.high 3817748708, %v249_v47, %v14578_v30 }
 0x26f   : > { %12225 = vmatprep.mubr.bf16.mxu0 %v4253_v40  ;;  %v307_v40 = vshrl.u32 %v14556_v23, 4  ;;  %v14666_v23 = vadd.s32 112, %v14545_v17 }
 0x276   : > { %12226 = vmatmul.mubr.bf16.gmra.mrb[4].mxu0 %v4255_v9  ;;  %v285_v9 = vshrl.u32 %v14560_v28, 4  ;;  %v14672_v28 = vadd.s32 96, %v14545_v17 }
 0x277   : > { %12229 = vmatprep.mubr.bf16.mxu0 %v4257_v39  ;;  %v14586_v39 = vmul.u32.u64.low 3817748708, %v250_v29  ;;  %v14587_v51 = vmul.u32.u64.high 3817748708, %v250_v29, %v14586_v39 }
 0x278   : > { %v286_v4 = vmul.u32 18, %v285_v9  ;;  %v17737_v9 = vmov 0 }
 0x279   : > { %v362_v53 = vshrl.u32 %v14587_v51, 4 }
 0x27b   : > { %v363_v33 = vmul.u32 18, %v362_v53 }
 0x27d   : > { %v14659_v36 = vsub.s32 %v250_v29, %v363_v33  ;;  %v14716_v29 = vmul.u32.u64.low 3817748708, %v14666_v23  ;;  %v14717_v42 = vmul.u32.u64.high 3817748708, %v14666_v23, %v14716_v29 }
 0x27e   : > { %12230 = vmatmul.mubr.bf16.gmra.mrb[8].mxu0 %v4259_v41  ;;  %v308_v41 = vmul.u32 18, %v307_v40  ;;  %v14728_v40 = vmul.u32.u64.low 3817748708, %v14672_v28  ;;  %v14729_v5 = vmul.u32.u64.high 3817748708, %v14672_v28, %v14728_v40 }
 0x27f   : > { %12233 = vmatprep.mubr.bf16.mxu0 %v4261_v43  ;;  %v296_v43 = vshrl.u32 %v14572_v25, 4  ;;  %17727 = vst [vmem:[#allocation7_spill] sm:$0xff] %v14659_v36  ;;  %v14743_v39 = vadd.s32 18, %v14659_v36  ;;  %v17751_v40 = vmov 0 }
 0x280   : > { %v14598_v21 = vsub.s32 %v245_v26, %v308_v41  ;;  %v340_v26 = vshrl.u32 %v14603_v46, 4 }
 0x281   : > { %17739 = vst [vmem:[#allocation9_spill] sm:$0xff] %v14743_v39 }
 0x282   : > { %vm677_vm12 = vcmp.ne.s32.totalorder %v14598_v21, 0  ;;  %vm713_vm13 = vcmp.lt.s32.totalorder %v14598_v21, 0 }
 0x283   : > { %vm14678_vm3 = vmand %vm713_vm13, %vm677_vm12  ;;  %vm682_vm13 = vcmp.ne.s32.totalorder %v14659_v36, 0 }
 0x286   : > { %12234 = vmatmul.mubr.bf16.gmra.mrb[12].mxu0 %v4263_v14  ;;  %v319_v14 = vmul.u32 18, %v318_v56  ;;  %v14747_v56 = vmul.u32.u64.low 3817748708, %v14688_v38  ;;  %v14748_v41 = vmul.u32.u64.high 3817748708, %v14688_v38, %v14747_v56 }
 0x287   : > { %12237 = vmatprep.mubr.bf16.mxu0 %v4265_v22  ;;  %v351_v22 = vshrl.u32 %v14579_v32, 4 }
 0x288   : > { %v14612_v31 = vsub.s32 %v246_v19, %v319_v14  ;;  %v14662_v19 = vmul.u32.u64.low 3817748708, %v14635_v8  ;;  %v14663_v18 = vmul.u32.u64.high 3817748708, %v14635_v8, %v14662_v19 }
 0x28a   : > { %vm678_vm6 = vcmp.ne.s32.totalorder %v14612_v31, 0  ;;  %vm714_vm9 = vcmp.lt.s32.totalorder %v14612_v31, 0  ;;  %v14645_v13 = vadd.s32 18, %v14612_v31  ;;  %v384_v46 = vshrl.u32 %v14663_v18, 4 }
 0x28b   : > { %vm14709_vm12 = vmand %vm714_vm9, %vm678_vm6 }
 0x28c   : > { %v385_v18 = vmul.u32 18, %v384_v46 }
 0x28e   : > { %12238 = vmatmul.mubr.bf16.gmra.mrb[16].mxu0 %v4267_v6  ;;  %v329_v6 = vshrl.u32 %v14583_v45, 4  ;;  %v14732_v45 = vadd.s32 144, %v14545_v17 }
 0x28f   : > { %12241 = vmatprep.mubr.bf16.mxu0 %v4269_v48  ;;  %v297_v48 = vmul.u32 18, %v296_v43  ;;  %v17740_v43 = vmov 0 }
 0x290   : > { %v330_v49 = vmul.u32 18, %v329_v6 }
 0x291   : > { %v14626_v58 = vsub.s32 %v244_v54, %v297_v48 }
 0x292   : > { %v14647_v20 = vsub.s32 %v247_v0, %v330_v49  ;;  %v5298_v49 = vld [vmem:[#allocation2 + $0x4] sm:$0xf] }
 0x293   : > { %vm676_vm10 = vcmp.ne.s32.totalorder %v14626_v58, 0  ;;  %vm712_vm5 = vcmp.lt.s32.totalorder %v14626_v58, 0  ;;  %v14656_v7 = vadd.s32 18, %v14626_v58 }
 0x294   : > { %17726 = vst [vmem:[#allocation6_spill] sm:$0xff] %v14647_v20  ;;  %vm679_vm2 = vcmp.ne.s32.totalorder %v14647_v20, 0  ;;  %vm715_vm0 = vcmp.lt.s32.totalorder %v14647_v20, 0  ;;  %v14699_v52 = vadd.s32 18, %v14647_v20 }
 0x296   : > { %12242 = vmatmul.mubr.bf16.gmra.mrb[20].mxu0 %v4271_v50  ;;  %v14606_v50 = vadd.s32 64, %v14545_v17  ;;  %17732 = vst [vmem:[#allocation8_spill] sm:$0xff] %v14699_v52 }
 0x297   : > { %12245 = vmatprep.mubr.bf16.mxu0 %v4273_v55  ;;  %v14609_v55 = vsub.s32 %v14545_v17, %v286_v4 }
 0x299   : > { %vm675_vm14 = vcmp.ne.s32.totalorder %v14609_v55, 0  ;;  %vm711_vm15 = vcmp.lt.s32.totalorder %v14609_v55, 0  ;;  %v14638_v16 = vadd.s32 18, %v14609_v55 }
 0x29a   : > { %vm14694_vm7 = vmand %vm711_vm15, %vm675_vm14  ;;  %vm718_vm14 = vcmp.lt.s32.totalorder %v14659_v36, 0 }
 0x29b   : > { %vm14723_vm15 = vmand %vm712_vm5, %vm676_vm10 }
 0x29c   : > { %vm14754_vm5 = vmand %vm715_vm0, %vm679_vm2 }
 0x29d   : > { %v17741_v43 = vsel %vm14754_vm5, 4294967295, %v17740_v43  ;;  %vm14777_vm0 = vmand %vm718_vm14, %vm682_vm13 }
 0x29e   : > { %12246 = vmatmul.mubr.bf16.gmra.mrb[24].mxu0 %v4275_v57  ;;  %v352_v57 = vmul.u32 18, %v351_v22  ;;  %v14762_v22 = vmul.u32.u64.low 3817748708, %v14703_v24  ;;  %v14763_v6 = vmul.u32.u64.high 3817748708, %v14703_v24, %v14762_v22 }
 0x29f   : > { %12249 = vmatprep.mubr.bf16.mxu0 %v4277_v59  ;;  %v14615_v59 = vmul.u32.u64.low 3817748708, %v14596_v15  ;;  %v14616_v61 = vmul.u32.u64.high 3817748708, %v14596_v15, %v14615_v59  ;;  %v14861_v22 = vadd.s32 176, %v14545_v17 }
 0x2a0   : > { %v14642_v11 = vsub.s32 %v249_v47, %v352_v57  ;;  %v341_v47 = vmul.u32 18, %v340_v26  ;;  %v13529_v26 = vld [vmem:[%s17605_s2] sm:$0xff]  }
 0x2a1   : > { %v395_v27 = vshrl.u32 %v14616_v61, 4  ;;  %v14790_v59 = vmul.u32.u64.low 3817748708, %v14732_v45  ;;  %v14791_v61 = vmul.u32.u64.high 3817748708, %v14732_v45, %v14790_v59  ;;  %12309 = vmatprep.subr.bf16.mxu1 %v13529_v26 }
 0x2a2   : > { %vm681_vm1 = vcmp.ne.s32.totalorder %v14642_v11, 0  ;;  %vm717_vm4 = vcmp.lt.s32.totalorder %v14642_v11, 0  ;;  %v14683_v35 = vadd.s32 18, %v14642_v11  ;;  %v14759_v4 = vsub.s32 %v14592_v62, %v341_v47 }
 0x2a3   : > { %v396_v32 = vmul.u32 18, %v395_v27  ;;  %vm14738_vm6 = vmand %vm717_vm4, %vm681_vm1  ;;  %v17743_v62 = vmov 0  ;;  %v439_v27 = vshrl.u32 %v14717_v42, 4  ;;  %v14828_v47 = vadd.s32 152, %v14545_v17 }
 0x2a4   : > { %v17738_v9 = vsel %vm14738_vm6, 4294967295, %v17737_v9  ;;  %17742 = vst [vmem:[#allocation10_spill] sm:$0xff] %v14759_v4  ;;  %v17744_v62 = vsel %vm14777_vm0, 4294967295, %v17743_v62  ;;  %vm680_vm1 = vcmp.ne.s32.totalorder %v14759_v4, 0  ;;  %vm716_vm2 = vcmp.lt.s32.totalorder %v14759_v4, 0 }
 0x2a5   : > { %17745 = vst [vmem:[#allocation11_spill] sm:$0xff] %v17744_v62  ;;  %v14787_v57 = vsub.s32 %v14596_v15, %v396_v32  ;;  %v14821_v19 = vadd.s32 18, %v14759_v4  ;;  %v450_v32 = vshrl.u32 %v14748_v41, 4  ;;  %v14838_v42 = vadd.s32 136, %v14545_v17  ;;  %vm14842_vm10 = vmand %vm716_vm2, %vm680_vm1 }
 0x2a6   : > { %12250 = vmatmul.mubr.bf16.gmra.mrb[28].mxu0 %v4279_v44  ;;  %v14621_v44 = vadd.s32 88, %v14545_v17  ;;  %v17752_v40 = vsel %vm14842_vm10, 4294967295, %v17751_v40  ;;  %v14858_v41 = vsub.s32 %v14635_v8, %v385_v18  ;;  %v14873_v15 = vadd.s32 160, %v14545_v17 }
 0x2a7   : > { %12253 = vmatprep.mubr.bf16.mxu0 %v4281_v63  ;;  %v14624_v63 = vadd.s32 18, %v14598_v21  ;;  %17746 = vst [vmem:[#allocation12_spill] sm:$0xff] %v14787_v57  ;;  %17748 = vst [vmem:[#allocation14_spill] sm:$0xff] %v14821_v19  ;;  %vm685_vm4 = vcmp.ne.s32.totalorder %v14787_v57, 0  ;;  %vm721_vm9 = vcmp.lt.s32.totalorder %v14787_v57, 0  ;;  %v451_v26 = vmul.u32 18, %v450_v32 }
 0x2a8   : > { %v14650_v3 = vmul.u32.u64.low 3817748708, %v14621_v44  ;;  %v14651_v12 = vmul.u32.u64.high 3817748708, %v14621_v44, %v14650_v3  ;;  %17753 = vst [vmem:[#allocation17_spill] sm:$0xff] %v17752_v40  ;;  %vm14852_vm14 = vmand %vm721_vm9, %vm685_vm4  ;;  %vm17774_vm9 = vcmp.ne.s32.totalorder %v14858_v41, 0  ;;  %vm17775_vm11 = vcmp.lt.s32.totalorder %v14858_v41, 0 }
 0x2a9   : > { %17757 = vst [vmem:[#allocation19_spill] sm:$0xff] %v14858_v41  ;;  %v17800_v4 = vmov 0 }
 0x2aa   : > { %v406_v51 = vshrl.u32 %v14651_v12, 4  ;;  %v14814_v12 = vadd.s32 128, %v14545_v17 }
 0x2ac   : > { %v17927_v54 = vld [vmem:[#allocation11_spill] sm:$0xff] }
 0x2ae   : > { %12254 = vmatmul.mubr.bf16.gmra.mrb[32].mxu0 %v4283_v60  ;;  %v14629_v60 = vmul.u32.u64.low 3817748708, %v14606_v50  ;;  %v14630_v1 = vmul.u32.u64.high 3817748708, %v14606_v50, %v14629_v60  ;;  %v17936_v25 = vld [vmem:[#allocation14_spill] sm:$0xff] }
 0x2af   : > { %v14911_v60 = vsub.s32 %v14688_v38, %v451_v26  ;;  %v14927_v38 = vadd.s32 18, %v14858_v41  ;;  %v14932_v26 = vadd.s32 184, %v14545_v17  ;;  %v15047_v41 = vadd.s32 208, %v14545_v17 }
 0x2b0   : > { %v373_v0 = vshrl.u32 %v14630_v1, 4  ;;  %v407_v1 = vmul.u32 18, %v406_v51  ;;  %v14849_v51 = vmul.u32.u64.low 3817748708, %v14814_v12  ;;  %v14850_v56 = vmul.u32.u64.high 3817748708, %v14814_v12, %v14849_v51 }
 0x2b1   : > { %v14869_v51 = vmul.u32.u64.low 3817748708, %v14838_v42  ;;  %v14870_v33 = vmul.u32.u64.high 3817748708, %v14838_v42, %v14869_v51  ;;  %17765 = vst [vmem:[#allocation25_spill] sm:$0xff] %v14911_v60  ;;  %17767 = vst [vmem:[#allocation27_spill] sm:$0xff] %v14927_v38  ;;  %vm17789_vm5 = vcmp.ne.s32.totalorder %v14911_v60, 0 }
 0x2b2   : > { %v374_v14 = vmul.u32 18, %v373_v0  ;;  %v14831_v0 = vadd.s32 18, %v14787_v57  ;;  %v14834_v29 = vsub.s32 %v14621_v44, %v407_v1  ;;  %v17754_v44 = vmov 0 }
 0x2b3   : > { %v17755_v44 = vsel %vm14852_vm14, 4294967295, %v17754_v44  ;;  %v14865_v59 = vmul.u32.u64.low 3817748708, %v14828_v47  ;;  %v14866_v1 = vmul.u32.u64.high 3817748708, %v14828_v47, %v14865_v59  ;;  %v472_v53 = vshrl.u32 %v14870_v33, 4  ;;  %vm14959_vm14 = vmand %vm17775_vm11, %vm17774_vm9 }
 0x2b4   : > { %v14811_v3 = vsub.s32 %v14606_v50, %v374_v14  ;;  %v417_v50 = vshrl.u32 %v14729_v5, 4  ;;  %17749 = vst [vmem:[#allocation15_spill] sm:$0xff] %v14831_v0  ;;  %17750 = vst [vmem:[#allocation16_spill] sm:$0xff] %v14834_v29  ;;  %v428_v5 = vshrl.u32 %v14763_v6, 4  ;;  %v440_v14 = vmul.u32 18, %v439_v27 }
 0x2b5   : > { %17756 = vst [vmem:[#allocation18_spill] sm:$0xff] %v17755_v44  ;;  %v483_v6 = vshrl.u32 %v14791_v61, 4  ;;  %vm686_vm2 = vcmp.ne.s32.totalorder %v14834_v29, 0  ;;  %v14899_v59 = vmul.u32.u64.low 3817748708, %v14861_v22  ;;  %v14900_v51 = vmul.u32.u64.high 3817748708, %v14861_v22, %v14899_v59 }
 0x2b6   : > { %17747 = vst [vmem:[#allocation13_spill] sm:$0xff] %v14811_v3  ;;  %vm683_vm13 = vcmp.ne.s32.totalorder %v14811_v3, 0  ;;  %vm719_vm8 = vcmp.lt.s32.totalorder %v14811_v3, 0  ;;  %v418_v46 = vmul.u32 18, %v417_v50  ;;  %v14884_v18 = vadd.s32 18, %v14811_v3 }
 0x2b7   : > { %v429_v27 = vmul.u32 18, %v428_v5  ;;  %vm14890_vm1 = vmand %vm719_vm8, %vm683_vm13  ;;  %v17759_v50 = vmov 0  ;;  %v14896_v32 = vsub.s32 %v14666_v23, %v440_v14  ;;  %vm722_vm4 = vcmp.lt.s32.totalorder %v14834_v29, 0 }
 0x2b8   : > { %17758 = vst [vmem:[#allocation20_spill] sm:$0xff] %v14884_v18  ;;  %v17760_v50 = vsel %vm14890_vm1, 4294967295, %v17759_v50  ;;  %v14904_v5 = vadd.s32 18, %v14834_v29  ;;  %v14907_v61 = vsub.s32 %v14672_v28, %v418_v46  ;;  %v484_v8 = vmul.u32 18, %v483_v6  ;;  %v5297_v6 = vld [vmem:[#allocation2] sm:$0xf]  ;;  %vm14946_vm13 = vmand %vm722_vm4, %vm686_vm2 }
 0x2b9   : > { %17761 = vst [vmem:[#allocation21_spill] sm:$0xff] %v17760_v50  ;;  %17762 = vst [vmem:[#allocation22_spill] sm:$0xff] %v14896_v32  ;;  %v14914_v23 = vmul.u32.u64.low 3817748708, %v14873_v15  ;;  %v14915_v14 = vmul.u32.u64.high 3817748708, %v14873_v15, %v14914_v23  ;;  %v14923_v28 = vsub.s32 %v14703_v24, %v429_v27  ;;  %v461_v46 = vshrl.u32 %v14850_v56, 4 }
 0x2ba   : > { %17763 = vst [vmem:[#allocation23_spill] sm:$0xff] %v14904_v5  ;;  %17764 = vst [vmem:[#allocation24_spill] sm:$0xff] %v14907_v61  ;;  %v14935_v23 = vadd.s32 18, %v14896_v32  ;;  %v14939_v24 = vsub.s32 %v14732_v45, %v484_v8  ;;  %v494_v56 = vshrl.u32 %v14866_v1, 4  ;;  %v17770_v27 = vmov 0 }
 0x2bb   : > { %17766 = vst [vmem:[#allocation26_spill] sm:$0xff] %v14923_v28  ;;  %v17771_v27 = vsel %vm14946_vm13, 4294967295, %v17770_v27  ;;  %vm723_vm8 = vcmp.lt.s32.totalorder %v14907_v61, 0  ;;  %v14952_v59 = vcombine.low %v5297_v6, %v5298_v49  ;;  %v17776_v45 = vmov 0 }
 0x2bc   : > { %17768 = vst [vmem:[#allocation28_spill] sm:$0xff] %v14935_v23  ;;  %17769 = vst [vmem:[#allocation29_spill] sm:$0xff] %v14939_v24  ;;  %v17777_v45 = vsel %vm14959_vm14, 4294967295, %v17776_v45  ;;  %vm726_vm2 = vcmp.lt.s32.totalorder %v14911_v60, 0  ;;  %v462_v1 = vmul.u32 18, %v461_v46  ;;  %v14966_v8 = vadd.s32 168, %v14545_v17 }
 0x2bd   : > { %17772 = vst [vmem:[#allocation30_spill] sm:$0xff] %v17771_v27  ;;  %17773 = vst [vmem:[#allocation31_spill] sm:$0xff] %v14952_v59  ;;  %vm17779_vm1 = vcmp.ne.s32.totalorder %v14896_v32, 0  ;;  %vm17780_vm10 = vcmp.lt.s32.totalorder %v14896_v32, 0  ;;  %v17781_v49 = vmov 0  ;;  %vm724_vm11 = vcmp.lt.s32.totalorder %v14923_v28, 0 }
 0x2be   : > { %17778 = vst [vmem:[#allocation32_spill] sm:$0xff] %v17777_v45  ;;  %vm14972_vm0 = vmand %vm17780_vm10, %vm17779_vm1  ;;  %v527_v33 = vshrl.u32 %v14900_v51, 4  ;;  %v14979_v6 = vmul.u32.u64.low 3817748708, %v14932_v26  ;;  %v14980_v2 = vmul.u32.u64.high 3817748708, %v14932_v26, %v14979_v6  ;;  %vm17784_vm9 = vcmp.ne.s32.totalorder %v14907_v61, 0 }
 0x2bf   : > { %v17782_v49 = vsel %vm14972_vm0, 4294967295, %v17781_v49  ;;  %vm14984_vm4 = vmand %vm723_vm8, %vm17784_vm9  ;;  %v17785_v46 = vmov 0  ;;  %v14989_v48 = vadd.s32 18, %v14907_v61  ;;  %vm693_vm10 = vcmp.ne.s32.totalorder %v14939_v24, 0 }
 0x2c0   : > { %17783 = vst [vmem:[#allocation33_spill] sm:$0xff] %v17782_v49  ;;  %v17786_v46 = vsel %vm14984_vm4, 4294967295, %v17785_v46  ;;  %vm729_vm1 = vcmp.lt.s32.totalorder %v14939_v24, 0  ;;  %v495_v37 = vmul.u32 18, %v494_v56  ;;  %vm14995_vm6 = vmand %vm726_vm2, %vm17789_vm5  ;;  %v17790_v51 = vmov 0 }
 0x2c1   : > { %17787 = vst [vmem:[#allocation34_spill] sm:$0xff] %v17786_v46  ;;  %17788 = vst [vmem:[#allocation35_spill] sm:$0xff] %v14989_v48  ;;  %v17791_v51 = vsel %vm14995_vm6, 4294967295, %v17790_v51  ;;  %v15000_v6 = vadd.s32 18, %v14911_v60  ;;  %v5462_v3 = vshll.u32 %v14952_v59, 16  ;;  %v473_v18 = vmul.u32 18, %v472_v53 }
 0x2c2   : > { %17792 = vst [vmem:[#allocation36_spill] sm:$0xff] %v17791_v51  ;;  %v505_v50 = vshrl.u32 %v14915_v14, 4  ;;  %vm17794_vm8 = vcmp.ne.s32.totalorder %v14923_v28, 0  ;;  %v15011_v56 = vadd.s32 18, %v14923_v28  ;;  %v15014_v57 = vadd.s32 18, %v14939_v24  ;;  %vm15028_vm5 = vmand %vm729_vm1, %vm693_vm10 }
 0x2c3   : > { %17793 = vst [vmem:[#allocation37_spill] sm:$0xff] %v15000_v6  ;;  %vm15006_vm9 = vmand %vm724_vm11, %vm17794_vm8  ;;  %v15017_v0 = vmul.u32.u64.low 3817748708, %v14966_v8  ;;  %v15018_v44 = vmul.u32.u64.high 3817748708, %v14966_v8, %v15017_v0  ;;  %v17801_v4 = vsel %vm15028_vm5, 4294967295, %v17800_v4  ;;  %v15033_v19 = vsub.s32 %v14814_v12, %v462_v1 }
 0x2c4   : > { %v17796_v10 = vsel %vm15006_vm9, 4294967295, %v17795_v10  ;;  %17798 = vst [vmem:[#allocation39_spill] sm:$0xff] %v15011_v56  ;;  %17799 = vst [vmem:[#allocation40_spill] sm:$0xff] %v15014_v57  ;;  %v528_v40 = vmul.u32 18, %v527_v33  ;;  %v15044_v14 = vsub.s32 %v14828_v47, %v495_v37  ;;  %v15055_v33 = vsub.s32 %v14838_v42, %v473_v18 }
 0x2c5   : > { %17797 = vst [vmem:[#allocation38_spill] sm:$0xff] %v17796_v10  ;;  %17802 = vst [vmem:[#allocation41_spill] sm:$0xff] %v17801_v4  ;;  %v506_v0 = vmul.u32 18, %v505_v50  ;;  %v15065_v53 = vrot.slane %v5462_v3, 1  ;;  %v15068_v12 = vadd.s32 192, %v14545_v17  ;;  %vm691_vm2 = vcmp.ne.s32.totalorder %v15033_v19, 0 }
 0x2c6   : > { %v15073_v42 = vadd.s32 18, %v15033_v19  ;;  %v15076_v18 = vsub.s32 %v14861_v22, %v528_v40  ;;  %v538_v50 = vshrl.u32 %v14980_v2, 4  ;;  %vm694_vm10 = vcmp.ne.s32.totalorder %v15044_v14, 0 }
 0x2c7   : > { %v15082_v3 = vadd.s32 18, %v15044_v14  ;;  %v15085_v47 = vmul.u32.u64.low 3817748708, %v15047_v41  ;;  %v15086_v37 = vmul.u32.u64.high 3817748708, %v15047_v41, %v15085_v47  ;;  %v15089_v1 = vadd.s32 216, %v14545_v17 }
 0x2c8   : > { %17803 = vst [vmem:[#allocation42_spill] sm:$0xff] %v15076_v18  ;;  %v15094_v2 = vadd.s32 18, %v15055_v33  ;;  %v15097_v40 = vsub.s32 %v14873_v15, %v506_v0  ;;  %v15100_v22 = vadd.s32 200, %v14545_v17  ;;  %v516_v24 = vshrl.u32 %v15018_v44, 4 }
 0x2c9   : > { %v15104_v47 = vmul.u32.u64.low 3817748708, %v15068_v12  ;;  %v15105_v57 = vmul.u32.u64.high 3817748708, %v15068_v12, %v15104_v47  ;;  %v15108_v4 = vadd.s32 240, %v14545_v17  ;;  %v539_v28 = vmul.u32 18, %v538_v50 }
 0x2ca   : > { %v15113_v15 = vadd.s32 224, %v14545_v17  ;;  %v15116_v0 = vadd.s32 18, %v15076_v18  ;;  %v15119_v44 = vmul.u32.u64.low 3817748708, %v15089_v1  ;;  %v15120_v56 = vmul.u32.u64.high 3817748708, %v15089_v1, %v15119_v44 }
 0x2cb   : > { %v15123_v47 = vadd.s32 248, %v14545_v17  ;;  %v15127_v10 = vmul.u32.u64.low 3817748708, %v15100_v22  ;;  %v15128_v60 = vmul.u32.u64.high 3817748708, %v15100_v22, %v15127_v10  ;;  %v15131_v50 = vadd.s32 232, %v14545_v17 }
 0x2cc   : > { %17804 = vst [vmem:[#allocation43_spill] sm:$0xff] %v15116_v0  ;;  %v517_v6 = vmul.u32 18, %v516_v24  ;;  %v15134_v51 = vmul.u32.u64.low 3817748708, %v15108_v4  ;;  %v15135_v61 = vmul.u32.u64.high 3817748708, %v15108_v4, %v15134_v51  ;;  %v15138_v48 = vadd.s32 272, %v14545_v17 }
 0x2cd   : > { %v15141_v44 = vsub.s32 %v14932_v26, %v539_v28  ;;  %v15144_v46 = vmul.u32.u64.low 3817748708, %v15113_v15  ;;  %v15145_v32 = vmul.u32.u64.high 3817748708, %v15113_v15, %v15144_v46  ;;  %v15148_v10 = vadd.s32 256, %v14545_v17 }
 0x2ce   : > { %v571_v23 = vshrl.u32 %v15086_v37, 4  ;;  %v15152_v24 = vmul.u32.u64.low 3817748708, %v15123_v47  ;;  %v15153_v49 = vmul.u32.u64.high 3817748708, %v15123_v47, %v15152_v24  ;;  %v15156_v51 = vadd.s32 280, %v14545_v17 }
 0x2cf   : > { %v15160_v28 = vmul.u32.u64.low 3817748708, %v15131_v50  ;;  %v15161_v26 = vmul.u32.u64.high 3817748708, %v15131_v50, %v15160_v28  ;;  %v15164_v46 = vadd.s32 264, %v14545_v17  ;;  %vm17805_vm8 = vcmp.lt.s32.totalorder %v15033_v19, 0 }
 0x2d0   : > { %vm15170_vm11 = vmand %vm17805_vm8, %vm691_vm2  ;;  %v17806_v37 = vmov 0  ;;  %v15175_v24 = vadd.s32 18, %v15097_v40  ;;  %v549_v38 = vshrl.u32 %v15105_v57, 4  ;;  %vm17808_vm1 = vcmp.lt.s32.totalorder %v15044_v14, 0 }
 0x2d1   : > { %v17807_v37 = vsel %vm15170_vm11, 4294967295, %v17806_v37  ;;  %v15179_v45 = vmul.u32.u64.low 3817748708, %v15138_v48  ;;  %v15180_v29 = vmul.u32.u64.high 3817748708, %v15138_v48, %v15179_v45  ;;  %vm15186_vm5 = vmand %vm17808_vm1, %vm694_vm10  ;;  %v17809_v28 = vmov 0 }
 0x2d2   : > { %v17810_v28 = vsel %vm15186_vm5, 4294967295, %v17809_v28  ;;  %v15192_v17 = vsub.s32 %v14966_v8, %v517_v6  ;;  %v15195_v5 = vmul.u32.u64.low 3817748708, %v15148_v10  ;;  %v15196_v57 = vmul.u32.u64.high 3817748708, %v15148_v10, %v15195_v5 }
 0x2d3   : > { %vm17811_vm8 = vcmp.ne.s32.totalorder %v15055_v33, 0  ;;  %vm17812_vm9 = vcmp.lt.s32.totalorder %v15055_v33, 0  ;;  %v17813_v45 = vmov 0  ;;  %v572_v27 = vmul.u32 18, %v571_v23 }
 0x2d4   : > { %vm15202_vm6 = vmand %vm17812_vm9, %vm17811_vm8  ;;  %v582_v36 = vshrl.u32 %v15120_v56, 4  ;;  %v15208_v39 = vmul.u32.u64.low 3817748708, %v15156_v51  ;;  %v15209_v62 = vmul.u32.u64.high 3817748708, %v15156_v51, %v15208_v39  ;;  %vm17815_vm10 = vcmp.ne.s32.totalorder %v15076_v18, 0 }
 0x2d5   : > { %v17814_v45 = vsel %vm15202_vm6, 4294967295, %v17813_v45  ;;  %vm17816_vm1 = vcmp.lt.s32.totalorder %v15076_v18, 0  ;;  %v17817_v5 = vmov 0  ;;  %vm734_vm9 = vcmp.lt.s32.totalorder %v15141_v44, 0 }
 0x2d6   : > { %vm15215_vm2 = vmand %vm17816_vm1, %vm17815_vm10  ;;  %v560_v8 = vshrl.u32 %v15128_v60, 4  ;;  %v15222_v23 = vmul.u32.u64.low 3817748708, %v15164_v46  ;;  %v15223_v6 = vmul.u32.u64.high 3817748708, %v15164_v46, %v15222_v23  ;;  %v17819_v56 = vshrl.u32 %v14952_v59, 16 }
 0x2d7   : > { %v17818_v5 = vsel %vm15215_vm2, 4294967295, %v17817_v5  ;;  %vm17821_vm8 = vcmp.ne.s32.totalorder %v15097_v40, 0  ;;  %vm17822_vm10 = vcmp.lt.s32.totalorder %v15097_v40, 0  ;;  %v17823_v60 = vmov 0 }
 0x2d8   : > { %v15232_v20 = vor.u32 %v15065_v53, %v17819_v56  ;;  %vm15238_vm1 = vmand %vm17822_vm10, %vm17821_vm8  ;;  %v550_v52 = vmul.u32 18, %v549_v38  ;;  %v615_v23 = vshrl.u32 %v15135_v61, 4  ;;  %v15252_v56 = vadd.s32 18, %v15141_v44 }
 0x2d9   : > { %v17824_v60 = vsel %vm15238_vm1, 4294967295, %v17823_v60  ;;  %v593_v59 = vshrl.u32 %v15145_v32, 4  ;;  %vm17825_vm8 = vcmp.ne.s32.totalorder %v15141_v44, 0  ;;  %v17826_v38 = vmov 0 }
 0x2da   : > { %17820 = vst [vmem:[#allocation44_spill] sm:$0xff] %v15232_v20  ;;  %vm15263_vm10 = vmand %vm734_vm9, %vm17825_vm8  ;;  %v15268_v53 = vsub.s32 %v15047_v41, %v572_v27  ;;  %v583_v39 = vmul.u32 18, %v582_v36  ;;  %v626_v20 = vshrl.u32 %v15153_v49, 4  ;;  %v561_v61 = vmul.u32 18, %v560_v8 }
 0x2db   : > { %v17827_v38 = vsel %vm15263_vm10, 4294967295, %v17826_v38  ;;  %v604_v18 = vshrl.u32 %v15161_v26, 4  ;;  %v15279_v0 = vsub.s32 %v15068_v12, %v550_v52  ;;  %v616_v41 = vmul.u32 18, %v615_v23 }
 0x2dc   : > { %v659_v36 = vshrl.u32 %v15180_v29, 4  ;;  %v15287_v49 = vadd.s32 18, %v15192_v17  ;;  %v594_v32 = vmul.u32 18, %v593_v59  ;;  %v637_v8 = vshrl.u32 %v15196_v57, 4 }
 0x2dd   : > { %v15292_v26 = vsub.s32 %v15089_v1, %v583_v39  ;;  %v627_v52 = vmul.u32 18, %v626_v20  ;;  %v670_v12 = vshrl.u32 %v15209_v62, 4  ;;  %v15297_v29 = vsub.s32 %v15100_v22, %v561_v61 }
 0x2de   : > { %v605_v23 = vmul.u32 18, %v604_v18  ;;  %v648_v27 = vshrl.u32 %v15223_v6, 4  ;;  %v15301_v59 = vadd.s32 18, %v15268_v53  ;;  %v15305_v57 = vsub.s32 %v15108_v4, %v616_v41 }
 0x2df   : > { %17828 = vst [vmem:[#allocation45_spill] sm:$0xff] %v15292_v26  ;;  %v660_v1 = vmul.u32 18, %v659_v36  ;;  %vm17830_vm8 = vcmp.ne.s32.totalorder %v15192_v17, 0  ;;  %vm17831_vm10 = vcmp.lt.s32.totalorder %v15192_v17, 0  ;;  %v17832_v20 = vmov 0 }
 0x2e0   : > { %17829 = vst [vmem:[#allocation46_spill] sm:$0xff] %v15305_v57  ;;  %vm15311_vm9 = vmand %vm17831_vm10, %vm17830_vm8  ;;  %v15317_v62 = vadd.s32 18, %v15279_v0  ;;  %v15320_v18 = vsub.s32 %v15113_v15, %v594_v32  ;;  %v638_v22 = vmul.u32 18, %v637_v8  ;;  %v15325_v4 = vsub.s32 %v15123_v47, %v627_v52 }
 0x2e1   : > { %v17833_v20 = vsel %vm15311_vm9, 4294967295, %v17832_v20  ;;  %v671_v6 = vmul.u32 18, %v670_v12  ;;  %vm17836_vm10 = vcmp.ne.s32.totalorder %v15268_v53, 0  ;;  %vm17837_vm8 = vcmp.lt.s32.totalorder %v15268_v53, 0 }
 0x2e2   : > { %17834 = vst [vmem:[#allocation47_spill] sm:$0xff] %v15320_v18  ;;  %17835 = vst [vmem:[#allocation48_spill] sm:$0xff] %v15325_v4  ;;  %v17838_v39 = vmov 0  ;;  %v15338_v15 = vsub.s32 %v15131_v50, %v605_v23  ;;  %v649_v61 = vmul.u32 18, %v648_v27  ;;  %v17841_v47 = vsel %vm14678_vm3, %v14624_v63, %v14598_v21 }
 0x2e3   : > { %vm15331_vm1 = vmand %vm17837_vm8, %vm17836_vm10  ;;  %vm15345_vm6 = vcmp.lt.s32.totalorder %v17841_v47, 16  ;;  %vm17844_vm10 = vcmp.ne.s32.totalorder %v15279_v0, 0  ;;  %vm17845_vm8 = vcmp.lt.s32.totalorder %v15279_v0, 0  ;;  %v17846_v50 = vmov 0 }
 0x2e4   : > { %v17839_v39 = vsel %vm15331_vm1, 4294967295, %v17838_v39  ;;  %17840 = vst [vmem:[#allocation49_spill] sm:$0xff] %v15338_v15  ;;  %vm15357_vm11 = vmand %vm17845_vm8, %vm17844_vm10  ;;  %v15364_v21 = vsub.s32 %v15138_v48, %v660_v1  ;;  %v17849_v63 = vsel %vm14694_vm7, %v14638_v16, %v14609_v55  ;;  %vm17852_vm10 = vcmp.ne.s32.totalorder %v15292_v26, 0 }
 0x2e5   : > { %v17847_v50 = vsel %vm15357_vm11, 4294967295, %v17846_v50  ;;  %vm15371_vm2 = vcmp.lt.s32.totalorder %v17849_v63, 16  ;;  %vm17853_vm8 = vcmp.lt.s32.totalorder %v15292_v26, 0  ;;  %v17854_v36 = vmov 0 }
 0x2e6   : > { %17848 = vst [vmem:[#allocation50_spill] sm:$0xff] %v15364_v21  ;;  %vm15379_vm9 = vmand %vm17853_vm8, %vm17852_vm10  ;;  %v15384_v48 = vadd.s32 18, %v15292_v26  ;;  %v15389_v55 = vsub.s32 %v15148_v10, %v638_v22  ;;  %v17858_v16 = vsel %vm14709_vm12, %v14645_v13, %v14612_v31  ;;  %vm17861_vm10 = vcmp.ne.s32.totalorder %v15297_v29, 0 }
 0x2e7   : > { %v17855_v36 = vsel %vm15379_vm9, 4294967295, %v17854_v36  ;;  %vm15396_vm7 = vcmp.lt.s32.totalorder %v17858_v16, 16  ;;  %vm17862_vm8 = vcmp.lt.s32.totalorder %v15297_v29, 0  ;;  %v17863_v10 = vmov 0 }
 0x2e8   : > { %17856 = vst [vmem:[#allocation51_spill] sm:$0xff] %v15384_v48  ;;  %17857 = vst [vmem:[#allocation52_spill] sm:$0xff] %v15389_v55  ;;  %v15415_v31 = vsub.s32 %v15156_v51, %v671_v6  ;;  %v17867_v13 = vsel %vm14723_vm15, %v14656_v7, %v14626_v58  ;;  %v17872_v51 = vmov 0  ;;  %v15441_v58 = vsub.s32 %v15164_v46, %v649_v61  ;;  %v15446_v7 = vld [vmem:[%s17606_s3] ss:$0 sm:$0xff] }
 0x2e9   : > { %vm15408_vm5 = vmand %vm17862_vm8, %vm17861_vm10  ;;  %vm15422_vm1 = vcmp.lt.s32.totalorder %v17867_v13, 16  ;;  %vm17870_vm10 = vcmp.ne.s32.totalorder %v15305_v57, 0  ;;  %vm17871_vm8 = vcmp.lt.s32.totalorder %v15305_v57, 0  ;;  %v15449_v30 = vadd.s32 18, %v15297_v29 }
 0x2ea   : > { %v17864_v10 = vsel %vm15408_vm5, 4294967295, %v17863_v10  ;;  %17866 = vst [vmem:[#allocation54_spill] sm:$0xff] %v15415_v31  ;;  %vm15434_vm12 = vmand %vm17871_vm8, %vm17870_vm10  ;;  %v15452_v52 = vadd.s32 18, %v15305_v57  ;;  %vm17877_vm10 = vcmp.ne.s32.totalorder %v15320_v18, 0  ;;  %vm17878_vm8 = vcmp.lt.s32.totalorder %v15320_v18, 0 }
 0x2eb   : > { %17865 = vst [vmem:[#allocation53_spill] sm:$0xff] %v17864_v10  ;;  %v17873_v51 = vsel %vm15434_vm12, 4294967295, %v17872_v51  ;;  %17875 = vst [vmem:[#allocation56_spill] sm:$0xff] %v15441_v58  ;;  %v17879_v12 = vmov 0  ;;  %vm745_vm11 = vcmp.lt.s32.totalorder %v15364_v21, 0  ;;  %v15469_v23 = vadd.s32 18, %v15320_v18 }
 0x2ec   : > { %17874 = vst [vmem:[#allocation55_spill] sm:$0xff] %v17873_v51  ;;  %17876 = vst [vmem:[#allocation57_spill] sm:$0xff] %v15452_v52  ;;  %vm17883_vm4 = vcmp.ne.s32.totalorder %v15325_v4, 0  ;;  %vm17884_vm0 = vcmp.lt.s32.totalorder %v15325_v4, 0  ;;  %v17885_v1 = vmov 0  ;;  %v15482_v6 = vadd.s32 18, %v15325_v4 }
 0x2ed   : > { %vm15458_vm3 = vmand %vm17878_vm8, %vm17877_vm10  ;;  %17882 = vst [vmem:[#allocation59_spill] sm:$0xff] %v15469_v23  ;;  %vm17889_vm9 = vcmp.ne.s32.totalorder %v15338_v15, 0  ;;  %vm17890_vm14 = vcmp.lt.s32.totalorder %v15338_v15, 0  ;;  %v17891_v61 = vmov 0  ;;  %v15493_v47 = vadd.s32 18, %v15338_v15  ;;  %v17923_v15 = vld [vmem:[#allocation6_spill] sm:$0xff] }
 0x2ee   : > { %v17880_v12 = vsel %vm15458_vm3, 4294967295, %v17879_v12  ;;  %vm15475_vm10 = vmand %vm17884_vm0, %vm17883_vm4  ;;  %17888 = vst [vmem:[#allocation61_spill] sm:$0xff] %v15482_v6  ;;  %vm746_vm4 = vcmp.lt.s32.totalorder %v15415_v31, 0  ;;  %vm17895_vm15 = vcmp.ne.s32.totalorder %v15364_v21, 0  ;;  %v17896_v13 = vmov 0  ;;  %v18005_v23 = vld [vmem:[#allocation40_spill] sm:$0xff] }
 0x2ef   : > { %17881 = vst [vmem:[#allocation58_spill] sm:$0xff] %v17880_v12  ;;  %v17886_v1 = vsel %vm15475_vm10, 4294967295, %v17885_v1  ;;  %vm15488_vm13 = vmand %vm17890_vm14, %vm17889_vm9  ;;  %v15505_v46 = vadd.s32 18, %v15364_v21  ;;  %v17902_v26 = vmov 0  ;;  %vm17906_vm0 = vnez %v17738_v9 }
 0x2f0   : > { %17887 = vst [vmem:[#allocation60_spill] sm:$0xff] %v17886_v1  ;;  %v17892_v61 = vsel %vm15488_vm13, 4294967295, %v17891_v61  ;;  %17894 = vst [vmem:[#allocation63_spill] sm:$0xff] %v15493_v47  ;;  %v17907_v41 = vsel %vm17906_vm0, %v14683_v35, %v14642_v11  ;;  %v17911_v52 = vmov 0  ;;  %v15551_v9 = vadd.s32 18, %v15441_v58  ;;  %v17922_v35 = vld [vmem:[#allocation8_spill] sm:$0xff] }
 0x2f1   : > { %17893 = vst [vmem:[#allocation62_spill] sm:$0xff] %v17892_v61  ;;  %vm15500_vm8 = vmand %vm745_vm11, %vm17895_vm15  ;;  %vm17900_vm11 = vcmp.ne.s32.totalorder %v15389_v55, 0  ;;  %vm17901_vm15 = vcmp.lt.s32.totalorder %v15389_v55, 0  ;;  %vm15535_vm9 = vcmp.lt.s32.totalorder %v17907_v41, 16  ;;  %vm17916_vm0 = vcmp.ne.s32.totalorder %v15441_v58, 0  ;;  %v17954_v61 = vld [vmem:[#allocation21_spill] sm:$0xff] }
 0x2f2   : > { %v17897_v13 = vsel %vm15500_vm8, 4294967295, %v17896_v13  ;;  %17899 = vst [vmem:[#allocation65_spill] sm:$0xff] %v15505_v46  ;;  %vm15522_vm14 = vmand %vm17901_vm15, %vm17900_vm11  ;;  %vm17910_vm11 = vcmp.ne.s32.totalorder %v15415_v31, 0  ;;  %v17918_v51 = vmov 0 }
 0x2f3   : > { %17898 = vst [vmem:[#allocation64_spill] sm:$0xff] %v17897_v13  ;;  %v17903_v26 = vsel %vm15522_vm14, 4294967295, %v17902_v26  ;;  %vm15543_vm15 = vmand %vm746_vm4, %vm17910_vm11  ;;  %vm17917_vm4 = vcmp.lt.s32.totalorder %v15441_v58, 0 }
 0x2f4   : > { %17904 = vst [vmem:[#allocation66_spill] sm:$0xff] %v17903_v26  ;;  %v17912_v52 = vsel %vm15543_vm15, 4294967295, %v17911_v52  ;;  %17915 = vst [vmem:[#allocation70_spill] sm:$0xff] %v15551_v9 }
 0x2f5   : > { %17913 = vst [vmem:[#allocation68_spill] sm:$0xff] %v17912_v52  ;;  %vm15566_vm11 = vmand %vm17917_vm4, %vm17916_vm0 }
 0x2f6   : > { %v17919_v51 = vsel %vm15566_vm11, 4294967295, %v17918_v51  ;;  %vm17949_vm11 = vsmask.f32 1280 }
 0x2f7   : > { %17920 = vst [vmem:[#allocation71_spill] sm:$0xff] %v17919_v51 }
 0x341   : > { %v12223_v22 = vpop.f32.mrb[0].mxu0 }
 0x342   : > { %v4572_v63 = vadd.f32 %v12223_v22, %v15446_v7  ;;  %v4384_v16 = vpop.f32.mrb[1].mxu0 }
 0x343   : > { %v4570_v8 = vadd.f32 %v15446_v7, %v4384_v16  ;;  %v12224_v27 = vpop.f32.mrb[2].mxu0  ;;  %v15527_v16 = vadd.s32 18, %v15389_v55 }
 0x344   : > { %v4608_v48 = vmax.f32 %v4572_v63, 0.0  ;;  %v4573_v10 = vadd.f32 %v12224_v27, %v15446_v7  ;;  %v4387_v22 = vpop.f32.mrb[3].mxu0  ;;  %v15548_v27 = vadd.s32 18, %v15415_v31 }
 0x345   : > { %17905 = vst [vmem:[#allocation67_spill] sm:$0xff] %v15527_v16  ;;  %v4606_v63 = vmax.f32 %v4570_v8, 0.0  ;;  %v4571_v11 = vadd.f32 %v15446_v7, %v4387_v22 }
 0x346   : > { %17914 = vst [vmem:[#allocation69_spill] sm:$0xff] %v15548_v27  ;;  %v4716_v8 = vsel %vm15345_vm6, %v4608_v48, 0.0  ;;  %v4609_v22 = vmax.f32 %v4573_v10, 0.0  ;;  %vm17921_vm6 = vnez %v17741_v43 }
 0x347   : > { %v11287_v4 = vpack.c.bf16 %v4716_v8, %v4716_v8  ;;  %v4714_v6 = vsel %vm15371_vm2, %v4606_v63, 0.0  ;;  %v4607_v1 = vmax.f32 %v4571_v11, 0.0  ;;  %v17924_v13 = vsel %vm17921_vm6, %v17922_v35, %v17923_v15  ;;  %v17929_v63 = vld [vmem:[#allocation9_spill] sm:$0xff]  ;;  %v17930_v11 = vld [vmem:[#allocation7_spill] sm:$0xff] }
 0x348   : > { %v11285_v48 = vpack.c.bf16 %v4714_v6, %v4714_v6  ;;  %v4717_v10 = vsel %vm15396_vm7, %v4609_v22, 0.0  ;;  %vm15593_vm0 = vcmp.lt.s32.totalorder %v17924_v13, 16  ;;  %vm17928_vm2 = vnez %v17927_v54 }
 0x349   : > { %v17931_v41 = vsel %vm17928_vm2, %v17929_v63, %v17930_v11  ;;  %v4880_v34 = vshrl.u32 %v11287_v4, 16  ;;  %v4883_v6 = vshll.u32 %v11287_v4, 16  ;;  %v11288_v13 = vpack.c.bf16 %v4717_v10, %v4717_v10  ;;  %v17934_v10 = vld [vmem:[#allocation17_spill] sm:$0xff] }
 0x34a   : > { %vm15602_vm4 = vcmp.lt.s32.totalorder %v17931_v41, 16  ;;  %v4715_v35 = vsel %vm15422_vm1, %v4607_v1, 0.0  ;;  %v12227_v41 = vpop.f32.mrb[4].mxu0  ;;  %v4861_v22 = vshrl.u32 %v11285_v48, 16  ;;  %v4864_v54 = vshll.u32 %v11285_v48, 16  ;;  %v17937_v1 = vld [vmem:[#allocation10_spill] sm:$0xff] }
 0x34b   : > { %v11286_v63 = vpack.c.bf16 %v4715_v35, %v4715_v35  ;;  %v4576_v11 = vadd.f32 %v12227_v41, %v15446_v7  ;;  %v4400_v55 = vpop.f32.mrb[5].mxu0  ;;  %v4882_v52 = vrot.slane %v4880_v34, 6  ;;  %v4885_v43 = vrot.slane %v4883_v6, 7  ;;  %v17941_v41 = vld [vmem:[#allocation18_spill] sm:$0xff]  ;;  %v17943_v34 = vld [vmem:[#allocation15_spill] sm:$0xff]  ;;  %v17944_v6 = vld [vmem:[#allocation12_spill] sm:$0xff] }
 0x34c   : > { %v4890_v31 = vshrl.u32 %v11288_v13, 16  ;;  %v4893_v27 = vshll.u32 %v11288_v13, 16  ;;  %v12228_v16 = vpop.f32.mrb[6].mxu0  ;;  %v4863_v51 = vrot.slane %v4861_v22, 6  ;;  %v4866_v15 = vrot.slane %v4864_v54, 7  ;;  %v17977_v22 = vld [vmem:[#allocation28_spill] sm:$0xff] }
 0x34d   : > { %v4870_v58 = vshrl.u32 %v11286_v63, 16  ;;  %v4873_v4 = vshll.u32 %v11286_v63, 16  ;;  %vm17935_vm7 = vnez %v17934_v10  ;;  %v4403_v35 = vpop.f32.mrb[7].mxu0  ;;  %vm17942_vm6 = vnez %v17941_v41  ;;  %v5256_v63 = vld [vmem:[#allocation2 + $0x8] sm:$0xe] }
 0x34e   : > { %v17938_v9 = vsel %vm17935_vm7, %v17936_v25, %v17937_v1  ;;  %v17945_v13 = vsel %vm17942_vm6, %v17943_v34, %v17944_v6  ;;  %v4886_v54 = vor.u32 %v4885_v43, %v4882_v52  ;;  %v4892_v10 = vrot.slane %v4890_v31, 6  ;;  %v17952_v43 = vld [vmem:[#allocation4_spill] sm:$0xff] }
 0x34f   : > { %vm15622_vm1 = vcmp.lt.s32.totalorder %v17938_v9, 16  ;;  %vm15631_vm2 = vcmp.lt.s32.totalorder %v17945_v13, 16  ;;  %v4895_v26 = vrot.slane %v4893_v27, 7  ;;  %v4612_v21 = vmax.f32 %v4576_v11, 0.0 }
 0x350   : > { %vm17948_vm7 = vsmask.f32 5392  ;;  %v4867_v25 = vor.u32 %v4866_v15, %v4863_v51  ;;  %v4872_v1 = vrot.slane %v4870_v58, 6  ;;  %v4875_v41 = vrot.slane %v4873_v4, 7  ;;  %v17956_v51 = vld [vmem:[#allocation20_spill] sm:$0xff]  ;;  %v17957_v58 = vld [vmem:[#allocation13_spill] sm:$0xff] }
 0x351   : > { %vm15637_vm15 = vmor %vm17949_vm11, %vm17948_vm7  ;;  %v4574_v34 = vadd.f32 %v15446_v7, %v4400_v55  ;;  %v4888_v6 = vrot.slane %v4886_v54, 4  ;;  %v15642_v13 = vor.u32 %v4895_v26, %v4892_v10  ;;  %v4720_v52 = vsel %vm15535_vm9, %v4612_v21, 0.0  ;;  %v12231_v4 = vpop.f32.mrb[8].mxu0 }
 0x352   : > { %v4577_v31 = vadd.f32 %v12228_v16, %v15446_v7  ;;  %v4868_v27 = vrot.slane %v4867_v25, 4  ;;  %vm17953_vm6 = vnez %v17952_v43  ;;  %v4876_v46 = vor.u32 %v4875_v41, %v4872_v1  ;;  %v4416_v1 = vpop.f32.mrb[9].mxu0  ;;  %v17964_v43 = vld [vmem:[#allocation16_spill] sm:$0xff] }
 0x353   : > { %v5257_v11 = vsel %vm17953_vm6, %v4867_v25, %v5256_v63  ;;  %v11291_v47 = vpack.c.bf16 %v4720_v52, %v4720_v52  ;;  %vm17955_vm11 = vnez %v17954_v61  ;;  %v4897_v26 = vsel %vm15637_vm15, %v4888_v6, %v15642_v13  ;;  %v17961_v52 = vld [vmem:[#allocation30_spill] sm:$0xff] }
 0x354   : > { %v17958_v15 = vsel %vm17955_vm11, %v17956_v51, %v17957_v58  ;;  %5258 = vst [vmem:[#allocation2 + $0x8] sm:$0xe] %v5257_v11  ;;  %v4898_v57 = vrot.slane %v15642_v13, 4  ;;  %v4610_v21 = vmax.f32 %v4574_v34, 0.0  ;;  %v4613_v16 = vmax.f32 %v4577_v31, 0.0  ;;  %v17963_v31 = vld [vmem:[#allocation23_spill] sm:$0xff] }
 0x355   : > { %vm15654_vm7 = vcmp.lt.s32.totalorder %v17958_v15, 16  ;;  %5261 = vst [vmem:[#allocation2 + $0x14] sm:$0xf] %v4897_v26  ;;  %v4877_v61 = vsel %vm15637_vm15, %v4868_v27, %v4876_v46  ;;  %v4878_v63 = vrot.slane %v4876_v46, 4  ;;  %v4920_v10 = vshrl.u32 %v11291_v47, 16 }
 0x356   : > { %v4923_v25 = vshll.u32 %v11291_v47, 16  ;;  %5259 = vst [vmem:[#allocation2 + $0xc] sm:$0xf] %v4877_v61  ;;  %v4718_v41 = vsel %vm15593_vm0, %v4610_v21, 0.0  ;;  %v4721_v6 = vsel %vm15602_vm4, %v4613_v16, 0.0  ;;  %v4575_v13 = vadd.f32 %v15446_v7, %v4403_v35  ;;  %v12232_v47 = vpop.f32.mrb[10].mxu0 }
 0x357   : > { %v4580_v34 = vadd.f32 %v12231_v4, %v15446_v7  ;;  %vm17962_vm9 = vnez %v17961_v52  ;;  %v4887_v8 = vsel %vm15637_vm15, %v4878_v63, %v4886_v54  ;;  %v4922_v11 = vrot.slane %v4920_v10, 6  ;;  %v4419_v58 = vpop.f32.mrb[11].mxu0 }
 0x358   : > { %v17965_v27 = vsel %vm17962_vm9, %v17963_v31, %v17964_v43  ;;  %v4925_v32 = vrot.slane %v4923_v25, 7  ;;  %v11289_v51 = vpack.c.bf16 %v4718_v41, %v4718_v41  ;;  %5260 = vst [vmem:[#allocation2 + $0x10] sm:$0xf] %v4887_v8  ;;  %v11292_v35 = vpack.c.bf16 %v4721_v6, %v4721_v6 }
 0x359   : > { %vm15675_vm6 = vcmp.lt.s32.totalorder %v17965_v27, 16  ;;  %v4611_v15 = vmax.f32 %v4575_v13, 0.0  ;;  %v4616_v26 = vmax.f32 %v4580_v34, 0.0  ;;  %v4578_v21 = vadd.f32 %v15446_v7, %v4416_v1  ;;  %v17968_v13 = vld [vmem:[#allocation32_spill] sm:$0xff]  ;;  %v17970_v1 = vld [vmem:[#allocation27_spill] sm:$0xff] }
 0x35a   : > { %v4926_v16 = vor.u32 %v4925_v32, %v4922_v11  ;;  %v4900_v4 = vshrl.u32 %v11289_v51, 16  ;;  %v4903_v61 = vshll.u32 %v11289_v51, 16  ;;  %v4581_v52 = vadd.f32 %v12232_v47, %v15446_v7  ;;  %v17971_v34 = vld [vmem:[#allocation19_spill] sm:$0xff]  ;;  %v17975_v51 = vld [vmem:[#allocation33_spill] sm:$0xff] }
 0x35b   : > { %v4930_v31 = vshrl.u32 %v11292_v35, 16  ;;  %v4933_v43 = vshll.u32 %v11292_v35, 16  ;;  %v4719_v54 = vsel %vm15622_vm1, %v4611_v15, 0.0  ;;  %v4724_v63 = vsel %vm15631_vm2, %v4616_v26, 0.0  ;;  %v17978_v35 = vld [vmem:[#allocation22_spill] sm:$0xff] }
 0x35c   : > { %v4928_v10 = vrot.slane %v4926_v16, 4  ;;  %v4902_v25 = vrot.slane %v4900_v4, 6  ;;  %v4905_v41 = vrot.slane %v4903_v61, 7  ;;  %v11290_v6 = vpack.c.bf16 %v4719_v54, %v4719_v54  ;;  %v12235_v4 = vpop.f32.mrb[12].mxu0 }
 0x35d   : > { %vm17969_vm0 = vnez %v17968_v13  ;;  %v4932_v47 = vrot.slane %v4930_v31, 6  ;;  %v4935_v11 = vrot.slane %v4933_v43, 7  ;;  %v11295_v48 = vpack.c.bf16 %v4724_v63, %v4724_v63  ;;  %v17984_v31 = vld [vmem:[#allocation35_spill] sm:$0xff]  ;;  %v17985_v43 = vld [vmem:[#allocation24_spill] sm:$0xff] }
 0x35e   : > { %v17972_v27 = vsel %vm17969_vm0, %v17970_v1, %v17971_v34  ;;  %v4614_v32 = vmax.f32 %v4578_v21, 0.0  ;;  %vm17976_vm1 = vnez %v17975_v51  ;;  %v4906_v61 = vor.u32 %v4905_v41, %v4902_v25  ;;  %v17982_v34 = vld [vmem:[#allocation34_spill] sm:$0xff] }
 0x35f   : > { %vm15692_vm4 = vcmp.lt.s32.totalorder %v17972_v27, 16  ;;  %v17979_v15 = vsel %vm17976_vm1, %v17977_v22, %v17978_v35  ;;  %v4910_v54 = vshrl.u32 %v11290_v6, 16  ;;  %v4913_v13 = vshll.u32 %v11290_v6, 16  ;;  %v4432_v27 = vpop.f32.mrb[13].mxu0 }
 0x360   : > { %vm15701_vm2 = vcmp.lt.s32.totalorder %v17979_v15, 16  ;;  %v4617_v1 = vmax.f32 %v4581_v52, 0.0  ;;  %vm17983_vm11 = vnez %v17982_v34  ;;  %v4936_v51 = vor.u32 %v4935_v11, %v4932_v47  ;;  %v12236_v25 = vpop.f32.mrb[14].mxu0 }
 0x361   : > { %v17986_v63 = vsel %vm17983_vm11, %v17984_v31, %v17985_v43  ;;  %v4960_v22 = vshrl.u32 %v11295_v48, 16  ;;  %v4963_v35 = vshll.u32 %v11295_v48, 16  ;;  %v4722_v15 = vsel %vm15654_vm7, %v4614_v32, 0.0  ;;  %v4435_v18 = vpop.f32.mrb[15].mxu0 }
 0x362   : > { %vm15710_vm9 = vcmp.lt.s32.totalorder %v17986_v63, 16  ;;  %v4907_v52 = vsel %vm15637_vm15, %v4898_v57, %v4906_v61  ;;  %v4908_v41 = vrot.slane %v4906_v61, 4  ;;  %v4912_v6 = vrot.slane %v4910_v54, 6 }
 0x363   : > { %v4915_v34 = vrot.slane %v4913_v13, 7  ;;  %5262 = vst [vmem:[#allocation2 + $0x18] sm:$0xf] %v4907_v52  ;;  %v4937_v31 = vsel %vm15637_vm15, %v4928_v10, %v4936_v51  ;;  %v4938_v43 = vrot.slane %v4936_v51, 4  ;;  %v4962_v63 = vrot.slane %v4960_v22, 6  ;;  %v17989_v52 = vld [vmem:[#allocation36_spill] sm:$0xff] }
 0x364   : > { %v4965_v47 = vrot.slane %v4963_v35, 7  ;;  %5265 = vst [vmem:[#allocation2 + $0x24] sm:$0xf] %v4937_v31  ;;  %v11293_v48 = vpack.c.bf16 %v4722_v15, %v4722_v15  ;;  %v4725_v55 = vsel %vm15675_vm6, %v4617_v1, 0.0  ;;  %v4579_v32 = vadd.f32 %v15446_v7, %v4419_v58  ;;  %v17991_v10 = vld [vmem:[#allocation37_spill] sm:$0xff] }
 0x365   : > { %v4916_v11 = vor.u32 %v4915_v34, %v4912_v6  ;;  %v11296_v61 = vpack.c.bf16 %v4725_v55, %v4725_v55  ;;  %v4584_v54 = vadd.f32 %v12235_v4, %v15446_v7  ;;  %v4582_v13 = vadd.f32 %v15446_v7, %v4432_v27  ;;  %v17992_v51 = vld [vmem:[#allocation25_spill] sm:$0xff]  ;;  %v17996_v6 = vld [vmem:[#allocation38_spill] sm:$0xff]  ;;  %v17998_v4 = vld [vmem:[#allocation39_spill] sm:$0xff] }
 0x366   : > { %v15723_v57 = vor.u32 %v4965_v47, %v4962_v63  ;;  %vm17990_vm7 = vnez %v17989_v52  ;;  %v4940_v1 = vshrl.u32 %v11293_v48, 16  ;;  %v4943_v15 = vshll.u32 %v11293_v48, 16  ;;  %v17999_v34 = vld [vmem:[#allocation26_spill] sm:$0xff] }
 0x367   : > { %v17993_v22 = vsel %vm17990_vm7, %v17991_v10, %v17992_v51  ;;  %v4917_v46 = vsel %vm15637_vm15, %v4908_v41, %v4916_v11  ;;  %v4918_v58 = vrot.slane %v4916_v11, 4  ;;  %vm17997_vm6 = vnez %v17996_v6  ;;  %v12239_v10 = vpop.f32.mrb[16].mxu0 }
 0x368   : > { %vm15732_vm0 = vcmp.lt.s32.totalorder %v17993_v22, 16  ;;  %v18000_v27 = vsel %vm17997_vm6, %v17998_v4, %v17999_v34  ;;  %5263 = vst [vmem:[#allocation2 + $0x1c] sm:$0xf] %v4917_v46  ;;  %v4968_v63 = vrot.slane %v15723_v57, 4  ;;  %v4970_v47 = vshrl.u32 %v11296_v61, 16  ;;  %v4448_v22 = vpop.f32.mrb[17].mxu0 }
 0x369   : > { %vm15743_vm1 = vcmp.lt.s32.totalorder %v18000_v27, 16  ;;  %v4973_v55 = vshll.u32 %v11296_v61, 16  ;;  %v4615_v52 = vmax.f32 %v4579_v32, 0.0  ;;  %v4927_v41 = vsel %vm15637_vm15, %v4918_v58, %v4926_v16  ;;  %v18003_v27 = vld [vmem:[#allocation41_spill] sm:$0xff]  ;;  %v15761_v16 = vpop.f32.mrb[18].mxu0 }
 0x36a   : > { %v4942_v11 = vrot.slane %v4940_v1, 6  ;;  %v4945_v48 = vrot.slane %v4943_v15, 7  ;;  %v4620_v51 = vmax.f32 %v4584_v54, 0.0  ;;  %5264 = vst [vmem:[#allocation2 + $0x20] sm:$0xf] %v4927_v41  ;;  %v4972_v6 = vrot.slane %v4970_v47, 6 }
 0x36b   : > { %v4975_v4 = vrot.slane %v4973_v55, 7  ;;  %v4723_v34 = vsel %vm15692_vm4, %v4615_v52, 0.0  ;;  %v4618_v46 = vmax.f32 %v4582_v13, 0.0  ;;  %vm18004_vm11 = vnez %v18003_v27  ;;  %v18006_v61 = vld [vmem:[#allocation29_spill] sm:$0xff]  ;;  %v15766_v15 = vpop.f32.mrb[19].mxu0 }
 0x36c   : > { %v18007_v32 = vsel %vm18004_vm11, %v18005_v23, %v18006_v61  ;;  %v4946_v54 = vor.u32 %v4945_v48, %v4942_v11  ;;  %v11294_v58 = vpack.c.bf16 %v4723_v34, %v4723_v34  ;;  %v4728_v1 = vsel %vm15701_vm2, %v4620_v51, 0.0 }
 0x36d   : > { %vm15757_vm7 = vcmp.lt.s32.totalorder %v18007_v32, 16  ;;  %v4585_v8 = vadd.f32 %v12236_v25, %v15446_v7  ;;  %v4976_v13 = vor.u32 %v4975_v4, %v4972_v6  ;;  %v11299_v47 = vpack.c.bf16 %v4728_v1, %v4728_v1 }
 0x36e   : > { %v4726_v23 = vsel %vm15710_vm9, %v4618_v46, 0.0  ;;  %v4583_v55 = vadd.f32 %v15446_v7, %v4435_v18  ;;  %v4947_v52 = vsel %vm15637_vm15, %v4938_v43, %v4946_v54  ;;  %v4948_v41 = vrot.slane %v4946_v54, 4  ;;  %v15785_v54 = vpop.f32.mrb[20].mxu0 }
 0x36f   : > { %v4950_v11 = vshrl.u32 %v11294_v58, 16  ;;  %v4953_v48 = vshll.u32 %v11294_v58, 16  ;;  %5266 = vst [vmem:[#allocation2 + $0x28] sm:$0xf] %v4947_v52  ;;  %v4977_v26 = vsel %vm15637_vm15, %v4968_v63, %v4976_v13  ;;  %v4978_v25 = vrot.slane %v4976_v13, 4 }
 0x370   : > { %v5000_v51 = vshrl.u32 %v11299_v47, 16  ;;  %v5003_v34 = vshll.u32 %v11299_v47, 16  ;;  %vm18010_vm4 = vnez %v17807_v37  ;;  %5269 = vst [vmem:[#allocation2 + $0x34] sm:$0xf] %v4977_v26  ;;  %v11297_v4 = vpack.c.bf16 %v4726_v23, %v4726_v23 }
 0x371   : > { %v18011_v21 = vsel %vm18010_vm4, %v15073_v42, %v15033_v19  ;;  %v4952_v43 = vrot.slane %v4950_v11, 6  ;;  %v4955_v6 = vrot.slane %v4953_v48, 7  ;;  %v4621_v46 = vmax.f32 %v4585_v8, 0.0  ;;  %v15789_v42 = vpop.f32.mrb[21].mxu0 }
 0x372   : > { %vm15780_vm2 = vcmp.lt.s32.totalorder %v18011_v21, 16  ;;  %v5002_v27 = vrot.slane %v5000_v51, 6  ;;  %v5005_v61 = vrot.slane %v5003_v34, 7  ;;  %v4619_v63 = vmax.f32 %v4583_v55, 0.0  ;;  %v15804_v35 = vpop.f32.mrb[22].mxu0 }
 0x373   : > { %v4588_v32 = vadd.f32 %v12239_v10, %v15446_v7  ;;  %v4956_v37 = vor.u32 %v4955_v6, %v4952_v43  ;;  %v4980_v58 = vshrl.u32 %v11297_v4, 16  ;;  %v4983_v1 = vshll.u32 %v11297_v4, 16  ;;  %v15808_v31 = vpop.f32.mrb[23].mxu0 }
 0x374   : > { %v4729_v19 = vsel %vm15732_vm0, %v4621_v46, 0.0  ;;  %v15791_v13 = vor.u32 %v5005_v61, %v5002_v27  ;;  %v4727_v8 = vsel %vm15743_vm1, %v4619_v63, 0.0  ;;  %vm18014_vm9 = vnez %v17810_v28 }
 0x375   : > { %v11300_v47 = vpack.c.bf16 %v4729_v19, %v4729_v19  ;;  %v4624_v23 = vmax.f32 %v4588_v32, 0.0  ;;  %v18015_v10 = vsel %vm18014_vm9, %v15082_v3, %v15044_v14  ;;  %v4957_v52 = vsel %vm15637_vm15, %v4948_v41, %v4956_v37  ;;  %v15811_v3 = vld [vmem:[#allocation2 + $0x8] sm:$0xff]  }
 0x376   : > { %vm15800_vm6 = vcmp.lt.s32.totalorder %v18015_v10, 16  ;;  %v4958_v11 = vrot.slane %v4956_v37, 4  ;;  %v4982_v48 = vrot.slane %v4980_v58, 6  ;;  %v4985_v26 = vrot.slane %v4983_v1, 7  ;;  %5267 = vst [vmem:[#allocation2 + $0x2c] sm:$0xf] %v4957_v52 }
 0x377   : > { %v5008_v28 = vrot.slane %v15791_v13, 4  ;;  %v5010_v51 = vshrl.u32 %v11300_v47, 16  ;;  %v5013_v34 = vshll.u32 %v11300_v47, 16  ;;  %v11298_v14 = vpack.c.bf16 %v4727_v8, %v4727_v8 }
 0x378   : > { %v4967_v21 = vsel %vm15637_vm15, %v4958_v11, %v15723_v57  ;;  %v4986_v43 = vor.u32 %v4985_v26, %v4982_v48  ;;  %v4732_v41 = vsel %vm15757_vm7, %v4624_v23, 0.0  ;;  %v4586_v6 = vadd.f32 %v15446_v7, %v4448_v22 }
 0x379   : > { %5268 = vst [vmem:[#allocation2 + $0x30] sm:$0xf] %v4967_v21  ;;  %v5012_v4 = vrot.slane %v5010_v51, 6  ;;  %v5015_v46 = vrot.slane %v5013_v34, 7  ;;  %v4990_v27 = vshrl.u32 %v11298_v14, 16  ;;  %v4993_v61 = vshll.u32 %v11298_v14, 16 }
 0x37a   : > { %vm18018_vm0 = vnez %v17814_v45  ;;  %v4987_v12 = vsel %vm15637_vm15, %v4978_v25, %v4986_v43  ;;  %v4988_v57 = vrot.slane %v4986_v43, 4  ;;  %v11303_v37 = vpack.c.bf16 %v4732_v41, %v4732_v41  ;;  %v15831_v45 = vpop.f32.mrb[24].mxu0  ;;  %v15837_v25 = vld [vmem:[#allocation2 + $0x10] sm:$0xff]   ;;  %v18023_v51 = vld [vmem:[#allocation43_spill] sm:$0xff]  ;;  %v18024_v34 = vld [vmem:[#allocation42_spill] sm:$0xff] }
 0x37b   : > { %v18019_v63 = vsel %vm18018_vm0, %v15094_v2, %v15055_v33  ;;  %v4622_v22 = vmax.f32 %v4586_v6, 0.0  ;;  %5270 = vst [vmem:[#allocation2 + $0x38] sm:$0xf] %v4987_v12  ;;  %v5016_v58 = vor.u32 %v5015_v46, %v5012_v4  ;;  %v4992_v1 = vrot.slane %v4990_v27, 6  ;;  %v15839_v10 = vpop.f32.mrb[25].mxu0 }
 0x37c   : > { %vm15824_vm1 = vcmp.lt.s32.totalorder %v18019_v63, 16  ;;  %v4995_v19 = vrot.slane %v4993_v61, 7  ;;  %v5467_v47 = vshll.u32 %v15811_v3, 16  ;;  %v5040_v8 = vshrl.u32 %v11303_v37, 16 }
 0x37d   : > { %v5043_v33 = vshll.u32 %v11303_v37, 16  ;;  %v4730_v2 = vsel %vm15780_vm2, %v4622_v22, 0.0  ;;  %v4589_v23 = vadd.f32 %v15761_v16, %v15446_v7  ;;  %v5017_v52 = vsel %vm15637_vm15, %v5008_v28, %v5016_v58  ;;  %v15861_v28 = vpop.f32.mrb[26].mxu0 }
 0x37e   : > { %v5018_v11 = vrot.slane %v5016_v58, 4  ;;  %v4996_v48 = vor.u32 %v4995_v19, %v4992_v1  ;;  %v11301_v26 = vpack.c.bf16 %v4730_v2, %v4730_v2  ;;  %vm18022_vm11 = vnez %v17818_v5  ;;  %5273 = vst [vmem:[#allocation2 + $0x44] sm:$0xf] %v5017_v52  ;;  %v15865_v61 = vpop.f32.mrb[27].mxu0 }
 0x37f   : > { %v18025_v14 = vsel %vm18022_vm11, %v18023_v51, %v18024_v34  ;;  %vm18028_vm4 = vnez %v17824_v60  ;;  %v5042_v5 = vrot.slane %v5040_v8, 6  ;;  %v5045_v43 = vrot.slane %v5043_v33, 7 }
 0x380   : > { %vm15848_vm7 = vcmp.lt.s32.totalorder %v18025_v14, 16  ;;  %v18029_v16 = vsel %vm18028_vm4, %v15175_v24, %v15097_v40  ;;  %v5469_v41 = vrot.slane %v5467_v47, 1  ;;  %v4625_v6 = vmax.f32 %v4589_v23, 0.0  ;;  %v18032_v24 = vld [vmem:[#allocation44_spill] sm:$0xff] }
 0x381   : > { %vm15857_vm2 = vcmp.lt.s32.totalorder %v18029_v16, 16  ;;  %v4997_v4 = vsel %vm15637_vm15, %v4988_v57, %v4996_v48  ;;  %v4998_v46 = vrot.slane %v4996_v48, 4  ;;  %v5020_v27 = vshrl.u32 %v11301_v26, 16 }
 0x382   : > { %v5023_v60 = vshll.u32 %v11301_v26, 16  ;;  %5271 = vst [vmem:[#allocation2 + $0x3c] sm:$0xf] %v4997_v4  ;;  %v15867_v40 = vor.u32 %v5045_v43, %v5042_v5  ;;  %vm18033_vm9 = vsmask.f32 7424  ;;  %v4733_v12 = vsel %vm15800_vm6, %v4625_v6, 0.0 }
 0x383   : > { %v5470_v63 = vsel %vm18033_vm9, %v18032_v24, %v5469_v41  ;;  %v4587_v37 = vadd.f32 %v15446_v7, %v15766_v15  ;;  %v5007_v57 = vsel %vm15637_vm15, %v4998_v46, %v15791_v13  ;;  %v5022_v22 = vrot.slane %v5020_v27, 6  ;;  %v15885_v13 = vld [vmem:[#allocation2 + $0x18] sm:$0xff]   ;;  %vm18042_vm4 = vmmov %vm18033_vm9 }
 0x384   : > { %v5025_v58 = vrot.slane %v5023_v60, 7  ;;  %12273 = vmatprep.mubr.bf16.mxu1 %v5470_v63  ;;  %v11304_v1 = vpack.c.bf16 %v4733_v12, %v4733_v12  ;;  %5272 = vst [vmem:[#allocation2 + $0x40] sm:$0xf] %v5007_v57  ;;  %v5048_v19 = vrot.slane %v15867_v40, 4  ;;  %v5471_v8 = vshrl.u32 %v15811_v3, 16  ;;  %v15896_v3 = vpop.f32.mrb[28].mxu0  ;;  %vm18047_vm9 = vmmov %vm18042_vm4 }
 0x385   : > { %v4623_v47 = vmax.f32 %v4587_v37, 0.0  ;;  %v5475_v55 = vshll.u32 %v15837_v25, 16  ;;  %v4592_v23 = vadd.f32 %v15785_v54, %v15446_v7  ;;  %vm18034_vm6 = vnez %v17827_v38  ;;  %v13532_v38 = vld [vmem:[%s17605_s2 + $0x8] sm:$0xff]   ;;  %v15905_v14 = vpop.f32.mrb[29].mxu0  ;;  %v13664_v63 = vld [vmem:[%s17605_s2] sm:$0xff]  }
 0x386   : > { %v15881_v33 = vor.u32 %v5025_v58, %v5022_v22  ;;  %v5050_v2 = vshrl.u32 %v11304_v1, 16  ;;  %v5053_v15 = vshll.u32 %v11304_v1, 16  ;;  %v18035_v52 = vsel %vm18034_vm6, %v15252_v56, %v15141_v44  ;;  %v15920_v43 = vpop.f32.mrb[30].mxu0  ;;  %v13535_v58 = vld [vmem:[%s17605_s2 + $0x10] sm:$0xff]  }
 0x387   : > { %vm15892_vm0 = vcmp.lt.s32.totalorder %v18035_v52, 16  ;;  %v4731_v26 = vsel %vm15824_vm1, %v4623_v47, 0.0  ;;  %v5473_v51 = vor.u32 %v5471_v8, %v5469_v41  ;;  %v5477_v34 = vrot.slane %v5475_v55, 1  ;;  %v15923_v46 = vpop.f32.mrb[31].mxu0  ;;  %v13538_v52 = vld [vmem:[%s17605_s2 + $0x18] sm:$0xff]  }
 0x388   : > { %v4590_v54 = vadd.f32 %v15446_v7, %v15789_v42  ;;  %v5027_v44 = vsel %vm15637_vm15, %v5018_v11, %v15881_v33  ;;  %v5028_v56 = vrot.slane %v15881_v33, 4  ;;  %v5052_v16 = vrot.slane %v5050_v2, 6 }
 0x389   : > { %v5055_v32 = vrot.slane %v5053_v15, 7  ;;  %vm18038_vm1 = vnez %v17833_v20  ;;  %5274 = vst [vmem:[#allocation2 + $0x48] sm:$0xf] %v5027_v44  ;;  %v11302_v41 = vpack.c.bf16 %v4731_v26, %v4731_v26  ;;  %v5478_v6 = vsel %vm18042_vm4, %v5473_v51, %v5477_v34  ;;  %v15959_v26 = vpop.f32.mrb[32].mxu0 }
 0x38a   : > { %v18039_v5 = vsel %vm18038_vm1, %v15287_v49, %v15192_v17  ;;  %v4628_v11 = vmax.f32 %v4592_v23, 0.0  ;;  %v4626_v4 = vmax.f32 %v4590_v54, 0.0  ;;  %12274 = vmatmul.mubr.bf16.vlgmr.msra.gmra.mrb[0].mxu1 %v5478_v6  ;;  %v5479_v20 = vshrl.u32 %v15837_v25, 16  ;;  %v15954_v23 = vld [vmem:[#allocation2 + $0x20] sm:$0xff]   ;;  %v15973_v44 = vpop.f32.mrb[33].mxu0  ;;  %v13548_v54 = vld [vmem:[%s17605_s2 + $0x30] sm:$0xff]  }
 0x38b   : > { %vm15916_vm11 = vcmp.lt.s32.totalorder %v18039_v5, 16  ;;  %v15925_v27 = vor.u32 %v5055_v32, %v5052_v16  ;;  %v5483_v17 = vshll.u32 %v15885_v13, 16  ;;  %v4593_v49 = vadd.f32 %v15804_v35, %v15446_v7  ;;  %12310 = vmatpush3.bf16.msra.mxu1 %v13664_v63 }
 0x38c   : > { %v5030_v60 = vshrl.u32 %v11302_v41, 16  ;;  %v5033_v24 = vshll.u32 %v11302_v41, 16  ;;  %v4736_v12 = vsel %vm15848_vm7, %v4628_v11, 0.0  ;;  %v4734_v37 = vsel %vm15857_vm2, %v4626_v4, 0.0  ;;  %12311 = vmatprep.subr.bf16.mxu1 %v13532_v38 }
 0x38d   : > { %v5057_v25 = vsel %vm15637_vm15, %v5048_v19, %v15925_v27  ;;  %v5058_v57 = vrot.slane %v15925_v27, 4  ;;  %v11307_v35 = vpack.c.bf16 %v4736_v12, %v4736_v12  ;;  %v11305_v22 = vpack.c.bf16 %v4734_v37, %v4734_v37  ;;  %v16013_v37 = vld [vmem:[#allocation2 + $0x28] sm:$0xff]  }
 0x38e   : > { %5277 = vst [vmem:[#allocation2 + $0x54] sm:$0xf] %v5057_v25  ;;  %v5032_v1 = vrot.slane %v5030_v60, 6  ;;  %v5035_v18 = vrot.slane %v5033_v24, 7  ;;  %v5481_v47 = vor.u32 %v5479_v20, %v5477_v34  ;;  %v5485_v8 = vrot.slane %v5483_v17, 1  ;;  %v18053_v60 = vld [vmem:[#allocation51_spill] sm:$0xff] }
 0x38f   : > { %vm18043_vm7 = vnez %v17839_v39  ;;  %v5080_v55 = vshrl.u32 %v11307_v35, 16  ;;  %v5083_v33 = vshll.u32 %v11307_v35, 16  ;;  %v5060_v2 = vshrl.u32 %v11305_v22, 16  ;;  %12312 = vmatpush3.bf16.msra.mxu1 %v13532_v38  ;;  %v18054_v24 = vld [vmem:[#allocation45_spill] sm:$0xff] }
 0x390   : > { %v18044_v21 = vsel %vm18043_vm7, %v15301_v59, %v15268_v53  ;;  %v5063_v15 = vshll.u32 %v11305_v22, 16  ;;  %v5036_v39 = vor.u32 %v5035_v18, %v5032_v1  ;;  %v5486_v51 = vsel %vm18047_vm9, %v5481_v47, %v5485_v8  ;;  %12313 = vmatprep.subr.bf16.mxu1 %v13535_v58 }
 0x391   : > { %vm15950_vm2 = vcmp.lt.s32.totalorder %v18044_v21, 16  ;;  %v4629_v53 = vmax.f32 %v4593_v49, 0.0  ;;  %v4591_v59 = vadd.f32 %v15446_v7, %v15808_v31  ;;  %vm18048_vm6 = vnez %v17847_v50  ;;  %12277 = vmatprep.mubr.bf16.mxu1 %v5486_v51 }
 0x392   : > { %v18049_v34 = vsel %vm18048_vm6, %v15317_v62, %v15279_v0  ;;  %v5082_v16 = vrot.slane %v5080_v55, 6  ;;  %v5085_v32 = vrot.slane %v5083_v33, 7  ;;  %v5062_v5 = vrot.slane %v5060_v2, 6  ;;  %v15979_v62 = vpop.f32.mrb[34].mxu0 }
 0x393   : > { %vm15969_vm1 = vcmp.lt.s32.totalorder %v18049_v34, 16  ;;  %v5065_v41 = vrot.slane %v5063_v15, 7  ;;  %v5037_v31 = vsel %vm15637_vm15, %v5028_v56, %v5036_v39  ;;  %v5038_v38 = vrot.slane %v5036_v39, 4  ;;  %v15986_v20 = vpop.f32.mrb[35].mxu0  ;;  %12314 = vmatpush3.bf16.msra.mxu1 %v13535_v58 }
 0x394   : > { %v4737_v50 = vsel %vm15892_vm0, %v4629_v53, 0.0  ;;  %v4627_v0 = vmax.f32 %v4591_v59, 0.0  ;;  %5275 = vst [vmem:[#allocation2 + $0x4c] sm:$0xf] %v5037_v31  ;;  %v15981_v6 = vor.u32 %v5085_v32, %v5082_v16  ;;  %v5487_v27 = vshrl.u32 %v15885_v13, 16  ;;  %12315 = vmatprep.subr.bf16.mxu1 %v13538_v52 }
 0x395   : > { %v15983_v11 = vor.u32 %v5065_v41, %v5062_v5  ;;  %v11308_v4 = vpack.c.bf16 %v4737_v50, %v4737_v50  ;;  %v5047_v56 = vsel %vm15637_vm15, %v5038_v38, %v15867_v40  ;;  %v5491_v17 = vshll.u32 %v15954_v23, 16  ;;  %v13541_v40 = vld [vmem:[%s17605_s2 + $0x20] sm:$0xff]  }
 0x396   : > { %v4735_v48 = vsel %vm15916_vm11, %v4627_v0, 0.0  ;;  %v4596_v49 = vadd.f32 %v15831_v45, %v15446_v7  ;;  %vm18052_vm0 = vnez %v17855_v36  ;;  %5276 = vst [vmem:[#allocation2 + $0x50] sm:$0xf] %v5047_v56  ;;  %v5088_v42 = vrot.slane %v15981_v6, 4  ;;  %v18066_v56 = vld [vmem:[#allocation46_spill] sm:$0xff] }
 0x397   : > { %v18055_v63 = vsel %vm18052_vm0, %v18053_v60, %v18054_v24  ;;  %v5067_v45 = vsel %vm15637_vm15, %v5058_v57, %v15983_v11  ;;  %v5068_v36 = vrot.slane %v15983_v11, 4  ;;  %v5090_v12 = vshrl.u32 %v11308_v4, 16  ;;  %12316 = vmatpush3.bf16.msra.mxu1 %v13538_v52 }
 0x398   : > { %vm16001_vm4 = vcmp.lt.s32.totalorder %v18055_v63, 16  ;;  %v18059_v35 = vsel %vm15408_vm5, %v15449_v30, %v15297_v29  ;;  %5278 = vst [vmem:[#allocation2 + $0x58] sm:$0xf] %v5067_v45  ;;  %v5093_v58 = vshll.u32 %v11308_v4, 16  ;;  %v11306_v1 = vpack.c.bf16 %v4735_v48, %v4735_v48  ;;  %vm18062_vm5 = vmmov %vm18047_vm9  ;;  %12317 = vmatprep.subr.bf16.mxu1 %v13541_v40 }
 0x399   : > { %vm16020_vm11 = vcmp.lt.s32.totalorder %v18059_v35, 16  ;;  %v5489_v18 = vor.u32 %v5487_v27, %v5485_v8  ;;  %v5493_v57 = vrot.slane %v5491_v17, 1  ;;  %v5092_v47 = vrot.slane %v5090_v12, 6  ;;  %vm18063_vm7 = vmmov %vm18062_vm5 }
 0x39a   : > { %v4632_v21 = vmax.f32 %v4596_v49, 0.0  ;;  %v4594_v55 = vadd.f32 %v15446_v7, %v15839_v10  ;;  %v5495_v33 = vshrl.u32 %v15954_v23, 16  ;;  %v5095_v2 = vrot.slane %v5093_v58, 7  ;;  %v13544_v10 = vld [vmem:[%s17605_s2 + $0x28] sm:$0xff]  }
 0x39b   : > { %v5070_v15 = vshrl.u32 %v11306_v1, 16  ;;  %v5073_v29 = vshll.u32 %v11306_v1, 16  ;;  %v5494_v30 = vsel %vm18062_vm5, %v5489_v18, %v5493_v57  ;;  %v5499_v53 = vshll.u32 %v16013_v37, 16  ;;  %12318 = vmatpush3.bf16.msra.mxu1 %v13541_v40  ;;  %v16061_v40 = vld [vmem:[#allocation2 + $0x30] sm:$0xff]   ;;  %v18071_v58 = vld [vmem:[#allocation59_spill] sm:$0xff] }
 0x39c   : > { %12278 = vmatmul.mubr.bf16.gmra.mrb[4].mxu1 %v5494_v30  ;;  %v4740_v39 = vsel %vm15950_vm2, %v4632_v21, 0.0  ;;  %v4630_v51 = vmax.f32 %v4594_v55, 0.0  ;;  %v5497_v8 = vor.u32 %v5495_v33, %v5493_v57  ;;  %v16034_v59 = vor.u32 %v5095_v2, %v5092_v47  ;;  %12319 = vmatprep.subr.bf16.mxu1 %v13544_v10  ;;  %v18072_v1 = vld [vmem:[#allocation47_spill] sm:$0xff]  ;;  %v18077_v30 = vld [vmem:[#allocation61_spill] sm:$0xff] }
 0x39d   : > { %v5072_v34 = vrot.slane %v5070_v15, 6  ;;  %v5075_v16 = vrot.slane %v5073_v29, 7  ;;  %v11311_v32 = vpack.c.bf16 %v4740_v39, %v4740_v39  ;;  %v5501_v5 = vrot.slane %v5499_v53, 1  ;;  %v18078_v39 = vld [vmem:[#allocation48_spill] sm:$0xff] }
 0x39e   : > { %v4738_v52 = vsel %vm15969_vm1, %v4630_v51, 0.0  ;;  %v4597_v19 = vadd.f32 %v15861_v28, %v15446_v7  ;;  %v4595_v41 = vadd.f32 %v15446_v7, %v15865_v61  ;;  %v5097_v31 = vsel %vm15637_vm15, %v5088_v42, %v16034_v59  ;;  %v18065_v61 = vld [vmem:[#allocation57_spill] sm:$0xff] }
 0x39f   : > { %v5098_v38 = vrot.slane %v16034_v59, 4  ;;  %v5076_v50 = vor.u32 %v5075_v16, %v5072_v34  ;;  %v5120_v0 = vshrl.u32 %v11311_v32, 16  ;;  %5281 = vst [vmem:[#allocation2 + $0x64] sm:$0xf] %v5097_v31  ;;  %v5123_v11 = vshll.u32 %v11311_v32, 16  ;;  %12320 = vmatpush3.bf16.msra.mxu1 %v13544_v10  ;;  %v18083_v31 = vld [vmem:[#allocation63_spill] sm:$0xff] }
 0x3a0   : > { %v11309_v4 = vpack.c.bf16 %v4738_v52, %v4738_v52  ;;  %v5502_v28 = vsel %vm18063_vm7, %v5497_v8, %v5501_v5  ;;  %v4633_v27 = vmax.f32 %v4597_v19, 0.0  ;;  %v18067_v48 = vsel %vm15434_vm12, %v18065_v61, %v18066_v56  ;;  %12321 = vmatprep.subr.bf16.mxu1 %v13548_v54  ;;  %v16093_v19 = vld [vmem:[#allocation2 + $0x38] sm:$0xff]   ;;  %vm18117_vm7 = vmmov %vm18062_vm5 }
 0x3a1   : > { %vm16055_vm2 = vcmp.lt.s32.totalorder %v18067_v48, 16  ;;  %v5077_v49 = vsel %vm15637_vm15, %v5068_v36, %v5076_v50  ;;  %v5078_v60 = vrot.slane %v5076_v50, 4  ;;  %v5122_v24 = vrot.slane %v5120_v0, 6  ;;  %12281 = vmatprep.mubr.bf16.mxu1 %v5502_v28  ;;  %v18084_v50 = vld [vmem:[#allocation49_spill] sm:$0xff] }
 0x3a2   : > { %v4631_v63 = vmax.f32 %v4595_v41, 0.0  ;;  %5279 = vst [vmem:[#allocation2 + $0x5c] sm:$0xf] %v5077_v49  ;;  %v5125_v42 = vrot.slane %v5123_v11, 7  ;;  %v5100_v45 = vshrl.u32 %v11309_v4, 16  ;;  %v5103_v12 = vshll.u32 %v11309_v4, 16 }
 0x3a3   : > { %v4741_v25 = vsel %vm16001_vm4, %v4633_v27, 0.0  ;;  %v18073_v18 = vsel %vm15458_vm3, %v18071_v58, %v18072_v1  ;;  %v5087_v57 = vsel %vm15637_vm15, %v5078_v60, %v15981_v6  ;;  %v5503_v13 = vshrl.u32 %v16013_v37, 16  ;;  %v13551_v6 = vld [vmem:[%s17605_s2 + $0x38] sm:$0xff]   ;;  %v16107_v27 = vld [vmem:[%s17606_s3] ss:$0 sm:$0xff]  ;;  %12322 = vmatpush3.bf16.msra.mxu1 %v13548_v54 }
 0x3a4   : > { %vm16070_vm12 = vcmp.lt.s32.totalorder %v18073_v18, 16  ;;  %v11312_v47 = vpack.c.bf16 %v4741_v25, %v4741_v25  ;;  %v4739_v21 = vsel %vm16020_vm11, %v4631_v63, 0.0  ;;  %5280 = vst [vmem:[#allocation2 + $0x60] sm:$0xf] %v5087_v57  ;;  %v5126_v55 = vor.u32 %v5125_v42, %v5122_v24  ;;  %12323 = vmatprep.subr.bf16.mxu1 %v13551_v6  ;;  %v16116_v60 = vld [vmem:[%s17605_s2 + $0x80] sm:$0xff]   ;;  %vm18116_vm11 = vmmov %vm18062_vm5 }
 0x3a5   : > { %v5102_v33 = vrot.slane %v5100_v45, 6  ;;  %v5105_v2 = vrot.slane %v5103_v12, 7  ;;  %v11310_v15 = vpack.c.bf16 %v4739_v21, %v4739_v21  ;;  %v18079_v51 = vsel %vm15475_vm10, %v18077_v30, %v18078_v39  ;;  %v16149_v39 = vld [vmem:[#allocation2 + $0x40] sm:$0xff]  }
 0x3a6   : > { %vm16085_vm3 = vcmp.lt.s32.totalorder %v18079_v51, 16  ;;  %v5130_v22 = vshrl.u32 %v11312_v47, 16  ;;  %v5133_v53 = vshll.u32 %v11312_v47, 16  ;;  %v5505_v10 = vor.u32 %v5503_v13, %v5501_v5  ;;  %v18091_v13 = vld [vmem:[#allocation50_spill] sm:$0xff] }
 0x3a7   : > { %v5507_v59 = vshll.u32 %v16061_v40, 16  ;;  %v5128_v34 = vrot.slane %v5126_v55, 4  ;;  %v5106_v16 = vor.u32 %v5105_v2, %v5102_v33  ;;  %v5110_v32 = vshrl.u32 %v11310_v15, 16  ;;  %12324 = vmatpush3.bf16.msra.mxu1 %v13551_v6 }
 0x3a8   : > { %v5113_v52 = vshll.u32 %v11310_v15, 16  ;;  %v18085_v0 = vsel %vm15488_vm13, %v18083_v31, %v18084_v50  ;;  %v5132_v4 = vrot.slane %v5130_v22, 6  ;;  %v5135_v28 = vrot.slane %v5133_v53, 7  ;;  %vm18088_vm13 = vmmov %vm18062_vm5  ;;  %12361 = vmatprep.subr.bf16.mxu1 %v16116_v60  ;;  %v18098_v31 = vld [vmem:[#allocation52_spill] sm:$0xff] }
 0x3a9   : > { %vm16100_vm10 = vcmp.lt.s32.totalorder %v18085_v0, 16  ;;  %v5509_v5 = vrot.slane %v5507_v59, 1  ;;  %v4600_v7 = vadd.f32 %v16107_v27, %v15896_v3  ;;  %v5107_v61 = vsel %vm15637_vm15, %v5098_v38, %v5106_v16 }
 0x3aa   : > { %v5108_v56 = vrot.slane %v5106_v16, 4  ;;  %v5112_v48 = vrot.slane %v5110_v32, 6  ;;  %v5115_v49 = vrot.slane %v5113_v52, 7  ;;  %5282 = vst [vmem:[#allocation2 + $0x68] sm:$0xf] %v5107_v61  ;;  %v16118_v24 = vor.u32 %v5135_v28, %v5132_v4 }
 0x3ab   : > { %v5510_v63 = vsel %vm18088_vm13, %v5505_v10, %v5509_v5  ;;  %v4636_v42 = vmax.f32 %v4600_v7, 0.0  ;;  %v4598_v3 = vadd.f32 %v16107_v27, %v15905_v14  ;;  %v5511_v38 = vshrl.u32 %v16061_v40, 16 }
 0x3ac   : > { %v5116_v54 = vor.u32 %v5115_v49, %v5112_v48  ;;  %12282 = vmatmul.mubr.bf16.gmra.mrb[8].mxu1 %v5510_v63  ;;  %v5515_v45 = vshll.u32 %v16093_v19, 16  ;;  %v4601_v12 = vadd.f32 %v16107_v27, %v15920_v43  ;;  %v5137_v25 = vsel %vm15637_vm15, %v5128_v34, %v16118_v24  ;;  %v18090_v43 = vld [vmem:[#allocation65_spill] sm:$0xff]  ;;  %v18102_v49 = vld [vmem:[#allocation68_spill] sm:$0xff]  ;;  %v18105_v63 = vld [vmem:[#allocation54_spill] sm:$0xff] }
 0x3ad   : > { %v5138_v35 = vrot.slane %v16118_v24, 4  ;;  %v4744_v58 = vsel %vm16055_vm2, %v4636_v42, 0.0  ;;  %v4634_v1 = vmax.f32 %v4598_v3, 0.0  ;;  %5285 = vst [vmem:[#allocation2 + $0x74] sm:$0xf] %v5137_v25  ;;  %v5513_v47 = vor.u32 %v5511_v38, %v5509_v5  ;;  %v18104_v24 = vld [vmem:[#allocation69_spill] sm:$0xff]  ;;  %vm18118_vm2 = vmmov %vm18062_vm5 }
 0x3ae   : > { %v5117_v14 = vsel %vm15637_vm15, %v5108_v56, %v5116_v54  ;;  %v5118_v18 = vrot.slane %v5116_v54, 4  ;;  %v11315_v57 = vpack.c.bf16 %v4744_v58, %v4744_v58  ;;  %v18092_v33 = vsel %vm15500_vm8, %v18090_v43, %v18091_v13  ;;  %vm18095_vm8 = vmmov %vm18062_vm5 }
 0x3af   : > { %vm16140_vm9 = vcmp.lt.s32.totalorder %v18092_v33, 16  ;;  %5283 = vst [vmem:[#allocation2 + $0x6c] sm:$0xf] %v5117_v14  ;;  %v4742_v17 = vsel %vm16070_vm12, %v4634_v1, 0.0  ;;  %v5517_v15 = vrot.slane %v5515_v45, 1  ;;  %v4637_v29 = vmax.f32 %v4601_v12, 0.0  ;;  %vm18123_vm13 = vmmov %vm18118_vm2 }
 0x3b0   : > { %v4599_v30 = vadd.f32 %v16107_v27, %v15923_v46  ;;  %v5127_v51 = vsel %vm15637_vm15, %v5118_v18, %v5126_v55  ;;  %v5160_v6 = vshrl.u32 %v11315_v57, 16  ;;  %v5163_v22 = vshll.u32 %v11315_v57, 16  ;;  %v18097_v55 = vld [vmem:[#allocation67_spill] sm:$0xff]  ;;  %v18111_v57 = vld [vmem:[#allocation70_spill] sm:$0xff] }
 0x3b1   : > { %v11313_v53 = vpack.c.bf16 %v4742_v17, %v4742_v17  ;;  %5284 = vst [vmem:[#allocation2 + $0x70] sm:$0xf] %v5127_v51  ;;  %v5518_v10 = vsel %vm18095_vm8, %v5513_v47, %v5517_v15  ;;  %v4745_v36 = vsel %vm16085_vm3, %v4637_v29, 0.0  ;;  %v5519_v34 = vshrl.u32 %v16093_v19, 16  ;;  %v16180_v14 = vld [vmem:[#allocation2 + $0x48] sm:$0xff]   ;;  %vm18121_vm3 = vmmov %vm18118_vm2 }
 0x3b2   : > { %v4635_v59 = vmax.f32 %v4599_v30, 0.0  ;;  %v5162_v16 = vrot.slane %v5160_v6, 6  ;;  %v5165_v32 = vrot.slane %v5163_v22, 7  ;;  %12285 = vmatprep.mubr.bf16.mxu1 %v5518_v10  ;;  %v18099_v50 = vsel %vm15522_vm14, %v18097_v55, %v18098_v31  ;;  %v18109_v18 = vld [vmem:[#allocation71_spill] sm:$0xff]  ;;  %v18112_v47 = vld [vmem:[#allocation56_spill] sm:$0xff]  ;;  %vm18126_vm8 = vmmov %vm18118_vm2 }
 0x3b3   : > { %v5140_v46 = vshrl.u32 %v11313_v53, 16  ;;  %v5143_v52 = vshll.u32 %v11313_v53, 16  ;;  %vm16162_vm6 = vcmp.lt.s32.totalorder %v18099_v50, 16  ;;  %v11316_v4 = vpack.c.bf16 %v4745_v36, %v4745_v36 }
 0x3b4   : > { %v4743_v8 = vsel %vm16100_vm10, %v4635_v59, 0.0  ;;  %v5521_v28 = vor.u32 %v5519_v34, %v5517_v15  ;;  %v5523_v5 = vshll.u32 %v16149_v39, 16  ;;  %v5166_v7 = vor.u32 %v5165_v32, %v5162_v16  ;;  %vm18122_vm10 = vmmov %vm18118_vm2 }
 0x3b5   : > { %v5142_v61 = vrot.slane %v5140_v46, 6  ;;  %v5145_v56 = vrot.slane %v5143_v52, 7  ;;  %v11314_v48 = vpack.c.bf16 %v4743_v8, %v4743_v8  ;;  %vm18103_vm1 = vnez %v18102_v49  ;;  %v16210_v8 = vld [vmem:[#allocation2 + $0x50] sm:$0xff]  }
 0x3b6   : > { %v18106_v42 = vsel %vm18103_vm1, %v18104_v24, %v18105_v63  ;;  %v5170_v54 = vshrl.u32 %v11316_v4, 16  ;;  %v5173_v38 = vshll.u32 %v11316_v4, 16  ;;  %v5525_v11 = vrot.slane %v5523_v5, 1  ;;  %v16218_v63 = vld [vmem:[#allocation2 + $0x58] sm:$0xff]  }
 0x3b7   : > { %vm16174_vm14 = vcmp.lt.s32.totalorder %v18106_v42, 16  ;;  %v4604_v45 = vadd.f32 %v16107_v27, %v15959_v26  ;;  %v5168_v12 = vrot.slane %v5166_v7, 4  ;;  %v5146_v25 = vor.u32 %v5145_v56, %v5142_v61 }
 0x3b8   : > { %v5150_v58 = vshrl.u32 %v11314_v48, 16  ;;  %v5153_v1 = vshll.u32 %v11314_v48, 16  ;;  %vm18110_vm0 = vnez %v18109_v18  ;;  %v5172_v13 = vrot.slane %v5170_v54, 6 }
 0x3b9   : > { %v18113_v21 = vsel %vm18110_vm0, %v18111_v57, %v18112_v47  ;;  %v5175_v33 = vrot.slane %v5173_v38, 7  ;;  %v5526_v17 = vsel %vm18116_vm11, %v5521_v28, %v5525_v11  ;;  %v4640_v26 = vmax.f32 %v4604_v45, 0.0 }
 0x3ba   : > { %vm16187_vm4 = vcmp.lt.s32.totalorder %v18113_v21, 16  ;;  %v5147_v15 = vsel %vm15637_vm15, %v5138_v35, %v5146_v25  ;;  %v5148_v29 = vrot.slane %v5146_v25, 4  ;;  %v5152_v30 = vrot.slane %v5150_v58, 6  ;;  %12286 = vmatmul.mubr.bf16.gmra.mrb[12].mxu1 %v5526_v17 }
 0x3bb   : > { %v5155_v51 = vrot.slane %v5153_v1, 7  ;;  %5286 = vst [vmem:[#allocation2 + $0x78] sm:$0xf] %v5147_v15  ;;  %v5176_v6 = vor.u32 %v5175_v33, %v5172_v13  ;;  %v4748_v22 = vsel %vm16140_vm9, %v4640_v26, 0.0  ;;  %v4602_v53 = vadd.f32 %v16107_v27, %v15973_v44  ;;  %v16229_v26 = vld [vmem:[#allocation2 + $0x68] sm:$0xff]   ;;  %vm18125_vm9 = vmmov %vm18118_vm2 }
 0x3bc   : > { %v5527_v10 = vshrl.u32 %v16149_v39, 16  ;;  %v11319_v59 = vpack.c.bf16 %v4748_v22, %v4748_v22  ;;  %v5531_v34 = vshll.u32 %v16180_v14, 16  ;;  %v4605_v35 = vadd.f32 %v16107_v27, %v15979_v62 }
 0x3bd   : > { %v5156_v36 = vor.u32 %v5155_v51, %v5152_v30  ;;  %v5177_v16 = vsel %vm15637_vm15, %v5168_v12, %v5176_v6  ;;  %v5178_v32 = vrot.slane %v5176_v6, 4  ;;  %v4638_v46 = vmax.f32 %v4602_v53, 0.0  ;;  %v5294_v53 = vld [vmem:[#allocation2 + $0x98] sm:$0x3] }
 0x3be   : > { %v5529_v52 = vor.u32 %v5527_v10, %v5525_v11  ;;  %5289 = vst [vmem:[#allocation2 + $0x84] sm:$0xf] %v5177_v16  ;;  %v5200_v41 = vshrl.u32 %v11319_v59, 16  ;;  %v5203_v55 = vshll.u32 %v11319_v59, 16  ;;  %v5533_v50 = vrot.slane %v5531_v34, 1  ;;  %v16234_v59 = vld [vmem:[#allocation2 + $0x70] sm:$0xff]  }
 0x3bf   : > { %v5157_v2 = vsel %vm15637_vm15, %v5148_v29, %v5156_v36  ;;  %v5158_v44 = vrot.slane %v5156_v36, 4  ;;  %v4746_v31 = vsel %vm16162_vm6, %v4638_v46, 0.0  ;;  %v4641_v4 = vmax.f32 %v4605_v35, 0.0  ;;  %vm18127_vm6 = vmmov %vm18118_vm2 }
 0x3c0   : > { %5287 = vst [vmem:[#allocation2 + $0x7c] sm:$0xf] %v5157_v2  ;;  %v4603_v62 = vadd.f32 %v16107_v27, %v15986_v20  ;;  %v5202_v5 = vrot.slane %v5200_v41, 6  ;;  %v5205_v61 = vrot.slane %v5203_v55, 7  ;;  %v11317_v56 = vpack.c.bf16 %v4746_v31, %v4746_v31  ;;  %v16220_v20 = vld [vmem:[#allocation2 + $0x60] sm:$0xff]  }
 0x3c1   : > { %v5167_v28 = vsel %vm15637_vm15, %v5158_v44, %v5166_v7  ;;  %v5534_v48 = vsel %vm18062_vm5, %v5529_v52, %v5533_v50  ;;  %v4749_v0 = vsel %vm16174_vm14, %v4641_v4, 0.0  ;;  %v5535_v24 = vshrl.u32 %v16180_v14, 16 }
 0x3c2   : > { %5288 = vst [vmem:[#allocation2 + $0x80] sm:$0xf] %v5167_v28  ;;  %v4639_v49 = vmax.f32 %v4603_v62, 0.0  ;;  %v5206_v27 = vor.u32 %v5205_v61, %v5202_v5  ;;  %v5180_v42 = vshrl.u32 %v11317_v56, 16  ;;  %v5183_v54 = vshll.u32 %v11317_v56, 16  ;;  %12289 = vmatprep.mubr.bf16.mxu1 %v5534_v48  ;;  %v18119_v5 = vld [vmem:[#allocation3_spill] sm:$0xff] }
 0x3c3   : > { %v11320_v7 = vpack.c.bf16 %v4749_v0, %v4749_v0  ;;  %v5537_v11 = vor.u32 %v5535_v24, %v5533_v50  ;;  %v5539_v45 = vshll.u32 %v16210_v8, 16  ;;  %v5543_v3 = vshrl.u32 %v16210_v8, 16 }
 0x3c4   : > { %v4747_v38 = vsel %vm16187_vm4, %v4639_v49, 0.0  ;;  %v5208_v12 = vrot.slane %v5206_v27, 4  ;;  %v5182_v25 = vrot.slane %v5180_v42, 6  ;;  %v5185_v58 = vrot.slane %v5183_v54, 7 }
 0x3c5   : > { %v5210_v1 = vshrl.u32 %v11320_v7, 16  ;;  %v5213_v18 = vshll.u32 %v11320_v7, 16  ;;  %v11318_v57 = vpack.c.bf16 %v4747_v38, %v4747_v38  ;;  %v5541_v47 = vrot.slane %v5539_v45, 1 }
 0x3c6   : > { %v5547_v21 = vshll.u32 %v16218_v63, 16  ;;  %v5186_v13 = vor.u32 %v5185_v58, %v5182_v25  ;;  %v5551_v17 = vshrl.u32 %v16218_v63, 16  ;;  %v5555_v43 = vshll.u32 %v16220_v20, 16 }
 0x3c7   : > { %v5212_v33 = vrot.slane %v5210_v1, 6  ;;  %v5215_v15 = vrot.slane %v5213_v18, 7  ;;  %v5190_v29 = vshrl.u32 %v11318_v57, 16  ;;  %v5193_v30 = vshll.u32 %v11318_v57, 16  ;;  %v16236_v52 = vld [vmem:[#allocation2 + $0x78] sm:$0xff]  }
 0x3c8   : > { %v5542_v51 = vsel %vm18117_vm7, %v5537_v11, %v5541_v47  ;;  %v5187_v6 = vsel %vm15637_vm15, %v5178_v32, %v5186_v13  ;;  %v5188_v22 = vrot.slane %v5186_v13, 4  ;;  %v5545_v10 = vor.u32 %v5543_v3, %v5541_v47 }
 0x3c9   : > { %12290 = vmatmul.mubr.bf16.gmra.mrb[16].mxu1 %v5542_v51  ;;  %v5549_v36 = vrot.slane %v5547_v21, 1  ;;  %5290 = vst [vmem:[#allocation2 + $0x88] sm:$0xf] %v5187_v6  ;;  %v5216_v34 = vor.u32 %v5215_v15, %v5212_v33  ;;  %v5192_v35 = vrot.slane %v5190_v29, 6  ;;  %v5195_v16 = vrot.slane %v5193_v30, 7  ;;  %v16254_v38 = vld [vmem:[#allocation2 + $0x80] sm:$0xff]  }
 0x3ca   : > { %v5557_v46 = vrot.slane %v5555_v43, 1  ;;  %v5559_v41 = vshrl.u32 %v16220_v20, 16  ;;  %v5563_v32 = vshll.u32 %v16229_v26, 16  ;;  %v5571_v28 = vshll.u32 %v16234_v59, 16  ;;  %v16271_v51 = vld [vmem:[#allocation2 + $0xc] sm:$0xf] }
 0x3cb   : > { %v5550_v2 = vsel %vm18118_vm2, %v5545_v10, %v5549_v36  ;;  %v5553_v44 = vor.u32 %v5551_v17, %v5549_v36  ;;  %v5217_v55 = vsel %vm15637_vm15, %v5208_v12, %v5216_v34  ;;  %v5218_v31 = vrot.slane %v5216_v34, 4  ;;  %v16276_v36 = vld [vmem:[#allocation2 + $0x10] sm:$0xff]   ;;  %v16278_v34 = vld [vmem:[#allocation2 + $0x18] sm:$0xff]  }
 0x3cc   : > { %v5196_v50 = vor.u32 %v5195_v16, %v5192_v35  ;;  %12293 = vmatprep.mubr.bf16.mxu1 %v5550_v2  ;;  %5293 = vst [vmem:[#allocation2 + $0x94] sm:$0xf] %v5217_v55  ;;  %v5561_v4 = vor.u32 %v5559_v41, %v5557_v46  ;;  %v5565_v62 = vrot.slane %v5563_v32, 1  ;;  %vm18120_vm12 = vnez %v18119_v5  ;;  %v16281_v16 = vld [vmem:[#allocation2 + $0x20] sm:$0xff]   ;;  %v16289_v55 = vld [vmem:[#allocation2 + $0x30] sm:$0xff]  }
 0x3cd   : > { %v5295_v61 = vsel %vm18120_vm12, %v5218_v31, %v5294_v53  ;;  %v5558_v0 = vsel %vm18121_vm3, %v5553_v44, %v5557_v46  ;;  %v5579_v24 = vshll.u32 %v16236_v52, 16  ;;  %v5567_v54 = vshrl.u32 %v16229_v26, 16  ;;  %v6429_v53 = vld [vmem:[#allocation2 + $0x8] sm:$0xe] }
 0x3ce   : > { %v5197_v56 = vsel %vm15637_vm15, %v5188_v22, %v5196_v50  ;;  %v5198_v48 = vrot.slane %v5196_v50, 4  ;;  %5296 = vst [vmem:[#allocation2 + $0x98] sm:$0x3] %v5295_v61  ;;  %v5566_v49 = vsel %vm18122_vm10, %v5561_v4, %v5565_v62  ;;  %v5573_v7 = vrot.slane %v5571_v28, 1  ;;  %v16283_v46 = vld [vmem:[#allocation2 + $0x28] sm:$0xff]  }
 0x3cf   : > { %5291 = vst [vmem:[#allocation2 + $0x8c] sm:$0xf] %v5197_v56  ;;  %v5569_v11 = vor.u32 %v5567_v54, %v5565_v62  ;;  %v5575_v45 = vshrl.u32 %v16234_v59, 16  ;;  %v5581_v3 = vrot.slane %v5579_v24, 1  ;;  %v5587_v25 = vshll.u32 %v16254_v38, 16  ;;  %v18128_v61 = vld [vmem:[#allocation31_spill] sm:$0xff] }
 0x3d0   : > { %v5207_v42 = vsel %vm15637_vm15, %v5198_v48, %v5206_v27  ;;  %vm18124_vm15 = vmmov %vm18118_vm2  ;;  %v5583_v27 = vshrl.u32 %v16236_v52, 16  ;;  %v5591_v13 = vshrl.u32 %v16254_v38, 16  ;;  %v16274_v10 = vcombine.low %v6429_v53, %v16271_v51  ;;  %v16294_v56 = vld [vmem:[#allocation2 + $0x38] sm:$0xff]  }
 0x3d1   : > { %5292 = vst [vmem:[#allocation2 + $0x90] sm:$0xf] %v5207_v42  ;;  %12294 = vmatmul.mubr.bf16.gmra.mrb[20].mxu1 %v5558_v0  ;;  %v5577_v12 = vor.u32 %v5575_v45, %v5573_v7  ;;  %v5574_v58 = vsel %vm18123_vm13, %v5569_v11, %v5573_v7  ;;  %v5589_v57 = vrot.slane %v5587_v25, 1  ;;  %v6920_v41 = vshrl.u32 %v16276_v36, 16  ;;  %v16298_v42 = vld [vmem:[#allocation2 + $0x40] sm:$0xff]  }
 0x3d2   : > { %12297 = vmatprep.mubr.bf16.mxu1 %v5566_v49  ;;  %v5585_v47 = vor.u32 %v5583_v27, %v5581_v3  ;;  %v6912_v2 = vshrl.u32 %v16274_v10, 16  ;;  %v6915_v44 = vshll.u32 %v16274_v10, 16  ;;  %v6923_v32 = vshll.u32 %v16276_v36, 16 }
 0x3d3   : > { %v5582_v9 = vsel %vm18124_vm15, %v5577_v12, %v5581_v3  ;;  %v5593_v17 = vor.u32 %v5591_v13, %v5589_v57  ;;  %v6929_v31 = vshrl.u32 %v16278_v34, 16  ;;  %v6932_v50 = vshll.u32 %v16278_v34, 16  ;;  %v16302_v3 = vld [vmem:[#allocation2 + $0x48] sm:$0xff]   ;;  %v16309_v13 = vld [vmem:[#allocation2 + $0x50] sm:$0xff]  }
 0x3d4   : > { %v5590_v43 = vsel %vm18125_vm9, %v5585_v47, %v5589_v57  ;;  %v6914_v4 = vrot.slane %v6912_v2, 1  ;;  %v6917_v62 = vrot.slane %v6915_v44, 2  ;;  %v6922_v28 = vrot.slane %v6920_v41, 1 }
 0x3d5   : > { %v6925_v5 = vrot.slane %v6923_v32, 2  ;;  %v6931_v48 = vrot.slane %v6929_v31, 1  ;;  %v6934_v0 = vrot.slane %v6932_v50, 2  ;;  %v6938_v49 = vshrl.u32 %v16281_v16, 16  ;;  %v16327_v31 = vld [vmem:[#allocation2 + $0x8] sm:$0xff]   ;;  %v16330_v50 = vld [vmem:[#allocation2 + $0x60] sm:$0xff]  }
 0x3d6   : > { %v16259_v1 = vld [vmem:[#allocation2 + $0x88] sm:$0xff]   ;;  %v6941_v24 = vshll.u32 %v16281_v16, 16  ;;  %v6918_v54 = vor.u32 %v6917_v62, %v6914_v4  ;;  %v6947_v11 = vshrl.u32 %v16283_v46, 16  ;;  %v6950_v45 = vshll.u32 %v16283_v46, 16 }
 0x3d7   : > { %v5595_v18 = vshll.u32 %v16259_v1, 16  ;;  %v5599_v30 = vshrl.u32 %v16259_v1, 16  ;;  %v6926_v7 = vor.u32 %v6925_v5, %v6922_v28  ;;  %v6935_v12 = vor.u32 %v6934_v0, %v6931_v48 }
 0x3d8   : > { %v16264_v21 = vld [vmem:[#allocation2 + $0x90] ss:$0 sps:$4 sm:$0x11]   ;;  %v6940_v25 = vrot.slane %v6938_v49, 1  ;;  %vm18129_vm1 = vsmask.f32 6400 }
 0x3d9   : > { %12298 = vmatmul.mubr.bf16.gmra.mrb[24].mxu1 %v5574_v58  ;;  %v5597_v33 = vrot.slane %v5595_v18, 1  ;;  %v5603_v15 = vshll.u32 %v16264_v21, 16  ;;  %v6943_v58 = vrot.slane %v6941_v24, 2  ;;  %v16306_v27 = vsel %vm18129_vm1, %v6918_v54, %v6926_v7  ;;  %vm18131_vm14 = vmmov %vm18129_vm1  ;;  %v13555_v54 = vld [vmem:[%s17605_s2 + $0x90] sm:$0xff]  }
 0x3da   : > { %12301 = vmatprep.mubr.bf16.mxu1 %v5582_v9  ;;  %v6956_v9 = vshrl.u32 %v16289_v55, 16  ;;  %18130 = vst [vmem:[#allocation8_spill] sm:$0xff] %v16306_v27  ;;  %v6949_v18 = vrot.slane %v6947_v11, 1  ;;  %v6952_v57 = vrot.slane %v6950_v45, 2  ;;  %v6959_v47 = vshll.u32 %v16289_v55, 16  ;;  %vm18133_vm0 = vmmov %vm18129_vm1 }
 0x3db   : > { %v5598_v29 = vsel %vm18126_vm8, %v5593_v17, %v5597_v33  ;;  %v5601_v6 = vor.u32 %v5599_v30, %v5597_v33  ;;  %v5605_v22 = vrot.slane %v5603_v15, 1  ;;  %v16312_v33 = vsel %vm18131_vm14, %v6926_v7, %v6935_v12  ;;  %v16318_v30 = vld [vmem:[#allocation2 + $0x58] sm:$0xff]   ;;  %vm18135_vm4 = vmmov %vm18133_vm0  ;;  %v16344_v7 = vld [vmem:[#allocation2 + $0x68] sm:$0xff]  }
 0x3dc   : > { %18132 = vst [vmem:[#allocation6_spill] sm:$0xff] %v16312_v33  ;;  %v6944_v17 = vor.u32 %v6943_v58, %v6940_v25  ;;  %v6965_v15 = vshrl.u32 %v16294_v56, 16  ;;  %v6968_v53 = vshll.u32 %v16294_v56, 16  ;;  %v6977_v41 = vshll.u32 %v16298_v42, 16  ;;  %vm18137_vm11 = vmmov %vm18133_vm0  ;;  %v16351_v25 = vld [vmem:[#allocation2 + $0x70] sm:$0xff]  }
 0x3dd   : > { %v5606_v35 = vsel %vm18127_vm6, %v5601_v6, %v5605_v22  ;;  %v6953_v6 = vor.u32 %v6952_v57, %v6949_v18  ;;  %v6961_v22 = vrot.slane %v6959_v47, 2  ;;  %v6983_v32 = vshrl.u32 %v16302_v3, 16  ;;  %vm18139_vm5 = vmmov %vm18133_vm0 }
 0x3de   : > { %v16323_v2 = vsel %vm18133_vm0, %v6935_v12, %v6944_v17  ;;  %v6967_v44 = vrot.slane %v6965_v15, 1  ;;  %v6970_v28 = vrot.slane %v6968_v53, 2  ;;  %v6979_v48 = vrot.slane %v6977_v41, 2  ;;  %vm18141_vm7 = vmmov %vm18133_vm0  ;;  %v13556_v41 = vld [vmem:[%s17605_s2 + $0x98] sm:$0xff]  }
 0x3df   : > { %18134 = vst [vmem:[#allocation11_spill] sm:$0xff] %v16323_v2  ;;  %v16333_v4 = vsel %vm18135_vm4, %v6944_v17, %v6953_v6  ;;  %v6985_v0 = vrot.slane %v6983_v32, 1  ;;  %v6986_v49 = vshll.u32 %v16302_v3, 16  ;;  %v6992_v24 = vshrl.u32 %v16309_v13, 16  ;;  %v16367_v32 = vld [vmem:[#allocation2 + $0x80] sm:$0xff]   ;;  %vm18145_vm2 = vmmov %vm18133_vm0 }
 0x3e0   : > { %18136 = vst [vmem:[#allocation9_spill] sm:$0xff] %v16333_v4  ;;  %v6971_v45 = vor.u32 %v6970_v28, %v6967_v44  ;;  %v6995_v12 = vshll.u32 %v16309_v13, 16  ;;  %v7004_v57 = vshll.u32 %v16318_v30, 16  ;;  %v7010_v15 = vshrl.u32 %v16330_v50, 16  ;;  %18143 = vst [vmem:[#allocation10_spill] sm:$0xff] %v16367_v32 }
 0x3e1   : > { %12302 = vmatmul.mubr.bf16.gmra.mrb[28].mxu1 %v5590_v43  ;;  %v6958_v43 = vrot.slane %v6956_v9, 1  ;;  %v6988_v9 = vrot.slane %v6986_v49, 2  ;;  %v6994_v18 = vrot.slane %v6992_v24, 1  ;;  %v7013_v44 = vshll.u32 %v16330_v50, 16  ;;  %vm18147_vm12 = vmmov %vm18133_vm0 }
 0x3e2   : > { %12305 = vmatprep.mubr.bf16.mxu1 %v5598_v29  ;;  %v13554_v29 = vld [vmem:[%s17605_s2 + $0x88] sm:$0xff]   ;;  %v6997_v17 = vrot.slane %v6995_v12, 2  ;;  %v7012_v28 = vrot.slane %v7010_v15, 1  ;;  %v16377_v12 = vld [vmem:[#allocation2 + $0x18] sm:$0xff]   ;;  %vm18150_vm3 = vmmov %vm18133_vm0  ;;  %vm18167_vm14 = vcmask 1045504  }
 0x3e3   : > { %v6962_v62 = vor.u32 %v6961_v22, %v6958_v43  ;;  %v6989_v53 = vor.u32 %v6988_v9, %v6985_v0  ;;  %v7015_v24 = vrot.slane %v7013_v44, 2  ;;  %vm18152_vm10 = vmmov %vm18133_vm0 }
 0x3e4   : > { %vm18154_vm13 = vmmov %vm18133_vm0 }
 0x3e5   : > { %v16347_v11 = vsel %vm18137_vm11, %v6953_v6, %v6962_v62  ;;  %v16355_v47 = vsel %vm18139_vm5, %v6962_v62, %v6971_v45  ;;  %v16358_v6 = vld [vmem:[#allocation2 + $0x78] sm:$0xff]   ;;  %v6998_v62 = vor.u32 %v6997_v17, %v6994_v18  ;;  %vm18156_vm15 = vmmov %vm18133_vm0 }
 0x3e6   : > { %18138 = vst [vmem:[#allocation7_spill] sm:$0xff] %v16347_v11  ;;  %18140 = vst [vmem:[#allocation17_spill] sm:$0xff] %v16355_v47 }
 0x3e7   : > { %vm18158_vm9 = vmmov %vm18133_vm0 }
 0x3e8   : > { %vm18160_vm8 = vmmov %vm18133_vm0 }
 0x3e9   : > { %12306 = vmatmul.mubr.bf16.gmra.mrb[32].mxu1 %v5606_v35  ;;  %v6974_v35 = vshrl.u32 %v16298_v42, 16  ;;  %vm18163_vm6 = vmmov %vm18133_vm0 }
 0x3ea   : > { %12325 = vmatprep.mubr.bf16.mxu1 %v18128_v61  ;;  %v16335_v61 = vld [vmem:[#allocation2 + $0x10] sm:$0xff]   ;;  %vm18165_vm1 = vmmov %vm18133_vm0 }
 0x3eb   : > { %v6976_v5 = vrot.slane %v6974_v35, 1  ;;  %v7006_v35 = vrot.slane %v7004_v57, 2  ;;  %v7031_v57 = vshll.u32 %v16351_v25, 16  ;;  %vm18169_vm0 = vmmov %vm18167_vm14 }
 0x3ec   : > { %vm18171_vm4 = vmmov %vm18169_vm0 }
 0x3ed   : > { %v6980_v58 = vor.u32 %v6979_v48, %v6976_v5  ;;  %v7022_v5 = vshll.u32 %v16344_v7, 16  ;;  %v16371_v48 = vld [vmem:[#allocation2 + $0x88] sm:$0xff]   ;;  %vm18174_vm11 = vmmov %vm18169_vm0 }
 0x3ee   : > { %18144 = vst [vmem:[#allocation18_spill] sm:$0xff] %v16371_v48  ;;  %vm18176_vm5 = vmmov %vm18169_vm0 }
 0x3ef   : > { %v16361_v22 = vsel %vm18141_vm7, %v6971_v45, %v6980_v58  ;;  %v16374_v0 = vsel %vm18145_vm2, %v6980_v58, %v6989_v53  ;;  %v7028_v45 = vshrl.u32 %v16351_v25, 16  ;;  %v7024_v18 = vrot.slane %v7022_v5, 2  ;;  %v16385_v58 = vld [vmem:[#allocation2 + $0x90] sm:$0xff]   ;;  %vm18178_vm7 = vmmov %vm18169_vm0 }
 0x3f0   : > { %18142 = vst [vmem:[#allocation14_spill] sm:$0xff] %v16361_v22  ;;  %18146 = vst [vmem:[#allocation15_spill] sm:$0xff] %v16374_v0  ;;  %v7040_v5 = vshll.u32 %v16358_v6, 16  ;;  %v7064_v22 = vshrl.u32 %v16385_v58, 16 }
 0x3f1   : > { %12326 = vmatmul.mubr.bf16.vlgmr.msra.gmra.mrb[0].mxu1 %v16327_v31  ;;  %18149 = vst [vmem:[#allocation4_spill] sm:$0xff] %v16385_v58  ;;  %v7030_v15 = vrot.slane %v7028_v45, 1  ;;  %vm18180_vm2 = vmmov %vm18169_vm0 }
 0x3f2   : > { %12329 = vmatprep.mubr.bf16.mxu1 %v16335_v61  ;;  %12362 = vmatpush3.bf16.msra.mxu1 %v16116_v60  ;;  %v7001_v60 = vshrl.u32 %v16318_v30, 16 }
 0x3f3   : > { %12363 = vmatprep.subr.bf16.mxu1 %v13554_v29 }
 0x3f4   : > { %v7003_v43 = vrot.slane %v7001_v60, 1  ;;  %v16381_v60 = vsel %vm18147_vm12, %v6989_v53, %v6998_v62  ;;  %v13557_v53 = vld [vmem:[%s17605_s2 + $0xa0] sm:$0xff]   ;;  %vm18182_vm12 = vmmov %vm18169_vm0 }
 0x3f5   : > { %18148 = vst [vmem:[#allocation12_spill] sm:$0xff] %v16381_v60  ;;  %v7042_v60 = vrot.slane %v7040_v5, 2 }
 0x3f6   : > { %12364 = vmatpush3.bf16.msra.mxu1 %v13554_v29  ;;  %v7019_v29 = vshrl.u32 %v16344_v7, 16  ;;  %v7007_v49 = vor.u32 %v7006_v35, %v7003_v43  ;;  %v7016_v43 = vor.u32 %v7015_v24, %v7012_v28  ;;  %v7037_v35 = vshrl.u32 %v16358_v6, 16 }
 0x3f7   : > { %12365 = vmatprep.subr.bf16.mxu1 %v13555_v54  ;;  %v7049_v28 = vshll.u32 %v16367_v32, 16  ;;  %v7055_v24 = vshrl.u32 %v16371_v48, 16 }
 0x3f8   : > { %v7021_v9 = vrot.slane %v7019_v29, 1  ;;  %v16388_v17 = vsel %vm18150_vm3, %v6998_v62, %v7007_v49  ;;  %v7033_v29 = vrot.slane %v7031_v57, 2  ;;  %v7039_v62 = vrot.slane %v7037_v35, 1  ;;  %vm18184_vm3 = vmmov %vm18169_vm0 }
 0x3f9   : > { %12330 = vmatmul.mubr.bf16.gmra.mrb[4].mxu1 %v16377_v12  ;;  %18151 = vst [vmem:[#allocation21_spill] sm:$0xff] %v16388_v17  ;;  %v7058_v57 = vshll.u32 %v16371_v48, 16 }
 0x3fa   : > { %12333 = vmatprep.mubr.bf16.mxu1 %v15954_v23  ;;  %12366 = vmatpush3.bf16.msra.mxu1 %v13555_v54  ;;  %v7025_v44 = vor.u32 %v7024_v18, %v7021_v9  ;;  %v7046_v23 = vshrl.u32 %v16367_v32, 16  ;;  %v16397_v54 = vsel %vm18152_vm10, %v7007_v49, %v7016_v43  ;;  %v7034_v17 = vor.u32 %v7033_v29, %v7030_v15  ;;  %v13558_v49 = vld [vmem:[%s17605_s2 + $0xa8] sm:$0xff]   ;;  %vm18186_vm10 = vmmov %vm18169_vm0 }
 0x3fb   : > { %12367 = vmatprep.subr.bf16.mxu1 %v13556_v41  ;;  %18153 = vst [vmem:[#allocation20_spill] sm:$0xff] %v16397_v54  ;;  %v7051_v9 = vrot.slane %v7049_v28, 2  ;;  %v7057_v18 = vrot.slane %v7055_v24, 1  ;;  %v7067_v15 = vshll.u32 %v16385_v58, 16  ;;  %v7060_v5 = vrot.slane %v7058_v57, 2 }
 0x3fc   : > { %v16402_v45 = vsel %vm18154_vm13, %v7016_v43, %v7025_v44  ;;  %v7048_v0 = vrot.slane %v7046_v23, 1  ;;  %v16410_v35 = vsel %vm18156_vm15, %v7025_v44, %v7034_v17  ;;  %v7043_v43 = vor.u32 %v7042_v60, %v7039_v62  ;;  %v7360_v23 = vld [vmem:[#allocation2 + $0x8] sm:$0xc]  ;;  %vm18188_vm13 = vmmov %vm18169_vm0 }
 0x3fd   : > { %18155 = vst [vmem:[#allocation13_spill] sm:$0xff] %v16402_v45  ;;  %18157 = vst [vmem:[#allocation30_spill] sm:$0xff] %v16410_v35  ;;  %v7069_v24 = vrot.slane %v7067_v15, 2  ;;  %v11099_v45 = vcombine.low %v7360_v23, %v16271_v51  ;;  %v7061_v60 = vor.u32 %v7060_v5, %v7057_v18  ;;  %v7383_v62 = vrot.slane %v16278_v34, 2  ;;  %v13560_v23 = vld [vmem:[%s17605_s2 + $0xb8] sm:$0xff]  }
 0x3fe   : > { %12368 = vmatpush3.bf16.msra.mxu1 %v13556_v41  ;;  %v7052_v29 = vor.u32 %v7051_v9, %v7048_v0  ;;  %v7066_v41 = vrot.slane %v7064_v22, 1  ;;  %v16415_v28 = vsel %vm18158_vm9, %v7034_v17, %v7043_v43  ;;  %v7381_v0 = vrot.slane %v16276_v36, 2  ;;  %v16448_v15 = vld [vmem:[#allocation2 + $0x98] ss:$0 sps:$4 sm:$0x33]   ;;  %vm18190_vm15 = vmmov %vm18169_vm0 }
 0x3ff   : > { %12369 = vmatprep.subr.bf16.mxu1 %v13557_v53  ;;  %18159 = vst [vmem:[#allocation23_spill] sm:$0xff] %v16415_v28  ;;  %v7380_v17 = vrot.slane %v11099_v45, 2  ;;  %v7385_v51 = vrot.slane %v16281_v16, 2  ;;  %v7389_v9 = vrot.slane %v16289_v55, 2  ;;  %18173 = vst [vmem:[#allocation34_spill] sm:$0xff] %v16448_v15  ;;  %v16552_v28 = vld [vmem:[#allocation2 + $0x48] sm:$0xff]  }
 0x400   : > { %v16420_v44 = vsel %vm18160_vm8, %v7043_v43, %v7052_v29  ;;  %v16426_v22 = vor.u32 %v7069_v24, %v7066_v41  ;;  %v16443_v45 = vsel %vm18169_vm0, %v7381_v0, %v7383_v62  ;;  %v7391_v41 = vrot.slane %v16294_v56, 2  ;;  %vm18192_vm9 = vmmov %vm18169_vm0 }
 0x401   : > { %12334 = vmatmul.mubr.bf16.gmra.mrb[8].mxu1 %v16013_v37  ;;  %18161 = vst [vmem:[#allocation16_spill] sm:$0xff] %v16420_v44  ;;  %v13559_v37 = vld [vmem:[%s17605_s2 + $0xb0] sm:$0xff]   ;;  %v16440_v57 = vsel %vm18167_vm14, %v7380_v17, %v7381_v0  ;;  %18170 = vst [vmem:[#allocation28_spill] sm:$0xff] %v16443_v45  ;;  %v16446_v43 = vsel %vm18171_vm4, %v7383_v62, %v7385_v51  ;;  %v7393_v24 = vrot.slane %v16298_v42, 2  ;;  %v7399_v0 = vrot.slane %v16318_v30, 2 }
 0x402   : > { %12337 = vmatprep.mubr.bf16.mxu1 %v16061_v40  ;;  %12370 = vmatpush3.bf16.msra.mxu1 %v13557_v53  ;;  %18162 = vst [vmem:[#allocation32_spill] sm:$0xff] %v16426_v22  ;;  %v16431_v40 = vsel %vm18163_vm6, %v7052_v29, %v7061_v60  ;;  %v7387_v53 = vrot.slane %v16283_v46, 2  ;;  %v16437_v18 = vsel %vm18165_vm1, %v7061_v60, %v16426_v22  ;;  %18168 = vst [vmem:[#allocation33_spill] sm:$0xff] %v16440_v57  ;;  %vm18204_vm4 = vsmask.f32 5376 }
 0x403   : > { %12371 = vmatprep.subr.bf16.mxu1 %v13558_v49  ;;  %18164 = vst [vmem:[#allocation27_spill] sm:$0xff] %v16431_v40  ;;  %18166 = vst [vmem:[#allocation19_spill] sm:$0xff] %v16437_v18  ;;  %v7395_v60 = vrot.slane %v16302_v3, 2  ;;  %v16465_v17 = vsel %vm18178_vm7, %v7389_v9, %v7391_v41  ;;  %v7401_v62 = vrot.slane %v16330_v50, 2  ;;  %v8241_v11 = vshrl.u32 %v16552_v28, 16 }
 0x404   : > { %18172 = vst [vmem:[#allocation22_spill] sm:$0xff] %v16446_v43  ;;  %v16451_v29 = vsel %vm18174_vm11, %v7385_v51, %v7387_v53  ;;  %v16454_v5 = vsel %vm18176_vm5, %v7387_v53, %v7389_v9  ;;  %18179 = vst [vmem:[#allocation36_spill] sm:$0xff] %v16465_v17  ;;  %v7403_v51 = vrot.slane %v16344_v7, 2  ;;  %v7405_v53 = vrot.slane %v16351_v25, 2 }
 0x405   : > { %18175 = vst [vmem:[#allocation35_spill] sm:$0xff] %v16451_v29  ;;  %18177 = vst [vmem:[#allocation24_spill] sm:$0xff] %v16454_v5  ;;  %v16472_v5 = vsel %vm18180_vm2, %v7391_v41, %v7393_v24  ;;  %v16475_v29 = vsel %vm18182_vm12, %v7393_v24, %v7395_v60  ;;  %v16485_v17 = vsel %vm18188_vm13, %v7399_v0, %v7401_v62  ;;  %v7407_v24 = vrot.slane %v16358_v6, 2 }
 0x406   : > { %12372 = vmatpush3.bf16.msra.mxu1 %v13558_v49  ;;  %v7397_v49 = vrot.slane %v16309_v13, 2  ;;  %18181 = vst [vmem:[#allocation37_spill] sm:$0xff] %v16472_v5  ;;  %18183 = vst [vmem:[#allocation25_spill] sm:$0xff] %v16475_v29  ;;  %v16491_v41 = vsel %vm18192_vm9, %v7403_v51, %v7405_v53 }
 0x407   : > { %12373 = vmatprep.subr.bf16.mxu1 %v13559_v37  ;;  %18189 = vst [vmem:[#allocation26_spill] sm:$0xff] %v16485_v17  ;;  %18193 = vst [vmem:[#allocation40_spill] sm:$0xff] %v16491_v41 }
 0x408   : > { %v16478_v43 = vsel %vm18184_vm3, %v7395_v60, %v7397_v49  ;;  %v16481_v9 = vsel %vm18186_vm10, %v7397_v49, %v7399_v0  ;;  %v16497_v60 = vld [vmem:[%s17605_s2 + $0xc0] sm:$0xff]   ;;  %v7413_v49 = vrot.slane %v16385_v58, 2  ;;  %v7415_v0 = vrot.slane %v16448_v15, 2  ;;  %vm18194_vm8 = vmmov %vm18169_vm0 }
 0x409   : > { %12338 = vmatmul.mubr.bf16.gmra.mrb[12].mxu1 %v16093_v19  ;;  %18185 = vst [vmem:[#allocation38_spill] sm:$0xff] %v16478_v43  ;;  %18187 = vst [vmem:[#allocation39_spill] sm:$0xff] %v16481_v9  ;;  %v16488_v19 = vsel %vm18190_vm15, %v7401_v62, %v7403_v51  ;;  %v16504_v62 = vsel %vm18194_vm8, %v7405_v53, %v7407_v24  ;;  %v6093_v9 = vld [vmem:[#allocation2] sm:$0xe]  ;;  %v7696_v43 = vld [vmem:[#allocation2 + $0x10] sm:$0xc] }
 0x40a   : > { %12341 = vmatprep.mubr.bf16.mxu1 %v16149_v39  ;;  %12374 = vmatpush3.bf16.msra.mxu1 %v13559_v37  ;;  %18191 = vst [vmem:[#allocation41_spill] sm:$0xff] %v16488_v19  ;;  %v7409_v39 = vrot.slane %v16367_v32, 2  ;;  %v7411_v37 = vrot.slane %v16371_v48, 2  ;;  %18195 = vst [vmem:[#allocation29_spill] sm:$0xff] %v16504_v62  ;;  %v16516_v17 = vsel %vm18169_vm0, %v7413_v49, %v7415_v0  ;;  %v16520_v53 = vld [vmem:[#allocation2 + $0x14] sm:$0xf] }
 0x40b   : > { %12375 = vmatprep.subr.bf16.mxu1 %v13560_v23  ;;  %vm18196_vm6 = vmmov %vm18169_vm0  ;;  %18202 = vst [vmem:[#allocation51_spill] sm:$0xff] %v16516_v17  ;;  %v16534_v17 = vld [vmem:[#allocation2 + $0x30] sm:$0xff]  }
 0x40c   : > { %v16507_v51 = vsel %vm18196_vm6, %v7407_v24, %v7409_v39  ;;  %vm18198_vm1 = vmmov %vm18169_vm0  ;;  %v13669_v24 = vld [vmem:[#allocation2 + $0x4] sm:$0xf]  ;;  %v8214_v62 = vshrl.u32 %v16534_v17, 16 }
 0x40d   : > { %18197 = vst [vmem:[#allocation43_spill] sm:$0xff] %v16507_v51  ;;  %v16510_v41 = vsel %vm18198_vm1, %v7409_v39, %v7411_v37  ;;  %vm18200_vm14 = vmmov %vm18169_vm0  ;;  %v11054_v39 = vcombine.low %v6093_v9, %v13669_v24 }
 0x40e   : > { %18199 = vst [vmem:[#allocation42_spill] sm:$0xff] %v16510_v41  ;;  %v16513_v19 = vsel %vm18200_vm14, %v7411_v37, %v7413_v49  ;;  %12376 = vmatpush3.bf16.msra.mxu1 %v13560_v23  ;;  %v16524_v41 = vcombine.low %v7696_v43, %v16520_v53  ;;  %v16526_v37 = vld [vmem:[#allocation2 + $0x18] sm:$0xff]   ;;  %v16528_v49 = vld [vmem:[#allocation2 + $0x20] sm:$0xff]   ;;  %v16530_v23 = vld [vmem:[#allocation2 + $0x28] sm:$0xff]   ;;  %vm18229_vm14 = vcmask 1046528  }
 0x40f   : > { %18201 = vst [vmem:[#allocation44_spill] sm:$0xff] %v16513_v19  ;;  %12413 = vmatprep.subr.bf16.mxu1 %v16497_v60  ;;  %v16532_v0 = vrot.slane %v11054_v39, 1  ;;  %v8187_v9 = vshrl.u32 %v16526_v37, 16  ;;  %v8190_v43 = vshll.u32 %v16526_v37, 16  ;;  %v8196_v24 = vshrl.u32 %v16528_v49, 16  ;;  %v16545_v39 = vld [vmem:[#allocation2 + $0x40] sm:$0xff]   ;;  %vm18206_vm11 = vmmov %vm18204_vm4 }
 0x410   : > { %18203 = vst [vmem:[#allocation45_spill] sm:$0xff] %v16524_v41  ;;  %v8182_v19 = vshll.u32 %v16524_v41, 16  ;;  %v8199_v51 = vshll.u32 %v16528_v49, 16  ;;  %v8205_v45 = vshrl.u32 %v16530_v23, 16  ;;  %v8208_v44 = vshll.u32 %v16530_v23, 16  ;;  %vm18208_vm5 = vmmov %vm18204_vm4 }
 0x411   : > { %12342 = vmatmul.mubr.bf16.gmra.mrb[16].mxu1 %v16180_v14  ;;  %v8179_v14 = vshrl.u32 %v16524_v41, 16  ;;  %v8189_v41 = vrot.slane %v8187_v9, 2  ;;  %v8192_v57 = vrot.slane %v8190_v43, 3  ;;  %v8198_v22 = vrot.slane %v8196_v24, 2  ;;  %vm18210_vm7 = vmmov %vm18204_vm4 }
 0x412   : > { %12345 = vmatprep.mubr.bf16.mxu1 %v16210_v8  ;;  %v16538_v8 = vld [vmem:[#allocation2 + $0x38] sm:$0xff]   ;;  %v8184_v5 = vrot.slane %v8182_v19, 3  ;;  %v8201_v18 = vrot.slane %v8199_v51, 3  ;;  %v8207_v15 = vrot.slane %v8205_v45, 2  ;;  %v8210_v43 = vrot.slane %v8208_v44, 3  ;;  %vm18212_vm2 = vmmov %vm18204_vm4 }
 0x413   : > { %v8181_v29 = vrot.slane %v8179_v14, 2  ;;  %v16554_v14 = vld [vmem:[#allocation2 + $0x50] sm:$0xff]   ;;  %v8193_v19 = vor.u32 %v8192_v57, %v8189_v41  ;;  %v8223_v9 = vshrl.u32 %v16538_v8, 16  ;;  %v8216_v51 = vrot.slane %v8214_v62, 2  ;;  %v16566_v57 = vld [vmem:[#allocation2 + $0x58] sm:$0xff]   ;;  %v16569_v62 = vld [vmem:[#allocation2 + $0x60] sm:$0xff]  }
 0x414   : > { %v8202_v35 = vor.u32 %v8201_v18, %v8198_v22  ;;  %v8232_v45 = vshrl.u32 %v16545_v39, 16  ;;  %v8211_v22 = vor.u32 %v8210_v43, %v8207_v15  ;;  %v8235_v44 = vshll.u32 %v16545_v39, 16  ;;  %vm18214_vm12 = vmmov %vm18212_vm2 }
 0x415   : > { %v8185_v40 = vor.u32 %v8184_v5, %v8181_v29  ;;  %v8225_v54 = vrot.slane %v8223_v9, 2  ;;  %v8253_v43 = vshll.u32 %v16554_v14, 16  ;;  %vm18216_vm3 = vmmov %vm18212_vm2 }
 0x416   : > { %v16564_v5 = vsel %vm18206_vm11, %v8193_v19, %v8202_v35  ;;  %v8234_v41 = vrot.slane %v8232_v45, 2  ;;  %v8237_v15 = vrot.slane %v8235_v44, 3  ;;  %v16591_v44 = vld [vmem:[#allocation2 + $0x78] sm:$0xff]   ;;  %vm18218_vm10 = vmmov %vm18212_vm2 }
 0x417   : > { %v16561_v29 = vsel %vm18204_vm4, %v8185_v40, %v8193_v19  ;;  %18207 = vst [vmem:[#allocation55_spill] sm:$0xff] %v16564_v5  ;;  %v8244_v40 = vshll.u32 %v16552_v28, 16  ;;  %v16574_v19 = vld [vmem:[#allocation2 + $0x68] sm:$0xff]   ;;  %v16585_v5 = vld [vmem:[#allocation2 + $0x70] sm:$0xff]   ;;  %vm18220_vm13 = vmmov %vm18212_vm2 }
 0x418   : > { %18205 = vst [vmem:[#allocation53_spill] sm:$0xff] %v16561_v29  ;;  %v8250_v29 = vshrl.u32 %v16554_v14, 16  ;;  %v8280_v2 = vshll.u32 %v16574_v19, 16  ;;  %v8286_v33 = vshrl.u32 %v16585_v5, 16  ;;  %vm18222_vm15 = vmmov %vm18212_vm2 }
 0x419   : > { %12346 = vmatmul.mubr.bf16.gmra.mrb[20].mxu1 %v16218_v63  ;;  %v8217_v63 = vshll.u32 %v16534_v17, 16  ;;  %v8246_v45 = vrot.slane %v8244_v40, 3  ;;  %v16596_v40 = vld [vmem:[#allocation2 + $0x80] sm:$0xff]   ;;  %vm18224_vm9 = vmmov %vm18212_vm2 }
 0x41a   : > { %12349 = vmatprep.mubr.bf16.mxu1 %v16220_v20  ;;  %v8226_v20 = vshll.u32 %v16538_v8, 16  ;;  %vm18225_vm8 = vmmov %vm18212_vm2 }
 0x41b   : > { %v8219_v24 = vrot.slane %v8217_v63, 3  ;;  %v16577_v63 = vsel %vm18208_vm5, %v8202_v35, %v8211_v22  ;;  %v8238_v35 = vor.u32 %v8237_v15, %v8234_v41  ;;  %v8277_v41 = vshrl.u32 %v16574_v19, 16  ;;  %vm18226_vm6 = vmmov %vm18212_vm2 }
 0x41c   : > { %v8228_v18 = vrot.slane %v8226_v20, 3  ;;  %18209 = vst [vmem:[#allocation57_spill] sm:$0xff] %v16577_v63  ;;  %vm18227_vm1 = vmmov %vm18212_vm2  ;;  %vm18234_vm5 = vcmask 1044480  }
 0x41d   : > { %v8220_v47 = vor.u32 %v8219_v24, %v8216_v51  ;;  %v8243_v51 = vrot.slane %v8241_v11, 2  ;;  %v8252_v24 = vrot.slane %v8250_v29, 2  ;;  %v8268_v11 = vshrl.u32 %v16569_v62, 16  ;;  %vm18230_vm0 = vmmov %vm18227_vm1 }
 0x41e   : > { %v8229_v9 = vor.u32 %v8228_v18, %v8225_v54  ;;  %v8255_v54 = vrot.slane %v8253_v43, 3  ;;  %v8259_v18 = vshrl.u32 %v16566_v57, 16  ;;  %v8271_v29 = vshll.u32 %v16569_v62, 16  ;;  %vm18231_vm4 = vmmov %vm18230_vm0 }
 0x41f   : > { %v16582_v20 = vsel %vm18210_vm7, %v8211_v22, %v8220_v47  ;;  %v8262_v22 = vshll.u32 %v16566_v57, 16  ;;  %v8279_v63 = vrot.slane %v8277_v41, 2  ;;  %v8304_v41 = vshrl.u32 %v16596_v40, 16  ;;  %vm18233_vm11 = vmmov %vm18229_vm14 }
 0x420   : > { %18211 = vst [vmem:[#allocation46_spill] sm:$0xff] %v16582_v20  ;;  %v16588_v4 = vsel %vm18212_vm2, %v8220_v47, %v8229_v9  ;;  %v8256_v47 = vor.u32 %v8255_v54, %v8252_v24  ;;  %v16612_v24 = vld [vmem:[#allocation2 + $0x90] sm:$0xff]   ;;  %vm18235_vm7 = vmmov %vm18234_vm5 }
 0x421   : > { %12350 = vmatmul.mubr.bf16.gmra.mrb[24].mxu1 %v16229_v26  ;;  %18213 = vst [vmem:[#allocation58_spill] sm:$0xff] %v16588_v4  ;;  %v8247_v26 = vor.u32 %v8246_v45, %v8243_v51  ;;  %v8261_v4 = vrot.slane %v8259_v18, 2  ;;  %v8264_v43 = vrot.slane %v8262_v22, 3  ;;  %v8270_v51 = vrot.slane %v8268_v11, 2  ;;  %vm18237_vm2 = vmmov %vm18233_vm11 }
 0x422   : > { %12353 = vmatprep.mubr.bf16.mxu1 %v16234_v59  ;;  %v16599_v59 = vsel %vm18214_vm12, %v8229_v9, %v8238_v35  ;;  %v8273_v45 = vrot.slane %v8271_v29, 3  ;;  %v16610_v9 = vld [vmem:[#allocation2 + $0x88] sm:$0xff]   ;;  %v8295_v22 = vshrl.u32 %v16591_v44, 16  ;;  %v8282_v11 = vrot.slane %v8280_v2, 3  ;;  %vm18238_vm12 = vmmov %vm18230_vm0 }
 0x423   : > { %18215 = vst [vmem:[#allocation59_spill] sm:$0xff] %v16599_v59  ;;  %v16603_v15 = vsel %vm18216_vm3, %v8238_v35, %v8247_v26  ;;  %v16606_v20 = vsel %vm18218_vm10, %v8247_v26, %v8256_v47  ;;  %v8265_v54 = vor.u32 %v8264_v43, %v8261_v4  ;;  %v8289_v35 = vshll.u32 %v16585_v5, 16  ;;  %vm18239_vm3 = vmmov %vm18234_vm5 }
 0x424   : > { %18217 = vst [vmem:[#allocation47_spill] sm:$0xff] %v16603_v15  ;;  %18219 = vst [vmem:[#allocation60_spill] sm:$0xff] %v16606_v20  ;;  %v8274_v18 = vor.u32 %v8273_v45, %v8270_v51  ;;  %v8288_v29 = vrot.slane %v8286_v33, 2  ;;  %v8298_v26 = vshll.u32 %v16591_v44, 16  ;;  %v8297_v43 = vrot.slane %v8295_v22, 2  ;;  %v16626_v51 = vld [vmem:[#allocation2 + $0x98] sm:$0xff]  }
 0x425   : > { %v16620_v20 = vsel %vm18220_vm13, %v8256_v47, %v8265_v54  ;;  %v8291_v4 = vrot.slane %v8289_v35, 3  ;;  %v8283_v2 = vor.u32 %v8282_v11, %v8279_v63  ;;  %v8306_v45 = vrot.slane %v8304_v41, 2  ;;  %vm18241_vm10 = vmmov %vm18239_vm3 }
 0x426   : > { %18221 = vst [vmem:[#allocation61_spill] sm:$0xff] %v16620_v20  ;;  %v16623_v15 = vsel %vm18222_vm15, %v8265_v54, %v8274_v18  ;;  %v8300_v33 = vrot.slane %v8298_v26, 3  ;;  %v8307_v59 = vshll.u32 %v16596_v40, 16  ;;  %v8316_v47 = vshll.u32 %v16610_v9, 16  ;;  %vm18243_vm13 = vmmov %vm18239_vm3 }
 0x427   : > { %18223 = vst [vmem:[#allocation48_spill] sm:$0xff] %v16623_v15  ;;  %v8292_v27 = vor.u32 %v8291_v4, %v8288_v29  ;;  %v8322_v20 = vshrl.u32 %v16612_v24, 16  ;;  %v16633_v54 = vsel %vm18224_vm9, %v8274_v18, %v8283_v2  ;;  %v8325_v15 = vshll.u32 %v16612_v24, 16  ;;  %v8627_v29 = vld [vmem:[#allocation2 + $0x10] sm:$0x8]  ;;  %vm18245_vm15 = vmmov %vm18239_vm3 }
 0x428   : > { %v8301_v35 = vor.u32 %v8300_v33, %v8297_v43  ;;  %v8309_v22 = vrot.slane %v8307_v59, 3  ;;  %v8318_v26 = vrot.slane %v8316_v47, 3  ;;  %v8331_v32 = vshrl.u32 %v16626_v51, 16  ;;  %vm18247_vm9 = vmmov %vm18239_vm3 }
 0x429   : > { %12354 = vmatmul.mubr.bf16.gmra.mrb[28].mxu1 %v16236_v52  ;;  %v8313_v52 = vshrl.u32 %v16610_v9, 16  ;;  %v16637_v63 = vsel %vm18225_vm8, %v8283_v2, %v8292_v27  ;;  %v8324_v41 = vrot.slane %v8322_v20, 2  ;;  %v8327_v48 = vrot.slane %v8325_v15, 3  ;;  %vm18248_vm8 = vmmov %vm18239_vm3 }
 0x42a   : > { %12357 = vmatprep.mubr.bf16.mxu1 %v16254_v38  ;;  %v16640_v4 = vsel %vm18226_vm6, %v8292_v27, %v8301_v35  ;;  %v8310_v58 = vor.u32 %v8309_v22, %v8306_v45  ;;  %v6116_v18 = vrot.slane %v16335_v61, 1  ;;  %v8334_v59 = vshll.u32 %v16626_v51, 16  ;;  %vm18249_vm6 = vmmov %vm18239_vm3 }
 0x42b   : > { %v8315_v11 = vrot.slane %v8313_v52, 2  ;;  %v8328_v2 = vor.u32 %v8327_v48, %v8324_v41  ;;  %v8333_v52 = vrot.slane %v8331_v32, 2  ;;  %v11144_v20 = vcombine.low %v8627_v29, %v16520_v53 }
 0x42c   : > { %v16646_v33 = vsel %vm18227_vm1, %v8301_v35, %v8310_v58  ;;  %v18228_v27 = vrot.slane %v16327_v31, 1  ;;  %v6118_v45 = vrot.slane %v16377_v12, 1  ;;  %v8336_v47 = vrot.slane %v8334_v59, 3  ;;  %vm18250_vm1 = vmmov %vm18239_vm3 }
 0x42d   : > { %v8319_v43 = vor.u32 %v8318_v26, %v8315_v11  ;;  %v8647_v32 = vrot.slane %v11144_v20, 3  ;;  %v8648_v48 = vrot.slane %v16526_v37, 3  ;;  %v8650_v53 = vrot.slane %v16528_v49, 3 }
 0x42e   : > { %v6115_v15 = vsel %vm18229_vm14, %v16532_v0, %v18228_v27  ;;  %v18232_v22 = vmov %v18228_v27  ;;  %v16666_v0 = vor.u32 %v8336_v47, %v8333_v52  ;;  %v8652_v12 = vrot.slane %v16530_v23, 3  ;;  %v16689_v27 = vld [vmem:[#allocation2 + $0xa0] ss:$0 sps:$4 sm:$0x77]   ;;  %vm18252_vm14 = vmmov %vm18250_vm1 }
 0x42f   : > { %v16656_v61 = vsel %vm18230_vm0, %v8310_v58, %v8319_v43  ;;  %v16659_v35 = vsel %vm18231_vm4, %v8319_v43, %v8328_v2  ;;  %v6117_v11 = vsel %vm18233_vm11, %v18232_v22, %v6116_v18  ;;  %v8654_v58 = vrot.slane %v16534_v17, 3  ;;  %vm18254_vm0 = vmmov %vm18250_vm1 }
 0x430   : > { %v16671_v26 = vsel %vm18234_vm5, %v8647_v32, %v8648_v48  ;;  %v16674_v41 = vsel %vm18235_vm7, %v8648_v48, %v8650_v53  ;;  %v8656_v29 = vrot.slane %v16538_v8, 3  ;;  %v8658_v43 = vrot.slane %v16545_v39, 3  ;;  %vm18256_vm4 = vmmov %vm18254_vm0 }
 0x431   : > { %12358 = vmatmul.mubr.bf16.gmra.mrb[32].mxu1 %v16259_v1  ;;  %18236 = vst [vmem:[#allocation62_spill] sm:$0xff] %v16674_v41  ;;  %v6119_v31 = vsel %vm18237_vm2, %v6116_v18, %v6118_v45  ;;  %v16681_v59 = vsel %vm18238_vm12, %v8328_v2, %v16666_v0  ;;  %v16684_v52 = vsel %vm18239_vm3, %v8650_v53, %v8652_v12  ;;  %v8660_v18 = vrot.slane %v16552_v28, 3  ;;  %v13563_v2 = vld [vmem:[%s17605_s2 + $0xc8] sm:$0xff]   ;;  %vm18258_vm11 = vmmov %vm18254_vm0 }
 0x432   : > { %12377 = vmatprep.mubr.bf16.mxu1 %v6115_v15  ;;  %18240 = vst [vmem:[#allocation63_spill] sm:$0xff] %v16684_v52  ;;  %v16687_v20 = vsel %vm18241_vm10, %v8652_v12, %v8654_v58  ;;  %v16692_v15 = vsel %vm18243_vm13, %v8654_v58, %v8656_v29  ;;  %v16695_v47 = vsel %vm18245_vm15, %v8656_v29, %v8658_v43  ;;  %v8662_v32 = vrot.slane %v16554_v14, 3  ;;  %vm18260_vm5 = vmmov %vm18254_vm0 }
 0x433   : > { %18242 = vst [vmem:[#allocation49_spill] sm:$0xff] %v16687_v20  ;;  %18244 = vst [vmem:[#allocation64_spill] sm:$0xff] %v16692_v15  ;;  %v8664_v48 = vrot.slane %v16566_v57, 3  ;;  %v8666_v53 = vrot.slane %v16569_v62, 3  ;;  %v8668_v22 = vrot.slane %v16574_v19, 3  ;;  %v8670_v12 = vrot.slane %v16585_v5, 3 }
 0x434   : > { %18246 = vst [vmem:[#allocation65_spill] sm:$0xff] %v16695_v47  ;;  %v16707_v58 = vsel %vm18247_vm9, %v8658_v43, %v8660_v18  ;;  %v16710_v29 = vsel %vm18248_vm8, %v8660_v18, %v8662_v32  ;;  %v8672_v47 = vrot.slane %v16591_v44, 3  ;;  %v8674_v15 = vrot.slane %v16596_v40, 3  ;;  %vm18262_vm7 = vmmov %vm18254_vm0 }
 0x435   : > { %v16715_v20 = vsel %vm18249_vm6, %v8662_v32, %v8664_v48  ;;  %v16718_v52 = vsel %vm18250_vm1, %v8664_v48, %v8666_v53  ;;  %v16721_v41 = vsel %vm18252_vm14, %v8666_v53, %v8668_v22  ;;  %v16724_v43 = vsel %vm18254_vm0, %v8668_v22, %v8670_v12  ;;  %v13564_v53 = vld [vmem:[%s17605_s2 + $0xd0] sm:$0xff]   ;;  %vm18264_vm2 = vmmov %vm18254_vm0 }
 0x436   : > { %18251 = vst [vmem:[#allocation50_spill] sm:$0xff] %v16718_v52  ;;  %18253 = vst [vmem:[#allocation66_spill] sm:$0xff] %v16721_v41  ;;  %v16728_v18 = vsel %vm18256_vm4, %v8670_v12, %v8672_v47  ;;  %v8676_v32 = vrot.slane %v16610_v9, 3  ;;  %v8678_v48 = vrot.slane %v16612_v24, 3  ;;  %v8680_v22 = vrot.slane %v16626_v51, 3 }
 0x437   : > { %18255 = vst [vmem:[#allocation67_spill] sm:$0xff] %v16724_v43  ;;  %18257 = vst [vmem:[#allocation52_spill] sm:$0xff] %v16728_v18  ;;  %vm18268_vm3 = vcmask 1046528  }
 0x438   : > { %v16741_v12 = vsel %vm18260_vm5, %v8674_v15, %v8676_v32  ;;  %v16747_v41 = vsel %vm18264_vm2, %v8678_v48, %v8680_v22  ;;  %vm18266_vm12 = vmmov %vm18254_vm0 }
 0x439   : > { %12378 = vmatmul.mubr.bf16.vlgmr.msra.gmra.mrb[0].mxu1 %v6117_v11  ;;  %v16731_v11 = vsel %vm18258_vm11, %v8672_v47, %v8674_v15  ;;  %18261 = vst [vmem:[#allocation69_spill] sm:$0xff] %v16741_v12  ;;  %v16744_v47 = vsel %vm18262_vm7, %v8676_v32, %v8678_v48  ;;  %18265 = vst [vmem:[#allocation71_spill] sm:$0xff] %v16747_v41  ;;  %v13672_v48 = vld [vmem:[#allocation2 + $0x30] sm:$0xff]  }
 0x43a   : > { %12381 = vmatprep.mubr.bf16.mxu1 %v6119_v31  ;;  %12414 = vmatpush3.bf16.msra.mxu1 %v16497_v60  ;;  %18259 = vst [vmem:[#allocation68_spill] sm:$0xff] %v16731_v11  ;;  %v8682_v31 = vrot.slane %v16689_v27, 3  ;;  %v13670_v60 = vld [vmem:[#allocation2 + $0x20] sm:$0xff]   ;;  %18263 = vst [vmem:[#allocation54_spill] sm:$0xff] %v16744_v47  ;;  %v13671_v11 = vld [vmem:[#allocation2 + $0x28] sm:$0xff]  }
 0x43b   : > { %12415 = vmatprep.subr.bf16.mxu1 %v13563_v2  ;;  %v6120_v43 = vrot.slane %v13670_v60, 1  ;;  %v6122_v18 = vrot.slane %v13671_v11, 1  ;;  %v13565_v60 = vld [vmem:[%s17605_s2 + $0xd8] sm:$0xff]   ;;  %vm18269_vm10 = vmmov %vm18268_vm3  ;;  %v13566_v11 = vld [vmem:[%s17605_s2 + $0xe0] sm:$0xff]  }
 0x43c   : > { %v16750_v52 = vsel %vm18266_vm12, %v8680_v22, %v8682_v31  ;;  %v6124_v22 = vrot.slane %v13672_v48, 1  ;;  %vm18270_vm13 = vmmov %vm18268_vm3 }
 0x43d   : > { %18267 = vst [vmem:[#allocation70_spill] sm:$0xff] %v16750_v52  ;;  %v6121_v15 = vsel %vm18268_vm3, %v6118_v45, %v6120_v43  ;;  %v6123_v32 = vsel %vm18269_vm10, %v6120_v43, %v6122_v18  ;;  %v13567_v45 = vld [vmem:[%s17605_s2 + $0xe8] sm:$0xff]   ;;  %vm18271_vm15 = vmmov %vm18268_vm3 }
 0x43e   : > { %12416 = vmatpush3.bf16.msra.mxu1 %v13563_v2  ;;  %v13673_v2 = vld [vmem:[#allocation2 + $0x38] sm:$0xff]   ;;  %vm18272_vm9 = vmmov %vm18268_vm3 }
 0x43f   : > { %12417 = vmatprep.subr.bf16.mxu1 %v13564_v53  ;;  %v6126_v31 = vrot.slane %v13673_v2, 1  ;;  %vm18273_vm8 = vmmov %vm18268_vm3 }
 0x440   : > { %vm18274_vm6 = vmmov %vm18268_vm3 }
 0x441   : > { %12382 = vmatmul.mubr.bf16.gmra.mrb[4].mxu1 %v6121_v15  ;;  %v6125_v15 = vsel %vm18270_vm13, %v6122_v18, %v6124_v22  ;;  %v6127_v43 = vsel %vm18271_vm15, %v6124_v22, %v6126_v31  ;;  %v13569_v18 = vld [vmem:[%s17605_s2 + $0xf8] sm:$0xff]   ;;  %v13573_v22 = vld [vmem:[%s17605_s2 + $0x100] sm:$0xff]   ;;  %vm18275_vm1 = vmmov %vm18268_vm3 }
 0x442   : > { %12385 = vmatprep.mubr.bf16.mxu1 %v6123_v32  ;;  %12418 = vmatpush3.bf16.msra.mxu1 %v13564_v53  ;;  %v13568_v53 = vld [vmem:[%s17605_s2 + $0xf0] sm:$0xff]   ;;  %v13674_v32 = vld [vmem:[#allocation2 + $0x40] sm:$0xff]   ;;  %vm18276_vm14 = vmmov %vm18275_vm1 }
 0x443   : > { %12419 = vmatprep.subr.bf16.mxu1 %v13565_v60  ;;  %v6128_v48 = vrot.slane %v13674_v32, 1  ;;  %vm18277_vm0 = vmmov %vm18275_vm1 }
 0x444   : > { %vm18278_vm4 = vmmov %vm18277_vm0 }
 0x445   : > { %vm18279_vm11 = vmmov %vm18277_vm0 }
 0x446   : > { %12420 = vmatpush3.bf16.msra.mxu1 %v13565_v60  ;;  %v13675_v60 = vld [vmem:[#allocation2 + $0x48] sm:$0xff]   ;;  %vm18280_vm5 = vmmov %vm18277_vm0 }
 0x447   : > { %12421 = vmatprep.subr.bf16.mxu1 %v13566_v11  ;;  %v6130_v2 = vrot.slane %v13675_v60, 1  ;;  %vm18281_vm7 = vmmov %vm18277_vm0 }
 0x448   : > { %vm18282_vm2 = vmmov %vm18277_vm0 }
 0x449   : > { %12386 = vmatmul.mubr.bf16.gmra.mrb[8].mxu1 %v6125_v15  ;;  %v6129_v15 = vsel %vm18272_vm9, %v6126_v31, %v6128_v48  ;;  %vm18283_vm12 = vmmov %vm18277_vm0 }
 0x44a   : > { %12389 = vmatprep.mubr.bf16.mxu1 %v6127_v43  ;;  %12422 = vmatpush3.bf16.msra.mxu1 %v13566_v11  ;;  %v6131_v11 = vsel %vm18273_vm8, %v6128_v48, %v6130_v2  ;;  %v13676_v43 = vld [vmem:[#allocation2 + $0x50] sm:$0xff]   ;;  %v13678_v48 = vld [vmem:[#allocation2 + $0x60] sm:$0xff]   ;;  %vm18284_vm3 = vmmov %vm18277_vm0 }
 0x44b   : > { %12423 = vmatprep.subr.bf16.mxu1 %v13567_v45  ;;  %v6132_v32 = vrot.slane %v13676_v43, 1  ;;  %v13680_v43 = vld [vmem:[#allocation2 + $0x70] sm:$0xff]   ;;  %vm18285_vm10 = vmmov %vm18277_vm0 }
 0x44c   : > { %vm18286_vm13 = vmmov %vm18277_vm0 }
 0x44d   : > { %v6133_v52 = vsel %vm18274_vm6, %v6130_v2, %v6132_v32  ;;  %vm18287_vm15 = vmmov %vm18277_vm0 }
 0x44e   : > { %12424 = vmatpush3.bf16.msra.mxu1 %v13567_v45  ;;  %v13677_v45 = vld [vmem:[#allocation2 + $0x58] sm:$0xff]   ;;  %vm18288_vm9 = vmmov %vm18277_vm0 }
 0x44f   : > { %12425 = vmatprep.subr.bf16.mxu1 %v13568_v53  ;;  %v6134_v60 = vrot.slane %v13677_v45, 1  ;;  %v6140_v45 = vrot.slane %v13680_v43, 1  ;;  %v13583_v43 = vld [vmem:[%s17605_s2 + $0x118] sm:$0xff]   ;;  %vm18289_vm8 = vmmov %vm18277_vm0 }
 0x450   : > { %vm18290_vm6 = vmmov %vm18277_vm0 }
 0x451   : > { %12390 = vmatmul.mubr.bf16.gmra.mrb[12].mxu1 %v6129_v15  ;;  %v6135_v31 = vsel %vm18275_vm1, %v6132_v32, %v6134_v60  ;;  %v6136_v15 = vrot.slane %v13678_v48, 1  ;;  %v6144_v32 = vrot.slane %v16254_v38, 1  ;;  %v6575_v48 = vrot.slane %v16274_v10, 1  ;;  %vm18291_vm1 = vmmov %vm18277_vm0 }
 0x452   : > { %12393 = vmatprep.mubr.bf16.mxu1 %v6131_v11  ;;  %12426 = vmatpush3.bf16.msra.mxu1 %v13568_v53  ;;  %v13679_v53 = vld [vmem:[#allocation2 + $0x68] sm:$0xff]   ;;  %v6578_v38 = vrot.slane %v16278_v34, 1  ;;  %v6582_v34 = vrot.slane %v16283_v46, 1  ;;  %v13586_v46 = vld [vmem:[%s17605_s2 + $0x120] sm:$0xff]  }
 0x453   : > { %12427 = vmatprep.subr.bf16.mxu1 %v13569_v18  ;;  %v6138_v11 = vrot.slane %v13679_v53, 1  ;;  %v6137_v41 = vsel %vm18276_vm14, %v6134_v60, %v6136_v15  ;;  %vm18292_vm14 = vmmov %vm18277_vm0 }
 0x455   : > { %v6139_v47 = vsel %vm18277_vm0, %v6136_v15, %v6138_v11  ;;  %v6141_v2 = vsel %vm18278_vm4, %v6138_v11, %v6140_v45  ;;  %v6576_v15 = vrot.slane %v16276_v36, 1  ;;  %v13580_v36 = vld [vmem:[%s17605_s2 + $0x110] sm:$0xff]   ;;  %vm18293_vm4 = vmmov %vm18277_vm0 }
 0x456   : > { %12428 = vmatpush3.bf16.msra.mxu1 %v13569_v18  ;;  %v13681_v18 = vld [vmem:[#allocation2 + $0x78] sm:$0xff]  }
 0x457   : > { %12465 = vmatprep.subr.bf16.mxu1 %v13573_v22  ;;  %v6142_v12 = vrot.slane %v13681_v18, 1  ;;  %v6577_v11 = vsel %vm18283_vm12, %v6575_v48, %v6576_v15  ;;  %v6588_v18 = vrot.slane %v16298_v42, 1  ;;  %v6590_v42 = vrot.slane %v16302_v3, 1  ;;  %v13597_v3 = vld [vmem:[%s17605_s2 + $0x140] sm:$0xff]   ;;  %vm18301_vm12 = vmmov %vm18277_vm0 }
 0x458   : > { %v6596_v48 = vrot.slane %v16330_v50, 1  ;;  %v18295_v50 = vld [vmem:[#allocation10_spill] sm:$0xff] }
 0x459   : > { %12394 = vmatmul.mubr.bf16.gmra.mrb[16].mxu1 %v6133_v52  ;;  %v6143_v52 = vsel %vm18279_vm11, %v6140_v45, %v6142_v12  ;;  %v6145_v60 = vsel %vm18280_vm5, %v6142_v12, %v6144_v32  ;;  %v13577_v12 = vld [vmem:[%s17605_s2 + $0x108] sm:$0xff]   ;;  %vm18294_vm11 = vmmov %vm18277_vm0 }
 0x45a   : > { %12397 = vmatprep.mubr.bf16.mxu1 %v6135_v31  ;;  %v6146_v31 = vrot.slane %v16259_v1, 1  ;;  %v6580_v1 = vrot.slane %v16281_v16, 1  ;;  %v6584_v16 = vrot.slane %v16289_v55, 1  ;;  %v6586_v55 = vrot.slane %v16294_v56, 1  ;;  %v13592_v56 = vld [vmem:[%s17605_s2 + $0x130] sm:$0xff]   ;;  %vm18296_vm5 = vmmov %vm18277_vm0 }
 0x45c   : > { %v6581_v10 = vsel %vm18285_vm10, %v6578_v38, %v6580_v1  ;;  %v6583_v45 = vsel %vm18286_vm13, %v6580_v1, %v6582_v34  ;;  %vm18322_vm10 = vsmask.f32 6400  ;;  %vm18342_vm13 = vcmask 1045504  }
 0x461   : > { %12398 = vmatmul.mubr.bf16.gmra.mrb[20].mxu1 %v6137_v41  ;;  %v6147_v41 = vsel %vm18281_vm7, %v6144_v32, %v6146_v31  ;;  %v6589_v32 = vsel %vm18289_vm8, %v6586_v55, %v6588_v18  ;;  %vm18297_vm7 = vmmov %vm18277_vm0 }
 0x462   : > { %12401 = vmatprep.mubr.bf16.mxu1 %v6139_v47  ;;  %v6148_v47 = vrot.slane %v16264_v21, 1  ;;  %v6579_v21 = vsel %vm18284_vm3, %v6576_v15, %v6578_v38  ;;  %v6600_v38 = vrot.slane %v16351_v25, 1  ;;  %vm18302_vm3 = vmmov %vm18277_vm0 }
 0x464   : > { %v6149_v53 = vsel %vm18282_vm2, %v6146_v31, %v6148_v47  ;;  %v6592_v31 = vrot.slane %v16309_v13, 1  ;;  %v6594_v13 = vrot.slane %v16318_v30, 1  ;;  %v6602_v30 = vrot.slane %v16358_v6, 1  ;;  %vm18300_vm2 = vmmov %vm18277_vm0 }
 0x466   : > { %v6593_v47 = vsel %vm18291_vm1, %v6590_v42, %v6592_v31  ;;  %v6595_v15 = vsel %vm18292_vm14, %v6592_v31, %v6594_v13  ;;  %v18307_v31 = vld [vmem:[#allocation7_spill] sm:$0xff] }
 0x469   : > { %12402 = vmatmul.mubr.bf16.gmra.mrb[24].mxu1 %v6141_v2  ;;  %v13589_v2 = vld [vmem:[%s17605_s2 + $0x128] sm:$0xff]  }
 0x46a   : > { %12405 = vmatprep.mubr.bf16.mxu1 %v6143_v52  ;;  %v6587_v52 = vsel %vm18288_vm9, %v6584_v16, %v6586_v55  ;;  %v18303_v55 = vld [vmem:[#allocation8_spill] sm:$0xff]  ;;  %vm18344_vm9 = vmmov %vm18342_vm13 }
 0x46b   : > { %vm18345_vm8 = vmmov %vm18344_vm9 }
 0x471   : > { %12406 = vmatmul.mubr.bf16.gmra.mrb[28].mxu1 %v6145_v60  ;;  %v13595_v60 = vld [vmem:[%s17605_s2 + $0x138] sm:$0xff]  }
 0x472   : > { %12409 = vmatprep.mubr.bf16.mxu1 %v6147_v41  ;;  %v6591_v41 = vsel %vm18290_vm6, %v6588_v18, %v6590_v42  ;;  %v13598_v18 = vld [vmem:[%s17605_s2 + $0x148] sm:$0xff]   ;;  %v18306_v42 = vld [vmem:[#allocation9_spill] sm:$0xff]  ;;  %vm18346_vm6 = vmmov %vm18345_vm8 }
 0x473   : > { %vm18347_vm1 = vmmov %vm18346_vm6 }
 0x474   : > { %vm18348_vm14 = vmmov %vm18347_vm1 }
 0x479   : > { %12410 = vmatmul.mubr.bf16.gmra.mrb[32].mxu1 %v6149_v53  ;;  %v6597_v53 = vsel %vm18277_vm0, %v6594_v13, %v6596_v48  ;;  %v13603_v13 = vld [vmem:[%s17605_s2 + $0x170] sm:$0xff]   ;;  %vm18349_vm0 = vmmov %vm18347_vm1 }
 0x47a   : > { %12429 = vmatprep.mubr.bf16.mxu1 %v6577_v11  ;;  %v6598_v11 = vrot.slane %v16344_v7, 1 }
 0x47c   : > { %v6599_v1 = vsel %vm18293_vm4, %v6596_v48, %v6598_v11  ;;  %v13604_v48 = vld [vmem:[%s17605_s2 + $0x178] sm:$0xff]   ;;  %vm18350_vm4 = vmmov %vm18349_vm0 }
 0x481   : > { %12430 = vmatmul.mubr.bf16.vlgmr.msra.gmra.mrb[0].mxu1 %v6579_v21  ;;  %v6604_v21 = vrot.slane %v18295_v50, 1  ;;  %v18316_v50 = vld [vmem:[#allocation23_spill] sm:$0xff] }
 0x482   : > { %12433 = vmatprep.mubr.bf16.mxu1 %v6581_v10  ;;  %12466 = vmatpush3.bf16.msra.mxu1 %v13573_v22  ;;  %v6585_v22 = vsel %vm18287_vm15, %v6582_v34, %v6584_v16  ;;  %v6603_v10 = vsel %vm18296_vm5, %v6600_v38, %v6602_v30  ;;  %v18298_v34 = vld [vmem:[#allocation18_spill] sm:$0xff]  ;;  %v18299_v16 = vld [vmem:[#allocation4_spill] sm:$0xff]  ;;  %vm18343_vm15 = vmmov %vm18342_vm13 }
 0x483   : > { %12467 = vmatprep.subr.bf16.mxu1 %v13577_v12  ;;  %v6606_v7 = vrot.slane %v18298_v34, 1  ;;  %v6608_v25 = vrot.slane %v18299_v16, 1  ;;  %vm18352_vm5 = vmmov %vm18349_vm0 }
 0x486   : > { %12468 = vmatpush3.bf16.msra.mxu1 %v13577_v12  ;;  %v6601_v12 = vsel %vm18294_vm11, %v6598_v11, %v6600_v38  ;;  %v13607_v11 = vld [vmem:[%s17605_s2 + $0x180] sm:$0xff]   ;;  %v18312_v38 = vld [vmem:[#allocation21_spill] sm:$0xff]  ;;  %vm18351_vm11 = vmmov %vm18349_vm0 }
 0x487   : > { %12469 = vmatprep.subr.bf16.mxu1 %v13580_v36 }
 0x489   : > { %12434 = vmatmul.mubr.bf16.gmra.mrb[4].mxu1 %v6583_v45  ;;  %v13596_v45 = vld [vmem:[#allocation2 + $0x98] ss:$0 sps:$4 sm:$0x11]  }
 0x48a   : > { %12437 = vmatprep.mubr.bf16.mxu1 %v6585_v22  ;;  %12470 = vmatpush3.bf16.msra.mxu1 %v13580_v36  ;;  %v6605_v36 = vsel %vm18297_vm7, %v6602_v30, %v6604_v21  ;;  %v6609_v22 = vsel %vm18301_vm12, %v6606_v7, %v6608_v25  ;;  %v6610_v6 = vrot.slane %v13596_v45, 1  ;;  %v18315_v30 = vld [vmem:[#allocation30_spill] sm:$0xff]  ;;  %vm18353_vm7 = vmmov %vm18349_vm0 }
 0x48b   : > { %12471 = vmatprep.subr.bf16.mxu1 %v13583_v43  ;;  %vm18355_vm12 = vmmov %vm18349_vm0 }
 0x48e   : > { %12472 = vmatpush3.bf16.msra.mxu1 %v13583_v43  ;;  %v6607_v43 = vsel %vm18300_vm2, %v6604_v21, %v6606_v7  ;;  %v18317_v21 = vld [vmem:[#allocation16_spill] sm:$0xff]  ;;  %vm18354_vm2 = vmmov %vm18349_vm0 }
 0x48f   : > { %12473 = vmatprep.subr.bf16.mxu1 %v13586_v46 }
 0x491   : > { %12438 = vmatmul.mubr.bf16.gmra.mrb[8].mxu1 %v6587_v52  ;;  %v18305_v52 = vld [vmem:[#allocation11_spill] sm:$0xff] }
 0x492   : > { %12441 = vmatprep.mubr.bf16.mxu1 %v6589_v32  ;;  %12474 = vmatpush3.bf16.msra.mxu1 %v13586_v46  ;;  %v6611_v46 = vsel %vm18302_vm3, %v6608_v25, %v6610_v6  ;;  %v13599_v32 = vld [vmem:[%s17605_s2 + $0x150] sm:$0xff]   ;;  %v18319_v25 = vld [vmem:[#allocation27_spill] sm:$0xff]  ;;  %vm18356_vm3 = vmmov %vm18349_vm0 }
 0x493   : > { %12475 = vmatprep.subr.bf16.mxu1 %v13589_v2 }
 0x496   : > { %12476 = vmatpush3.bf16.msra.mxu1 %v13589_v2  ;;  %v18304_v2 = vld [vmem:[#allocation6_spill] sm:$0xff] }
 0x497   : > { %12477 = vmatprep.subr.bf16.mxu1 %v13592_v56 }
 0x499   : > { %12442 = vmatmul.mubr.bf16.gmra.mrb[12].mxu1 %v6591_v41  ;;  %v13602_v41 = vld [vmem:[%s17605_s2 + $0x168] sm:$0xff]  }
 0x49a   : > { %12445 = vmatprep.mubr.bf16.mxu1 %v6593_v47  ;;  %12478 = vmatpush3.bf16.msra.mxu1 %v13592_v56  ;;  %v13600_v56 = vld [vmem:[%s17605_s2 + $0x158] sm:$0xff]  }
 0x49b   : > { %12479 = vmatprep.subr.bf16.mxu1 %v13595_v60  ;;  %v18308_v47 = vld [vmem:[#allocation17_spill] sm:$0xff] }
 0x49e   : > { %12480 = vmatpush3.bf16.msra.mxu1 %v13595_v60  ;;  %v13601_v60 = vld [vmem:[%s17605_s2 + $0x160] sm:$0xff]  }
 0x49f   : > { %12517 = vmatprep.subr.bf16.mxu1 %v13597_v3 }
 0x4a1   : > { %12446 = vmatmul.mubr.bf16.gmra.mrb[16].mxu1 %v6595_v15  ;;  %v18310_v15 = vld [vmem:[#allocation15_spill] sm:$0xff] }
 0x4a2   : > { %12449 = vmatprep.mubr.bf16.mxu1 %v6597_v53  ;;  %v18311_v53 = vld [vmem:[#allocation12_spill] sm:$0xff] }
 0x4a9   : > { %12450 = vmatmul.mubr.bf16.gmra.mrb[20].mxu1 %v6599_v1  ;;  %v18313_v1 = vld [vmem:[#allocation20_spill] sm:$0xff] }
 0x4aa   : > { %12453 = vmatprep.mubr.bf16.mxu1 %v6601_v12  ;;  %v18314_v12 = vld [vmem:[#allocation13_spill] sm:$0xff] }
 0x4b1   : > { %12454 = vmatmul.mubr.bf16.gmra.mrb[24].mxu1 %v6603_v10  ;;  %v18318_v10 = vld [vmem:[#allocation34_spill] sm:$0xff] }
 0x4b2   : > { %12457 = vmatprep.mubr.bf16.mxu1 %v6605_v36  ;;  %v7073_v36 = vshrl.u32 %v18318_v10, 16  ;;  %v7076_v34 = vshll.u32 %v18318_v10, 16  ;;  %v18339_v10 = vld [vmem:[#allocation44_spill] sm:$0xff] }
 0x4b4   : > { %v7075_v7 = vrot.slane %v7073_v36, 1  ;;  %v7078_v16 = vrot.slane %v7076_v34, 2  ;;  %v7843_v36 = vrot.slane %v16526_v37, 2  ;;  %v18340_v34 = vld [vmem:[#allocation45_spill] sm:$0xff] }
 0x4b6   : > { %v7079_v45 = vor.u32 %v7078_v16, %v7075_v7  ;;  %v7842_v7 = vrot.slane %v18340_v34, 2  ;;  %v18341_v16 = vld [vmem:[#allocation51_spill] sm:$0xff]  ;;  %v13644_v34 = vld [vmem:[%s17605_s2 + $0x210] sm:$0xff]  }
 0x4b9   : > { %12458 = vmatmul.mubr.bf16.gmra.mrb[28].mxu1 %v6607_v43  ;;  %v18320_v43 = vld [vmem:[#allocation19_spill] sm:$0xff] }
 0x4ba   : > { %12461 = vmatprep.mubr.bf16.mxu1 %v6609_v22  ;;  %v18321_v22 = vld [vmem:[#allocation32_spill] sm:$0xff] }
 0x4bb   : > { %v7080_v6 = vsel %vm18322_vm10, %v18321_v22, %v7079_v45  ;;  %v7847_v45 = vrot.slane %v16530_v23, 2  ;;  %v13622_v22 = vld [vmem:[%s17605_s2 + $0x1c8] sm:$0xff]   ;;  %v7851_v23 = vrot.slane %v16538_v8, 2  ;;  %v7853_v8 = vrot.slane %v16545_v39, 2  ;;  %v13637_v39 = vld [vmem:[%s17605_s2 + $0x1f0] sm:$0xff]   ;;  %vm18357_vm10 = vmmov %vm18349_vm0 }
 0x4c1   : > { %12462 = vmatmul.mubr.bf16.gmra.mrb[32].mxu1 %v6611_v46  ;;  %v18323_v46 = vld [vmem:[#allocation33_spill] sm:$0xff] }
 0x4c2   : > { %12481 = vmatprep.mubr.bf16.mxu1 %v18303_v55  ;;  %v13608_v55 = vld [vmem:[%s17605_s2 + $0x188] sm:$0xff]  }
 0x4c9   : > { %12482 = vmatmul.mubr.bf16.vlgmr.msra.gmra.mrb[0].mxu1 %v18304_v2  ;;  %v18325_v2 = vld [vmem:[#allocation22_spill] sm:$0xff] }
 0x4ca   : > { %12485 = vmatprep.mubr.bf16.mxu1 %v18305_v52  ;;  %12518 = vmatpush3.bf16.msra.mxu1 %v13597_v3  ;;  %v18309_v3 = vld [vmem:[#allocation14_spill] sm:$0xff]  ;;  %v13609_v52 = vld [vmem:[%s17605_s2 + $0x190] sm:$0xff]  }
 0x4cb   : > { %12519 = vmatprep.subr.bf16.mxu1 %v13598_v18 }
 0x4ce   : > { %12520 = vmatpush3.bf16.msra.mxu1 %v13598_v18  ;;  %v18324_v18 = vld [vmem:[#allocation28_spill] sm:$0xff] }
 0x4cf   : > { %12521 = vmatprep.subr.bf16.mxu1 %v13599_v32 }
 0x4d1   : > { %12486 = vmatmul.mubr.bf16.gmra.mrb[4].mxu1 %v18306_v42  ;;  %v18327_v42 = vld [vmem:[#allocation24_spill] sm:$0xff] }
 0x4d2   : > { %12489 = vmatprep.mubr.bf16.mxu1 %v18307_v31  ;;  %12522 = vmatpush3.bf16.msra.mxu1 %v13599_v32  ;;  %v13610_v32 = vld [vmem:[%s17605_s2 + $0x198] sm:$0xff]   ;;  %v13611_v31 = vld [vmem:[%s17605_s2 + $0x1a0] sm:$0xff]  }
 0x4d3   : > { %12523 = vmatprep.subr.bf16.mxu1 %v13600_v56 }
 0x4d6   : > { %12524 = vmatpush3.bf16.msra.mxu1 %v13600_v56  ;;  %v18326_v56 = vld [vmem:[#allocation35_spill] sm:$0xff] }
 0x4d7   : > { %12525 = vmatprep.subr.bf16.mxu1 %v13601_v60 }
 0x4d9   : > { %12490 = vmatmul.mubr.bf16.gmra.mrb[8].mxu1 %v18308_v47  ;;  %v18329_v47 = vld [vmem:[#allocation37_spill] sm:$0xff] }
 0x4da   : > { %12493 = vmatprep.mubr.bf16.mxu1 %v18309_v3  ;;  %12526 = vmatpush3.bf16.msra.mxu1 %v13601_v60  ;;  %v13612_v60 = vld [vmem:[%s17605_s2 + $0x1a8] sm:$0xff]   ;;  %v13613_v3 = vld [vmem:[%s17605_s2 + $0x1b0] sm:$0xff]  }
 0x4db   : > { %12527 = vmatprep.subr.bf16.mxu1 %v13602_v41 }
 0x4de   : > { %12528 = vmatpush3.bf16.msra.mxu1 %v13602_v41  ;;  %v18328_v41 = vld [vmem:[#allocation36_spill] sm:$0xff] }
 0x4df   : > { %12529 = vmatprep.subr.bf16.mxu1 %v13603_v13 }
 0x4e1   : > { %12494 = vmatmul.mubr.bf16.gmra.mrb[12].mxu1 %v18310_v15  ;;  %v18331_v15 = vld [vmem:[#allocation38_spill] sm:$0xff] }
 0x4e2   : > { %12497 = vmatprep.mubr.bf16.mxu1 %v18311_v53  ;;  %12530 = vmatpush3.bf16.msra.mxu1 %v13603_v13  ;;  %v13614_v13 = vld [vmem:[%s17605_s2 + $0x1b8] sm:$0xff]   ;;  %v13618_v53 = vld [vmem:[%s17605_s2 + $0x1c0] sm:$0xff]  }
 0x4e3   : > { %12531 = vmatprep.subr.bf16.mxu1 %v13604_v48 }
 0x4e6   : > { %12532 = vmatpush3.bf16.msra.mxu1 %v13604_v48  ;;  %v18330_v48 = vld [vmem:[#allocation25_spill] sm:$0xff] }
 0x4e7   : > { %12569 = vmatprep.subr.bf16.mxu1 %v13607_v11 }
 0x4e9   : > { %12498 = vmatmul.mubr.bf16.gmra.mrb[16].mxu1 %v18312_v38  ;;  %v18333_v38 = vld [vmem:[#allocation26_spill] sm:$0xff] }
 0x4ea   : > { %12501 = vmatprep.mubr.bf16.mxu1 %v18313_v1  ;;  %v18334_v1 = vld [vmem:[#allocation41_spill] sm:$0xff] }
 0x4f1   : > { %12502 = vmatmul.mubr.bf16.gmra.mrb[20].mxu1 %v18314_v12  ;;  %v18335_v12 = vld [vmem:[#allocation40_spill] sm:$0xff] }
 0x4f2   : > { %12505 = vmatprep.mubr.bf16.mxu1 %v18315_v30  ;;  %v18336_v30 = vld [vmem:[#allocation29_spill] sm:$0xff] }
 0x4f9   : > { %12506 = vmatmul.mubr.bf16.gmra.mrb[24].mxu1 %v18316_v50  ;;  %v18337_v50 = vld [vmem:[#allocation43_spill] sm:$0xff] }
 0x4fa   : > { %12509 = vmatprep.mubr.bf16.mxu1 %v18317_v21  ;;  %v18338_v21 = vld [vmem:[#allocation42_spill] sm:$0xff] }
 0x501   : > { %12510 = vmatmul.mubr.bf16.gmra.mrb[28].mxu1 %v18319_v25  ;;  %v7844_v25 = vsel %vm18342_vm13, %v7842_v7, %v7843_v36  ;;  %vm18358_vm13 = vmmov %vm18349_vm0  ;;  %v13645_v7 = vld [vmem:[%s17605_s2 + $0x218] sm:$0xff]  }
 0x502   : > { %12513 = vmatprep.mubr.bf16.mxu1 %v18320_v43  ;;  %v7845_v43 = vrot.slane %v16528_v49, 2  ;;  %v7849_v49 = vrot.slane %v16534_v17, 2  ;;  %v13631_v17 = vld [vmem:[%s17605_s2 + $0x1e0] sm:$0xff]  }
 0x504   : > { %v7848_v37 = vsel %vm18344_vm9, %v7845_v43, %v7847_v45  ;;  %vm18370_vm9 = vsmask.f32 5376 }
 0x509   : > { %12514 = vmatmul.mubr.bf16.gmra.mrb[32].mxu1 %v7080_v6  ;;  %v7846_v6 = vsel %vm18343_vm15, %v7843_v36, %v7845_v43  ;;  %vm18359_vm15 = vmmov %vm18349_vm0  ;;  %v13643_v36 = vld [vmem:[%s17605_s2 + $0x208] sm:$0xff]   ;;  %v13646_v43 = vld [vmem:[%s17605_s2 + $0x220] sm:$0xff]  }
 0x50a   : > { %12533 = vmatprep.mubr.bf16.mxu1 %v18323_v46  ;;  %v13625_v46 = vld [vmem:[%s17605_s2 + $0x1d0] sm:$0xff]  }
 0x511   : > { %12534 = vmatmul.mubr.bf16.vlgmr.msra.gmra.mrb[0].mxu1 %v18324_v18  ;;  %v7850_v18 = vsel %vm18345_vm8, %v7847_v45, %v7849_v49  ;;  %v13647_v45 = vld [vmem:[%s17605_s2 + $0x228] sm:$0xff]   ;;  %vm10706_vm8 = vcmask 1041409  }
 0x512   : > { %12537 = vmatprep.mubr.bf16.mxu1 %v18325_v2  ;;  %12570 = vmatpush3.bf16.msra.mxu1 %v13607_v11  ;;  %v18332_v11 = vld [vmem:[#allocation39_spill] sm:$0xff]  ;;  %v7852_v2 = vsel %vm18346_vm6, %v7849_v49, %v7851_v23  ;;  %v18367_v49 = vld [vmem:[#allocation60_spill] sm:$0xff]  ;;  %vm10708_vm6 = vcmask 1042434  }
 0x513   : > { %12571 = vmatprep.subr.bf16.mxu1 %v13608_v55 }
 0x516   : > { %12572 = vmatpush3.bf16.msra.mxu1 %v13608_v55  ;;  %v13628_v55 = vld [vmem:[%s17605_s2 + $0x1d8] sm:$0xff]  }
 0x517   : > { %12573 = vmatprep.subr.bf16.mxu1 %v13609_v52 }
 0x519   : > { %12538 = vmatmul.mubr.bf16.gmra.mrb[4].mxu1 %v18326_v56  ;;  %v7854_v56 = vsel %vm18347_vm1, %v7851_v23, %v7853_v8  ;;  %v18368_v23 = vld [vmem:[#allocation61_spill] sm:$0xff]  ;;  %vm10710_vm1 = vcmask 1043459  }
 0x51a   : > { %12541 = vmatprep.mubr.bf16.mxu1 %v18327_v42  ;;  %12574 = vmatpush3.bf16.msra.mxu1 %v13609_v52  ;;  %v7855_v52 = vrot.slane %v16552_v28, 2  ;;  %v7857_v28 = vrot.slane %v16554_v14, 2  ;;  %v13642_v14 = vld [vmem:[%s17605_s2 + $0x200] sm:$0xff]  }
 0x51b   : > { %12575 = vmatprep.subr.bf16.mxu1 %v13610_v32 }
 0x51c   : > { %v7856_v42 = vsel %vm18348_vm14, %v7853_v8, %v7855_v52  ;;  %vm10712_vm14 = vcmask 1044484  }
 0x51e   : > { %12576 = vmatpush3.bf16.msra.mxu1 %v13610_v32  ;;  %v13634_v32 = vld [vmem:[%s17605_s2 + $0x1e8] sm:$0xff]  }
 0x51f   : > { %12577 = vmatprep.subr.bf16.mxu1 %v13611_v31 }
 0x521   : > { %12542 = vmatmul.mubr.bf16.gmra.mrb[8].mxu1 %v18328_v41  ;;  %v7858_v41 = vsel %vm18349_vm0, %v7855_v52, %v7857_v28  ;;  %vm10714_vm0 = vcmask 1045509  }
 0x522   : > { %12545 = vmatprep.mubr.bf16.mxu1 %v18329_v47  ;;  %12578 = vmatpush3.bf16.msra.mxu1 %v13611_v31  ;;  %v7859_v31 = vrot.slane %v16566_v57, 2  ;;  %v7861_v57 = vrot.slane %v16569_v62, 2  ;;  %v7869_v62 = vrot.slane %v16596_v40, 2 }
 0x523   : > { %12579 = vmatprep.subr.bf16.mxu1 %v13612_v60 }
 0x524   : > { %v7860_v47 = vsel %vm18350_vm4, %v7857_v28, %v7859_v31  ;;  %vm10716_vm4 = vcmask 1046534  }
 0x526   : > { %12580 = vmatpush3.bf16.msra.mxu1 %v13612_v60  ;;  %v13640_v60 = vld [vmem:[%s17605_s2 + $0x1f8] sm:$0xff]  }
 0x527   : > { %12581 = vmatprep.subr.bf16.mxu1 %v13613_v3 }
 0x529   : > { %12546 = vmatmul.mubr.bf16.gmra.mrb[12].mxu1 %v18330_v48 }
 0x52a   : > { %12549 = vmatprep.mubr.bf16.mxu1 %v18331_v15  ;;  %12582 = vmatpush3.bf16.msra.mxu1 %v13613_v3  ;;  %v7863_v3 = vrot.slane %v16574_v19, 2  ;;  %v7865_v15 = vrot.slane %v16585_v5, 2  ;;  %v7871_v19 = vrot.slane %v16610_v9, 2  ;;  %v7873_v5 = vrot.slane %v16612_v24, 2  ;;  %v18361_v24 = vld [vmem:[#allocation55_spill] sm:$0xff] }
 0x52b   : > { %12583 = vmatprep.subr.bf16.mxu1 %v13614_v13 }
 0x52c   : > { %v7864_v48 = vsel %vm18352_vm5, %v7861_v57, %v7863_v3 }
 0x52e   : > { %12584 = vmatpush3.bf16.msra.mxu1 %v13614_v13  ;;  %v7862_v13 = vsel %vm18351_vm11, %v7859_v31, %v7861_v57  ;;  %v17058_v31 = vld [vmem:[%s17607_s4] ss:$0 sm:$0xff]  ;;  %vm10718_vm11 = vcmask 1047559  }
 0x52f   : > { %12621 = vmatprep.subr.bf16.mxu1 %v13618_v53 }
 0x531   : > { %12550 = vmatmul.mubr.bf16.gmra.mrb[16].mxu1 %v18332_v11  ;;  %v7866_v11 = vsel %vm18353_vm7, %v7863_v3, %v7865_v15 }
 0x532   : > { %12553 = vmatprep.mubr.bf16.mxu1 %v18333_v38 }
 0x539   : > { %12554 = vmatmul.mubr.bf16.gmra.mrb[20].mxu1 %v18334_v1 }
 0x53a   : > { %12557 = vmatprep.mubr.bf16.mxu1 %v18335_v12  ;;  %v7872_v12 = vsel %vm18356_vm3, %v7869_v62, %v7871_v19 }
 0x541   : > { %12558 = vmatmul.mubr.bf16.gmra.mrb[24].mxu1 %v18336_v30  ;;  %v7874_v30 = vsel %vm18357_vm10, %v7871_v19, %v7873_v5 }
 0x542   : > { %12561 = vmatprep.mubr.bf16.mxu1 %v18337_v50  ;;  %v13641_v50 = vld [vmem:[#allocation2 + $0xa0] ss:$0 sps:$4 sm:$0x33]  }
 0x543   : > { %v7877_v40 = vrot.slane %v13641_v50, 2 }
 0x549   : > { %12562 = vmatmul.mubr.bf16.gmra.mrb[28].mxu1 %v18338_v21 }
 0x54a   : > { %12565 = vmatprep.mubr.bf16.mxu1 %v18339_v10  ;;  %v18360_v10 = vld [vmem:[#allocation53_spill] sm:$0xff] }
 0x551   : > { %12566 = vmatmul.mubr.bf16.gmra.mrb[32].mxu1 %v18341_v16  ;;  %v18363_v16 = vld [vmem:[#allocation46_spill] sm:$0xff] }
 0x552   : > { %12585 = vmatprep.mubr.bf16.mxu1 %v7844_v25  ;;  %v18364_v25 = vld [vmem:[#allocation58_spill] sm:$0xff] }
 0x559   : > { %12586 = vmatmul.mubr.bf16.vlgmr.msra.gmra.mrb[0].mxu1 %v7846_v6  ;;  %v18366_v6 = vld [vmem:[#allocation47_spill] sm:$0xff] }
 0x55a   : > { %12589 = vmatprep.mubr.bf16.mxu1 %v7848_v37  ;;  %12622 = vmatpush3.bf16.msra.mxu1 %v13618_v53  ;;  %v7867_v53 = vrot.slane %v16591_v44, 2  ;;  %v7875_v44 = vrot.slane %v16626_v51, 2  ;;  %v18362_v51 = vld [vmem:[#allocation57_spill] sm:$0xff] }
 0x55b   : > { %12623 = vmatprep.subr.bf16.mxu1 %v13622_v22  ;;  %v13648_v37 = vld [vmem:[%s17605_s2 + $0x230] sm:$0xff]  }
 0x55c   : > { %v7868_v38 = vsel %vm18354_vm2, %v7865_v15, %v7867_v53  ;;  %v7870_v1 = vsel %vm18355_vm12, %v7867_v53, %v7869_v62  ;;  %v7876_v21 = vsel %vm18358_vm13, %v7873_v5, %v7875_v44  ;;  %v7878_v9 = vsel %vm18359_vm15, %v7875_v44, %v7877_v40 }
 0x55e   : > { %12624 = vmatpush3.bf16.msra.mxu1 %v13622_v22  ;;  %v18365_v22 = vld [vmem:[#allocation59_spill] sm:$0xff] }
 0x55f   : > { %12625 = vmatprep.subr.bf16.mxu1 %v13625_v46 }
 0x561   : > { %12590 = vmatmul.mubr.bf16.gmra.mrb[4].mxu1 %v7850_v18  ;;  %v8340_v18 = vshrl.u32 %v16689_v27, 16 }
 0x562   : > { %12593 = vmatprep.mubr.bf16.mxu1 %v7852_v2  ;;  %12626 = vmatpush3.bf16.msra.mxu1 %v13625_v46  ;;  %v13649_v46 = vld [vmem:[%s17605_s2 + $0x238] sm:$0xff]   ;;  %v8343_v2 = vshll.u32 %v16689_v27, 16 }
 0x563   : > { %12627 = vmatprep.subr.bf16.mxu1 %v13628_v55  ;;  %v18375_v27 = vld [vmem:[#allocation65_spill] sm:$0xff] }
 0x564   : > { %v8345_v8 = vrot.slane %v8343_v2, 3 }
 0x566   : > { %12628 = vmatpush3.bf16.msra.mxu1 %v13628_v55  ;;  %v18369_v55 = vld [vmem:[#allocation48_spill] sm:$0xff] }
 0x567   : > { %12629 = vmatprep.subr.bf16.mxu1 %v13631_v17 }
 0x569   : > { %12594 = vmatmul.mubr.bf16.gmra.mrb[8].mxu1 %v7854_v56  ;;  %v18381_v56 = vld [vmem:[#allocation69_spill] sm:$0xff] }
 0x56a   : > { %12597 = vmatprep.mubr.bf16.mxu1 %v7856_v42  ;;  %12630 = vmatpush3.bf16.msra.mxu1 %v13631_v17  ;;  %v8342_v17 = vrot.slane %v8340_v18, 2  ;;  %v18382_v42 = vld [vmem:[#allocation54_spill] sm:$0xff] }
 0x56b   : > { %12631 = vmatprep.subr.bf16.mxu1 %v13634_v32 }
 0x56c   : > { %v8346_v52 = vor.u32 %v8345_v8, %v8342_v17 }
 0x56e   : > { %12632 = vmatpush3.bf16.msra.mxu1 %v13634_v32  ;;  %v18380_v32 = vld [vmem:[#allocation68_spill] sm:$0xff] }
 0x56f   : > { %12633 = vmatprep.subr.bf16.mxu1 %v13637_v39 }
 0x571   : > { %12598 = vmatmul.mubr.bf16.gmra.mrb[12].mxu1 %v7858_v41 }
 0x572   : > { %12601 = vmatprep.mubr.bf16.mxu1 %v7860_v47  ;;  %12634 = vmatpush3.bf16.msra.mxu1 %v13637_v39  ;;  %v18383_v39 = vld [vmem:[#allocation71_spill] sm:$0xff]  ;;  %v18385_v47 = vld [vmem:[#allocation5_spill] sm:$0xff] }
 0x573   : > { %12635 = vmatprep.subr.bf16.mxu1 %v13640_v60  ;;  %v17070_v44 = vsub.s32 0, %v18385_v47 }
 0x576   : > { %12636 = vmatpush3.bf16.msra.mxu1 %v13640_v60 }
 0x577   : > { %12673 = vmatprep.subr.bf16.mxu1 %v13642_v14 }
 0x579   : > { %12602 = vmatmul.mubr.bf16.gmra.mrb[16].mxu1 %v7862_v13 }
 0x57a   : > { %12605 = vmatprep.mubr.bf16.mxu1 %v7864_v48 }
 0x581   : > { %12606 = vmatmul.mubr.bf16.gmra.mrb[20].mxu1 %v7866_v11 }
 0x582   : > { %12609 = vmatprep.mubr.bf16.mxu1 %v7868_v38 }
 0x589   : > { %12610 = vmatmul.mubr.bf16.gmra.mrb[24].mxu1 %v7870_v1 }
 0x58a   : > { %12613 = vmatprep.mubr.bf16.mxu1 %v7872_v12 }
 0x591   : > { %12614 = vmatmul.mubr.bf16.gmra.mrb[28].mxu1 %v7874_v30 }
 0x592   : > { %12617 = vmatprep.mubr.bf16.mxu1 %v7876_v21 }
 0x599   : > { %12618 = vmatmul.mubr.bf16.gmra.mrb[32].mxu1 %v7878_v9 }
 0x59a   : > { %12637 = vmatprep.mubr.bf16.mxu1 %v18360_v10 }
 0x5a1   : > { %12638 = vmatmul.mubr.bf16.vlgmr.msra.gmra.mrb[0].mxu1 %v18361_v24 }
 0x5a2   : > { %12641 = vmatprep.mubr.bf16.mxu1 %v18362_v51  ;;  %12674 = vmatpush3.bf16.msra.mxu1 %v13642_v14 }
 0x5a3   : > { %12675 = vmatprep.subr.bf16.mxu1 %v13643_v36 }
 0x5a6   : > { %12676 = vmatpush3.bf16.msra.mxu1 %v13643_v36 }
 0x5a7   : > { %12677 = vmatprep.subr.bf16.mxu1 %v13644_v34 }
 0x5a9   : > { %12642 = vmatmul.mubr.bf16.gmra.mrb[4].mxu1 %v18363_v16 }
 0x5aa   : > { %12645 = vmatprep.mubr.bf16.mxu1 %v18364_v25  ;;  %12678 = vmatpush3.bf16.msra.mxu1 %v13644_v34 }
 0x5ab   : > { %12679 = vmatprep.subr.bf16.mxu1 %v13645_v7 }
 0x5ae   : > { %12680 = vmatpush3.bf16.msra.mxu1 %v13645_v7 }
 0x5af   : > { %12681 = vmatprep.subr.bf16.mxu1 %v13646_v43 }
 0x5b1   : > { %12646 = vmatmul.mubr.bf16.gmra.mrb[8].mxu1 %v18365_v22 }
 0x5b2   : > { %12649 = vmatprep.mubr.bf16.mxu1 %v18366_v6  ;;  %12682 = vmatpush3.bf16.msra.mxu1 %v13646_v43 }
 0x5b3   : > { %12683 = vmatprep.subr.bf16.mxu1 %v13647_v45 }
 0x5b6   : > { %12684 = vmatpush3.bf16.msra.mxu1 %v13647_v45 }
 0x5b7   : > { %12685 = vmatprep.subr.bf16.mxu1 %v13648_v37 }
 0x5b9   : > { %12650 = vmatmul.mubr.bf16.gmra.mrb[12].mxu1 %v18367_v49 }
 0x5ba   : > { %12653 = vmatprep.mubr.bf16.mxu1 %v18368_v23  ;;  %12686 = vmatpush3.bf16.msra.mxu1 %v13648_v37 }
 0x5bb   : > { %12687 = vmatprep.subr.bf16.mxu1 %v13649_v46 }
 0x5be   : > { %12688 = vmatpush3.bf16.msra.mxu1 %v13649_v46 }
 0x5c1   : > { %12654 = vmatmul.mubr.bf16.gmra.mrb[16].mxu1 %v18369_v55 }
 0x5c2   : > { %12657 = vmatprep.mubr.bf16.mxu1 %v16633_v54  ;;  %v8347_v54 = vsel %vm18370_vm9, %v16666_v0, %v8346_v52  ;;  %v18377_v0 = vld [vmem:[#allocation66_spill] sm:$0xff] }
 0x5c9   : > { %12658 = vmatmul.mubr.bf16.gmra.mrb[20].mxu1 %v16637_v63  ;;  %v18371_v63 = vld [vmem:[#allocation62_spill] sm:$0xff] }
 0x5ca   : > { %12661 = vmatprep.mubr.bf16.mxu1 %v16640_v4  ;;  %v18372_v4 = vld [vmem:[#allocation63_spill] sm:$0xff] }
 0x5d1   : > { %12662 = vmatmul.mubr.bf16.gmra.mrb[24].mxu1 %v16646_v33  ;;  %v18373_v33 = vld [vmem:[#allocation49_spill] sm:$0xff] }
 0x5d2   : > { %12665 = vmatprep.mubr.bf16.mxu1 %v16656_v61  ;;  %v18374_v61 = vld [vmem:[#allocation64_spill] sm:$0xff] }
 0x5d9   : > { %12666 = vmatmul.mubr.bf16.gmra.mrb[28].mxu1 %v16659_v35  ;;  %v18376_v35 = vld [vmem:[#allocation50_spill] sm:$0xff] }
 0x5da   : > { %12669 = vmatprep.mubr.bf16.mxu1 %v16681_v59  ;;  %v18379_v59 = vld [vmem:[#allocation52_spill] sm:$0xff] }
 0x5e1   : > { %12670 = vmatmul.mubr.bf16.gmra.mrb[32].mxu1 %v8347_v54 }
 0x5e2   : > { %12689 = vmatprep.mubr.bf16.mxu1 %v16671_v26  ;;  %v18378_v26 = vld [vmem:[#allocation67_spill] sm:$0xff] }
 0x5e9   : > { %12690 = vmatmul.mubr.bf16.vlgmr.msra.gmra.mrb[0].mxu1 %v18371_v63 }
 0x5ea   : > { %12693 = vmatprep.mubr.bf16.mxu1 %v18372_v4 }
 0x5f1   : > { %12694 = vmatmul.mubr.bf16.gmra.mrb[4].mxu1 %v18373_v33 }
 0x5f2   : > { %12697 = vmatprep.mubr.bf16.mxu1 %v18374_v61 }
 0x5f9   : > { %12698 = vmatmul.mubr.bf16.gmra.mrb[8].mxu1 %v18375_v27 }
 0x5fa   : > { %12701 = vmatprep.mubr.bf16.mxu1 %v16707_v58  ;;  %v18384_v58 = vld [vmem:[#allocation70_spill] sm:$0xff] }
 0x601   : > { %12702 = vmatmul.mubr.bf16.gmra.mrb[12].mxu1 %v16710_v29  ;;  %v13692_v29 = vmov 1983009808  }
 0x602   : > { %12705 = vmatprep.mubr.bf16.mxu1 %v16715_v20  ;;  %v9080_v20 = vunpack.c.l.s4 %v13692_v29 }
 0x604   : > { %v9081_v28 = vunpack.c.0.s8 %v9080_v20 }
 0x606   : > { %v17062_v14 = vsub.s32 %v9081_v28, %v18385_v47 }
 0x609   : > { %12706 = vmatmul.mubr.bf16.gmra.mrb[16].mxu1 %v18376_v35 }
 0x60a   : > { %12709 = vmatprep.mubr.bf16.mxu1 %v18377_v0 }
 0x611   : > { %12710 = vmatmul.mubr.bf16.gmra.mrb[20].mxu1 %v18378_v26 }
 0x612   : > { %12713 = vmatprep.mubr.bf16.mxu1 %v18379_v59 }
 0x619   : > { %12714 = vmatmul.mubr.bf16.gmra.mrb[24].mxu1 %v18380_v32 }
 0x61a   : > { %12717 = vmatprep.mubr.bf16.mxu1 %v18381_v56 }
 0x621   : > { %12718 = vmatmul.mubr.bf16.gmra.mrb[28].mxu1 %v18382_v42 }
 0x622   : > { %12721 = vmatprep.mubr.bf16.mxu1 %v18383_v39 }
 0x629   : > { %12722 = vmatmul.mubr.bf16.gmra.mrb[32].mxu1 %v18384_v58 }
 0x6bc   : > { %v12691_v60 = vpop.f32.mrb[0].mxu1 }
 0x6bd   : > { %v8972_v41 = vadd.f32 %v12691_v60, %v17058_v31  ;;  %v8784_v57 = vpop.f32.mrb[1].mxu1 }
 0x6be   : > { %v8970_v3 = vadd.f32 %v17058_v31, %v8784_v57  ;;  %v12692_v13 = vpop.f32.mrb[2].mxu1 }
 0x6bf   : > { %v9008_v48 = vmax.f32 %v8972_v41, 0.0  ;;  %v8973_v15 = vadd.f32 %v12692_v13, %v17058_v31  ;;  %v8787_v53 = vpop.f32.mrb[3].mxu1 }
 0x6c0   : > { %v9006_v11 = vmax.f32 %v8970_v3, 0.0  ;;  %v8971_v38 = vadd.f32 %v17058_v31, %v8787_v53 }
 0x6c1   : > { %v9112_v62 = vcombine.high %v9008_v48, %v9008_v48  ;;  %v9119_v19 = vrot.slane %v9008_v48, %v17062_v14  ;;  %v9009_v1 = vmax.f32 %v8973_v15, 0.0 }
 0x6c2   : > { %v9078_v12 = vcombine.high %v9006_v11, %v9006_v11  ;;  %v9085_v5 = vrot.slane %v9006_v11, %v17062_v14  ;;  %v9007_v30 = vmax.f32 %v8971_v38, 0.0 }
 0x6c3   : > { %v9126_v50 = vrot.slane %v9112_v62, %v17062_v14  ;;  %v9127_v21 = vcombine.high %v9119_v19, %v9119_v19  ;;  %v9129_v40 = vcombine.high %v9009_v1, %v9009_v1  ;;  %v9136_v9 = vrot.slane %v9009_v1, %v17062_v14 }
 0x6c4   : > { %v9092_v10 = vrot.slane %v9078_v12, %v17062_v14  ;;  %v9093_v36 = vcombine.high %v9085_v5, %v9085_v5  ;;  %v11154_v24 = vrot.slane %v9085_v5, 9  ;;  %v9095_v51 = vcombine.high %v9007_v30, %v9007_v30  ;;  %v12695_v34 = vpop.f32.mrb[4].mxu1 }
 0x6c5   : > { %v9128_v7 = vcombine.high %v9126_v50, %v9126_v50  ;;  %v11218_v16 = vrot.slane %v9127_v21, 9  ;;  %v11219_v25 = vrot.slane %v9126_v50, 9  ;;  %v9143_v43 = vrot.slane %v9129_v40, %v17062_v14  ;;  %v8800_v45 = vpop.f32.mrb[5].mxu1 }
 0x6c6   : > { %v9094_v22 = vcombine.high %v9092_v10, %v9092_v10  ;;  %v11155_v6 = vrot.slane %v9093_v36, 9  ;;  %v11156_v37 = vrot.slane %v9092_v10, 9  ;;  %v10002_v46 = vmax.f32 %v9085_v5, %v11154_v24  ;;  %v12696_v49 = vpop.f32.mrb[6].mxu1 }
 0x6c7   : > { %v11220_v23 = vrot.slane %v9128_v7, 9  ;;  %v10258_v55 = vmax.f32 %v9127_v21, %v11218_v16  ;;  %v10259_v18 = vmax.f32 %v9126_v50, %v11219_v25  ;;  %v9144_v2 = vcombine.high %v9136_v9, %v9136_v9  ;;  %v17076_v17 = vpop.f32.mrb[7].mxu1 }
 0x6c8   : > { %v11157_v8 = vrot.slane %v9094_v22, 9  ;;  %v10003_v52 = vmax.f32 %v9093_v36, %v11155_v6  ;;  %v10004_v54 = vmax.f32 %v9092_v10, %v11156_v37  ;;  %v9145_v63 = vcombine.high %v9143_v43, %v9143_v43 }
 0x6c9   : > { %v10260_v4 = vmax.f32 %v9128_v7, %v11220_v23  ;;  %v10322_v33 = vmax.f32 %v10002_v46, %v10258_v55  ;;  %v11221_v61 = vrot.slane %v9136_v9, 9  ;;  %v11222_v27 = vrot.slane %v9144_v2, 9 }
 0x6ca   : > { %v10323_v35 = vmax.f32 %v10003_v52, %v10259_v18  ;;  %v10005_v0 = vmax.f32 %v9094_v22, %v11157_v8  ;;  %v11223_v26 = vrot.slane %v9143_v43, 9  ;;  %v11224_v59 = vrot.slane %v9145_v63, 9 }
 0x6cb   : > { %v10324_v32 = vmax.f32 %v10004_v54, %v10260_v4  ;;  %v10453_v56 = vrot.slane %v10322_v33, %v17070_v44  ;;  %v10261_v42 = vmax.f32 %v9136_v9, %v11221_v61  ;;  %v10262_v39 = vmax.f32 %v9144_v2, %v11222_v27 }
 0x6cc   : > { %v10457_v58 = vrot.slane %v10323_v35, %v17070_v44  ;;  %v10263_v29 = vmax.f32 %v9143_v43, %v11223_v26  ;;  %v10264_v20 = vmax.f32 %v9145_v63, %v11224_v59  ;;  %v9102_v28 = vrot.slane %v9007_v30, %v17062_v14  ;;  %v17081_v60 = vpop.f32.mrb[8].mxu1 }
 0x6cd   : > { %v10461_v41 = vrot.slane %v10324_v32, %v17070_v44  ;;  %v10325_v47 = vmax.f32 %v10005_v0, %v10261_v42  ;;  %v9109_v57 = vrot.slane %v9095_v51, %v17062_v14  ;;  %v8976_v3 = vadd.f32 %v12695_v34, %v17058_v31  ;;  %v17086_v13 = vpop.f32.mrb[9].mxu1 }
 0x6ce   : > { %v10707_v48 = vsel %vm10706_vm8, %v10457_v58, %v10453_v56  ;;  %v9110_v15 = vcombine.high %v9102_v28, %v9102_v28  ;;  %v11158_v53 = vrot.slane %v9102_v28, 9  ;;  %v8974_v11 = vadd.f32 %v17058_v31, %v8800_v45  ;;  %v17090_v38 = vpop.f32.mrb[10].mxu1 }
 0x6cf   : > { %v10709_v62 = vsel %vm10708_vm6, %v10461_v41, %v10707_v48  ;;  %v10465_v19 = vrot.slane %v10325_v47, %v17070_v44  ;;  %v9111_v1 = vcombine.high %v9109_v57, %v9109_v57  ;;  %v11160_v12 = vrot.slane %v9109_v57, 9  ;;  %v17094_v5 = vpop.f32.mrb[11].mxu1 }
 0x6d0   : > { %v11159_v30 = vrot.slane %v9110_v15, 9  ;;  %v10006_v50 = vmax.f32 %v9102_v28, %v11158_v53  ;;  %v9012_v21 = vmax.f32 %v8976_v3, 0.0  ;;  %v9010_v40 = vmax.f32 %v8974_v11, 0.0 }
 0x6d1   : > { %v10711_v9 = vsel %vm10710_vm1, %v10465_v19, %v10709_v62  ;;  %v10008_v10 = vmax.f32 %v9109_v57, %v11160_v12  ;;  %v11161_v36 = vrot.slane %v9111_v1, 9  ;;  %v8977_v37 = vadd.f32 %v12696_v49, %v17058_v31 }
 0x6d2   : > { %v10007_v24 = vmax.f32 %v9110_v15, %v11159_v30  ;;  %v10326_v51 = vmax.f32 %v10006_v50, %v10262_v39  ;;  %v9179_v34 = vcombine.high %v9012_v21, %v9012_v21  ;;  %v17098_v7 = vrot.slane %v9012_v21, %v17062_v14 }
 0x6d3   : > { %v10328_v16 = vmax.f32 %v10008_v10, %v10264_v20  ;;  %v9146_v25 = vcombine.high %v9010_v40, %v9010_v40  ;;  %v9153_v43 = vrot.slane %v9010_v40, %v17062_v14  ;;  %v10009_v55 = vmax.f32 %v9111_v1, %v11161_v36 }
 0x6d4   : > { %v10327_v45 = vmax.f32 %v10007_v24, %v10263_v29  ;;  %v10469_v22 = vrot.slane %v10326_v51, %v17070_v44  ;;  %v9193_v6 = vrot.slane %v9179_v34, %v17062_v14  ;;  %v17104_v46 = vpop.f32.mrb[12].mxu1  ;;  %v17113_v54 = vcombine.high %v17098_v7, %v17098_v7 }
 0x6d5   : > { %v9160_v23 = vrot.slane %v9146_v25, %v17062_v14  ;;  %v11225_v18 = vrot.slane %v9153_v43, 9  ;;  %v17107_v2 = vpop.f32.mrb[13].mxu1  ;;  %v10477_v4 = vrot.slane %v10328_v16, %v17070_v44  ;;  %v11168_v0 = vrot.slane %v17098_v7, 9 }
 0x6d6   : > { %v10473_v8 = vrot.slane %v10327_v45, %v17070_v44  ;;  %v10713_v52 = vsel %vm10712_vm14, %v10469_v22, %v10711_v9  ;;  %v9195_v63 = vcombine.high %v9193_v6, %v9193_v6  ;;  %v17115_v49 = vpop.f32.mrb[14].mxu1  ;;  %v9013_v32 = vmax.f32 %v8977_v37, 0.0 }
 0x6d7   : > { %v9161_v33 = vcombine.high %v9160_v23, %v9160_v23  ;;  %v11162_v61 = vrot.slane %v9160_v23, 9  ;;  %v10265_v27 = vmax.f32 %v9153_v43, %v11225_v18  ;;  %v17118_v35 = vpop.f32.mrb[15].mxu1  ;;  %v8975_v41 = vadd.f32 %v17058_v31, %v17076_v17 }
 0x6d8   : > { %v11226_v26 = vrot.slane %v9195_v63, 9  ;;  %v10715_v59 = vsel %vm10714_vm0, %v10473_v8, %v10713_v52  ;;  %v9196_v20 = vcombine.high %v9013_v32, %v9013_v32  ;;  %v9203_v28 = vrot.slane %v9013_v32, %v17062_v14 }
 0x6d9   : > { %v11163_v56 = vrot.slane %v9161_v33, 9  ;;  %v10010_v42 = vmax.f32 %v9160_v23, %v11162_v61  ;;  %v10329_v39 = vmax.f32 %v10009_v55, %v10265_v27  ;;  %v10717_v58 = vsel %vm10716_vm4, %v10477_v4, %v10715_v59 }
 0x6da   : > { %v10266_v29 = vmax.f32 %v9195_v63, %v11226_v26  ;;  %v11169_v47 = vrot.slane %v17113_v54, 9  ;;  %v8980_v3 = vadd.f32 %v17081_v60, %v17058_v31  ;;  %v8978_v48 = vadd.f32 %v17058_v31, %v17086_v13 }
 0x6db   : > { %v10481_v57 = vrot.slane %v10329_v39, %v17070_v44  ;;  %v9210_v53 = vrot.slane %v9196_v20, %v17062_v14  ;;  %v9211_v17 = vcombine.high %v9203_v28, %v9203_v28  ;;  %v11227_v11 = vrot.slane %v9203_v28, 9 }
 0x6dc   : > { %v10330_v15 = vmax.f32 %v10010_v42, %v10266_v29  ;;  %v17139_v62 = vpop.f32.mrb[16].mxu1  ;;  %v10011_v1 = vmax.f32 %v9161_v33, %v11163_v56  ;;  %v9011_v12 = vmax.f32 %v8975_v41, 0.0  ;;  %v9016_v30 = vmax.f32 %v8980_v3, 0.0 }
 0x6dd   : > { %v10719_v19 = vsel %vm10718_vm11, %v10481_v57, %v10717_v58  ;;  %v17142_v50 = vpop.f32.mrb[17].mxu1  ;;  %v9212_v21 = vcombine.high %v9210_v53, %v9210_v53  ;;  %v11228_v60 = vrot.slane %v9211_v17, 9  ;;  %v11229_v40 = vrot.slane %v9210_v53, 9 }
 0x6de   : > { %10777 = vst [vmem:[%s17131_s19] sm:$0xff] %v10719_v19  ;;  %v9014_v9 = vmax.f32 %v8978_v48, 0.0  ;;  %v17145_v13 = vpop.f32.mrb[18].mxu1  ;;  %v10267_v10 = vmax.f32 %v9203_v28, %v11227_v11  ;;  %v9162_v36 = vcombine.high %v9011_v12, %v9011_v12  ;;  %v9169_v24 = vrot.slane %v9011_v12, %v17062_v14 }
 0x6df   : > { %v9246_v51 = vcombine.high %v9016_v30, %v9016_v30  ;;  %v17148_v34 = vpop.f32.mrb[19].mxu1  ;;  %v10485_v16 = vrot.slane %v10330_v15, %v17070_v44  ;;  %v11230_v25 = vrot.slane %v9212_v21, 9  ;;  %v10268_v43 = vmax.f32 %v9211_v17, %v11228_v60 }
 0x6e0   : > { %v17152_v45 = vrot.slane %v9016_v30, %v17062_v14  ;;  %v10331_v22 = vmax.f32 %v10011_v1, %v10267_v10  ;;  %v9176_v6 = vrot.slane %v9162_v36, %v17062_v14  ;;  %v9177_v37 = vcombine.high %v9169_v24, %v9169_v24 }
 0x6e1   : > { %v11164_v23 = vrot.slane %v9169_v24, 9  ;;  %v10269_v55 = vmax.f32 %v9210_v53, %v11229_v40  ;;  %v10270_v18 = vmax.f32 %v9212_v21, %v11230_v25  ;;  %v17156_v8 = vrot.slane %v9246_v51, %v17062_v14 }
 0x6e2   : > { %v17160_v52 = vcombine.high %v17152_v45, %v17152_v45  ;;  %v10489_v63 = vrot.slane %v10331_v22, %v17070_v44  ;;  %v9178_v4 = vcombine.high %v9176_v6, %v9176_v6  ;;  %v11165_v33 = vrot.slane %v9177_v37, 9 }
 0x6e3   : > { %v11166_v61 = vrot.slane %v9176_v6, 9  ;;  %v10016_v27 = vmax.f32 %v17098_v7, %v11168_v0  ;;  %v10017_v26 = vmax.f32 %v17113_v54, %v11169_v47  ;;  %v10012_v59 = vmax.f32 %v9169_v24, %v11164_v23 }
 0x6e4   : > { %v17165_v32 = vpop.f32.mrb[20].mxu1  ;;  %v10720_v56 = vsel %vm10706_vm8, %v10489_v63, %v10485_v16  ;;  %v11167_v42 = vrot.slane %v9178_v4, 9  ;;  %v10013_v39 = vmax.f32 %v9177_v37, %v11165_v33  ;;  %v11174_v28 = vrot.slane %v17152_v45, 9 }
 0x6e5   : > { %v10014_v58 = vmax.f32 %v9176_v6, %v11166_v61  ;;  %v17168_v29 = vpop.f32.mrb[21].mxu1  ;;  %v10332_v20 = vmax.f32 %v10012_v59, %v10268_v43  ;;  %v11175_v41 = vrot.slane %v17160_v52, 9  ;;  %v11176_v57 = vrot.slane %v17156_v8, 9 }
 0x6e6   : > { %v17173_v7 = vpop.f32.mrb[22].mxu1  ;;  %v10333_v54 = vmax.f32 %v10013_v39, %v10269_v55  ;;  %v9213_v47 = vcombine.high %v9014_v9, %v9014_v9  ;;  %v9220_v3 = vrot.slane %v9014_v9, %v17062_v14  ;;  %v10015_v53 = vmax.f32 %v9178_v4, %v11167_v42 }
 0x6e7   : > { %v10334_v0 = vmax.f32 %v10014_v58, %v10270_v18  ;;  %v17176_v48 = vpop.f32.mrb[23].mxu1  ;;  %v10493_v15 = vrot.slane %v10332_v20, %v17070_v44  ;;  %v8981_v17 = vadd.f32 %v17090_v38, %v17058_v31  ;;  %v8979_v11 = vadd.f32 %v17058_v31, %v17094_v5 }
 0x6e8   : > { %v10497_v19 = vrot.slane %v10333_v54, %v17070_v44  ;;  %v9227_v12 = vrot.slane %v9213_v47, %v17062_v14  ;;  %v9228_v30 = vcombine.high %v9220_v3, %v9220_v3  ;;  %v11231_v60 = vrot.slane %v9220_v3, 9 }
 0x6e9   : > { %v10501_v1 = vrot.slane %v10334_v0, %v17070_v44  ;;  %v10721_v21 = vsel %vm10708_vm6, %v10493_v15, %v10720_v56  ;;  %v9017_v40 = vmax.f32 %v8981_v17, 0.0  ;;  %v9015_v9 = vmax.f32 %v8979_v11, 0.0 }
 0x6ea   : > { %v10722_v10 = vsel %vm10710_vm1, %v10497_v19, %v10721_v21  ;;  %v11232_v36 = vrot.slane %v9228_v30, 9  ;;  %v11233_v24 = vrot.slane %v9227_v12, 9  ;;  %v8984_v38 = vadd.f32 %v17104_v46, %v17058_v31 }
 0x6eb   : > { %v10723_v5 = vsel %vm10712_vm14, %v10501_v1, %v10722_v10  ;;  %v10271_v51 = vmax.f32 %v9220_v3, %v11231_v60  ;;  %v9263_v16 = vcombine.high %v9017_v40, %v9017_v40  ;;  %v9270_v25 = vrot.slane %v9017_v40, %v17062_v14 }
 0x6ec   : > { %v17192_v43 = vpop.f32.mrb[24].mxu1  ;;  %v10272_v22 = vmax.f32 %v9228_v30, %v11232_v36  ;;  %v10273_v6 = vmax.f32 %v9227_v12, %v11233_v24  ;;  %v9229_v37 = vcombine.high %v9015_v9, %v9015_v9  ;;  %v9236_v23 = vrot.slane %v9015_v9, %v17062_v14 }
 0x6ed   : > { %v17195_v55 = vpop.f32.mrb[25].mxu1  ;;  %v10335_v18 = vmax.f32 %v10015_v53, %v10271_v51  ;;  %v9277_v63 = vrot.slane %v9263_v16, %v17062_v14  ;;  %v9278_v4 = vcombine.high %v9270_v25, %v9270_v25  ;;  %v9020_v46 = vmax.f32 %v8984_v38, 0.0 }
 0x6ee   : > { %v17198_v33 = vpop.f32.mrb[26].mxu1  ;;  %v10336_v61 = vmax.f32 %v10016_v27, %v10272_v22  ;;  %v10337_v59 = vmax.f32 %v10017_v26, %v10273_v6  ;;  %v9243_v56 = vrot.slane %v9229_v37, %v17062_v14  ;;  %v9244_v42 = vcombine.high %v9236_v23, %v9236_v23 }
 0x6ef   : > { %v17201_v39 = vpop.f32.mrb[27].mxu1  ;;  %v10505_v58 = vrot.slane %v10335_v18, %v17070_v44  ;;  %v9279_v20 = vcombine.high %v9277_v63, %v9277_v63  ;;  %v11234_v54 = vrot.slane %v9278_v4, 9  ;;  %v11235_v0 = vrot.slane %v9277_v63, 9 }
 0x6f0   : > { %v10509_v47 = vrot.slane %v10336_v61, %v17070_v44  ;;  %v10513_v3 = vrot.slane %v10337_v59, %v17070_v44  ;;  %v9245_v15 = vcombine.high %v9243_v56, %v9243_v56  ;;  %v11170_v53 = vrot.slane %v9236_v23, 9 }
 0x6f1   : > { %v10724_v27 = vsel %vm10714_vm0, %v10505_v58, %v10723_v5  ;;  %v11236_v26 = vrot.slane %v9279_v20, 9  ;;  %v10274_v17 = vmax.f32 %v9278_v4, %v11234_v54  ;;  %v10275_v11 = vmax.f32 %v9277_v63, %v11235_v0 }
 0x6f2   : > { %v10725_v19 = vsel %vm10716_vm4, %v10509_v47, %v10724_v27  ;;  %v11171_v1 = vrot.slane %v9244_v42, 9  ;;  %v11172_v12 = vrot.slane %v9243_v56, 9  ;;  %v11173_v30 = vrot.slane %v9245_v15, 9 }
 0x6f3   : > { %v10726_v21 = vsel %vm10718_vm11, %v10513_v3, %v10725_v19  ;;  %v10276_v60 = vmax.f32 %v9279_v20, %v11236_v26  ;;  %v10018_v40 = vmax.f32 %v9236_v23, %v11170_v53  ;;  %v9313_v9 = vcombine.high %v9020_v46, %v9020_v46 }
 0x6f4   : > { %v17209_v10 = vpop.f32.mrb[28].mxu1  ;;  %10778 = vst [vmem:[%s17131_s19 + $0x8] sm:$0xff] %v10726_v21  ;;  %v10019_v36 = vmax.f32 %v9244_v42, %v11171_v1  ;;  %v10020_v24 = vmax.f32 %v9243_v56, %v11172_v12  ;;  %v9320_v38 = vrot.slane %v9020_v46, %v17062_v14  ;;  %v8982_v5 = vadd.f32 %v17058_v31, %v17107_v2 }
 0x6f5   : > { %v17215_v51 = vpop.f32.mrb[29].mxu1  ;;  %v17219_v16 = vcombine.high %v17156_v8, %v17156_v8  ;;  %v10338_v25 = vmax.f32 %v10018_v40, %v10274_v17  ;;  %v17222_v22 = vrot.slane %v9313_v9, %v17062_v14  ;;  %v10022_v37 = vmax.f32 %v17152_v45, %v11174_v28 }
 0x6f6   : > { %v17224_v6 = vpop.f32.mrb[30].mxu1  ;;  %v10339_v23 = vmax.f32 %v10019_v36, %v10275_v11  ;;  %v10340_v18 = vmax.f32 %v10020_v24, %v10276_v60  ;;  %v8985_v2 = vadd.f32 %v17115_v49, %v17058_v31  ;;  %v10023_v4 = vmax.f32 %v17160_v52, %v11175_v41 }
 0x6f7   : > { %v17231_v63 = vpop.f32.mrb[31].mxu1  ;;  %v10024_v46 = vmax.f32 %v17156_v8, %v11176_v57  ;;  %v10517_v61 = vrot.slane %v10338_v25, %v17070_v44  ;;  %v9018_v59 = vmax.f32 %v8982_v5, 0.0  ;;  %v17242_v56 = vcombine.high %v9320_v38, %v9320_v38 }
 0x6f8   : > { %v10521_v45 = vrot.slane %v10339_v23, %v17070_v44  ;;  %v10525_v28 = vrot.slane %v10340_v18, %v17070_v44  ;;  %v10021_v49 = vmax.f32 %v9245_v15, %v11173_v30  ;;  %v17246_v42 = vcombine.high %v17222_v22, %v17222_v22 }
 0x6f9   : > { %v11180_v58 = vrot.slane %v9320_v38, 9  ;;  %v9280_v52 = vcombine.high %v9018_v59, %v9018_v59  ;;  %v9287_v41 = vrot.slane %v9018_v59, %v17062_v14  ;;  %v11182_v57 = vrot.slane %v17222_v22, 9 }
 0x6fa   : > { %v10727_v8 = vsel %vm10706_vm8, %v10521_v45, %v10517_v61  ;;  %v9021_v20 = vmax.f32 %v8985_v2, 0.0  ;;  %v8983_v54 = vadd.f32 %v17058_v31, %v17118_v35  ;;  %v11181_v27 = vrot.slane %v17242_v56, 9 }
 0x6fb   : > { %v10728_v0 = vsel %vm10708_vm6, %v10525_v28, %v10727_v8  ;;  %v9294_v47 = vrot.slane %v9280_v52, %v17062_v14  ;;  %v9295_v3 = vcombine.high %v9287_v41, %v9287_v41  ;;  %v11237_v15 = vrot.slane %v9287_v41, 9 }
 0x6fc   : > { %v17255_v53 = vpop.f32.mrb[32].mxu1  ;;  %v9330_v26 = vcombine.high %v9021_v20, %v9021_v20  ;;  %v9337_v17 = vrot.slane %v9021_v20, %v17062_v14  ;;  %v9019_v11 = vmax.f32 %v8983_v54, 0.0  ;;  %v17263_v60 = vmax.f32 %v9320_v38, %v11180_v58 }
 0x6fd   : > { %v17259_v19 = vpop.f32.mrb[33].mxu1  ;;  %v9296_v1 = vcombine.high %v9294_v47, %v9294_v47  ;;  %v11238_v12 = vrot.slane %v9295_v3, 9  ;;  %v11239_v30 = vrot.slane %v9294_v47, 9  ;;  %v10277_v35 = vmax.f32 %v9287_v41, %v11237_v15 }
 0x6fe   : > { %v17261_v21 = vpop.f32.mrb[34].mxu1  ;;  %v9344_v40 = vrot.slane %v9330_v26, %v17062_v14  ;;  %v9345_v9 = vcombine.high %v9337_v17, %v9337_v17  ;;  %v9297_v36 = vcombine.high %v9019_v11, %v9019_v11  ;;  %v11183_v2 = vrot.slane %v17246_v42, 9 }
 0x6ff   : > { %v17266_v24 = vpop.f32.mrb[35].mxu1  ;;  %v11240_v5 = vrot.slane %v9296_v1, 9  ;;  %v10278_v25 = vmax.f32 %v9295_v3, %v11238_v12  ;;  %v10279_v23 = vmax.f32 %v9294_v47, %v11239_v30  ;;  %v10341_v18 = vmax.f32 %v10021_v49, %v10277_v35 }
 0x700   : > { %v9346_v61 = vcombine.high %v9344_v40, %v9344_v40  ;;  %v9304_v59 = vrot.slane %v9019_v11, %v17062_v14  ;;  %v11177_v45 = vrot.slane %v17219_v16, 9  ;;  %v11184_v41 = vrot.slane %v9337_v17, 9 }
 0x701   : > { %v10280_v28 = vmax.f32 %v9296_v1, %v11240_v5  ;;  %v10342_v38 = vmax.f32 %v10022_v37, %v10278_v25  ;;  %v10343_v58 = vmax.f32 %v10023_v4, %v10279_v23  ;;  %v10529_v52 = vrot.slane %v10341_v18, %v17070_v44 }
 0x702   : > { %v11185_v8 = vrot.slane %v9345_v9, 9  ;;  %v11242_v20 = vrot.slane %v9346_v61, 9  ;;  %v9311_v54 = vrot.slane %v9297_v36, %v17062_v14  ;;  %v11241_v1 = vrot.slane %v9304_v59, 9 }
 0x703   : > { %v10344_v3 = vmax.f32 %v10024_v46, %v10280_v28  ;;  %v10533_v49 = vrot.slane %v10342_v38, %v17070_v44  ;;  %v10537_v47 = vrot.slane %v10343_v58, %v17070_v44  ;;  %v10729_v15 = vsel %vm10710_vm1, %v10529_v52, %v10728_v0 }
 0x704   : > { %v10282_v26 = vmax.f32 %v9346_v61, %v11242_v20  ;;  %v9312_v11 = vcombine.high %v9311_v54, %v9311_v54  ;;  %v11178_v12 = vrot.slane %v9311_v54, 9  ;;  %v8988_v30 = vadd.f32 %v17139_v62, %v17058_v31 }
 0x705   : > { %v10541_v37 = vrot.slane %v10344_v3, %v17070_v44  ;;  %v10730_v4 = vsel %vm10712_vm14, %v10533_v49, %v10729_v15  ;;  %v8986_v46 = vadd.f32 %v17058_v31, %v17142_v50  ;;  %v10025_v35 = vmax.f32 %v17219_v16, %v11177_v45 }
 0x706   : > { %v10026_v40 = vmax.f32 %v9311_v54, %v11178_v12  ;;  %v10281_v36 = vmax.f32 %v9304_v59, %v11241_v1  ;;  %v10731_v0 = vsel %vm10714_vm0, %v10537_v47, %v10730_v4  ;;  %v9024_v25 = vmax.f32 %v8988_v30, 0.0 }
 0x707   : > { %v10732_v5 = vsel %vm10716_vm4, %v10541_v37, %v10731_v0  ;;  %v9022_v23 = vmax.f32 %v8986_v46, 0.0  ;;  %v8989_v18 = vadd.f32 %v17145_v13, %v17058_v31  ;;  %v11179_v61 = vrot.slane %v9312_v11, 9 }
 0x708   : > { %v10345_v28 = vmax.f32 %v10025_v35, %v10281_v36  ;;  %v10346_v38 = vmax.f32 %v10026_v40, %v10282_v26  ;;  %v8987_v62 = vadd.f32 %v17058_v31, %v17148_v34  ;;  %v9380_v50 = vcombine.high %v9024_v25, %v9024_v25 }
 0x709   : > { %v9387_v16 = vrot.slane %v9024_v25, %v17062_v14  ;;  %v9347_v59 = vcombine.high %v9022_v23, %v9022_v23  ;;  %v9354_v45 = vrot.slane %v9022_v23, %v17062_v14  ;;  %v10029_v58 = vmax.f32 %v17242_v56, %v11181_v27 }
 0x70a   : > { %v10030_v52 = vmax.f32 %v17222_v22, %v11182_v57  ;;  %v10545_v13 = vrot.slane %v10345_v28, %v17070_v44  ;;  %v9025_v20 = vmax.f32 %v8989_v18, 0.0  ;;  %v17296_v54 = vmax.f32 %v9337_v17, %v11184_v41 }
 0x70b   : > { %v9394_v34 = vrot.slane %v9380_v50, %v17062_v14  ;;  %v9395_v3 = vcombine.high %v9387_v16, %v9387_v16  ;;  %v9361_v49 = vrot.slane %v9347_v59, %v17062_v14  ;;  %v17300_v47 = vmax.f32 %v9345_v9, %v11185_v8 }
 0x70c   : > { %v10733_v15 = vsel %vm10718_vm11, %v10545_v13, %v10732_v5  ;;  %v9362_v26 = vcombine.high %v9354_v45, %v9354_v45  ;;  %v11243_v56 = vrot.slane %v9354_v45, 9  ;;  %v11186_v27 = vrot.slane %v9387_v16, 9 }
 0x70d   : > { %10779 = vst [vmem:[%s17131_s19 + $0x10] sm:$0xff] %v10733_v15  ;;  %v10027_v12 = vmax.f32 %v9312_v11, %v11179_v61  ;;  %v9397_v22 = vcombine.high %v9025_v20, %v9025_v20  ;;  %v9023_v57 = vmax.f32 %v8987_v62, 0.0  ;;  %v9363_v1 = vcombine.high %v9361_v49, %v9361_v49 }
 0x70e   : > { %v11244_v37 = vrot.slane %v9362_v26, 9  ;;  %v11245_v17 = vrot.slane %v9361_v49, 9  ;;  %v10283_v41 = vmax.f32 %v9354_v45, %v11243_v56  ;;  %v17304_v4 = vcombine.high %v9394_v34, %v9394_v34 }
 0x70f   : > { %v11187_v30 = vrot.slane %v9395_v3, 9  ;;  %v11188_v46 = vrot.slane %v9394_v34, 9  ;;  %v9404_v9 = vrot.slane %v9025_v20, %v17062_v14  ;;  %v11246_v8 = vrot.slane %v9363_v1, 9 }
 0x710   : > { %v10284_v35 = vmax.f32 %v9362_v26, %v11244_v37  ;;  %v10285_v40 = vmax.f32 %v9361_v49, %v11245_v17  ;;  %v10347_v36 = vmax.f32 %v10027_v12, %v10283_v41  ;;  %v10549_v0 = vrot.slane %v10346_v38, %v17070_v44 }
 0x711   : > { %v17309_v11 = vrot.slane %v9397_v22, %v17062_v14  ;;  %v17311_v5 = vcombine.high %v9404_v9, %v9404_v9  ;;  %v9364_v25 = vcombine.high %v9023_v57, %v9023_v57  ;;  %v10286_v23 = vmax.f32 %v9363_v1, %v11246_v8 }
 0x712   : > { %v10348_v18 = vmax.f32 %v17263_v60, %v10284_v35  ;;  %v10349_v61 = vmax.f32 %v10029_v58, %v10285_v40  ;;  %v10553_v28 = vrot.slane %v10347_v36, %v17070_v44  ;;  %v11189_v62 = vrot.slane %v17304_v4, 9 }
 0x713   : > { %v17316_v50 = vmax.f32 %v9387_v16, %v11186_v27  ;;  %v17318_v59 = vmax.f32 %v9395_v3, %v11187_v30  ;;  %v17320_v45 = vmax.f32 %v9394_v34, %v11188_v46  ;;  %v10350_v38 = vmax.f32 %v10030_v52, %v10286_v23 }
 0x714   : > { %v10557_v13 = vrot.slane %v10348_v18, %v17070_v44  ;;  %v10561_v20 = vrot.slane %v10349_v61, %v17070_v44  ;;  %v10734_v49 = vsel %vm10706_vm8, %v10553_v28, %v10549_v0  ;;  %v9413_v60 = vcombine.high %v17309_v11, %v17309_v11 }
 0x715   : > { %v11190_v58 = vrot.slane %v9404_v9, 9  ;;  %v9371_v15 = vrot.slane %v9023_v57, %v17062_v14  ;;  %v9378_v16 = vrot.slane %v9364_v25, %v17062_v14  ;;  %v10565_v3 = vrot.slane %v10350_v38, %v17070_v44 }
 0x716   : > { %v10735_v34 = vsel %vm10708_vm6, %v10557_v13, %v10734_v49  ;;  %v11191_v52 = vrot.slane %v17311_v5, 9  ;;  %v8992_v26 = vadd.f32 %v17165_v32, %v17058_v31  ;;  %v10031_v57 = vmax.f32 %v17246_v42, %v11183_v2 }
 0x717   : > { %v10736_v56 = vsel %vm10710_vm1, %v10561_v20, %v10735_v34  ;;  %v9379_v27 = vcombine.high %v9371_v15, %v9371_v15  ;;  %v11247_v12 = vrot.slane %v9371_v15, 9  ;;  %v11249_v22 = vrot.slane %v9378_v16, 9 }
 0x718   : > { %v10737_v1 = vsel %vm10712_vm14, %v10565_v3, %v10736_v56  ;;  %v9028_v37 = vmax.f32 %v8992_v26, 0.0  ;;  %v8990_v17 = vadd.f32 %v17058_v31, %v17168_v29  ;;  %v8993_v32 = vadd.f32 %v17173_v7, %v17058_v31 }
 0x719   : > { %v11248_v41 = vrot.slane %v9379_v27, 9  ;;  %v10287_v30 = vmax.f32 %v9371_v15, %v11247_v12  ;;  %v10289_v46 = vmax.f32 %v9378_v16, %v11249_v22  ;;  %v11193_v40 = vrot.slane %v9413_v60, 9 }
 0x71a   : > { %v9448_v8 = vcombine.high %v9028_v37, %v9028_v37  ;;  %v9455_v35 = vrot.slane %v9028_v37, %v17062_v14  ;;  %v9026_v36 = vmax.f32 %v8990_v17, 0.0  ;;  %v9029_v2 = vmax.f32 %v8993_v32, 0.0 }
 0x71b   : > { %v10288_v0 = vmax.f32 %v9379_v27, %v11248_v41  ;;  %v10351_v25 = vmax.f32 %v10031_v57, %v10287_v30  ;;  %v10353_v42 = vmax.f32 %v17300_v47, %v10289_v46  ;;  %v11192_v28 = vrot.slane %v17309_v11, 9 }
 0x71c   : > { %v9462_v23 = vrot.slane %v9448_v8, %v17062_v14  ;;  %v11257_v18 = vrot.slane %v9455_v35, 9  ;;  %v9414_v29 = vcombine.high %v9026_v36, %v9026_v36  ;;  %v9421_v61 = vrot.slane %v9026_v36, %v17062_v14 }
 0x71d   : > { %v10352_v7 = vmax.f32 %v17296_v54, %v10288_v0  ;;  %v10569_v38 = vrot.slane %v10351_v25, %v17070_v44  ;;  %v9464_v13 = vcombine.high %v9029_v2, %v9029_v2  ;;  %v17350_v20 = vmax.f32 %v9404_v9, %v11190_v58 }
 0x71e   : > { %v10041_v49 = vmax.f32 %v9413_v60, %v11193_v40  ;;  %v10297_v15 = vmax.f32 %v9455_v35, %v11257_v18  ;;  %v9428_v47 = vrot.slane %v9414_v29, %v17062_v14  ;;  %v9429_v34 = vcombine.high %v9421_v61, %v9421_v61 }
 0x71f   : > { %v10573_v16 = vrot.slane %v10352_v7, %v17070_v44  ;;  %v10738_v3 = vsel %vm10714_vm0, %v10569_v38, %v10737_v1  ;;  %v17356_v26 = vrot.slane %v9029_v2, %v17062_v14  ;;  %v10577_v54 = vrot.slane %v10353_v42, %v17070_v44 }
 0x720   : > { %v11194_v56 = vrot.slane %v9462_v23, 9  ;;  %v10361_v27 = vmax.f32 %v10041_v49, %v10297_v15  ;;  %v9430_v12 = vcombine.high %v9428_v47, %v9428_v47  ;;  %v11250_v60 = vrot.slane %v9429_v34, 9 }
 0x721   : > { %v10739_v9 = vsel %vm10716_vm4, %v10573_v16, %v10738_v3  ;;  %v11251_v58 = vrot.slane %v9428_v47, 9  ;;  %v17361_v22 = vrot.slane %v9464_v13, %v17062_v14  ;;  %v17364_v57 = vmax.f32 %v17311_v5, %v11191_v52 }
 0x722   : > { %v10740_v1 = vsel %vm10718_vm11, %v10577_v54, %v10739_v9  ;;  %v11252_v37 = vrot.slane %v9430_v12, 9  ;;  %v17369_v17 = vcombine.high %v17356_v26, %v17356_v26  ;;  %v17372_v41 = vmax.f32 %v17309_v11, %v11192_v28 }
 0x723   : > { %10780 = vst [vmem:[%s17131_s19 + $0x18] sm:$0xff] %v10740_v1  ;;  %v10290_v30 = vmax.f32 %v9429_v34, %v11250_v60  ;;  %v10291_v46 = vmax.f32 %v9428_v47, %v11251_v58  ;;  %v9480_v32 = vcombine.high %v17361_v22, %v17361_v22  ;;  %v17377_v8 = vcombine.high %v9462_v23, %v9462_v23 }
 0x724   : > { %v17379_v5 = vmax.f32 %v9462_v23, %v11194_v56  ;;  %v10292_v52 = vmax.f32 %v9430_v12, %v11252_v37  ;;  %v8991_v35 = vadd.f32 %v17058_v31, %v17176_v48  ;;  %v17384_v40 = vrot.slane %v10361_v27, %v17070_v44 }
 0x725   : > { %v10354_v11 = vmax.f32 %v17316_v50, %v10290_v30  ;;  %v10355_v36 = vmax.f32 %v17318_v59, %v10291_v46  ;;  %v11199_v0 = vrot.slane %v9480_v32, 9  ;;  %v11196_v42 = vrot.slane %v17356_v26, 9 }
 0x726   : > { %v10356_v25 = vmax.f32 %v17320_v45, %v10292_v52  ;;  %v11197_v2 = vrot.slane %v17369_v17, 9  ;;  %v9027_v23 = vmax.f32 %v8991_v35, 0.0  ;;  %v10037_v48 = vmax.f32 %v17304_v4, %v11189_v62 }
 0x727   : > { %v10581_v18 = vrot.slane %v10354_v11, %v17070_v44  ;;  %v10585_v29 = vrot.slane %v10355_v36, %v17070_v44  ;;  %v8996_v50 = vadd.f32 %v17192_v43, %v17058_v31  ;;  %v17400_v28 = vmax.f32 %v9480_v32, %v11199_v0 }
 0x728   : > { %v10589_v59 = vrot.slane %v10356_v25, %v17070_v44  ;;  %v9431_v61 = vcombine.high %v9027_v23, %v9027_v23  ;;  %v9438_v45 = vrot.slane %v9027_v23, %v17062_v14  ;;  %v8994_v13 = vadd.f32 %v17058_v31, %v17195_v55 }
 0x729   : > { %v10741_v7 = vsel %vm10706_vm8, %v10585_v29, %v10581_v18  ;;  %v9032_v38 = vmax.f32 %v8996_v50, 0.0  ;;  %v8997_v49 = vadd.f32 %v17198_v33, %v17058_v31  ;;  %v11198_v25 = vrot.slane %v17361_v22, 9 }
 0x72a   : > { %v10742_v4 = vsel %vm10708_vm6, %v10589_v59, %v10741_v7  ;;  %v9445_v43 = vrot.slane %v9431_v61, %v17062_v14  ;;  %v9446_v62 = vcombine.high %v9438_v45, %v9438_v45  ;;  %v11253_v15 = vrot.slane %v9438_v45, 9 }
 0x72b   : > { %v9515_v47 = vcombine.high %v9032_v38, %v9032_v38  ;;  %v9522_v16 = vrot.slane %v9032_v38, %v17062_v14  ;;  %v9030_v3 = vmax.f32 %v8994_v13, 0.0  ;;  %v9033_v34 = vmax.f32 %v8997_v49, 0.0 }
 0x72c   : > { %v9447_v54 = vcombine.high %v9445_v43, %v9445_v43  ;;  %v11254_v56 = vrot.slane %v9446_v62, 9  ;;  %v11255_v27 = vrot.slane %v9445_v43, 9  ;;  %v10293_v12 = vmax.f32 %v9438_v45, %v11253_v15 }
 0x72d   : > { %v9529_v55 = vrot.slane %v9515_v47, %v17062_v14  ;;  %v9530_v9 = vcombine.high %v9522_v16, %v9522_v16  ;;  %v11263_v60 = vrot.slane %v9522_v16, 9  ;;  %v9481_v31 = vcombine.high %v9030_v3, %v9030_v3 }
 0x72e   : > { %v11256_v33 = vrot.slane %v9447_v54, 9  ;;  %v10294_v58 = vmax.f32 %v9446_v62, %v11254_v56  ;;  %v10295_v1 = vmax.f32 %v9445_v43, %v11255_v27  ;;  %v10357_v37 = vmax.f32 %v10037_v48, %v10293_v12 }
 0x72f   : > { %v11264_v30 = vrot.slane %v9530_v9, 9  ;;  %v11265_v46 = vrot.slane %v9529_v55, 9  ;;  %v10303_v32 = vmax.f32 %v9522_v16, %v11263_v60  ;;  %v9488_v52 = vrot.slane %v9030_v3, %v17062_v14 }
 0x730   : > { %v10296_v35 = vmax.f32 %v9447_v54, %v11256_v33  ;;  %v10358_v11 = vmax.f32 %v17350_v20, %v10294_v58  ;;  %v10359_v36 = vmax.f32 %v17364_v57, %v10295_v1  ;;  %v10593_v0 = vrot.slane %v10357_v37, %v17070_v44 }
 0x731   : > { %v10304_v23 = vmax.f32 %v9530_v9, %v11264_v30  ;;  %v10367_v18 = vmax.f32 %v17400_v28, %v10303_v32  ;;  %v9495_v29 = vrot.slane %v9481_v31, %v17062_v14  ;;  %v10305_v61 = vmax.f32 %v9529_v55, %v11265_v46 }
 0x732   : > { %v10360_v48 = vmax.f32 %v17372_v41, %v10296_v35  ;;  %v10597_v50 = vrot.slane %v10358_v11, %v17070_v44  ;;  %v10743_v59 = vsel %vm10710_vm1, %v10593_v0, %v10742_v4  ;;  %v10601_v20 = vrot.slane %v10359_v36, %v17070_v44 }
 0x733   : > { %v9496_v45 = vcombine.high %v9488_v52, %v9488_v52  ;;  %v9497_v57 = vcombine.high %v9495_v29, %v9495_v29  ;;  %v11200_v7 = vrot.slane %v9488_v52, 9  ;;  %v9531_v49 = vcombine.high %v9033_v34, %v9033_v34 }
 0x734   : > { %v10605_v38 = vrot.slane %v10360_v48, %v17070_v44  ;;  %v10744_v13 = vsel %vm10712_vm14, %v10597_v50, %v10743_v59  ;;  %v9538_v28 = vrot.slane %v9033_v34, %v17062_v14  ;;  %v11195_v12 = vrot.slane %v17377_v8, 9 }
 0x735   : > { %v10745_v41 = vsel %vm10714_vm0, %v10601_v20, %v10744_v13  ;;  %v11201_v43 = vrot.slane %v9496_v45, 9  ;;  %v10048_v62 = vmax.f32 %v9488_v52, %v11200_v7  ;;  %v11258_v15 = vrot.slane %v9497_v57, 9 }
 0x736   : > { %v10746_v4 = vsel %vm10716_vm4, %v10605_v38, %v10745_v41  ;;  %v17428_v47 = vrot.slane %v9531_v49, %v17062_v14  ;;  %v17430_v16 = vcombine.high %v9538_v28, %v9538_v28  ;;  %v11202_v3 = vrot.slane %v9538_v28, 9 }
 0x737   : > { %v10747_v54 = vsel %vm10718_vm11, %v17384_v40, %v10746_v4  ;;  %v10049_v56 = vmax.f32 %v9496_v45, %v11201_v43  ;;  %v10298_v27 = vmax.f32 %v9497_v57, %v11258_v15  ;;  %v10368_v34 = vmax.f32 %v10048_v62, %v10304_v23 }
 0x738   : > { %v17438_v55 = vmax.f32 %v17356_v26, %v11196_v42  ;;  %v17443_v9 = vmax.f32 %v17369_v17, %v11197_v2  ;;  %10781 = vst [vmem:[%s17131_s19 + $0x20] sm:$0xff] %v10747_v54  ;;  %v9547_v60 = vcombine.high %v17428_v47, %v17428_v47  ;;  %v17449_v40 = vmax.f32 %v17361_v22, %v11198_v25  ;;  %v17455_v26 = vld [vmem:[%s17607_s4] ss:$0 sm:$0xff] }
 0x739   : > { %v10362_v31 = vmax.f32 %v17379_v5, %v10298_v27  ;;  %v10369_v33 = vmax.f32 %v10049_v56, %v10305_v61  ;;  %v8995_v42 = vadd.f32 %v17455_v26, %v17201_v39  ;;  %v17460_v17 = vrot.slane %v10367_v18, %v17070_v44 }
 0x73a   : > { %v11203_v2 = vrot.slane %v17430_v16, 9  ;;  %v11204_v58 = vrot.slane %v17428_v47, 9  ;;  %v11205_v22 = vrot.slane %v9547_v60, 9  ;;  %v17465_v1 = vrot.slane %v10368_v34, %v17070_v44 }
 0x73b   : > { %v17467_v5 = vmax.f32 %v9538_v28, %v11202_v3  ;;  %v9031_v37 = vmax.f32 %v8995_v42, 0.0  ;;  %v9000_v30 = vadd.f32 %v17455_v26, %v17209_v10  ;;  %v10043_v46 = vmax.f32 %v17377_v8, %v11195_v12 }
 0x73c   : > { %v8998_v39 = vadd.f32 %v17455_v26, %v17215_v51  ;;  %v9001_v32 = vadd.f32 %v17455_v26, %v17224_v6  ;;  %v8999_v52 = vadd.f32 %v17455_v26, %v17231_v63  ;;  %v10613_v35 = vrot.slane %v10362_v31, %v17070_v44 }
 0x73d   : > { %v9498_v11 = vcombine.high %v9031_v37, %v9031_v37  ;;  %v9505_v36 = vrot.slane %v9031_v37, %v17062_v14  ;;  %v9036_v0 = vmax.f32 %v9000_v30, 0.0  ;;  %v17481_v25 = vrot.slane %v10369_v33, %v17070_v44 }
 0x73e   : > { %v17483_v10 = vmax.f32 %v9547_v60, %v11205_v22  ;;  %v9034_v8 = vmax.f32 %v8998_v39, 0.0  ;;  %v9037_v23 = vmax.f32 %v9001_v32, 0.0  ;;  %v17488_v59 = vmax.f32 %v8999_v52, 0.0 }
 0x73f   : > { %v9512_v51 = vrot.slane %v9498_v11, %v17062_v14  ;;  %v9513_v18 = vcombine.high %v9505_v36, %v9505_v36  ;;  %v11259_v6 = vrot.slane %v9505_v36, 9  ;;  %v9582_v29 = vcombine.high %v9036_v0, %v9036_v0 }
 0x740   : > { %v9589_v63 = vrot.slane %v9036_v0, %v17062_v14  ;;  %v9548_v48 = vcombine.high %v9034_v8, %v9034_v8  ;;  %v9555_v50 = vrot.slane %v9034_v8, %v17062_v14  ;;  %v9599_v42 = vcombine.high %v9037_v23, %v9037_v23 }
 0x741   : > { %v9514_v61 = vcombine.high %v9512_v51, %v9512_v51  ;;  %v11260_v20 = vrot.slane %v9513_v18, 9  ;;  %v11261_v45 = vrot.slane %v9512_v51, 9  ;;  %v10299_v57 = vmax.f32 %v9505_v36, %v11259_v6 }
 0x742   : > { %v9596_v7 = vrot.slane %v9582_v29, %v17062_v14  ;;  %v9597_v38 = vcombine.high %v9589_v63, %v9589_v63  ;;  %v11269_v13 = vrot.slane %v9589_v63, 9  ;;  %v9562_v49 = vrot.slane %v9548_v48, %v17062_v14 }
 0x743   : > { %v11262_v28 = vrot.slane %v9514_v61, 9  ;;  %v10300_v41 = vmax.f32 %v9513_v18, %v11260_v20  ;;  %v10301_v43 = vmax.f32 %v9512_v51, %v11261_v45  ;;  %v10363_v62 = vmax.f32 %v10043_v46, %v10299_v57 }
 0x744   : > { %v9598_v15 = vcombine.high %v9596_v7, %v9596_v7  ;;  %v11270_v4 = vrot.slane %v9597_v38, 9  ;;  %v11271_v3 = vrot.slane %v9596_v7, 9  ;;  %v10309_v54 = vmax.f32 %v9589_v63, %v11269_v13 }
 0x745   : > { %v10302_v56 = vmax.f32 %v9514_v61, %v11262_v28  ;;  %v10364_v27 = vmax.f32 %v17438_v55, %v10300_v41  ;;  %v10365_v34 = vmax.f32 %v17443_v9, %v10301_v43  ;;  %v10617_v12 = vrot.slane %v10363_v62, %v17070_v44 }
 0x746   : > { %v11272_v60 = vrot.slane %v9598_v15, 9  ;;  %v10310_v31 = vmax.f32 %v9597_v38, %v11270_v4  ;;  %v10373_v33 = vmax.f32 %v17483_v10, %v10309_v54  ;;  %v10311_v46 = vmax.f32 %v9596_v7, %v11271_v3 }
 0x747   : > { %v10366_v22 = vmax.f32 %v17449_v40, %v10302_v56  ;;  %v10621_v37 = vrot.slane %v10364_v27, %v17070_v44  ;;  %v10748_v30 = vsel %vm10706_vm8, %v10617_v12, %v10613_v35  ;;  %v10625_v39 = vrot.slane %v10365_v34, %v17070_v44 }
 0x748   : > { %v17500_v32 = vmax.f32 %v9598_v15, %v11272_v60  ;;  %v9563_v55 = vcombine.high %v9555_v50, %v9555_v50  ;;  %v9564_v9 = vcombine.high %v9562_v49, %v9562_v49  ;;  %v11206_v36 = vrot.slane %v9555_v50, 9 }
 0x749   : > { %v10629_v52 = vrot.slane %v10366_v22, %v17070_v44  ;;  %v10749_v11 = vsel %vm10708_vm6, %v10621_v37, %v10748_v30  ;;  %v11208_v0 = vrot.slane %v9562_v49, 9  ;;  %v9606_v8 = vrot.slane %v9037_v23, %v17062_v14 }
 0x74a   : > { %v10750_v10 = vsel %vm10710_vm1, %v10625_v39, %v10749_v11  ;;  %v11207_v40 = vrot.slane %v9563_v55, 9  ;;  %v17507_v35 = vrot.slane %v9599_v42, %v17062_v14  ;;  %v10054_v18 = vmax.f32 %v9555_v50, %v11206_v36 }
 0x74b   : > { %v10751_v51 = vsel %vm10712_vm14, %v10629_v52, %v10750_v10  ;;  %v17510_v6 = vmax.f32 %v9562_v49, %v11208_v0  ;;  %v11209_v29 = vrot.slane %v9564_v9, 9  ;;  %v9004_v23 = vadd.f32 %v17455_v26, %v17255_v53 }
 0x74c   : > { %v10752_v63 = vsel %vm10714_vm0, %v17460_v17, %v10751_v51  ;;  %v10055_v48 = vmax.f32 %v9563_v55, %v11207_v40  ;;  %v9614_v61 = vcombine.high %v17507_v35, %v17507_v35  ;;  %v10374_v45 = vmax.f32 %v10054_v18, %v10310_v31 }
 0x74d   : > { %v10753_v20 = vsel %vm10716_vm4, %v17465_v1, %v10752_v63  ;;  %v10376_v50 = vmax.f32 %v17510_v6, %v17500_v32  ;;  %v9002_v57 = vadd.f32 %v17455_v26, %v17259_v19  ;;  %v10051_v17 = vmax.f32 %v17430_v16, %v11203_v2 }
 0x74e   : > { %v10754_v7 = vsel %vm10718_vm11, %v17481_v25, %v10753_v20  ;;  %v10375_v38 = vmax.f32 %v10055_v48, %v10311_v46  ;;  %v11211_v13 = vrot.slane %v9614_v61, 9  ;;  %v10052_v53 = vmax.f32 %v17428_v47, %v11204_v58 }
 0x74f   : > { %10782 = vst [vmem:[%s17131_s19 + $0x28] sm:$0xff] %v10754_v7  ;;  %v17533_v1 = vmax.f32 %v9564_v9, %v11209_v29  ;;  %v11273_v49 = vrot.slane %v9606_v8, 9  ;;  %v9565_v19 = vcombine.high %v17488_v59, %v17488_v59  ;;  %v10657_v28 = vrot.slane %v10373_v33, %v17070_v44 }
 0x750   : > { %v10661_v16 = vrot.slane %v10374_v45, %v17070_v44  ;;  %v9572_v2 = vrot.slane %v17488_v59, %v17062_v14  ;;  %v9040_v25 = vmax.f32 %v9004_v23, 0.0  ;;  %v10665_v41 = vrot.slane %v10375_v38, %v17070_v44 }
 0x751   : > { %v10313_v43 = vmax.f32 %v9606_v8, %v11273_v49  ;;  %v9579_v47 = vrot.slane %v9565_v19, %v17062_v14  ;;  %v9038_v58 = vmax.f32 %v9002_v57, 0.0  ;;  %v17544_v3 = vmax.f32 %v9614_v61, %v11211_v13 }
 0x752   : > { %v9580_v62 = vcombine.high %v9572_v2, %v9572_v2  ;;  %v9649_v15 = vcombine.high %v9040_v25, %v9040_v25  ;;  %v9656_v4 = vrot.slane %v9040_v25, %v17062_v14  ;;  %v9005_v37 = vadd.f32 %v17455_v26, %v17261_v21 }
 0x753   : > { %v10377_v54 = vmax.f32 %v17533_v1, %v10313_v43  ;;  %v9581_v56 = vcombine.high %v9579_v47, %v9579_v47  ;;  %v11267_v27 = vrot.slane %v9579_v47, 9  ;;  %v9615_v34 = vcombine.high %v9038_v58, %v9038_v58 }
 0x754   : > { %v11266_v12 = vrot.slane %v9580_v62, 9  ;;  %v9663_v59 = vrot.slane %v9649_v15, %v17062_v14  ;;  %v9664_v60 = vcombine.high %v9656_v4, %v9656_v4  ;;  %v11275_v31 = vrot.slane %v9656_v4, 9 }
 0x755   : > { %v11268_v33 = vrot.slane %v9581_v56, 9  ;;  %v10307_v42 = vmax.f32 %v9579_v47, %v11267_v27  ;;  %v9622_v22 = vrot.slane %v9038_v58, %v17062_v14  ;;  %v9629_v36 = vrot.slane %v9615_v34, %v17062_v14 }
 0x756   : > { %v10306_v30 = vmax.f32 %v9580_v62, %v11266_v12  ;;  %v9665_v46 = vcombine.high %v9663_v59, %v9663_v59  ;;  %v11276_v39 = vrot.slane %v9664_v60, 9  ;;  %v11277_v55 = vrot.slane %v9663_v59, 9 }
 0x757   : > { %v10308_v9 = vmax.f32 %v9581_v56, %v11268_v33  ;;  %v10371_v52 = vmax.f32 %v10051_v17, %v10307_v42  ;;  %v17551_v11 = vmax.f32 %v9656_v4, %v11275_v31  ;;  %v9003_v8 = vadd.f32 %v17455_v26, %v17266_v24 }
 0x758   : > { %v10370_v0 = vmax.f32 %v17467_v5, %v10306_v30  ;;  %v11278_v10 = vrot.slane %v9665_v46, 9  ;;  %v17555_v40 = vmax.f32 %v9664_v60, %v11276_v39  ;;  %v9630_v29 = vcombine.high %v9622_v22, %v9622_v22 }
 0x759   : > { %v10372_v51 = vmax.f32 %v10052_v53, %v10308_v9  ;;  %v10649_v21 = vrot.slane %v10371_v52, %v17070_v44  ;;  %v10379_v18 = vmax.f32 %v17544_v3, %v17551_v11  ;;  %v10317_v48 = vmax.f32 %v9663_v59, %v11277_v55 }
 0x75a   : > { %v10645_v63 = vrot.slane %v10370_v0, %v17070_v44  ;;  %v9631_v61 = vcombine.high %v9629_v36, %v9629_v36  ;;  %v11212_v23 = vrot.slane %v9622_v22, 9  ;;  %v10318_v20 = vmax.f32 %v9665_v46, %v11278_v10 }
 0x75b   : > { %v10653_v5 = vrot.slane %v10372_v51, %v17070_v44  ;;  %v11213_v45 = vrot.slane %v9630_v29, 9  ;;  %v11214_v57 = vrot.slane %v9629_v36, 9  ;;  %v9041_v7 = vmax.f32 %v9005_v37, 0.0 }
 0x75c   : > { %v10755_v17 = vsel %vm10706_vm8, %v10649_v21, %v10645_v63  ;;  %v11215_v24 = vrot.slane %v9631_v61, 9  ;;  %v10060_v26 = vmax.f32 %v9622_v22, %v11212_v23  ;;  %v9039_v1 = vmax.f32 %v9003_v8, 0.0 }
 0x75d   : > { %v10756_v38 = vsel %vm10708_vm6, %v10653_v5, %v10755_v17  ;;  %v10061_v13 = vmax.f32 %v9630_v29, %v11213_v45  ;;  %v10062_v53 = vmax.f32 %v9629_v36, %v11214_v57  ;;  %v9666_v2 = vcombine.high %v9041_v7, %v9041_v7 }
 0x75e   : > { %v10757_v49 = vsel %vm10710_vm1, %v10657_v28, %v10756_v38  ;;  %v10380_v19 = vmax.f32 %v10060_v26, %v17555_v40  ;;  %v9673_v25 = vrot.slane %v9041_v7, %v17062_v14  ;;  %v10669_v43 = vrot.slane %v10376_v50, %v17070_v44 }
 0x75f   : > { %v10758_v47 = vsel %vm10712_vm14, %v10661_v16, %v10757_v49  ;;  %v10381_v58 = vmax.f32 %v10061_v13, %v10317_v48  ;;  %v10382_v62 = vmax.f32 %v10062_v53, %v10318_v20  ;;  %v10673_v15 = vrot.slane %v10377_v54, %v17070_v44 }
 0x760   : > { %v10759_v4 = vsel %vm10714_vm0, %v10665_v41, %v10758_v47  ;;  %v9680_v28 = vrot.slane %v9666_v2, %v17062_v14  ;;  %v9681_v3 = vcombine.high %v9673_v25, %v9673_v25  ;;  %v10063_v27 = vmax.f32 %v9631_v61, %v11215_v24 }
 0x761   : > { %v10760_v56 = vsel %vm10716_vm4, %v10669_v43, %v10759_v4  ;;  %v11279_v34 = vrot.slane %v9673_v25, 9  ;;  %v9632_v32 = vcombine.high %v9039_v1, %v9039_v1  ;;  %v9639_v16 = vrot.slane %v9039_v1, %v17062_v14 }
 0x762   : > { %v10761_v12 = vsel %vm10718_vm11, %v10673_v15, %v10760_v56  ;;  %v11280_v59 = vrot.slane %v9681_v3, 9  ;;  %v11281_v6 = vrot.slane %v9680_v28, 9  ;;  %v11210_v42 = vrot.slane %v17507_v35, 9 }
 0x763   : > { %10783 = vst [vmem:[%s17131_s19 + $0x30] sm:$0xff] %v10761_v12  ;;  %v10319_v50 = vmax.f32 %v9673_v25, %v11279_v34  ;;  %v9646_v54 = vrot.slane %v9632_v32, %v17062_v14  ;;  %v9647_v31 = vcombine.high %v9639_v16, %v9639_v16  ;;  %v11216_v33 = vrot.slane %v9639_v16, 9 }
 0x764   : > { %v10320_v60 = vmax.f32 %v9681_v3, %v11280_v59  ;;  %v10321_v37 = vmax.f32 %v9680_v28, %v11281_v6  ;;  %v10058_v52 = vmax.f32 %v17507_v35, %v11210_v42  ;;  %v10681_v14 = vrot.slane %v10379_v18, %v17070_v44 }
 0x765   : > { %v10383_v41 = vmax.f32 %v10063_v27, %v10319_v50  ;;  %v9648_v22 = vcombine.high %v9646_v54, %v9646_v54  ;;  %v11217_v30 = vrot.slane %v9647_v31, 9  ;;  %v10064_v46 = vmax.f32 %v9639_v16, %v11216_v33 }
 0x766   : > { %v10685_v40 = vrot.slane %v10380_v19, %v17070_v44  ;;  %v10689_v8 = vrot.slane %v10381_v58, %v17070_v44  ;;  %v10693_v21 = vrot.slane %v10382_v62, %v17070_v44 }
 0x767   : > { %v11274_v39 = vrot.slane %v9648_v22, 9  ;;  %v10065_v55 = vmax.f32 %v9647_v31, %v11217_v30  ;;  %v10384_v9 = vmax.f32 %v10064_v46, %v10320_v60  ;;  %v10697_v35 = vrot.slane %v10383_v41, %v17070_v44 }
 0x769   : > { %v10314_v11 = vmax.f32 %v9648_v22, %v11274_v39  ;;  %v10385_v36 = vmax.f32 %v10065_v55, %v10321_v37  ;;  %v10701_v48 = vrot.slane %v10384_v9, %v17070_v44 }
 0x76b   : > { %v10378_v0 = vmax.f32 %v10058_v52, %v10314_v11  ;;  %v10705_v61 = vrot.slane %v10385_v36, %v17070_v44 }
 0x76d   : > { %v10677_v10 = vrot.slane %v10378_v0, %v17070_v44 }
 0x76f   : > { %v10762_v51 = vsel %vm10706_vm8, %v10681_v14, %v10677_v10 }
 0x770   : > { %v10763_v29 = vsel %vm10708_vm6, %v10685_v40, %v10762_v51 }
 0x771   : > { %v10764_v63 = vsel %vm10710_vm1, %v10689_v8, %v10763_v29 }
 0x772   : > { %v10765_v18 = vsel %vm10712_vm14, %v10693_v21, %v10764_v63 }
 0x773   : > { %v10766_v23 = vsel %vm10714_vm0, %v10697_v35, %v10765_v18 }
 0x774   : > { %v10767_v5 = vsel %vm10716_vm4, %v10701_v48, %v10766_v23 }
 0x775   : > { %v10768_v20 = vsel %vm10718_vm11, %v10705_v61, %v10767_v5 }
 0x776   : > { %10784 = vst [vmem:[%s17131_s19 + $0x38] sm:$0xff] %v10768_v20 }
 0x777 PF: > { %s15_s18 = sadd.s32 1, %s13689_s18  }
 0x778   : > { %p12_p4 = scmp.ge.s32.totalorder %s15_s18, 4  }
 0x77a   :  { %14 = sbr.rel (!%p12_p4) target bundleno = 1 (0x1), region = 70 }

</bundles_post_ra>
